<compile_context>
chip_gen: v7x
topology: tpu7x:2x2x1
jax: 0.10.0
libtpu: 0.0.40
codegen_flags: <defaults>
</compile_context>

<pallas_src>
import functools
import math

import numpy as np

import jax
import jax.numpy as jnp
from jax.experimental import pallas as pl
from jax.experimental.pallas import tpu as pltpu

LN_EPS = 1e-5
BN_EPS = 1e-5
MATMUL_DTYPE = jnp.bfloat16     # MXU input dtype (accumulation stays f32)


def _layernorm(x, gamma, beta):
    mu = jnp.mean(x, axis=-1, keepdims=True)
    var = jnp.mean((x - mu) ** 2, axis=-1, keepdims=True)
    return (x - mu) * jax.lax.rsqrt(var + LN_EPS) * gamma + beta


def _mxu(a, b):
    """a @ b on the MXU with bf16 inputs and f32 accumulation."""
    return jnp.dot(a.astype(MATMUL_DTYPE), b.astype(MATMUL_DTYPE),
                   preferred_element_type=jnp.float32)


def _mxu_t(a, b):
    """a @ b.T on the MXU with bf16 inputs and f32 accumulation."""
    return jax.lax.dot_general(a.astype(MATMUL_DTYPE), b.astype(MATMUL_DTYPE),
                               (((1,), (1,)), ((), ())),
                               preferred_element_type=jnp.float32)


# ---------------------------------------------------------------------------
# Relative shift (Transformer-XL style, exactly matching the reference module):
#   shifted[i, j] = ps[i, j - i + T - 1]   if j <= i
#                 = 0                      if j == i + 1
#                 = ps[i + 1, j - i - 2]   if j >= i + 2
# ---------------------------------------------------------------------------
def _relative_shift_fast(ps, i_idx, j_idx):
    t = ps.shape[0]
    # skew[i, j] = ps[i, (j - 1 - i) mod t]  -- one XLU strided lane rotate.
    skew = pltpu.roll(ps, 1, 1, stride=1, stride_axis=0)
    # skew_down[i, :] = skew[i + 1, :]; the wrapped last row is fully masked below.
    skew_down = pltpu.roll(skew, t - 1, 0)
    return (jnp.where(j_idx <= i_idx, skew, 0.0)
            + jnp.where(j_idx >= i_idx + 2, skew_down, 0.0))


def _relative_shift_slow(ps, i_idx, j_idx):
    # Fallback (exact, slower): only used when the roll-convention probe fails.
    t = ps.shape[0]
    rel = j_idx - i_idx - 1
    rel = jnp.where(rel < 0, rel + t, rel)
    skew = jnp.zeros_like(ps)
    for c in range(t):
        skew = skew + ps[:, c:c + 1] * (rel == c).astype(ps.dtype)
    skew_down = jnp.concatenate([skew[1:, :], jnp.zeros((1, t), ps.dtype)], axis=0)
    return (jnp.where(j_idx <= i_idx, skew, 0.0)
            + jnp.where(j_idx >= i_idx + 2, skew_down, 0.0))


def _relative_shift_ref_np(ps):
    t = ps.shape[0]
    out = np.zeros_like(ps)
    for i in range(t):
        for j in range(t):
            if j <= i:
                out[i, j] = ps[i, j - i + t - 1]
            elif j >= i + 2:
                out[i, j] = ps[i + 1, j - i - 2]
    return out


@functools.cache
def _fast_roll_ok(t: int, device_kind: str) -> bool:
    """One-off on-device probe of the pltpu.roll conventions used by the fast paths."""
    del device_kind  # part of the cache key only (result is backend-specific)
    try:
        x = np.arange(1.0, t * t + 1.0, dtype=np.float32).reshape(t, t)

        def kern(x_ref, o_ref):
            ii = jax.lax.broadcasted_iota(jnp.int32, (t, t), 0)
            jj = jax.lax.broadcasted_iota(jnp.int32, (t, t), 1)
            o_ref[...] = _relative_shift_fast(x_ref[...], ii, jj)

        out = pl.pallas_call(
            kern, out_shape=jax.ShapeDtypeStruct((t, t), jnp.float32))(jnp.asarray(x))
        out = np.asarray(jax.block_until_ready(out))
        return bool(np.array_equal(out, _relative_shift_ref_np(x)))
    except Exception:            # lowering unsupported or convention mismatch -> fallback
        return False


# ---------------------------------------------------------------------------
# Fully fused Conformer block kernel (one grid step = one batch group)
# ---------------------------------------------------------------------------
def _conformer_block_kernel(
        # activations / positional projection
        x_ref, pproj_ref,
        # FFN1
        f1g_ref, f1b_ref, f1w1_ref, f1b1_ref, f1w2_ref, f1b2_ref,
        # MHSA
        mhg_ref, mhb_ref, wqkv_ref, bqkv_ref, wo_ref, bo_ref, u_ref, v_ref,
        # Conv module
        cvg_ref, cvb_ref, cw1_ref, cb1_ref, wd_ref, bns_ref, bnb_ref, cw2_ref, cb2_ref,
        # FFN2
        f2g_ref, f2b_ref, f2w1_ref, f2b1_ref, f2w2_ref, f2b2_ref,
        # final LayerNorm
        fing_ref, finb_ref,
        # output
        o_ref,
        *, num_heads, d_head, kernel_size, use_fast_roll):
    bg, t, d = x_ref.shape
    n = bg * t
    x = x_ref[...].reshape(n, d)                              # (N, D), N = bg * T

    # ---- FeedForwardModule #1 (half-step residual) -------------------------
    h = _layernorm(x, f1g_ref[...], f1b_ref[...])
    h = _mxu(h, f1w1_ref[...]) + f1b1_ref[...]
    h = h * jax.nn.sigmoid(h)                                 # Swish
    x = x + 0.5 * (_mxu(h, f1w2_ref[...]) + f1b2_ref[...])

    # ---- MultiHeadedSelfAttentionModule (relative MHSA, residual) ----------
    xn = _layernorm(x, mhg_ref[...], mhb_ref[...])
    qkv = _mxu(xn, wqkv_ref[...]) + bqkv_ref[...]             # fused QKV: (N, 3D)
    q, k, v = qkv[:, :d], qkv[:, d:2 * d], qkv[:, 2 * d:]     # wq/bq pre-scaled by 1/sqrt(D)
    p = pproj_ref[...]                                        # pe @ Wp  (T, D)
    wo = wo_ref[...]
    u_all, v_all = u_ref[...], v_ref[...]                     # pre-scaled biases
    i_idx = jax.lax.broadcasted_iota(jnp.int32, (t, t), 0)
    j_idx = jax.lax.broadcasted_iota(jnp.int32, (t, t), 1)
    shift = _relative_shift_fast if use_fast_roll else _relative_shift_slow

    att_rows = []
    for b in range(bg):                                       # static, small loops
        r0 = b * t
        acc = jnp.zeros((t, d), jnp.float32)
        for hh in range(num_heads):
            c0 = hh * d_head
            qh = q[r0:r0 + t, c0:c0 + d_head]
            kh = k[r0:r0 + t, c0:c0 + d_head]
            vh = v[r0:r0 + t, c0:c0 + d_head]
            ph = p[:, c0:c0 + d_head]
            uh = u_all[hh:hh + 1, :]
            vbh = v_all[hh:hh + 1, :]
            content = _mxu_t(qh + uh, kh)                     # (T, T)
            pos = shift(_mxu_t(qh + vbh, ph), i_idx, j_idx)   # (T, T)
            score = content + pos                             # already / sqrt(d_model)
            score = score - jnp.max(score, axis=-1, keepdims=True)
            e = jnp.exp(score)
            attn = e * pl.reciprocal(jnp.sum(e, axis=-1, keepdims=True), approx=True)
            ctx = _mxu(attn, vh)                              # (T, d_head)
            acc = acc + _mxu(ctx, wo[c0:c0 + d_head, :])      # lane-dense per-head out-proj
        att_rows.append(x[r0:r0 + t, :] + acc + bo_ref[...])  # residual (factor 1)
    x = att_rows[0] if bg == 1 else jnp.concatenate(att_rows, axis=0)

    # ---- ConformerConvModule (residual) -------------------------------------
    xn = _layernorm(x, cvg_ref[...], cvb_ref[...])
    hv = _mxu(xn, cw1_ref[...]) + cb1_ref[...]                # pointwise conv1: (N, 2D)
    h = hv[:, :d] * jax.nn.sigmoid(hv[:, d:])                 # GLU (lane-aligned split)

    # Depthwise Conv1d ("same" zero padding) with register-resident taps: each tap is a
    # masked sublane roll (XLU slot), no VMEM scratch round trip.
    pad = (kernel_size - 1) // 2
    wd = wd_ref[...]                                          # (K, D)
    row = jax.lax.broadcasted_iota(jnp.int32, (bg, t, 1), 1).reshape(n, 1)
    y = jnp.zeros((n, d), jnp.float32)
    for kk in range(kernel_size):
        off = kk - pad                                        # tap reads h[i + off]
        valid = jnp.logical_and(row + off >= 0, row + off < t)
        if off == 0:
            tap = h
        elif use_fast_roll:
            tap = pltpu.roll(h, (-off) % n, 0)                # XLU sublane rotate
        elif off < 0:
            tap = jnp.concatenate(
                [jnp.zeros((-off, d), h.dtype), h[:n + off, :]], axis=0)
        else:
            tap = jnp.concatenate(
                [h[off:, :], jnp.zeros((off, d), h.dtype)], axis=0)
        y = y + jnp.where(valid, tap, 0.0) * wd[kk:kk + 1, :]

    y = y * bns_ref[...] + bnb_ref[...]                       # BatchNorm1d (eval, folded)
    y = y * jax.nn.sigmoid(y)                                 # Swish
    x = x + (_mxu(y, cw2_ref[...]) + cb2_ref[...])            # pointwise conv2 + residual

    # ---- FeedForwardModule #2 (half-step residual) + final LayerNorm --------
    h = _layernorm(x, f2g_ref[...], f2b_ref[...])
    h = _mxu(h, f2w1_ref[...]) + f2b1_ref[...]
    h = h * jax.nn.sigmoid(h)
    x = x + 0.5 * (_mxu(h, f2w2_ref[...]) + f2b2_ref[...])
    x = _layernorm(x, fing_ref[...], finb_ref[...])

    o_ref[...] = x.reshape(bg, t, d).astype(o_ref.dtype)


def _pick_batch_group(b, max_group=8):
    """Largest divisor of b (<= max_group) that still leaves >= 2 grid steps.

    >= 2 parallel grid steps keeps both v7x TensorCores busy; grouping batch elements
    raises the MXU M dimension and amortizes the resident-weight DMA when b allows it.
    """
    best = 1
    for g in range(1, min(b, max_group) + 1):
        if b % g == 0 and b // g >= 2:
            best = g
    return best


def conformer_block(x, prep):
    """Fused Conformer block forward. x: (B, T, D) f32; prep = prepare_params(...)."""
    b, t, d = x.shape
    f1, mh, cv, f2, fin = prep["ffn1"], prep["mhsa"], prep["conv"], prep["ffn2"], prep["final"]
    nh, dh = mh["u"].shape
    ksize = cv["wd"].shape[0]
    bg = _pick_batch_group(b)
    use_fast = _fast_roll_ok(t, jax.devices()[0].device_kind)

    args = [
        x, mh["pproj"],
        f1["ln_g"], f1["ln_b"], f1["w1"], f1["b1"], f1["w2"], f1["b2"],
        mh["ln_g"], mh["ln_b"], mh["wqkv"], mh["bqkv"], mh["wo"], mh["bo"], mh["u"], mh["v"],
        cv["ln_g"], cv["ln_b"], cv["w1"], cv["b1"], cv["wd"], cv["bn_s"], cv["bn_b"],
        cv["w2"], cv["b2"],
        f2["ln_g"], f2["ln_b"], f2["w1"], f2["b1"], f2["w2"], f2["b2"],
        fin["ln_g"], fin["ln_b"],
    ]
    # x/out are tiled over the batch-group grid; every parameter is a resident full block.
    in_specs = [pl.BlockSpec((bg, t, d), lambda i: (i, 0, 0))]
    in_specs += [pl.BlockSpec(a.shape, lambda i: (0, 0)) for a in args[1:]]

    return pl.pallas_call(
        functools.partial(_conformer_block_kernel, num_heads=nh, d_head=dh,
                          kernel_size=ksize, use_fast_roll=use_fast),
        out_shape=jax.ShapeDtypeStruct((b, t, d), x.dtype),
        grid_spec=pltpu.PrefetchScalarGridSpec(
            num_scalar_prefetch=0,
            grid=(b // bg,),
            in_specs=in_specs,
            out_specs=pl.BlockSpec((bg, t, d), lambda i: (i, 0, 0)),
        ),
        # TODO(synk): set vmem_limit_bytes and add flash-style T tiling before scaling to
        # production shapes; the toy config fits every generation's scoped-VMEM default.
        compiler_params=pltpu.CompilerParams(dimension_semantics=("parallel",)),
    )(*args)


# ---------------------------------------------------------------------------
# Glue: sinusoidal positional encoding, parameter init, one-time weight prep
# ---------------------------------------------------------------------------
def sinusoidal_positional_encoding(length, d_model):
    pos = jnp.arange(length, dtype=jnp.float32)[:, None]
    div = jnp.exp(jnp.arange(0, d_model, 2, dtype=jnp.float32)
                  * (-math.log(10000.0) / d_model))
    pe = jnp.zeros((length, d_model), jnp.float32)
    pe = pe.at[:, 0::2].set(jnp.sin(pos * div))
    pe = pe.at[:, 1::2].set(jnp.cos(pos * div))
    return pe


def init_params(key, d, num_heads, ff_expansion, conv_expansion, kernel_size):
    dff = d * ff_expansion
    dconv = d * conv_expansion
    dh = d // num_heads
    keys = iter(jax.random.split(key, 32))

    def rnd(shape, scale):
        return jax.random.normal(next(keys), shape, jnp.float32) * scale

    def ffn():
        return dict(
            ln_g=jnp.ones((1, d), jnp.float32), ln_b=jnp.zeros((1, d), jnp.float32),
            w1=rnd((d, dff), 1.0 / math.sqrt(d)), b1=rnd((1, dff), 0.02),
            w2=rnd((dff, d), 1.0 / math.sqrt(dff)), b2=rnd((1, d), 0.02))

    mhsa = dict(
        ln_g=jnp.ones((1, d), jnp.float32), ln_b=jnp.zeros((1, d), jnp.float32),
        wq=rnd((d, d), 1.0 / math.sqrt(d)), bq=rnd((1, d), 0.02),
        wk=rnd((d, d), 1.0 / math.sqrt(d)), bk=rnd((1, d), 0.02),
        wv=rnd((d, d), 1.0 / math.sqrt(d)), bv=rnd((1, d), 0.02),
        wp=rnd((d, d), 1.0 / math.sqrt(d)),                    # pos_proj (no bias)
        wo=rnd((d, d), 1.0 / math.sqrt(d)), bo=rnd((1, d), 0.02),
        u=rnd((num_heads, dh), 0.1), v=rnd((num_heads, dh), 0.1))

    conv = dict(
        ln_g=jnp.ones((1, d), jnp.float32), ln_b=jnp.zeros((1, d), jnp.float32),
        w1=rnd((d, dconv), 1.0 / math.sqrt(d)), b1=rnd((1, dconv), 0.02),
        # TODO(synk): PyTorch depthwise Conv1d weights are (D, 1, K); transpose to (K, D)
        #             when porting real checkpoints.
        wd=rnd((kernel_size, d), 1.0 / math.sqrt(kernel_size)),  # depthwise (no bias)
        bn_g=jnp.ones((1, d), jnp.float32), bn_b=jnp.zeros((1, d), jnp.float32),
        bn_mean=jnp.zeros((1, d), jnp.float32), bn_var=jnp.ones((1, d), jnp.float32),
        w2=rnd((d, d), 1.0 / math.sqrt(d)), b2=rnd((1, d), 0.02))

    final = dict(ln_g=jnp.ones((1, d), jnp.float32), ln_b=jnp.zeros((1, d), jnp.float32))
    return dict(ffn1=ffn(), mhsa=mhsa, conv=conv, ffn2=ffn(), final=final)


def prepare_params(params, t):
    """One-time weight preprocessing, hoisted out of the forward path.

    bf16 casts for all MXU weights, fused QKV concat, eval-BatchNorm folding, the
    1/sqrt(d_model) attention scale folded into wq/bq/u/v (the relative shift is linear,
    so this is exact), and the fixed-T positional projection pe @ Wp.
    """
    m, c = params["mhsa"], params["conv"]
    d = m["wq"].shape[0]
    scale = 1.0 / math.sqrt(d)            # reference divides scores by sqrt(d_model)

    def ffn_prep(f):
        return dict(ln_g=f["ln_g"], ln_b=f["ln_b"],
                    w1=f["w1"].astype(MATMUL_DTYPE), b1=f["b1"],
                    w2=f["w2"].astype(MATMUL_DTYPE), b2=f["b2"])

    pe = sinusoidal_positional_encoding(t, d)
    pproj = jnp.dot(pe, m["wp"], preferred_element_type=jnp.float32)
    bn_s = c["bn_g"] * jax.lax.rsqrt(c["bn_var"] + BN_EPS)
    bn_b = c["bn_b"] - c["bn_mean"] * bn_s

    return dict(
        ffn1=ffn_prep(params["ffn1"]),
        mhsa=dict(
            ln_g=m["ln_g"], ln_b=m["ln_b"],
            wqkv=jnp.concatenate([m["wq"] * scale, m["wk"], m["wv"]],
                                 axis=1).astype(MATMUL_DTYPE),
            bqkv=jnp.concatenate([m["bq"] * scale, m["bk"], m["bv"]], axis=1),
            wo=m["wo"].astype(MATMUL_DTYPE), bo=m["bo"],
            u=m["u"] * scale, v=m["v"] * scale, pproj=pproj),
        conv=dict(
            ln_g=c["ln_g"], ln_b=c["ln_b"],
            w1=c["w1"].astype(MATMUL_DTYPE), b1=c["b1"],
            wd=c["wd"], bn_s=bn_s, bn_b=bn_b,
            w2=c["w2"].astype(MATMUL_DTYPE), b2=c["b2"]),
        ffn2=ffn_prep(params["ffn2"]),
        final=dict(ln_g=params["final"]["ln_g"], ln_b=params["final"]["ln_b"]),
    )


if __name__ == "__main__":
    B, T, D = 2, 16, 128
    NUM_HEADS = 4
    FF_EXPANSION = 4
    CONV_EXPANSION = 2
    KERNEL_SIZE = 7            # conv_kernel_size (odd, as the module requires)

    key = jax.random.PRNGKey(0)
    kx, kp = jax.random.split(key)
    x = jax.random.normal(kx, (B, T, D), jnp.float32)
    params = init_params(kp, D, NUM_HEADS, FF_EXPANSION, CONV_EXPANSION, KERNEL_SIZE)
    prep = prepare_params(params, T)       # one-time weight prep (hoisted out of forward)

    # Warm the roll-convention probe outside of jit tracing (cached per (T, device_kind)).
    _fast_roll_ok(T, jax.devices()[0].device_kind)

    out = jax.jit(conformer_block)(x, prep)
    jax.block_until_ready(out)
    assert out.shape == (B, T, D) and out.dtype == jnp.float32
    assert bool(jnp.all(jnp.isfinite(out)))
    print("KERNEL_OK")
</pallas_src>

<mosaic_0001>
module attributes {stable_mosaic.version = 11 : i64} {
  func.func @kern(%arg0: memref<16x16xf32, #tpu.memory_space<vmem>>, %arg1: memref<16x16xf32, #tpu.memory_space<vmem>>) attributes {dimension_semantics = [], scalar_prefetch = 0 : i64, scratch_operands = 0 : i64, tpu.core_type = #tpu.core_type<tc>} {
    %0 = tpu.iota {dimensions = array<i32: 0>} : vector<16x16xi32>
    %1 = tpu.iota {dimensions = array<i32: 1>} : vector<16x16xi32>
    %c0 = arith.constant 0 : index
    %c0_0 = arith.constant 0 : index
    %2 = vector.load %arg0[%c0, %c0_0] : memref<16x16xf32, #tpu.memory_space<vmem>>, vector<16x16xf32>
    %c1_i32 = arith.constant 1 : i32
    %3 = tpu.dynamic_rotate %2 by %c1_i32 dim 1 {stride = 1 : si32, stride_dimension = 0 : si32} : vector<16x16xf32>, i32 -> vector<16x16xf32>
    %c15_i32 = arith.constant 15 : i32
    %4 = tpu.dynamic_rotate %3 by %c15_i32 dim 0 : vector<16x16xf32>, i32 -> vector<16x16xf32>
    %5 = arith.cmpi sle, %1, %0 : vector<16x16xi32>
    %cst = arith.constant 0.000000e+00 : f32
    %6 = vector.broadcast %cst : f32 to vector<16x16xf32>
    %7 = arith.select %5, %3, %6 : vector<16x16xi1>, vector<16x16xf32>
    %c2_i32 = arith.constant 2 : i32
    %8 = vector.broadcast %c2_i32 : i32 to vector<16x16xi32>
    %9 = arith.addi %0, %8 : vector<16x16xi32>
    %10 = arith.cmpi sge, %1, %9 : vector<16x16xi32>
    %cst_1 = arith.constant 0.000000e+00 : f32
    %11 = vector.broadcast %cst_1 : f32 to vector<16x16xf32>
    %12 = arith.select %10, %4, %11 : vector<16x16xi1>, vector<16x16xf32>
    %13 = arith.addf %7, %12 : vector<16x16xf32>
    %c0_2 = arith.constant 0 : index
    %c0_3 = arith.constant 0 : index
    %14 = vector.load %arg1[%c0_2, %c0_3] : memref<16x16xf32, #tpu.memory_space<vmem>>, vector<16x16xf32>
    tpu.vector_store %arg1[%c0_2, %c0_3], %13 {strides = array<i32>} : memref<16x16xf32, #tpu.memory_space<vmem>>, vector<16x16xf32>,
    return
  }
}

module attributes {stable_mosaic.version = 11 : i64} {
  func.func @_conformer_block_kernel(%arg0: i32, %arg1: memref<1x16x128xf32, #tpu.memory_space<vmem>>, %arg2: memref<16x128xf32, #tpu.memory_space<vmem>>, %arg3: memref<1x128xf32, #tpu.memory_space<vmem>>, %arg4: memref<1x128xf32, #tpu.memory_space<vmem>>, %arg5: memref<128x512xbf16, #tpu.memory_space<vmem>>, %arg6: memref<1x512xf32, #tpu.memory_space<vmem>>, %arg7: memref<512x128xbf16, #tpu.memory_space<vmem>>, %arg8: memref<1x128xf32, #tpu.memory_space<vmem>>, %arg9: memref<1x128xf32, #tpu.memory_space<vmem>>, %arg10: memref<1x128xf32, #tpu.memory_space<vmem>>, %arg11: memref<128x384xbf16, #tpu.memory_space<vmem>>, %arg12: memref<1x384xf32, #tpu.memory_space<vmem>>, %arg13: memref<128x128xbf16, #tpu.memory_space<vmem>>, %arg14: memref<1x128xf32, #tpu.memory_space<vmem>>, %arg15: memref<4x32xf32, #tpu.memory_space<vmem>>, %arg16: memref<4x32xf32, #tpu.memory_space<vmem>>, %arg17: memref<1x128xf32, #tpu.memory_space<vmem>>, %arg18: memref<1x128xf32, #tpu.memory_space<vmem>>, %arg19: memref<128x256xbf16, #tpu.memory_space<vmem>>, %arg20: memref<1x256xf32, #tpu.memory_space<vmem>>, %arg21: memref<7x128xf32, #tpu.memory_space<vmem>>, %arg22: memref<1x128xf32, #tpu.memory_space<vmem>>, %arg23: memref<1x128xf32, #tpu.memory_space<vmem>>, %arg24: memref<128x128xbf16, #tpu.memory_space<vmem>>, %arg25: memref<1x128xf32, #tpu.memory_space<vmem>>, %arg26: memref<1x128xf32, #tpu.memory_space<vmem>>, %arg27: memref<1x128xf32, #tpu.memory_space<vmem>>, %arg28: memref<128x512xbf16, #tpu.memory_space<vmem>>, %arg29: memref<1x512xf32, #tpu.memory_space<vmem>>, %arg30: memref<512x128xbf16, #tpu.memory_space<vmem>>, %arg31: memref<1x128xf32, #tpu.memory_space<vmem>>, %arg32: memref<1x128xf32, #tpu.memory_space<vmem>>, %arg33: memref<1x128xf32, #tpu.memory_space<vmem>>, %arg34: memref<1x16x128xf32, #tpu.memory_space<vmem>>) attributes {dimension_semantics = [#tpu.dimension_semantics<parallel>], iteration_bounds = array<i64: 2>, scalar_prefetch = 0 : i64, scratch_operands = 0 : i64, tpu.core_type = #tpu.core_type<tc>, window_params = [{transform_indices = @transform_0, window_bounds = array<i64: 1, 16, 128>}, {pipeline_mode = #tpu.pipeline_mode<synchronous>, transform_indices = @transform_1, window_bounds = array<i64: 16, 128>}, {pipeline_mode = #tpu.pipeline_mode<synchronous>, transform_indices = @transform_2, window_bounds = array<i64: 1, 128>}, {pipeline_mode = #tpu.pipeline_mode<synchronous>, transform_indices = @transform_3, window_bounds = array<i64: 1, 128>}, {pipeline_mode = #tpu.pipeline_mode<synchronous>, transform_indices = @transform_4, window_bounds = array<i64: 128, 512>}, {pipeline_mode = #tpu.pipeline_mode<synchronous>, transform_indices = @transform_5, window_bounds = array<i64: 1, 512>}, {pipeline_mode = #tpu.pipeline_mode<synchronous>, transform_indices = @transform_6, window_bounds = array<i64: 512, 128>}, {pipeline_mode = #tpu.pipeline_mode<synchronous>, transform_indices = @transform_7, window_bounds = array<i64: 1, 128>}, {pipeline_mode = #tpu.pipeline_mode<synchronous>, transform_indices = @transform_8, window_bounds = array<i64: 1, 128>}, {pipeline_mode = #tpu.pipeline_mode<synchronous>, transform_indices = @transform_9, window_bounds = array<i64: 1, 128>}, {pipeline_mode = #tpu.pipeline_mode<synchronous>, transform_indices = @transform_10, window_bounds = array<i64: 128, 384>}, {pipeline_mode = #tpu.pipeline_mode<synchronous>, transform_indices = @transform_11, window_bounds = array<i64: 1, 384>}, {pipeline_mode = #tpu.pipeline_mode<synchronous>, transform_indices = @transform_12, window_bounds = array<i64: 128, 128>}, {pipeline_mode = #tpu.pipeline_mode<synchronous>, transform_indices = @transform_13, window_bounds = array<i64: 1, 128>}, {pipeline_mode = #tpu.pipeline_mode<synchronous>, transform_indices = @transform_14, window_bounds = array<i64: 4, 32>}, {pipeline_mode = #tpu.pipeline_mode<synchronous>, transform_indices = @transform_15, window_bounds = array<i64: 4, 32>}, {pipeline_mode = #tpu.pipeline_mode<synchronous>, transform_indices = @transform_16, window_bounds = array<i64: 1, 128>}, {pipeline_mode = #tpu.pipeline_mode<synchronous>, transform_indices = @transform_17, window_bounds = array<i64: 1, 128>}, {pipeline_mode = #tpu.pipeline_mode<synchronous>, transform_indices = @transform_18, window_bounds = array<i64: 128, 256>}, {pipeline_mode = #tpu.pipeline_mode<synchronous>, transform_indices = @transform_19, window_bounds = array<i64: 1, 256>}, {pipeline_mode = #tpu.pipeline_mode<synchronous>, transform_indices = @transform_20, window_bounds = array<i64: 7, 128>}, {pipeline_mode = #tpu.pipeline_mode<synchronous>, transform_indices = @transform_21, window_bounds = array<i64: 1, 128>}, {pipeline_mode = #tpu.pipeline_mode<synchronous>, transform_indices = @transform_22, window_bounds = array<i64: 1, 128>}, {pipeline_mode = #tpu.pipeline_mode<synchronous>, transform_indices = @transform_23, window_bounds = array<i64: 128, 128>}, {pipeline_mode = #tpu.pipeline_mode<synchronous>, transform_indices = @transform_24, window_bounds = array<i64: 1, 128>}, {pipeline_mode = #tpu.pipeline_mode<synchronous>, transform_indices = @transform_25, window_bounds = array<i64: 1, 128>}, {pipeline_mode = #tpu.pipeline_mode<synchronous>, transform_indices = @transform_26, window_bounds = array<i64: 1, 128>}, {pipeline_mode = #tpu.pipeline_mode<synchronous>, transform_indices = @transform_27, window_bounds = array<i64: 128, 512>}, {pipeline_mode = #tpu.pipeline_mode<synchronous>, transform_indices = @transform_28, window_bounds = array<i64: 1, 512>}, {pipeline_mode = #tpu.pipeline_mode<synchronous>, transform_indices = @transform_29, window_bounds = array<i64: 512, 128>}, {pipeline_mode = #tpu.pipeline_mode<synchronous>, transform_indices = @transform_30, window_bounds = array<i64: 1, 128>}, {pipeline_mode = #tpu.pipeline_mode<synchronous>, transform_indices = @transform_31, window_bounds = array<i64: 1, 128>}, {pipeline_mode = #tpu.pipeline_mode<synchronous>, transform_indices = @transform_32, window_bounds = array<i64: 1, 128>}, {transform_indices = @transform_33, window_bounds = array<i64: 1, 16, 128>}]} {
    %c0 = arith.constant 0 : index
    %c0_0 = arith.constant 0 : index
    %c0_1 = arith.constant 0 : index
    %0 = vector.load %arg1[%c0, %c0_0, %c0_1] : memref<1x16x128xf32, #tpu.memory_space<vmem>>, vector<1x16x128xf32>
    %1 = vector.shape_cast %0 : vector<1x16x128xf32> to vector<16x128xf32>
    %c0_2 = arith.constant 0 : index
    %c0_3 = arith.constant 0 : index
    %2 = vector.load %arg3[%c0_2, %c0_3] : memref<1x128xf32, #tpu.memory_space<vmem>>, vector<1x128xf32>
    %c0_4 = arith.constant 0 : index
    %c0_5 = arith.constant 0 : index
    %3 = vector.load %arg4[%c0_4, %c0_5] : memref<1x128xf32, #tpu.memory_space<vmem>>, vector<1x128xf32>
    %cst = arith.constant dense<0.000000e+00> : vector<16xf32>
    %4 = vector.multi_reduction <add>, %1, %cst [1] : vector<16x128xf32> to vector<16xf32>
    %5 = vector.shape_cast %4 : vector<16xf32> to vector<16x1xf32>
    %cst_6 = arith.constant 1.280000e+02 : f32
    %6 = vector.broadcast %cst_6 : f32 to vector<16x1xf32>
    %7 = arith.divf %5, %6 : vector<16x1xf32>
    %8 = vector.broadcast %7 : vector<16x1xf32> to vector<16x128xf32>
    %9 = arith.subf %1, %8 : vector<16x128xf32>
    %10 = arith.mulf %9, %9 : vector<16x128xf32>
    %cst_7 = arith.constant dense<0.000000e+00> : vector<16xf32>
    %11 = vector.multi_reduction <add>, %10, %cst_7 [1] : vector<16x128xf32> to vector<16xf32>
    %12 = vector.shape_cast %11 : vector<16xf32> to vector<16x1xf32>
    %cst_8 = arith.constant 1.280000e+02 : f32
    %13 = vector.broadcast %cst_8 : f32 to vector<16x1xf32>
    %14 = arith.divf %12, %13 : vector<16x1xf32>
    %15 = vector.broadcast %7 : vector<16x1xf32> to vector<16x128xf32>
    %16 = arith.subf %1, %15 : vector<16x128xf32>
    %cst_9 = arith.constant 9.99999974E-6 : f32
    %17 = vector.broadcast %cst_9 : f32 to vector<16x1xf32>
    %18 = arith.addf %14, %17 : vector<16x1xf32>
    %19 = math.rsqrt %18 : vector<16x1xf32>
    %20 = vector.broadcast %19 : vector<16x1xf32> to vector<16x128xf32>
    %21 = arith.mulf %16, %20 : vector<16x128xf32>
    %22 = vector.broadcast %2 : vector<1x128xf32> to vector<16x128xf32>
    %23 = arith.mulf %21, %22 : vector<16x128xf32>
    %24 = vector.broadcast %3 : vector<1x128xf32> to vector<16x128xf32>
    %25 = arith.addf %23, %24 : vector<16x128xf32>
    %c0_10 = arith.constant 0 : index
    %c0_11 = arith.constant 0 : index
    %26 = vector.load %arg5[%c0_10, %c0_11] : memref<128x512xbf16, #tpu.memory_space<vmem>>, vector<128x512xbf16>
    %27 = arith.truncf %25 : vector<16x128xf32> to vector<16x128xbf16>
    %cst_12 = arith.constant dense<0.000000e+00> : vector<16x512xf32>
    %28 = tpu.matmul %27, %26, %cst_12 {dimension_numbers = #tpu.dot_dimension_numbers<[1], [0], [0], [1], [0, 0, 1, 1], [], []>} : vector<16x128xbf16>, vector<128x512xbf16>, vector<16x512xf32> -> vector<16x512xf32>
    %c0_13 = arith.constant 0 : index
    %c0_14 = arith.constant 0 : index
    %29 = vector.load %arg6[%c0_13, %c0_14] : memref<1x512xf32, #tpu.memory_space<vmem>>, vector<1x512xf32>
    %30 = vector.broadcast %29 : vector<1x512xf32> to vector<16x512xf32>
    %31 = arith.addf %28, %30 : vector<16x512xf32>
    %32 = arith.negf %31 : vector<16x512xf32>
    %33 = math.exp %32 : vector<16x512xf32>
    %cst_15 = arith.constant 1.000000e+00 : f32
    %34 = vector.broadcast %cst_15 : f32 to vector<16x512xf32>
    %35 = arith.addf %34, %33 : vector<16x512xf32>
    %36 = arith.divf %34, %35 : vector<16x512xf32>
    %37 = arith.mulf %31, %36 : vector<16x512xf32>
    %c0_16 = arith.constant 0 : index
    %c0_17 = arith.constant 0 : index
    %38 = vector.load %arg7[%c0_16, %c0_17] : memref<512x128xbf16, #tpu.memory_space<vmem>>, vector<512x128xbf16>
    %39 = arith.truncf %37 : vector<16x512xf32> to vector<16x512xbf16>
    %cst_18 = arith.constant dense<0.000000e+00> : vector<16x128xf32>
    %40 = tpu.matmul %39, %38, %cst_18 {dimension_numbers = #tpu.dot_dimension_numbers<[1], [0], [0], [1], [0, 0, 1, 1], [], []>} : vector<16x512xbf16>, vector<512x128xbf16>, vector<16x128xf32> -> vector<16x128xf32>
    %c0_19 = arith.constant 0 : index
    %c0_20 = arith.constant 0 : index
    %41 = vector.load %arg8[%c0_19, %c0_20] : memref<1x128xf32, #tpu.memory_space<vmem>>, vector<1x128xf32>
    %42 = vector.broadcast %41 : vector<1x128xf32> to vector<16x128xf32>
    %43 = arith.addf %40, %42 : vector<16x128xf32>
    %cst_21 = arith.constant 5.000000e-01 : f32
    %44 = vector.broadcast %cst_21 : f32 to vector<16x128xf32>
    %45 = arith.mulf %44, %43 : vector<16x128xf32>
    %46 = arith.addf %1, %45 : vector<16x128xf32>
    %c0_22 = arith.constant 0 : index
    %c0_23 = arith.constant 0 : index
    %47 = vector.load %arg9[%c0_22, %c0_23] : memref<1x128xf32, #tpu.memory_space<vmem>>, vector<1x128xf32>
    %c0_24 = arith.constant 0 : index
    %c0_25 = arith.constant 0 : index
    %48 = vector.load %arg10[%c0_24, %c0_25] : memref<1x128xf32, #tpu.memory_space<vmem>>, vector<1x128xf32>
    %cst_26 = arith.constant dense<0.000000e+00> : vector<16xf32>
    %49 = vector.multi_reduction <add>, %46, %cst_26 [1] : vector<16x128xf32> to vector<16xf32>
    %50 = vector.shape_cast %49 : vector<16xf32> to vector<16x1xf32>
    %cst_27 = arith.constant 1.280000e+02 : f32
    %51 = vector.broadcast %cst_27 : f32 to vector<16x1xf32>
    %52 = arith.divf %50, %51 : vector<16x1xf32>
    %53 = vector.broadcast %52 : vector<16x1xf32> to vector<16x128xf32>
    %54 = arith.subf %46, %53 : vector<16x128xf32>
    %55 = arith.mulf %54, %54 : vector<16x128xf32>
    %cst_28 = arith.constant dense<0.000000e+00> : vector<16xf32>
    %56 = vector.multi_reduction <add>, %55, %cst_28 [1] : vector<16x128xf32> to vector<16xf32>
    %57 = vector.shape_cast %56 : vector<16xf32> to vector<16x1xf32>
    %cst_29 = arith.constant 1.280000e+02 : f32
    %58 = vector.broadcast %cst_29 : f32 to vector<16x1xf32>
    %59 = arith.divf %57, %58 : vector<16x1xf32>
    %60 = vector.broadcast %52 : vector<16x1xf32> to vector<16x128xf32>
    %61 = arith.subf %46, %60 : vector<16x128xf32>
    %cst_30 = arith.constant 9.99999974E-6 : f32
    %62 = vector.broadcast %cst_30 : f32 to vector<16x1xf32>
    %63 = arith.addf %59, %62 : vector<16x1xf32>
    %64 = math.rsqrt %63 : vector<16x1xf32>
    %65 = vector.broadcast %64 : vector<16x1xf32> to vector<16x128xf32>
    %66 = arith.mulf %61, %65 : vector<16x128xf32>
    %67 = vector.broadcast %47 : vector<1x128xf32> to vector<16x128xf32>
    %68 = arith.mulf %66, %67 : vector<16x128xf32>
    %69 = vector.broadcast %48 : vector<1x128xf32> to vector<16x128xf32>
    %70 = arith.addf %68, %69 : vector<16x128xf32>
    %c0_31 = arith.constant 0 : index
    %c0_32 = arith.constant 0 : index
    %71 = vector.load %arg11[%c0_31, %c0_32] : memref<128x384xbf16, #tpu.memory_space<vmem>>, vector<128x384xbf16>
    %72 = arith.truncf %70 : vector<16x128xf32> to vector<16x128xbf16>
    %cst_33 = arith.constant dense<0.000000e+00> : vector<16x384xf32>
    %73 = tpu.matmul %72, %71, %cst_33 {dimension_numbers = #tpu.dot_dimension_numbers<[1], [0], [0], [1], [0, 0, 1, 1], [], []>} : vector<16x128xbf16>, vector<128x384xbf16>, vector<16x384xf32> -> vector<16x384xf32>
    %c0_34 = arith.constant 0 : index
    %c0_35 = arith.constant 0 : index
    %74 = vector.load %arg12[%c0_34, %c0_35] : memref<1x384xf32, #tpu.memory_space<vmem>>, vector<1x384xf32>
    %75 = vector.broadcast %74 : vector<1x384xf32> to vector<16x384xf32>
    %76 = arith.addf %73, %75 : vector<16x384xf32>
    %77 = vector.extract_strided_slice %76 {offsets = [0, 0], sizes = [16, 128], strides = [1, 1]} : vector<16x384xf32> to vector<16x128xf32>
    %78 = vector.extract_strided_slice %76 {offsets = [0, 128], sizes = [16, 128], strides = [1, 1]} : vector<16x384xf32> to vector<16x128xf32>
    %79 = vector.extract_strided_slice %76 {offsets = [0, 256], sizes = [16, 128], strides = [1, 1]} : vector<16x384xf32> to vector<16x128xf32>
    %c0_36 = arith.constant 0 : index
    %c0_37 = arith.constant 0 : index
    %80 = vector.load %arg2[%c0_36, %c0_37] : memref<16x128xf32, #tpu.memory_space<vmem>>, vector<16x128xf32>
    %c0_38 = arith.constant 0 : index
    %c0_39 = arith.constant 0 : index
    %81 = vector.load %arg13[%c0_38, %c0_39] : memref<128x128xbf16, #tpu.memory_space<vmem>>, vector<128x128xbf16>
    %c0_40 = arith.constant 0 : index
    %c0_41 = arith.constant 0 : index
    %82 = vector.load %arg15[%c0_40, %c0_41] : memref<4x32xf32, #tpu.memory_space<vmem>>, vector<4x32xf32>
    %c0_42 = arith.constant 0 : index
    %c0_43 = arith.constant 0 : index
    %83 = vector.load %arg16[%c0_42, %c0_43] : memref<4x32xf32, #tpu.memory_space<vmem>>, vector<4x32xf32>
    %84 = tpu.iota {dimensions = array<i32: 0>} : vector<16x16xi32>
    %85 = tpu.iota {dimensions = array<i32: 1>} : vector<16x16xi32>
    %cst_44 = arith.constant 0.000000e+00 : f32
    %86 = vector.broadcast %cst_44 : f32 to vector<16x128xf32>
    %87 = vector.extract_strided_slice %77 {offsets = [0, 0], sizes = [16, 32], strides = [1, 1]} : vector<16x128xf32> to vector<16x32xf32>
    %88 = vector.extract_strided_slice %78 {offsets = [0, 0], sizes = [16, 32], strides = [1, 1]} : vector<16x128xf32> to vector<16x32xf32>
    %89 = vector.extract_strided_slice %79 {offsets = [0, 0], sizes = [16, 32], strides = [1, 1]} : vector<16x128xf32> to vector<16x32xf32>
    %90 = vector.extract_strided_slice %80 {offsets = [0, 0], sizes = [16, 32], strides = [1, 1]} : vector<16x128xf32> to vector<16x32xf32>
    %91 = vector.extract_strided_slice %82 {offsets = [0, 0], sizes = [1, 32], strides = [1, 1]} : vector<4x32xf32> to vector<1x32xf32>
    %92 = vector.extract_strided_slice %83 {offsets = [0, 0], sizes = [1, 32], strides = [1, 1]} : vector<4x32xf32> to vector<1x32xf32>
    %93 = vector.broadcast %91 : vector<1x32xf32> to vector<16x32xf32>
    %94 = arith.addf %87, %93 : vector<16x32xf32>
    %95 = arith.truncf %94 : vector<16x32xf32> to vector<16x32xbf16>
    %96 = arith.truncf %88 : vector<16x32xf32> to vector<16x32xbf16>
    %cst_45 = arith.constant dense<0.000000e+00> : vector<16x16xf32>
    %97 = tpu.matmul %95, %96, %cst_45 {dimension_numbers = #tpu.dot_dimension_numbers<[1], [1], [0], [0], [0, 0, 1, 0], [], []>} : vector<16x32xbf16>, vector<16x32xbf16>, vector<16x16xf32> -> vector<16x16xf32>
    %98 = vector.broadcast %92 : vector<1x32xf32> to vector<16x32xf32>
    %99 = arith.addf %87, %98 : vector<16x32xf32>
    %100 = arith.truncf %99 : vector<16x32xf32> to vector<16x32xbf16>
    %101 = arith.truncf %90 : vector<16x32xf32> to vector<16x32xbf16>
    %cst_46 = arith.constant dense<0.000000e+00> : vector<16x16xf32>
    %102 = tpu.matmul %100, %101, %cst_46 {dimension_numbers = #tpu.dot_dimension_numbers<[1], [1], [0], [0], [0, 0, 1, 0], [], []>} : vector<16x32xbf16>, vector<16x32xbf16>, vector<16x16xf32> -> vector<16x16xf32>
    %103 = arith.subi %85, %84 : vector<16x16xi32>
    %c1_i32 = arith.constant 1 : i32
    %104 = vector.broadcast %c1_i32 : i32 to vector<16x16xi32>
    %105 = arith.subi %103, %104 : vector<16x16xi32>
    %c0_i32 = arith.constant 0 : i32
    %106 = vector.broadcast %c0_i32 : i32 to vector<16x16xi32>
    %107 = arith.cmpi slt, %105, %106 : vector<16x16xi32>
    %c16_i32 = arith.constant 16 : i32
    %108 = vector.broadcast %c16_i32 : i32 to vector<16x16xi32>
    %109 = arith.addi %105, %108 : vector<16x16xi32>
    %110 = arith.select %107, %109, %105 : vector<16x16xi1>, vector<16x16xi32>
    %cst_47 = arith.constant 0.000000e+00 : f32
    %111 = vector.broadcast %cst_47 : f32 to vector<16x16xf32>
    %112 = vector.extract_strided_slice %102 {offsets = [0, 0], sizes = [16, 1], strides = [1, 1]} : vector<16x16xf32> to vector<16x1xf32>
    %c0_i32_48 = arith.constant 0 : i32
    %113 = vector.broadcast %c0_i32_48 : i32 to vector<16x16xi32>
    %114 = arith.cmpi eq, %110, %113 : vector<16x16xi32>
    %115 = arith.extui %114 : vector<16x16xi1> to vector<16x16xi32>
    %116 = arith.sitofp %115 : vector<16x16xi32> to vector<16x16xf32>
    %117 = vector.broadcast %112 : vector<16x1xf32> to vector<16x16xf32>
    %118 = arith.mulf %117, %116 : vector<16x16xf32>
    %119 = arith.addf %111, %118 : vector<16x16xf32>
    %120 = vector.extract_strided_slice %102 {offsets = [0, 1], sizes = [16, 1], strides = [1, 1]} : vector<16x16xf32> to vector<16x1xf32>
    %c1_i32_49 = arith.constant 1 : i32
    %121 = vector.broadcast %c1_i32_49 : i32 to vector<16x16xi32>
    %122 = arith.cmpi eq, %110, %121 : vector<16x16xi32>
    %123 = arith.extui %122 : vector<16x16xi1> to vector<16x16xi32>
    %124 = arith.sitofp %123 : vector<16x16xi32> to vector<16x16xf32>
    %125 = vector.broadcast %120 : vector<16x1xf32> to vector<16x16xf32>
    %126 = arith.mulf %125, %124 : vector<16x16xf32>
    %127 = arith.addf %119, %126 : vector<16x16xf32>
    %128 = vector.extract_strided_slice %102 {offsets = [0, 2], sizes = [16, 1], strides = [1, 1]} : vector<16x16xf32> to vector<16x1xf32>
    %c2_i32 = arith.constant 2 : i32
    %129 = vector.broadcast %c2_i32 : i32 to vector<16x16xi32>
    %130 = arith.cmpi eq, %110, %129 : vector<16x16xi32>
    %131 = arith.extui %130 : vector<16x16xi1> to vector<16x16xi32>
    %132 = arith.sitofp %131 : vector<16x16xi32> to vector<16x16xf32>
    %133 = vector.broadcast %128 : vector<16x1xf32> to vector<16x16xf32>
    %134 = arith.mulf %133, %132 : vector<16x16xf32>
    %135 = arith.addf %127, %134 : vector<16x16xf32>
    %136 = vector.extract_strided_slice %102 {offsets = [0, 3], sizes = [16, 1], strides = [1, 1]} : vector<16x16xf32> to vector<16x1xf32>
    %c3_i32 = arith.constant 3 : i32
    %137 = vector.broadcast %c3_i32 : i32 to vector<16x16xi32>
    %138 = arith.cmpi eq, %110, %137 : vector<16x16xi32>
    %139 = arith.extui %138 : vector<16x16xi1> to vector<16x16xi32>
    %140 = arith.sitofp %139 : vector<16x16xi32> to vector<16x16xf32>
    %141 = vector.broadcast %136 : vector<16x1xf32> to vector<16x16xf32>
    %142 = arith.mulf %141, %140 : vector<16x16xf32>
    %143 = arith.addf %135, %142 : vector<16x16xf32>
    %144 = vector.extract_strided_slice %102 {offsets = [0, 4], sizes = [16, 1], strides = [1, 1]} : vector<16x16xf32> to vector<16x1xf32>
    %c4_i32 = arith.constant 4 : i32
    %145 = vector.broadcast %c4_i32 : i32 to vector<16x16xi32>
    %146 = arith.cmpi eq, %110, %145 : vector<16x16xi32>
    %147 = arith.extui %146 : vector<16x16xi1> to vector<16x16xi32>
    %148 = arith.sitofp %147 : vector<16x16xi32> to vector<16x16xf32>
    %149 = vector.broadcast %144 : vector<16x1xf32> to vector<16x16xf32>
    %150 = arith.mulf %149, %148 : vector<16x16xf32>
    %151 = arith.addf %143, %150 : vector<16x16xf32>
    %152 = vector.extract_strided_slice %102 {offsets = [0, 5], sizes = [16, 1], strides = [1, 1]} : vector<16x16xf32> to vector<16x1xf32>
    %c5_i32 = arith.constant 5 : i32
    %153 = vector.broadcast %c5_i32 : i32 to vector<16x16xi32>
    %154 = arith.cmpi eq, %110, %153 : vector<16x16xi32>
    %155 = arith.extui %154 : vector<16x16xi1> to vector<16x16xi32>
    %156 = arith.sitofp %155 : vector<16x16xi32> to vector<16x16xf32>
    %157 = vector.broadcast %152 : vector<16x1xf32> to vector<16x16xf32>
    %158 = arith.mulf %157, %156 : vector<16x16xf32>
    %159 = arith.addf %151, %158 : vector<16x16xf32>
    %160 = vector.extract_strided_slice %102 {offsets = [0, 6], sizes = [16, 1], strides = [1, 1]} : vector<16x16xf32> to vector<16x1xf32>
    %c6_i32 = arith.constant 6 : i32
    %161 = vector.broadcast %c6_i32 : i32 to vector<16x16xi32>
    %162 = arith.cmpi eq, %110, %161 : vector<16x16xi32>
    %163 = arith.extui %162 : vector<16x16xi1> to vector<16x16xi32>
    %164 = arith.sitofp %163 : vector<16x16xi32> to vector<16x16xf32>
    %165 = vector.broadcast %160 : vector<16x1xf32> to vector<16x16xf32>
    %166 = arith.mulf %165, %164 : vector<16x16xf32>
    %167 = arith.addf %159, %166 : vector<16x16xf32>
    %168 = vector.extract_strided_slice %102 {offsets = [0, 7], sizes = [16, 1], strides = [1, 1]} : vector<16x16xf32> to vector<16x1xf32>
    %c7_i32 = arith.constant 7 : i32
    %169 = vector.broadcast %c7_i32 : i32 to vector<16x16xi32>
    %170 = arith.cmpi eq, %110, %169 : vector<16x16xi32>
    %171 = arith.extui %170 : vector<16x16xi1> to vector<16x16xi32>
    %172 = arith.sitofp %171 : vector<16x16xi32> to vector<16x16xf32>
    %173 = vector.broadcast %168 : vector<16x1xf32> to vector<16x16xf32>
    %174 = arith.mulf %173, %172 : vector<16x16xf32>
    %175 = arith.addf %167, %174 : vector<16x16xf32>
    %176 = vector.extract_strided_slice %102 {offsets = [0, 8], sizes = [16, 1], strides = [1, 1]} : vector<16x16xf32> to vector<16x1xf32>
    %c8_i32 = arith.constant 8 : i32
    %177 = vector.broadcast %c8_i32 : i32 to vector<16x16xi32>
    %178 = arith.cmpi eq, %110, %177 : vector<16x16xi32>
    %179 = arith.extui %178 : vector<16x16xi1> to vector<16x16xi32>
    %180 = arith.sitofp %179 : vector<16x16xi32> to vector<16x16xf32>
    %181 = vector.broadcast %176 : vector<16x1xf32> to vector<16x16xf32>
    %182 = arith.mulf %181, %180 : vector<16x16xf32>
    %183 = arith.addf %175, %182 : vector<16x16xf32>
    %184 = vector.extract_strided_slice %102 {offsets = [0, 9], sizes = [16, 1], strides = [1, 1]} : vector<16x16xf32> to vector<16x1xf32>
    %c9_i32 = arith.constant 9 : i32
    %185 = vector.broadcast %c9_i32 : i32 to vector<16x16xi32>
    %186 = arith.cmpi eq, %110, %185 : vector<16x16xi32>
    %187 = arith.extui %186 : vector<16x16xi1> to vector<16x16xi32>
    %188 = arith.sitofp %187 : vector<16x16xi32> to vector<16x16xf32>
    %189 = vector.broadcast %184 : vector<16x1xf32> to vector<16x16xf32>
    %190 = arith.mulf %189, %188 : vector<16x16xf32>
    %191 = arith.addf %183, %190 : vector<16x16xf32>
    %192 = vector.extract_strided_slice %102 {offsets = [0, 10], sizes = [16, 1], strides = [1, 1]} : vector<16x16xf32> to vector<16x1xf32>
    %c10_i32 = arith.constant 10 : i32
    %193 = vector.broadcast %c10_i32 : i32 to vector<16x16xi32>
    %194 = arith.cmpi eq, %110, %193 : vector<16x16xi32>
    %195 = arith.extui %194 : vector<16x16xi1> to vector<16x16xi32>
    %196 = arith.sitofp %195 : vector<16x16xi32> to vector<16x16xf32>
    %197 = vector.broadcast %192 : vector<16x1xf32> to vector<16x16xf32>
    %198 = arith.mulf %197, %196 : vector<16x16xf32>
    %199 = arith.addf %191, %198 : vector<16x16xf32>
    %200 = vector.extract_strided_slice %102 {offsets = [0, 11], sizes = [16, 1], strides = [1, 1]} : vector<16x16xf32> to vector<16x1xf32>
    %c11_i32 = arith.constant 11 : i32
    %201 = vector.broadcast %c11_i32 : i32 to vector<16x16xi32>
    %202 = arith.cmpi eq, %110, %201 : vector<16x16xi32>
    %203 = arith.extui %202 : vector<16x16xi1> to vector<16x16xi32>
    %204 = arith.sitofp %203 : vector<16x16xi32> to vector<16x16xf32>
    %205 = vector.broadcast %200 : vector<16x1xf32> to vector<16x16xf32>
    %206 = arith.mulf %205, %204 : vector<16x16xf32>
    %207 = arith.addf %199, %206 : vector<16x16xf32>
    %208 = vector.extract_strided_slice %102 {offsets = [0, 12], sizes = [16, 1], strides = [1, 1]} : vector<16x16xf32> to vector<16x1xf32>
    %c12_i32 = arith.constant 12 : i32
    %209 = vector.broadcast %c12_i32 : i32 to vector<16x16xi32>
    %210 = arith.cmpi eq, %110, %209 : vector<16x16xi32>
    %211 = arith.extui %210 : vector<16x16xi1> to vector<16x16xi32>
    %212 = arith.sitofp %211 : vector<16x16xi32> to vector<16x16xf32>
    %213 = vector.broadcast %208 : vector<16x1xf32> to vector<16x16xf32>
    %214 = arith.mulf %213, %212 : vector<16x16xf32>
    %215 = arith.addf %207, %214 : vector<16x16xf32>
    %216 = vector.extract_strided_slice %102 {offsets = [0, 13], sizes = [16, 1], strides = [1, 1]} : vector<16x16xf32> to vector<16x1xf32>
    %c13_i32 = arith.constant 13 : i32
    %217 = vector.broadcast %c13_i32 : i32 to vector<16x16xi32>
    %218 = arith.cmpi eq, %110, %217 : vector<16x16xi32>
    %219 = arith.extui %218 : vector<16x16xi1> to vector<16x16xi32>
    %220 = arith.sitofp %219 : vector<16x16xi32> to vector<16x16xf32>
    %221 = vector.broadcast %216 : vector<16x1xf32> to vector<16x16xf32>
    %222 = arith.mulf %221, %220 : vector<16x16xf32>
    %223 = arith.addf %215, %222 : vector<16x16xf32>
    %224 = vector.extract_strided_slice %102 {offsets = [0, 14], sizes = [16, 1], strides = [1, 1]} : vector<16x16xf32> to vector<16x1xf32>
    %c14_i32 = arith.constant 14 : i32
    %225 = vector.broadcast %c14_i32 : i32 to vector<16x16xi32>
    %226 = arith.cmpi eq, %110, %225 : vector<16x16xi32>
    %227 = arith.extui %226 : vector<16x16xi1> to vector<16x16xi32>
    %228 = arith.sitofp %227 : vector<16x16xi32> to vector<16x16xf32>
    %229 = vector.broadcast %224 : vector<16x1xf32> to vector<16x16xf32>
    %230 = arith.mulf %229, %228 : vector<16x16xf32>
    %231 = arith.addf %223, %230 : vector<16x16xf32>
    %232 = vector.extract_strided_slice %102 {offsets = [0, 15], sizes = [16, 1], strides = [1, 1]} : vector<16x16xf32> to vector<16x1xf32>
    %c15_i32 = arith.constant 15 : i32
    %233 = vector.broadcast %c15_i32 : i32 to vector<16x16xi32>
    %234 = arith.cmpi eq, %110, %233 : vector<16x16xi32>
    %235 = arith.extui %234 : vector<16x16xi1> to vector<16x16xi32>
    %236 = arith.sitofp %235 : vector<16x16xi32> to vector<16x16xf32>
    %237 = vector.broadcast %232 : vector<16x1xf32> to vector<16x16xf32>
    %238 = arith.mulf %237, %236 : vector<16x16xf32>
    %239 = arith.addf %231, %238 : vector<16x16xf32>
    %240 = vector.extract_strided_slice %239 {offsets = [1, 0], sizes = [15, 16], strides = [1, 1]} : vector<16x16xf32> to vector<15x16xf32>
    %cst_50 = arith.constant 0.000000e+00 : f32
    %241 = vector.broadcast %cst_50 : f32 to vector<1x16xf32>
    %242 = tpu.concatenate %240, %241 in 0 : vector<15x16xf32>, vector<1x16xf32> -> vector<16x16xf32>
    %243 = arith.cmpi sle, %85, %84 : vector<16x16xi32>
    %cst_51 = arith.constant 0.000000e+00 : f32
    %244 = vector.broadcast %cst_51 : f32 to vector<16x16xf32>
    %245 = arith.select %243, %239, %244 : vector<16x16xi1>, vector<16x16xf32>
    %c2_i32_52 = arith.constant 2 : i32
    %246 = vector.broadcast %c2_i32_52 : i32 to vector<16x16xi32>
    %247 = arith.addi %84, %246 : vector<16x16xi32>
    %248 = arith.cmpi sge, %85, %247 : vector<16x16xi32>
    %cst_53 = arith.constant 0.000000e+00 : f32
    %249 = vector.broadcast %cst_53 : f32 to vector<16x16xf32>
    %250 = arith.select %248, %242, %249 : vector<16x16xi1>, vector<16x16xf32>
    %251 = arith.addf %245, %250 : vector<16x16xf32>
    %252 = arith.addf %97, %251 : vector<16x16xf32>
    %cst_54 = arith.constant dense<0xFF800000> : vector<16xf32>
    %253 = vector.multi_reduction <maximumf>, %252, %cst_54 [1] : vector<16x16xf32> to vector<16xf32>
    %254 = vector.shape_cast %253 : vector<16xf32> to vector<16x1xf32>
    %255 = vector.broadcast %254 : vector<16x1xf32> to vector<16x16xf32>
    %256 = arith.subf %252, %255 : vector<16x16xf32>
    %257 = math.exp %256 : vector<16x16xf32>
    %cst_55 = arith.constant dense<0.000000e+00> : vector<16xf32>
    %258 = vector.multi_reduction <add>, %257, %cst_55 [1] : vector<16x16xf32> to vector<16xf32>
    %259 = vector.shape_cast %258 : vector<16xf32> to vector<16x1xf32>
    %260 = tpu.reciprocal %259 {approx = true} : vector<16x1xf32> -> vector<16x1xf32>
    %261 = vector.broadcast %260 : vector<16x1xf32> to vector<16x16xf32>
    %262 = arith.mulf %257, %261 : vector<16x16xf32>
    %263 = arith.truncf %262 : vector<16x16xf32> to vector<16x16xbf16>
    %264 = arith.truncf %89 : vector<16x32xf32> to vector<16x32xbf16>
    %cst_56 = arith.constant dense<0.000000e+00> : vector<16x32xf32>
    %265 = tpu.matmul %263, %264, %cst_56 {dimension_numbers = #tpu.dot_dimension_numbers<[1], [0], [0], [1], [0, 0, 1, 1], [], []>} : vector<16x16xbf16>, vector<16x32xbf16>, vector<16x32xf32> -> vector<16x32xf32>
    %266 = vector.extract_strided_slice %81 {offsets = [0, 0], sizes = [32, 128], strides = [1, 1]} : vector<128x128xbf16> to vector<32x128xbf16>
    %267 = arith.truncf %265 : vector<16x32xf32> to vector<16x32xbf16>
    %cst_57 = arith.constant dense<0.000000e+00> : vector<16x128xf32>
    %268 = tpu.matmul %267, %266, %cst_57 {dimension_numbers = #tpu.dot_dimension_numbers<[1], [0], [0], [1], [0, 0, 1, 1], [], []>} : vector<16x32xbf16>, vector<32x128xbf16>, vector<16x128xf32> -> vector<16x128xf32>
    %269 = arith.addf %86, %268 : vector<16x128xf32>
    %270 = vector.extract_strided_slice %77 {offsets = [0, 32], sizes = [16, 32], strides = [1, 1]} : vector<16x128xf32> to vector<16x32xf32>
    %271 = vector.extract_strided_slice %78 {offsets = [0, 32], sizes = [16, 32], strides = [1, 1]} : vector<16x128xf32> to vector<16x32xf32>
    %272 = vector.extract_strided_slice %79 {offsets = [0, 32], sizes = [16, 32], strides = [1, 1]} : vector<16x128xf32> to vector<16x32xf32>
    %273 = vector.extract_strided_slice %80 {offsets = [0, 32], sizes = [16, 32], strides = [1, 1]} : vector<16x128xf32> to vector<16x32xf32>
    %274 = vector.extract_strided_slice %82 {offsets = [1, 0], sizes = [1, 32], strides = [1, 1]} : vector<4x32xf32> to vector<1x32xf32>
    %275 = vector.extract_strided_slice %83 {offsets = [1, 0], sizes = [1, 32], strides = [1, 1]} : vector<4x32xf32> to vector<1x32xf32>
    %276 = vector.broadcast %274 : vector<1x32xf32> to vector<16x32xf32>
    %277 = arith.addf %270, %276 : vector<16x32xf32>
    %278 = arith.truncf %277 : vector<16x32xf32> to vector<16x32xbf16>
    %279 = arith.truncf %271 : vector<16x32xf32> to vector<16x32xbf16>
    %cst_58 = arith.constant dense<0.000000e+00> : vector<16x16xf32>
    %280 = tpu.matmul %278, %279, %cst_58 {dimension_numbers = #tpu.dot_dimension_numbers<[1], [1], [0], [0], [0, 0, 1, 0], [], []>} : vector<16x32xbf16>, vector<16x32xbf16>, vector<16x16xf32> -> vector<16x16xf32>
    %281 = vector.broadcast %275 : vector<1x32xf32> to vector<16x32xf32>
    %282 = arith.addf %270, %281 : vector<16x32xf32>
    %283 = arith.truncf %282 : vector<16x32xf32> to vector<16x32xbf16>
    %284 = arith.truncf %273 : vector<16x32xf32> to vector<16x32xbf16>
    %cst_59 = arith.constant dense<0.000000e+00> : vector<16x16xf32>
    %285 = tpu.matmul %283, %284, %cst_59 {dimension_numbers = #tpu.dot_dimension_numbers<[1], [1], [0], [0], [0, 0, 1, 0], [], []>} : vector<16x32xbf16>, vector<16x32xbf16>, vector<16x16xf32> -> vector<16x16xf32>
    %286 = arith.subi %85, %84 : vector<16x16xi32>
    %c1_i32_60 = arith.constant 1 : i32
    %287 = vector.broadcast %c1_i32_60 : i32 to vector<16x16xi32>
    %288 = arith.subi %286, %287 : vector<16x16xi32>
    %c0_i32_61 = arith.constant 0 : i32
    %289 = vector.broadcast %c0_i32_61 : i32 to vector<16x16xi32>
    %290 = arith.cmpi slt, %288, %289 : vector<16x16xi32>
    %c16_i32_62 = arith.constant 16 : i32
    %291 = vector.broadcast %c16_i32_62 : i32 to vector<16x16xi32>
    %292 = arith.addi %288, %291 : vector<16x16xi32>
    %293 = arith.select %290, %292, %288 : vector<16x16xi1>, vector<16x16xi32>
    %cst_63 = arith.constant 0.000000e+00 : f32
    %294 = vector.broadcast %cst_63 : f32 to vector<16x16xf32>
    %295 = vector.extract_strided_slice %285 {offsets = [0, 0], sizes = [16, 1], strides = [1, 1]} : vector<16x16xf32> to vector<16x1xf32>
    %c0_i32_64 = arith.constant 0 : i32
    %296 = vector.broadcast %c0_i32_64 : i32 to vector<16x16xi32>
    %297 = arith.cmpi eq, %293, %296 : vector<16x16xi32>
    %298 = arith.extui %297 : vector<16x16xi1> to vector<16x16xi32>
    %299 = arith.sitofp %298 : vector<16x16xi32> to vector<16x16xf32>
    %300 = vector.broadcast %295 : vector<16x1xf32> to vector<16x16xf32>
    %301 = arith.mulf %300, %299 : vector<16x16xf32>
    %302 = arith.addf %294, %301 : vector<16x16xf32>
    %303 = vector.extract_strided_slice %285 {offsets = [0, 1], sizes = [16, 1], strides = [1, 1]} : vector<16x16xf32> to vector<16x1xf32>
    %c1_i32_65 = arith.constant 1 : i32
    %304 = vector.broadcast %c1_i32_65 : i32 to vector<16x16xi32>
    %305 = arith.cmpi eq, %293, %304 : vector<16x16xi32>
    %306 = arith.extui %305 : vector<16x16xi1> to vector<16x16xi32>
    %307 = arith.sitofp %306 : vector<16x16xi32> to vector<16x16xf32>
    %308 = vector.broadcast %303 : vector<16x1xf32> to vector<16x16xf32>
    %309 = arith.mulf %308, %307 : vector<16x16xf32>
    %310 = arith.addf %302, %309 : vector<16x16xf32>
    %311 = vector.extract_strided_slice %285 {offsets = [0, 2], sizes = [16, 1], strides = [1, 1]} : vector<16x16xf32> to vector<16x1xf32>
    %c2_i32_66 = arith.constant 2 : i32
    %312 = vector.broadcast %c2_i32_66 : i32 to vector<16x16xi32>
    %313 = arith.cmpi eq, %293, %312 : vector<16x16xi32>
    %314 = arith.extui %313 : vector<16x16xi1> to vector<16x16xi32>
    %315 = arith.sitofp %314 : vector<16x16xi32> to vector<16x16xf32>
    %316 = vector.broadcast %311 : vector<16x1xf32> to vector<16x16xf32>
    %317 = arith.mulf %316, %315 : vector<16x16xf32>
    %318 = arith.addf %310, %317 : vector<16x16xf32>
    %319 = vector.extract_strided_slice %285 {offsets = [0, 3], sizes = [16, 1], strides = [1, 1]} : vector<16x16xf32> to vector<16x1xf32>
    %c3_i32_67 = arith.constant 3 : i32
    %320 = vector.broadcast %c3_i32_67 : i32 to vector<16x16xi32>
    %321 = arith.cmpi eq, %293, %320 : vector<16x16xi32>
    %322 = arith.extui %321 : vector<16x16xi1> to vector<16x16xi32>
    %323 = arith.sitofp %322 : vector<16x16xi32> to vector<16x16xf32>
    %324 = vector.broadcast %319 : vector<16x1xf32> to vector<16x16xf32>
    %325 = arith.mulf %324, %323 : vector<16x16xf32>
    %326 = arith.addf %318, %325 : vector<16x16xf32>
    %327 = vector.extract_strided_slice %285 {offsets = [0, 4], sizes = [16, 1], strides = [1, 1]} : vector<16x16xf32> to vector<16x1xf32>
    %c4_i32_68 = arith.constant 4 : i32
    %328 = vector.broadcast %c4_i32_68 : i32 to vector<16x16xi32>
    %329 = arith.cmpi eq, %293, %328 : vector<16x16xi32>
    %330 = arith.extui %329 : vector<16x16xi1> to vector<16x16xi32>
    %331 = arith.sitofp %330 : vector<16x16xi32> to vector<16x16xf32>
    %332 = vector.broadcast %327 : vector<16x1xf32> to vector<16x16xf32>
    %333 = arith.mulf %332, %331 : vector<16x16xf32>
    %334 = arith.addf %326, %333 : vector<16x16xf32>
    %335 = vector.extract_strided_slice %285 {offsets = [0, 5], sizes = [16, 1], strides = [1, 1]} : vector<16x16xf32> to vector<16x1xf32>
    %c5_i32_69 = arith.constant 5 : i32
    %336 = vector.broadcast %c5_i32_69 : i32 to vector<16x16xi32>
    %337 = arith.cmpi eq, %293, %336 : vector<16x16xi32>
    %338 = arith.extui %337 : vector<16x16xi1> to vector<16x16xi32>
    %339 = arith.sitofp %338 : vector<16x16xi32> to vector<16x16xf32>
    %340 = vector.broadcast %335 : vector<16x1xf32> to vector<16x16xf32>
    %341 = arith.mulf %340, %339 : vector<16x16xf32>
    %342 = arith.addf %334, %341 : vector<16x16xf32>
    %343 = vector.extract_strided_slice %285 {offsets = [0, 6], sizes = [16, 1], strides = [1, 1]} : vector<16x16xf32> to vector<16x1xf32>
    %c6_i32_70 = arith.constant 6 : i32
    %344 = vector.broadcast %c6_i32_70 : i32 to vector<16x16xi32>
    %345 = arith.cmpi eq, %293, %344 : vector<16x16xi32>
    %346 = arith.extui %345 : vector<16x16xi1> to vector<16x16xi32>
    %347 = arith.sitofp %346 : vector<16x16xi32> to vector<16x16xf32>
    %348 = vector.broadcast %343 : vector<16x1xf32> to vector<16x16xf32>
    %349 = arith.mulf %348, %347 : vector<16x16xf32>
    %350 = arith.addf %342, %349 : vector<16x16xf32>
    %351 = vector.extract_strided_slice %285 {offsets = [0, 7], sizes = [16, 1], strides = [1, 1]} : vector<16x16xf32> to vector<16x1xf32>
    %c7_i32_71 = arith.constant 7 : i32
    %352 = vector.broadcast %c7_i32_71 : i32 to vector<16x16xi32>
    %353 = arith.cmpi eq, %293, %352 : vector<16x16xi32>
    %354 = arith.extui %353 : vector<16x16xi1> to vector<16x16xi32>
    %355 = arith.sitofp %354 : vector<16x16xi32> to vector<16x16xf32>
    %356 = vector.broadcast %351 : vector<16x1xf32> to vector<16x16xf32>
    %357 = arith.mulf %356, %355 : vector<16x16xf32>
    %358 = arith.addf %350, %357 : vector<16x16xf32>
    %359 = vector.extract_strided_slice %285 {offsets = [0, 8], sizes = [16, 1], strides = [1, 1]} : vector<16x16xf32> to vector<16x1xf32>
    %c8_i32_72 = arith.constant 8 : i32
    %360 = vector.broadcast %c8_i32_72 : i32 to vector<16x16xi32>
    %361 = arith.cmpi eq, %293, %360 : vector<16x16xi32>
    %362 = arith.extui %361 : vector<16x16xi1> to vector<16x16xi32>
    %363 = arith.sitofp %362 : vector<16x16xi32> to vector<16x16xf32>
    %364 = vector.broadcast %359 : vector<16x1xf32> to vector<16x16xf32>
    %365 = arith.mulf %364, %363 : vector<16x16xf32>
    %366 = arith.addf %358, %365 : vector<16x16xf32>
    %367 = vector.extract_strided_slice %285 {offsets = [0, 9], sizes = [16, 1], strides = [1, 1]} : vector<16x16xf32> to vector<16x1xf32>
    %c9_i32_73 = arith.constant 9 : i32
    %368 = vector.broadcast %c9_i32_73 : i32 to vector<16x16xi32>
    %369 = arith.cmpi eq, %293, %368 : vector<16x16xi32>
    %370 = arith.extui %369 : vector<16x16xi1> to vector<16x16xi32>
    %371 = arith.sitofp %370 : vector<16x16xi32> to vector<16x16xf32>
    %372 = vector.broadcast %367 : vector<16x1xf32> to vector<16x16xf32>
    %373 = arith.mulf %372, %371 : vector<16x16xf32>
    %374 = arith.addf %366, %373 : vector<16x16xf32>
    %375 = vector.extract_strided_slice %285 {offsets = [0, 10], sizes = [16, 1], strides = [1, 1]} : vector<16x16xf32> to vector<16x1xf32>
    %c10_i32_74 = arith.constant 10 : i32
    %376 = vector.broadcast %c10_i32_74 : i32 to vector<16x16xi32>
    %377 = arith.cmpi eq, %293, %376 : vector<16x16xi32>
    %378 = arith.extui %377 : vector<16x16xi1> to vector<16x16xi32>
    %379 = arith.sitofp %378 : vector<16x16xi32> to vector<16x16xf32>
    %380 = vector.broadcast %375 : vector<16x1xf32> to vector<16x16xf32>
    %381 = arith.mulf %380, %379 : vector<16x16xf32>
    %382 = arith.addf %374, %381 : vector<16x16xf32>
    %383 = vector.extract_strided_slice %285 {offsets = [0, 11], sizes = [16, 1], strides = [1, 1]} : vector<16x16xf32> to vector<16x1xf32>
    %c11_i32_75 = arith.constant 11 : i32
    %384 = vector.broadcast %c11_i32_75 : i32 to vector<16x16xi32>
    %385 = arith.cmpi eq, %293, %384 : vector<16x16xi32>
    %386 = arith.extui %385 : vector<16x16xi1> to vector<16x16xi32>
    %387 = arith.sitofp %386 : vector<16x16xi32> to vector<16x16xf32>
    %388 = vector.broadcast %383 : vector<16x1xf32> to vector<16x16xf32>
    %389 = arith.mulf %388, %387 : vector<16x16xf32>
    %390 = arith.addf %382, %389 : vector<16x16xf32>
    %391 = vector.extract_strided_slice %285 {offsets = [0, 12], sizes = [16, 1], strides = [1, 1]} : vector<16x16xf32> to vector<16x1xf32>
    %c12_i32_76 = arith.constant 12 : i32
    %392 = vector.broadcast %c12_i32_76 : i32 to vector<16x16xi32>
    %393 = arith.cmpi eq, %293, %392 : vector<16x16xi32>
    %394 = arith.extui %393 : vector<16x16xi1> to vector<16x16xi32>
    %395 = arith.sitofp %394 : vector<16x16xi32> to vector<16x16xf32>
    %396 = vector.broadcast %391 : vector<16x1xf32> to vector<16x16xf32>
    %397 = arith.mulf %396, %395 : vector<16x16xf32>
    %398 = arith.addf %390, %397 : vector<16x16xf32>
    %399 = vector.extract_strided_slice %285 {offsets = [0, 13], sizes = [16, 1], strides = [1, 1]} : vector<16x16xf32> to vector<16x1xf32>
    %c13_i32_77 = arith.constant 13 : i32
    %400 = vector.broadcast %c13_i32_77 : i32 to vector<16x16xi32>
    %401 = arith.cmpi eq, %293, %400 : vector<16x16xi32>
    %402 = arith.extui %401 : vector<16x16xi1> to vector<16x16xi32>
    %403 = arith.sitofp %402 : vector<16x16xi32> to vector<16x16xf32>
    %404 = vector.broadcast %399 : vector<16x1xf32> to vector<16x16xf32>
    %405 = arith.mulf %404, %403 : vector<16x16xf32>
    %406 = arith.addf %398, %405 : vector<16x16xf32>
    %407 = vector.extract_strided_slice %285 {offsets = [0, 14], sizes = [16, 1], strides = [1, 1]} : vector<16x16xf32> to vector<16x1xf32>
    %c14_i32_78 = arith.constant 14 : i32
    %408 = vector.broadcast %c14_i32_78 : i32 to vector<16x16xi32>
    %409 = arith.cmpi eq, %293, %408 : vector<16x16xi32>
    %410 = arith.extui %409 : vector<16x16xi1> to vector<16x16xi32>
    %411 = arith.sitofp %410 : vector<16x16xi32> to vector<16x16xf32>
    %412 = vector.broadcast %407 : vector<16x1xf32> to vector<16x16xf32>
    %413 = arith.mulf %412, %411 : vector<16x16xf32>
    %414 = arith.addf %406, %413 : vector<16x16xf32>
    %415 = vector.extract_strided_slice %285 {offsets = [0, 15], sizes = [16, 1], strides = [1, 1]} : vector<16x16xf32> to vector<16x1xf32>
    %c15_i32_79 = arith.constant 15 : i32
    %416 = vector.broadcast %c15_i32_79 : i32 to vector<16x16xi32>
    %417 = arith.cmpi eq, %293, %416 : vector<16x16xi32>
    %418 = arith.extui %417 : vector<16x16xi1> to vector<16x16xi32>
    %419 = arith.sitofp %418 : vector<16x16xi32> to vector<16x16xf32>
    %420 = vector.broadcast %415 : vector<16x1xf32> to vector<16x16xf32>
    %421 = arith.mulf %420, %419 : vector<16x16xf32>
    %422 = arith.addf %414, %421 : vector<16x16xf32>
    %423 = vector.extract_strided_slice %422 {offsets = [1, 0], sizes = [15, 16], strides = [1, 1]} : vector<16x16xf32> to vector<15x16xf32>
    %cst_80 = arith.constant 0.000000e+00 : f32
    %424 = vector.broadcast %cst_80 : f32 to vector<1x16xf32>
    %425 = tpu.concatenate %423, %424 in 0 : vector<15x16xf32>, vector<1x16xf32> -> vector<16x16xf32>
    %426 = arith.cmpi sle, %85, %84 : vector<16x16xi32>
    %cst_81 = arith.constant 0.000000e+00 : f32
    %427 = vector.broadcast %cst_81 : f32 to vector<16x16xf32>
    %428 = arith.select %426, %422, %427 : vector<16x16xi1>, vector<16x16xf32>
    %c2_i32_82 = arith.constant 2 : i32
    %429 = vector.broadcast %c2_i32_82 : i32 to vector<16x16xi32>
    %430 = arith.addi %84, %429 : vector<16x16xi32>
    %431 = arith.cmpi sge, %85, %430 : vector<16x16xi32>
    %cst_83 = arith.constant 0.000000e+00 : f32
    %432 = vector.broadcast %cst_83 : f32 to vector<16x16xf32>
    %433 = arith.select %431, %425, %432 : vector<16x16xi1>, vector<16x16xf32>
    %434 = arith.addf %428, %433 : vector<16x16xf32>
    %435 = arith.addf %280, %434 : vector<16x16xf32>
    %cst_84 = arith.constant dense<0xFF800000> : vector<16xf32>
    %436 = vector.multi_reduction <maximumf>, %435, %cst_84 [1] : vector<16x16xf32> to vector<16xf32>
    %437 = vector.shape_cast %436 : vector<16xf32> to vector<16x1xf32>
    %438 = vector.broadcast %437 : vector<16x1xf32> to vector<16x16xf32>
    %439 = arith.subf %435, %438 : vector<16x16xf32>
    %440 = math.exp %439 : vector<16x16xf32>
    %cst_85 = arith.constant dense<0.000000e+00> : vector<16xf32>
    %441 = vector.multi_reduction <add>, %440, %cst_85 [1] : vector<16x16xf32> to vector<16xf32>
    %442 = vector.shape_cast %441 : vector<16xf32> to vector<16x1xf32>
    %443 = tpu.reciprocal %442 {approx = true} : vector<16x1xf32> -> vector<16x1xf32>
    %444 = vector.broadcast %443 : vector<16x1xf32> to vector<16x16xf32>
    %445 = arith.mulf %440, %444 : vector<16x16xf32>
    %446 = arith.truncf %445 : vector<16x16xf32> to vector<16x16xbf16>
    %447 = arith.truncf %272 : vector<16x32xf32> to vector<16x32xbf16>
    %cst_86 = arith.constant dense<0.000000e+00> : vector<16x32xf32>
    %448 = tpu.matmul %446, %447, %cst_86 {dimension_numbers = #tpu.dot_dimension_numbers<[1], [0], [0], [1], [0, 0, 1, 1], [], []>} : vector<16x16xbf16>, vector<16x32xbf16>, vector<16x32xf32> -> vector<16x32xf32>
    %449 = vector.extract_strided_slice %81 {offsets = [32, 0], sizes = [32, 128], strides = [1, 1]} : vector<128x128xbf16> to vector<32x128xbf16>
    %450 = arith.truncf %448 : vector<16x32xf32> to vector<16x32xbf16>
    %cst_87 = arith.constant dense<0.000000e+00> : vector<16x128xf32>
    %451 = tpu.matmul %450, %449, %cst_87 {dimension_numbers = #tpu.dot_dimension_numbers<[1], [0], [0], [1], [0, 0, 1, 1], [], []>} : vector<16x32xbf16>, vector<32x128xbf16>, vector<16x128xf32> -> vector<16x128xf32>
    %452 = arith.addf %269, %451 : vector<16x128xf32>
    %453 = vector.extract_strided_slice %77 {offsets = [0, 64], sizes = [16, 32], strides = [1, 1]} : vector<16x128xf32> to vector<16x32xf32>
    %454 = vector.extract_strided_slice %78 {offsets = [0, 64], sizes = [16, 32], strides = [1, 1]} : vector<16x128xf32> to vector<16x32xf32>
    %455 = vector.extract_strided_slice %79 {offsets = [0, 64], sizes = [16, 32], strides = [1, 1]} : vector<16x128xf32> to vector<16x32xf32>
    %456 = vector.extract_strided_slice %80 {offsets = [0, 64], sizes = [16, 32], strides = [1, 1]} : vector<16x128xf32> to vector<16x32xf32>
    %457 = vector.extract_strided_slice %82 {offsets = [2, 0], sizes = [1, 32], strides = [1, 1]} : vector<4x32xf32> to vector<1x32xf32>
    %458 = vector.extract_strided_slice %83 {offsets = [2, 0], sizes = [1, 32], strides = [1, 1]} : vector<4x32xf32> to vector<1x32xf32>
    %459 = vector.broadcast %457 : vector<1x32xf32> to vector<16x32xf32>
    %460 = arith.addf %453, %459 : vector<16x32xf32>
    %461 = arith.truncf %460 : vector<16x32xf32> to vector<16x32xbf16>
    %462 = arith.truncf %454 : vector<16x32xf32> to vector<16x32xbf16>
    %cst_88 = arith.constant dense<0.000000e+00> : vector<16x16xf32>
    %463 = tpu.matmul %461, %462, %cst_88 {dimension_numbers = #tpu.dot_dimension_numbers<[1], [1], [0], [0], [0, 0, 1, 0], [], []>} : vector<16x32xbf16>, vector<16x32xbf16>, vector<16x16xf32> -> vector<16x16xf32>
    %464 = vector.broadcast %458 : vector<1x32xf32> to vector<16x32xf32>
    %465 = arith.addf %453, %464 : vector<16x32xf32>
    %466 = arith.truncf %465 : vector<16x32xf32> to vector<16x32xbf16>
    %467 = arith.truncf %456 : vector<16x32xf32> to vector<16x32xbf16>
    %cst_89 = arith.constant dense<0.000000e+00> : vector<16x16xf32>
    %468 = tpu.matmul %466, %467, %cst_89 {dimension_numbers = #tpu.dot_dimension_numbers<[1], [1], [0], [0], [0, 0, 1, 0], [], []>} : vector<16x32xbf16>, vector<16x32xbf16>, vector<16x16xf32> -> vector<16x16xf32>
    %469 = arith.subi %85, %84 : vector<16x16xi32>
    %c1_i32_90 = arith.constant 1 : i32
    %470 = vector.broadcast %c1_i32_90 : i32 to vector<16x16xi32>
    %471 = arith.subi %469, %470 : vector<16x16xi32>
    %c0_i32_91 = arith.constant 0 : i32
    %472 = vector.broadcast %c0_i32_91 : i32 to vector<16x16xi32>
    %473 = arith.cmpi slt, %471, %472 : vector<16x16xi32>
    %c16_i32_92 = arith.constant 16 : i32
    %474 = vector.broadcast %c16_i32_92 : i32 to vector<16x16xi32>
    %475 = arith.addi %471, %474 : vector<16x16xi32>
    %476 = arith.select %473, %475, %471 : vector<16x16xi1>, vector<16x16xi32>
    %cst_93 = arith.constant 0.000000e+00 : f32
    %477 = vector.broadcast %cst_93 : f32 to vector<16x16xf32>
    %478 = vector.extract_strided_slice %468 {offsets = [0, 0], sizes = [16, 1], strides = [1, 1]} : vector<16x16xf32> to vector<16x1xf32>
    %c0_i32_94 = arith.constant 0 : i32
    %479 = vector.broadcast %c0_i32_94 : i32 to vector<16x16xi32>
    %480 = arith.cmpi eq, %476, %479 : vector<16x16xi32>
    %481 = arith.extui %480 : vector<16x16xi1> to vector<16x16xi32>
    %482 = arith.sitofp %481 : vector<16x16xi32> to vector<16x16xf32>
    %483 = vector.broadcast %478 : vector<16x1xf32> to vector<16x16xf32>
    %484 = arith.mulf %483, %482 : vector<16x16xf32>
    %485 = arith.addf %477, %484 : vector<16x16xf32>
    %486 = vector.extract_strided_slice %468 {offsets = [0, 1], sizes = [16, 1], strides = [1, 1]} : vector<16x16xf32> to vector<16x1xf32>
    %c1_i32_95 = arith.constant 1 : i32
    %487 = vector.broadcast %c1_i32_95 : i32 to vector<16x16xi32>
    %488 = arith.cmpi eq, %476, %487 : vector<16x16xi32>
    %489 = arith.extui %488 : vector<16x16xi1> to vector<16x16xi32>
    %490 = arith.sitofp %489 : vector<16x16xi32> to vector<16x16xf32>
    %491 = vector.broadcast %486 : vector<16x1xf32> to vector<16x16xf32>
    %492 = arith.mulf %491, %490 : vector<16x16xf32>
    %493 = arith.addf %485, %492 : vector<16x16xf32>
    %494 = vector.extract_strided_slice %468 {offsets = [0, 2], sizes = [16, 1], strides = [1, 1]} : vector<16x16xf32> to vector<16x1xf32>
    %c2_i32_96 = arith.constant 2 : i32
    %495 = vector.broadcast %c2_i32_96 : i32 to vector<16x16xi32>
    %496 = arith.cmpi eq, %476, %495 : vector<16x16xi32>
    %497 = arith.extui %496 : vector<16x16xi1> to vector<16x16xi32>
    %498 = arith.sitofp %497 : vector<16x16xi32> to vector<16x16xf32>
    %499 = vector.broadcast %494 : vector<16x1xf32> to vector<16x16xf32>
    %500 = arith.mulf %499, %498 : vector<16x16xf32>
    %501 = arith.addf %493, %500 : vector<16x16xf32>
    %502 = vector.extract_strided_slice %468 {offsets = [0, 3], sizes = [16, 1], strides = [1, 1]} : vector<16x16xf32> to vector<16x1xf32>
    %c3_i32_97 = arith.constant 3 : i32
    %503 = vector.broadcast %c3_i32_97 : i32 to vector<16x16xi32>
    %504 = arith.cmpi eq, %476, %503 : vector<16x16xi32>
    %505 = arith.extui %504 : vector<16x16xi1> to vector<16x16xi32>
    %506 = arith.sitofp %505 : vector<16x16xi32> to vector<16x16xf32>
    %507 = vector.broadcast %502 : vector<16x1xf32> to vector<16x16xf32>
    %508 = arith.mulf %507, %506 : vector<16x16xf32>
    %509 = arith.addf %501, %508 : vector<16x16xf32>
    %510 = vector.extract_strided_slice %468 {offsets = [0, 4], sizes = [16, 1], strides = [1, 1]} : vector<16x16xf32> to vector<16x1xf32>
    %c4_i32_98 = arith.constant 4 : i32
    %511 = vector.broadcast %c4_i32_98 : i32 to vector<16x16xi32>
    %512 = arith.cmpi eq, %476, %511 : vector<16x16xi32>
    %513 = arith.extui %512 : vector<16x16xi1> to vector<16x16xi32>
    %514 = arith.sitofp %513 : vector<16x16xi32> to vector<16x16xf32>
    %515 = vector.broadcast %510 : vector<16x1xf32> to vector<16x16xf32>
    %516 = arith.mulf %515, %514 : vector<16x16xf32>
    %517 = arith.addf %509, %516 : vector<16x16xf32>
    %518 = vector.extract_strided_slice %468 {offsets = [0, 5], sizes = [16, 1], strides = [1, 1]} : vector<16x16xf32> to vector<16x1xf32>
    %c5_i32_99 = arith.constant 5 : i32
    %519 = vector.broadcast %c5_i32_99 : i32 to vector<16x16xi32>
    %520 = arith.cmpi eq, %476, %519 : vector<16x16xi32>
    %521 = arith.extui %520 : vector<16x16xi1> to vector<16x16xi32>
    %522 = arith.sitofp %521 : vector<16x16xi32> to vector<16x16xf32>
    %523 = vector.broadcast %518 : vector<16x1xf32> to vector<16x16xf32>
    %524 = arith.mulf %523, %522 : vector<16x16xf32>
    %525 = arith.addf %517, %524 : vector<16x16xf32>
    %526 = vector.extract_strided_slice %468 {offsets = [0, 6], sizes = [16, 1], strides = [1, 1]} : vector<16x16xf32> to vector<16x1xf32>
    %c6_i32_100 = arith.constant 6 : i32
    %527 = vector.broadcast %c6_i32_100 : i32 to vector<16x16xi32>
    %528 = arith.cmpi eq, %476, %527 : vector<16x16xi32>
    %529 = arith.extui %528 : vector<16x16xi1> to vector<16x16xi32>
    %530 = arith.sitofp %529 : vector<16x16xi32> to vector<16x16xf32>
    %531 = vector.broadcast %526 : vector<16x1xf32> to vector<16x16xf32>
    %532 = arith.mulf %531, %530 : vector<16x16xf32>
    %533 = arith.addf %525, %532 : vector<16x16xf32>
    %534 = vector.extract_strided_slice %468 {offsets = [0, 7], sizes = [16, 1], strides = [1, 1]} : vector<16x16xf32> to vector<16x1xf32>
    %c7_i32_101 = arith.constant 7 : i32
    %535 = vector.broadcast %c7_i32_101 : i32 to vector<16x16xi32>
    %536 = arith.cmpi eq, %476, %535 : vector<16x16xi32>
    %537 = arith.extui %536 : vector<16x16xi1> to vector<16x16xi32>
    %538 = arith.sitofp %537 : vector<16x16xi32> to vector<16x16xf32>
    %539 = vector.broadcast %534 : vector<16x1xf32> to vector<16x16xf32>
    %540 = arith.mulf %539, %538 : vector<16x16xf32>
    %541 = arith.addf %533, %540 : vector<16x16xf32>
    %542 = vector.extract_strided_slice %468 {offsets = [0, 8], sizes = [16, 1], strides = [1, 1]} : vector<16x16xf32> to vector<16x1xf32>
    %c8_i32_102 = arith.constant 8 : i32
    %543 = vector.broadcast %c8_i32_102 : i32 to vector<16x16xi32>
    %544 = arith.cmpi eq, %476, %543 : vector<16x16xi32>
    %545 = arith.extui %544 : vector<16x16xi1> to vector<16x16xi32>
    %546 = arith.sitofp %545 : vector<16x16xi32> to vector<16x16xf32>
    %547 = vector.broadcast %542 : vector<16x1xf32> to vector<16x16xf32>
    %548 = arith.mulf %547, %546 : vector<16x16xf32>
    %549 = arith.addf %541, %548 : vector<16x16xf32>
    %550 = vector.extract_strided_slice %468 {offsets = [0, 9], sizes = [16, 1], strides = [1, 1]} : vector<16x16xf32> to vector<16x1xf32>
    %c9_i32_103 = arith.constant 9 : i32
    %551 = vector.broadcast %c9_i32_103 : i32 to vector<16x16xi32>
    %552 = arith.cmpi eq, %476, %551 : vector<16x16xi32>
    %553 = arith.extui %552 : vector<16x16xi1> to vector<16x16xi32>
    %554 = arith.sitofp %553 : vector<16x16xi32> to vector<16x16xf32>
    %555 = vector.broadcast %550 : vector<16x1xf32> to vector<16x16xf32>
    %556 = arith.mulf %555, %554 : vector<16x16xf32>
    %557 = arith.addf %549, %556 : vector<16x16xf32>
    %558 = vector.extract_strided_slice %468 {offsets = [0, 10], sizes = [16, 1], strides = [1, 1]} : vector<16x16xf32> to vector<16x1xf32>
    %c10_i32_104 = arith.constant 10 : i32
    %559 = vector.broadcast %c10_i32_104 : i32 to vector<16x16xi32>
    %560 = arith.cmpi eq, %476, %559 : vector<16x16xi32>
    %561 = arith.extui %560 : vector<16x16xi1> to vector<16x16xi32>
    %562 = arith.sitofp %561 : vector<16x16xi32> to vector<16x16xf32>
    %563 = vector.broadcast %558 : vector<16x1xf32> to vector<16x16xf32>
    %564 = arith.mulf %563, %562 : vector<16x16xf32>
    %565 = arith.addf %557, %564 : vector<16x16xf32>
    %566 = vector.extract_strided_slice %468 {offsets = [0, 11], sizes = [16, 1], strides = [1, 1]} : vector<16x16xf32> to vector<16x1xf32>
    %c11_i32_105 = arith.constant 11 : i32
    %567 = vector.broadcast %c11_i32_105 : i32 to vector<16x16xi32>
    %568 = arith.cmpi eq, %476, %567 : vector<16x16xi32>
    %569 = arith.extui %568 : vector<16x16xi1> to vector<16x16xi32>
    %570 = arith.sitofp %569 : vector<16x16xi32> to vector<16x16xf32>
    %571 = vector.broadcast %566 : vector<16x1xf32> to vector<16x16xf32>
    %572 = arith.mulf %571, %570 : vector<16x16xf32>
    %573 = arith.addf %565, %572 : vector<16x16xf32>
    %574 = vector.extract_strided_slice %468 {offsets = [0, 12], sizes = [16, 1], strides = [1, 1]} : vector<16x16xf32> to vector<16x1xf32>
    %c12_i32_106 = arith.constant 12 : i32
    %575 = vector.broadcast %c12_i32_106 : i32 to vector<16x16xi32>
    %576 = arith.cmpi eq, %476, %575 : vector<16x16xi32>
    %577 = arith.extui %576 : vector<16x16xi1> to vector<16x16xi32>
    %578 = arith.sitofp %577 : vector<16x16xi32> to vector<16x16xf32>
    %579 = vector.broadcast %574 : vector<16x1xf32> to vector<16x16xf32>
    %580 = arith.mulf %579, %578 : vector<16x16xf32>
    %581 = arith.addf %573, %580 : vector<16x16xf32>
    %582 = vector.extract_strided_slice %468 {offsets = [0, 13], sizes = [16, 1], strides = [1, 1]} : vector<16x16xf32> to vector<16x1xf32>
    %c13_i32_107 = arith.constant 13 : i32
    %583 = vector.broadcast %c13_i32_107 : i32 to vector<16x16xi32>
    %584 = arith.cmpi eq, %476, %583 : vector<16x16xi32>
    %585 = arith.extui %584 : vector<16x16xi1> to vector<16x16xi32>
    %586 = arith.sitofp %585 : vector<16x16xi32> to vector<16x16xf32>
    %587 = vector.broadcast %582 : vector<16x1xf32> to vector<16x16xf32>
    %588 = arith.mulf %587, %586 : vector<16x16xf32>
    %589 = arith.addf %581, %588 : vector<16x16xf32>
    %590 = vector.extract_strided_slice %468 {offsets = [0, 14], sizes = [16, 1], strides = [1, 1]} : vector<16x16xf32> to vector<16x1xf32>
    %c14_i32_108 = arith.constant 14 : i32
    %591 = vector.broadcast %c14_i32_108 : i32 to vector<16x16xi32>
    %592 = arith.cmpi eq, %476, %591 : vector<16x16xi32>
    %593 = arith.extui %592 : vector<16x16xi1> to vector<16x16xi32>
    %594 = arith.sitofp %593 : vector<16x16xi32> to vector<16x16xf32>
    %595 = vector.broadcast %590 : vector<16x1xf32> to vector<16x16xf32>
    %596 = arith.mulf %595, %594 : vector<16x16xf32>
    %597 = arith.addf %589, %596 : vector<16x16xf32>
    %598 = vector.extract_strided_slice %468 {offsets = [0, 15], sizes = [16, 1], strides = [1, 1]} : vector<16x16xf32> to vector<16x1xf32>
    %c15_i32_109 = arith.constant 15 : i32
    %599 = vector.broadcast %c15_i32_109 : i32 to vector<16x16xi32>
    %600 = arith.cmpi eq, %476, %599 : vector<16x16xi32>
    %601 = arith.extui %600 : vector<16x16xi1> to vector<16x16xi32>
    %602 = arith.sitofp %601 : vector<16x16xi32> to vector<16x16xf32>
    %603 = vector.broadcast %598 : vector<16x1xf32> to vector<16x16xf32>
    %604 = arith.mulf %603, %602 : vector<16x16xf32>
    %605 = arith.addf %597, %604 : vector<16x16xf32>
    %606 = vector.extract_strided_slice %605 {offsets = [1, 0], sizes = [15, 16], strides = [1, 1]} : vector<16x16xf32> to vector<15x16xf32>
    %cst_110 = arith.constant 0.000000e+00 : f32
    %607 = vector.broadcast %cst_110 : f32 to vector<1x16xf32>
    %608 = tpu.concatenate %606, %607 in 0 : vector<15x16xf32>, vector<1x16xf32> -> vector<16x16xf32>
    %609 = arith.cmpi sle, %85, %84 : vector<16x16xi32>
    %cst_111 = arith.constant 0.000000e+00 : f32
    %610 = vector.broadcast %cst_111 : f32 to vector<16x16xf32>
    %611 = arith.select %609, %605, %610 : vector<16x16xi1>, vector<16x16xf32>
    %c2_i32_112 = arith.constant 2 : i32
    %612 = vector.broadcast %c2_i32_112 : i32 to vector<16x16xi32>
    %613 = arith.addi %84, %612 : vector<16x16xi32>
    %614 = arith.cmpi sge, %85, %613 : vector<16x16xi32>
    %cst_113 = arith.constant 0.000000e+00 : f32
    %615 = vector.broadcast %cst_113 : f32 to vector<16x16xf32>
    %616 = arith.select %614, %608, %615 : vector<16x16xi1>, vector<16x16xf32>
    %617 = arith.addf %611, %616 : vector<16x16xf32>
    %618 = arith.addf %463, %617 : vector<16x16xf32>
    %cst_114 = arith.constant dense<0xFF800000> : vector<16xf32>
    %619 = vector.multi_reduction <maximumf>, %618, %cst_114 [1] : vector<16x16xf32> to vector<16xf32>
    %620 = vector.shape_cast %619 : vector<16xf32> to vector<16x1xf32>
    %621 = vector.broadcast %620 : vector<16x1xf32> to vector<16x16xf32>
    %622 = arith.subf %618, %621 : vector<16x16xf32>
    %623 = math.exp %622 : vector<16x16xf32>
    %cst_115 = arith.constant dense<0.000000e+00> : vector<16xf32>
    %624 = vector.multi_reduction <add>, %623, %cst_115 [1] : vector<16x16xf32> to vector<16xf32>
    %625 = vector.shape_cast %624 : vector<16xf32> to vector<16x1xf32>
    %626 = tpu.reciprocal %625 {approx = true} : vector<16x1xf32> -> vector<16x1xf32>
    %627 = vector.broadcast %626 : vector<16x1xf32> to vector<16x16xf32>
    %628 = arith.mulf %623, %627 : vector<16x16xf32>
    %629 = arith.truncf %628 : vector<16x16xf32> to vector<16x16xbf16>
    %630 = arith.truncf %455 : vector<16x32xf32> to vector<16x32xbf16>
    %cst_116 = arith.constant dense<0.000000e+00> : vector<16x32xf32>
    %631 = tpu.matmul %629, %630, %cst_116 {dimension_numbers = #tpu.dot_dimension_numbers<[1], [0], [0], [1], [0, 0, 1, 1], [], []>} : vector<16x16xbf16>, vector<16x32xbf16>, vector<16x32xf32> -> vector<16x32xf32>
    %632 = vector.extract_strided_slice %81 {offsets = [64, 0], sizes = [32, 128], strides = [1, 1]} : vector<128x128xbf16> to vector<32x128xbf16>
    %633 = arith.truncf %631 : vector<16x32xf32> to vector<16x32xbf16>
    %cst_117 = arith.constant dense<0.000000e+00> : vector<16x128xf32>
    %634 = tpu.matmul %633, %632, %cst_117 {dimension_numbers = #tpu.dot_dimension_numbers<[1], [0], [0], [1], [0, 0, 1, 1], [], []>} : vector<16x32xbf16>, vector<32x128xbf16>, vector<16x128xf32> -> vector<16x128xf32>
    %635 = arith.addf %452, %634 : vector<16x128xf32>
    %636 = vector.extract_strided_slice %77 {offsets = [0, 96], sizes = [16, 32], strides = [1, 1]} : vector<16x128xf32> to vector<16x32xf32>
    %637 = vector.extract_strided_slice %78 {offsets = [0, 96], sizes = [16, 32], strides = [1, 1]} : vector<16x128xf32> to vector<16x32xf32>
    %638 = vector.extract_strided_slice %79 {offsets = [0, 96], sizes = [16, 32], strides = [1, 1]} : vector<16x128xf32> to vector<16x32xf32>
    %639 = vector.extract_strided_slice %80 {offsets = [0, 96], sizes = [16, 32], strides = [1, 1]} : vector<16x128xf32> to vector<16x32xf32>
    %640 = vector.extract_strided_slice %82 {offsets = [3, 0], sizes = [1, 32], strides = [1, 1]} : vector<4x32xf32> to vector<1x32xf32>
    %641 = vector.extract_strided_slice %83 {offsets = [3, 0], sizes = [1, 32], strides = [1, 1]} : vector<4x32xf32> to vector<1x32xf32>
    %642 = vector.broadcast %640 : vector<1x32xf32> to vector<16x32xf32>
    %643 = arith.addf %636, %642 : vector<16x32xf32>
    %644 = arith.truncf %643 : vector<16x32xf32> to vector<16x32xbf16>
    %645 = arith.truncf %637 : vector<16x32xf32> to vector<16x32xbf16>
    %cst_118 = arith.constant dense<0.000000e+00> : vector<16x16xf32>
    %646 = tpu.matmul %644, %645, %cst_118 {dimension_numbers = #tpu.dot_dimension_numbers<[1], [1], [0], [0], [0, 0, 1, 0], [], []>} : vector<16x32xbf16>, vector<16x32xbf16>, vector<16x16xf32> -> vector<16x16xf32>
    %647 = vector.broadcast %641 : vector<1x32xf32> to vector<16x32xf32>
    %648 = arith.addf %636, %647 : vector<16x32xf32>
    %649 = arith.truncf %648 : vector<16x32xf32> to vector<16x32xbf16>
    %650 = arith.truncf %639 : vector<16x32xf32> to vector<16x32xbf16>
    %cst_119 = arith.constant dense<0.000000e+00> : vector<16x16xf32>
    %651 = tpu.matmul %649, %650, %cst_119 {dimension_numbers = #tpu.dot_dimension_numbers<[1], [1], [0], [0], [0, 0, 1, 0], [], []>} : vector<16x32xbf16>, vector<16x32xbf16>, vector<16x16xf32> -> vector<16x16xf32>
    %652 = arith.subi %85, %84 : vector<16x16xi32>
    %c1_i32_120 = arith.constant 1 : i32
    %653 = vector.broadcast %c1_i32_120 : i32 to vector<16x16xi32>
    %654 = arith.subi %652, %653 : vector<16x16xi32>
    %c0_i32_121 = arith.constant 0 : i32
    %655 = vector.broadcast %c0_i32_121 : i32 to vector<16x16xi32>
    %656 = arith.cmpi slt, %654, %655 : vector<16x16xi32>
    %c16_i32_122 = arith.constant 16 : i32
    %657 = vector.broadcast %c16_i32_122 : i32 to vector<16x16xi32>
    %658 = arith.addi %654, %657 : vector<16x16xi32>
    %659 = arith.select %656, %658, %654 : vector<16x16xi1>, vector<16x16xi32>
    %cst_123 = arith.constant 0.000000e+00 : f32
    %660 = vector.broadcast %cst_123 : f32 to vector<16x16xf32>
    %661 = vector.extract_strided_slice %651 {offsets = [0, 0], sizes = [16, 1], strides = [1, 1]} : vector<16x16xf32> to vector<16x1xf32>
    %c0_i32_124 = arith.constant 0 : i32
    %662 = vector.broadcast %c0_i32_124 : i32 to vector<16x16xi32>
    %663 = arith.cmpi eq, %659, %662 : vector<16x16xi32>
    %664 = arith.extui %663 : vector<16x16xi1> to vector<16x16xi32>
    %665 = arith.sitofp %664 : vector<16x16xi32> to vector<16x16xf32>
    %666 = vector.broadcast %661 : vector<16x1xf32> to vector<16x16xf32>
    %667 = arith.mulf %666, %665 : vector<16x16xf32>
    %668 = arith.addf %660, %667 : vector<16x16xf32>
    %669 = vector.extract_strided_slice %651 {offsets = [0, 1], sizes = [16, 1], strides = [1, 1]} : vector<16x16xf32> to vector<16x1xf32>
    %c1_i32_125 = arith.constant 1 : i32
    %670 = vector.broadcast %c1_i32_125 : i32 to vector<16x16xi32>
    %671 = arith.cmpi eq, %659, %670 : vector<16x16xi32>
    %672 = arith.extui %671 : vector<16x16xi1> to vector<16x16xi32>
    %673 = arith.sitofp %672 : vector<16x16xi32> to vector<16x16xf32>
    %674 = vector.broadcast %669 : vector<16x1xf32> to vector<16x16xf32>
    %675 = arith.mulf %674, %673 : vector<16x16xf32>
    %676 = arith.addf %668, %675 : vector<16x16xf32>
    %677 = vector.extract_strided_slice %651 {offsets = [0, 2], sizes = [16, 1], strides = [1, 1]} : vector<16x16xf32> to vector<16x1xf32>
    %c2_i32_126 = arith.constant 2 : i32
    %678 = vector.broadcast %c2_i32_126 : i32 to vector<16x16xi32>
    %679 = arith.cmpi eq, %659, %678 : vector<16x16xi32>
    %680 = arith.extui %679 : vector<16x16xi1> to vector<16x16xi32>
    %681 = arith.sitofp %680 : vector<16x16xi32> to vector<16x16xf32>
    %682 = vector.broadcast %677 : vector<16x1xf32> to vector<16x16xf32>
    %683 = arith.mulf %682, %681 : vector<16x16xf32>
    %684 = arith.addf %676, %683 : vector<16x16xf32>
    %685 = vector.extract_strided_slice %651 {offsets = [0, 3], sizes = [16, 1], strides = [1, 1]} : vector<16x16xf32> to vector<16x1xf32>
    %c3_i32_127 = arith.constant 3 : i32
    %686 = vector.broadcast %c3_i32_127 : i32 to vector<16x16xi32>
    %687 = arith.cmpi eq, %659, %686 : vector<16x16xi32>
    %688 = arith.extui %687 : vector<16x16xi1> to vector<16x16xi32>
    %689 = arith.sitofp %688 : vector<16x16xi32> to vector<16x16xf32>
    %690 = vector.broadcast %685 : vector<16x1xf32> to vector<16x16xf32>
    %691 = arith.mulf %690, %689 : vector<16x16xf32>
    %692 = arith.addf %684, %691 : vector<16x16xf32>
    %693 = vector.extract_strided_slice %651 {offsets = [0, 4], sizes = [16, 1], strides = [1, 1]} : vector<16x16xf32> to vector<16x1xf32>
    %c4_i32_128 = arith.constant 4 : i32
    %694 = vector.broadcast %c4_i32_128 : i32 to vector<16x16xi32>
    %695 = arith.cmpi eq, %659, %694 : vector<16x16xi32>
    %696 = arith.extui %695 : vector<16x16xi1> to vector<16x16xi32>
    %697 = arith.sitofp %696 : vector<16x16xi32> to vector<16x16xf32>
    %698 = vector.broadcast %693 : vector<16x1xf32> to vector<16x16xf32>
    %699 = arith.mulf %698, %697 : vector<16x16xf32>
    %700 = arith.addf %692, %699 : vector<16x16xf32>
    %701 = vector.extract_strided_slice %651 {offsets = [0, 5], sizes = [16, 1], strides = [1, 1]} : vector<16x16xf32> to vector<16x1xf32>
    %c5_i32_129 = arith.constant 5 : i32
    %702 = vector.broadcast %c5_i32_129 : i32 to vector<16x16xi32>
    %703 = arith.cmpi eq, %659, %702 : vector<16x16xi32>
    %704 = arith.extui %703 : vector<16x16xi1> to vector<16x16xi32>
    %705 = arith.sitofp %704 : vector<16x16xi32> to vector<16x16xf32>
    %706 = vector.broadcast %701 : vector<16x1xf32> to vector<16x16xf32>
    %707 = arith.mulf %706, %705 : vector<16x16xf32>
    %708 = arith.addf %700, %707 : vector<16x16xf32>
    %709 = vector.extract_strided_slice %651 {offsets = [0, 6], sizes = [16, 1], strides = [1, 1]} : vector<16x16xf32> to vector<16x1xf32>
    %c6_i32_130 = arith.constant 6 : i32
    %710 = vector.broadcast %c6_i32_130 : i32 to vector<16x16xi32>
    %711 = arith.cmpi eq, %659, %710 : vector<16x16xi32>
    %712 = arith.extui %711 : vector<16x16xi1> to vector<16x16xi32>
    %713 = arith.sitofp %712 : vector<16x16xi32> to vector<16x16xf32>
    %714 = vector.broadcast %709 : vector<16x1xf32> to vector<16x16xf32>
    %715 = arith.mulf %714, %713 : vector<16x16xf32>
    %716 = arith.addf %708, %715 : vector<16x16xf32>
    %717 = vector.extract_strided_slice %651 {offsets = [0, 7], sizes = [16, 1], strides = [1, 1]} : vector<16x16xf32> to vector<16x1xf32>
    %c7_i32_131 = arith.constant 7 : i32
    %718 = vector.broadcast %c7_i32_131 : i32 to vector<16x16xi32>
    %719 = arith.cmpi eq, %659, %718 : vector<16x16xi32>
    %720 = arith.extui %719 : vector<16x16xi1> to vector<16x16xi32>
    %721 = arith.sitofp %720 : vector<16x16xi32> to vector<16x16xf32>
    %722 = vector.broadcast %717 : vector<16x1xf32> to vector<16x16xf32>
    %723 = arith.mulf %722, %721 : vector<16x16xf32>
    %724 = arith.addf %716, %723 : vector<16x16xf32>
    %725 = vector.extract_strided_slice %651 {offsets = [0, 8], sizes = [16, 1], strides = [1, 1]} : vector<16x16xf32> to vector<16x1xf32>
    %c8_i32_132 = arith.constant 8 : i32
    %726 = vector.broadcast %c8_i32_132 : i32 to vector<16x16xi32>
    %727 = arith.cmpi eq, %659, %726 : vector<16x16xi32>
    %728 = arith.extui %727 : vector<16x16xi1> to vector<16x16xi32>
    %729 = arith.sitofp %728 : vector<16x16xi32> to vector<16x16xf32>
    %730 = vector.broadcast %725 : vector<16x1xf32> to vector<16x16xf32>
    %731 = arith.mulf %730, %729 : vector<16x16xf32>
    %732 = arith.addf %724, %731 : vector<16x16xf32>
    %733 = vector.extract_strided_slice %651 {offsets = [0, 9], sizes = [16, 1], strides = [1, 1]} : vector<16x16xf32> to vector<16x1xf32>
    %c9_i32_133 = arith.constant 9 : i32
    %734 = vector.broadcast %c9_i32_133 : i32 to vector<16x16xi32>
    %735 = arith.cmpi eq, %659, %734 : vector<16x16xi32>
    %736 = arith.extui %735 : vector<16x16xi1> to vector<16x16xi32>
    %737 = arith.sitofp %736 : vector<16x16xi32> to vector<16x16xf32>
    %738 = vector.broadcast %733 : vector<16x1xf32> to vector<16x16xf32>
    %739 = arith.mulf %738, %737 : vector<16x16xf32>
    %740 = arith.addf %732, %739 : vector<16x16xf32>
    %741 = vector.extract_strided_slice %651 {offsets = [0, 10], sizes = [16, 1], strides = [1, 1]} : vector<16x16xf32> to vector<16x1xf32>
    %c10_i32_134 = arith.constant 10 : i32
    %742 = vector.broadcast %c10_i32_134 : i32 to vector<16x16xi32>
    %743 = arith.cmpi eq, %659, %742 : vector<16x16xi32>
    %744 = arith.extui %743 : vector<16x16xi1> to vector<16x16xi32>
    %745 = arith.sitofp %744 : vector<16x16xi32> to vector<16x16xf32>
    %746 = vector.broadcast %741 : vector<16x1xf32> to vector<16x16xf32>
    %747 = arith.mulf %746, %745 : vector<16x16xf32>
    %748 = arith.addf %740, %747 : vector<16x16xf32>
    %749 = vector.extract_strided_slice %651 {offsets = [0, 11], sizes = [16, 1], strides = [1, 1]} : vector<16x16xf32> to vector<16x1xf32>
    %c11_i32_135 = arith.constant 11 : i32
    %750 = vector.broadcast %c11_i32_135 : i32 to vector<16x16xi32>
    %751 = arith.cmpi eq, %659, %750 : vector<16x16xi32>
    %752 = arith.extui %751 : vector<16x16xi1> to vector<16x16xi32>
    %753 = arith.sitofp %752 : vector<16x16xi32> to vector<16x16xf32>
    %754 = vector.broadcast %749 : vector<16x1xf32> to vector<16x16xf32>
    %755 = arith.mulf %754, %753 : vector<16x16xf32>
    %756 = arith.addf %748, %755 : vector<16x16xf32>
    %757 = vector.extract_strided_slice %651 {offsets = [0, 12], sizes = [16, 1], strides = [1, 1]} : vector<16x16xf32> to vector<16x1xf32>
    %c12_i32_136 = arith.constant 12 : i32
    %758 = vector.broadcast %c12_i32_136 : i32 to vector<16x16xi32>
    %759 = arith.cmpi eq, %659, %758 : vector<16x16xi32>
    %760 = arith.extui %759 : vector<16x16xi1> to vector<16x16xi32>
    %761 = arith.sitofp %760 : vector<16x16xi32> to vector<16x16xf32>
    %762 = vector.broadcast %757 : vector<16x1xf32> to vector<16x16xf32>
    %763 = arith.mulf %762, %761 : vector<16x16xf32>
    %764 = arith.addf %756, %763 : vector<16x16xf32>
    %765 = vector.extract_strided_slice %651 {offsets = [0, 13], sizes = [16, 1], strides = [1, 1]} : vector<16x16xf32> to vector<16x1xf32>
    %c13_i32_137 = arith.constant 13 : i32
    %766 = vector.broadcast %c13_i32_137 : i32 to vector<16x16xi32>
    %767 = arith.cmpi eq, %659, %766 : vector<16x16xi32>
    %768 = arith.extui %767 : vector<16x16xi1> to vector<16x16xi32>
    %769 = arith.sitofp %768 : vector<16x16xi32> to vector<16x16xf32>
    %770 = vector.broadcast %765 : vector<16x1xf32> to vector<16x16xf32>
    %771 = arith.mulf %770, %769 : vector<16x16xf32>
    %772 = arith.addf %764, %771 : vector<16x16xf32>
    %773 = vector.extract_strided_slice %651 {offsets = [0, 14], sizes = [16, 1], strides = [1, 1]} : vector<16x16xf32> to vector<16x1xf32>
    %c14_i32_138 = arith.constant 14 : i32
    %774 = vector.broadcast %c14_i32_138 : i32 to vector<16x16xi32>
    %775 = arith.cmpi eq, %659, %774 : vector<16x16xi32>
    %776 = arith.extui %775 : vector<16x16xi1> to vector<16x16xi32>
    %777 = arith.sitofp %776 : vector<16x16xi32> to vector<16x16xf32>
    %778 = vector.broadcast %773 : vector<16x1xf32> to vector<16x16xf32>
    %779 = arith.mulf %778, %777 : vector<16x16xf32>
    %780 = arith.addf %772, %779 : vector<16x16xf32>
    %781 = vector.extract_strided_slice %651 {offsets = [0, 15], sizes = [16, 1], strides = [1, 1]} : vector<16x16xf32> to vector<16x1xf32>
    %c15_i32_139 = arith.constant 15 : i32
    %782 = vector.broadcast %c15_i32_139 : i32 to vector<16x16xi32>
    %783 = arith.cmpi eq, %659, %782 : vector<16x16xi32>
    %784 = arith.extui %783 : vector<16x16xi1> to vector<16x16xi32>
    %785 = arith.sitofp %784 : vector<16x16xi32> to vector<16x16xf32>
    %786 = vector.broadcast %781 : vector<16x1xf32> to vector<16x16xf32>
    %787 = arith.mulf %786, %785 : vector<16x16xf32>
    %788 = arith.addf %780, %787 : vector<16x16xf32>
    %789 = vector.extract_strided_slice %788 {offsets = [1, 0], sizes = [15, 16], strides = [1, 1]} : vector<16x16xf32> to vector<15x16xf32>
    %cst_140 = arith.constant 0.000000e+00 : f32
    %790 = vector.broadcast %cst_140 : f32 to vector<1x16xf32>
    %791 = tpu.concatenate %789, %790 in 0 : vector<15x16xf32>, vector<1x16xf32> -> vector<16x16xf32>
    %792 = arith.cmpi sle, %85, %84 : vector<16x16xi32>
    %cst_141 = arith.constant 0.000000e+00 : f32
    %793 = vector.broadcast %cst_141 : f32 to vector<16x16xf32>
    %794 = arith.select %792, %788, %793 : vector<16x16xi1>, vector<16x16xf32>
    %c2_i32_142 = arith.constant 2 : i32
    %795 = vector.broadcast %c2_i32_142 : i32 to vector<16x16xi32>
    %796 = arith.addi %84, %795 : vector<16x16xi32>
    %797 = arith.cmpi sge, %85, %796 : vector<16x16xi32>
    %cst_143 = arith.constant 0.000000e+00 : f32
    %798 = vector.broadcast %cst_143 : f32 to vector<16x16xf32>
    %799 = arith.select %797, %791, %798 : vector<16x16xi1>, vector<16x16xf32>
    %800 = arith.addf %794, %799 : vector<16x16xf32>
    %801 = arith.addf %646, %800 : vector<16x16xf32>
    %cst_144 = arith.constant dense<0xFF800000> : vector<16xf32>
    %802 = vector.multi_reduction <maximumf>, %801, %cst_144 [1] : vector<16x16xf32> to vector<16xf32>
    %803 = vector.shape_cast %802 : vector<16xf32> to vector<16x1xf32>
    %804 = vector.broadcast %803 : vector<16x1xf32> to vector<16x16xf32>
    %805 = arith.subf %801, %804 : vector<16x16xf32>
    %806 = math.exp %805 : vector<16x16xf32>
    %cst_145 = arith.constant dense<0.000000e+00> : vector<16xf32>
    %807 = vector.multi_reduction <add>, %806, %cst_145 [1] : vector<16x16xf32> to vector<16xf32>
    %808 = vector.shape_cast %807 : vector<16xf32> to vector<16x1xf32>
    %809 = tpu.reciprocal %808 {approx = true} : vector<16x1xf32> -> vector<16x1xf32>
    %810 = vector.broadcast %809 : vector<16x1xf32> to vector<16x16xf32>
    %811 = arith.mulf %806, %810 : vector<16x16xf32>
    %812 = arith.truncf %811 : vector<16x16xf32> to vector<16x16xbf16>
    %813 = arith.truncf %638 : vector<16x32xf32> to vector<16x32xbf16>
    %cst_146 = arith.constant dense<0.000000e+00> : vector<16x32xf32>
    %814 = tpu.matmul %812, %813, %cst_146 {dimension_numbers = #tpu.dot_dimension_numbers<[1], [0], [0], [1], [0, 0, 1, 1], [], []>} : vector<16x16xbf16>, vector<16x32xbf16>, vector<16x32xf32> -> vector<16x32xf32>
    %815 = vector.extract_strided_slice %81 {offsets = [96, 0], sizes = [32, 128], strides = [1, 1]} : vector<128x128xbf16> to vector<32x128xbf16>
    %816 = arith.truncf %814 : vector<16x32xf32> to vector<16x32xbf16>
    %cst_147 = arith.constant dense<0.000000e+00> : vector<16x128xf32>
    %817 = tpu.matmul %816, %815, %cst_147 {dimension_numbers = #tpu.dot_dimension_numbers<[1], [0], [0], [1], [0, 0, 1, 1], [], []>} : vector<16x32xbf16>, vector<32x128xbf16>, vector<16x128xf32> -> vector<16x128xf32>
    %818 = arith.addf %635, %817 : vector<16x128xf32>
    %819 = arith.addf %46, %818 : vector<16x128xf32>
    %c0_148 = arith.constant 0 : index
    %c0_149 = arith.constant 0 : index
    %820 = vector.load %arg14[%c0_148, %c0_149] : memref<1x128xf32, #tpu.memory_space<vmem>>, vector<1x128xf32>
    %821 = vector.broadcast %820 : vector<1x128xf32> to vector<16x128xf32>
    %822 = arith.addf %819, %821 : vector<16x128xf32>
    %c0_150 = arith.constant 0 : index
    %c0_151 = arith.constant 0 : index
    %823 = vector.load %arg17[%c0_150, %c0_151] : memref<1x128xf32, #tpu.memory_space<vmem>>, vector<1x128xf32>
    %c0_152 = arith.constant 0 : index
    %c0_153 = arith.constant 0 : index
    %824 = vector.load %arg18[%c0_152, %c0_153] : memref<1x128xf32, #tpu.memory_space<vmem>>, vector<1x128xf32>
    %cst_154 = arith.constant dense<0.000000e+00> : vector<16xf32>
    %825 = vector.multi_reduction <add>, %822, %cst_154 [1] : vector<16x128xf32> to vector<16xf32>
    %826 = vector.shape_cast %825 : vector<16xf32> to vector<16x1xf32>
    %cst_155 = arith.constant 1.280000e+02 : f32
    %827 = vector.broadcast %cst_155 : f32 to vector<16x1xf32>
    %828 = arith.divf %826, %827 : vector<16x1xf32>
    %829 = vector.broadcast %828 : vector<16x1xf32> to vector<16x128xf32>
    %830 = arith.subf %822, %829 : vector<16x128xf32>
    %831 = arith.mulf %830, %830 : vector<16x128xf32>
    %cst_156 = arith.constant dense<0.000000e+00> : vector<16xf32>
    %832 = vector.multi_reduction <add>, %831, %cst_156 [1] : vector<16x128xf32> to vector<16xf32>
    %833 = vector.shape_cast %832 : vector<16xf32> to vector<16x1xf32>
    %cst_157 = arith.constant 1.280000e+02 : f32
    %834 = vector.broadcast %cst_157 : f32 to vector<16x1xf32>
    %835 = arith.divf %833, %834 : vector<16x1xf32>
    %836 = vector.broadcast %828 : vector<16x1xf32> to vector<16x128xf32>
    %837 = arith.subf %822, %836 : vector<16x128xf32>
    %cst_158 = arith.constant 9.99999974E-6 : f32
    %838 = vector.broadcast %cst_158 : f32 to vector<16x1xf32>
    %839 = arith.addf %835, %838 : vector<16x1xf32>
    %840 = math.rsqrt %839 : vector<16x1xf32>
    %841 = vector.broadcast %840 : vector<16x1xf32> to vector<16x128xf32>
    %842 = arith.mulf %837, %841 : vector<16x128xf32>
    %843 = vector.broadcast %823 : vector<1x128xf32> to vector<16x128xf32>
    %844 = arith.mulf %842, %843 : vector<16x128xf32>
    %845 = vector.broadcast %824 : vector<1x128xf32> to vector<16x128xf32>
    %846 = arith.addf %844, %845 : vector<16x128xf32>
    %c0_159 = arith.constant 0 : index
    %c0_160 = arith.constant 0 : index
    %847 = vector.load %arg19[%c0_159, %c0_160] : memref<128x256xbf16, #tpu.memory_space<vmem>>, vector<128x256xbf16>
    %848 = arith.truncf %846 : vector<16x128xf32> to vector<16x128xbf16>
    %cst_161 = arith.constant dense<0.000000e+00> : vector<16x256xf32>
    %849 = tpu.matmul %848, %847, %cst_161 {dimension_numbers = #tpu.dot_dimension_numbers<[1], [0], [0], [1], [0, 0, 1, 1], [], []>} : vector<16x128xbf16>, vector<128x256xbf16>, vector<16x256xf32> -> vector<16x256xf32>
    %c0_162 = arith.constant 0 : index
    %c0_163 = arith.constant 0 : index
    %850 = vector.load %arg20[%c0_162, %c0_163] : memref<1x256xf32, #tpu.memory_space<vmem>>, vector<1x256xf32>
    %851 = vector.broadcast %850 : vector<1x256xf32> to vector<16x256xf32>
    %852 = arith.addf %849, %851 : vector<16x256xf32>
    %853 = vector.extract_strided_slice %852 {offsets = [0, 0], sizes = [16, 128], strides = [1, 1]} : vector<16x256xf32> to vector<16x128xf32>
    %854 = vector.extract_strided_slice %852 {offsets = [0, 128], sizes = [16, 128], strides = [1, 1]} : vector<16x256xf32> to vector<16x128xf32>
    %855 = arith.negf %854 : vector<16x128xf32>
    %856 = math.exp %855 : vector<16x128xf32>
    %cst_164 = arith.constant 1.000000e+00 : f32
    %857 = vector.broadcast %cst_164 : f32 to vector<16x128xf32>
    %858 = arith.addf %857, %856 : vector<16x128xf32>
    %859 = arith.divf %857, %858 : vector<16x128xf32>
    %860 = arith.mulf %853, %859 : vector<16x128xf32>
    %c0_165 = arith.constant 0 : index
    %c0_166 = arith.constant 0 : index
    %861 = vector.load %arg21[%c0_165, %c0_166] : memref<7x128xf32, #tpu.memory_space<vmem>>, vector<7x128xf32>
    %862 = tpu.iota {dimensions = array<i32: 1>} : vector<1x16x1xi32>
    %863 = vector.shape_cast %862 : vector<1x16x1xi32> to vector<16x1xi32>
    %cst_167 = arith.constant 0.000000e+00 : f32
    %864 = vector.broadcast %cst_167 : f32 to vector<16x128xf32>
    %c-3_i32 = arith.constant -3 : i32
    %865 = vector.broadcast %c-3_i32 : i32 to vector<16x1xi32>
    %866 = arith.addi %863, %865 : vector<16x1xi32>
    %c0_i32_168 = arith.constant 0 : i32
    %867 = vector.broadcast %c0_i32_168 : i32 to vector<16x1xi32>
    %868 = arith.cmpi sge, %866, %867 : vector<16x1xi32>
    %c-3_i32_169 = arith.constant -3 : i32
    %869 = vector.broadcast %c-3_i32_169 : i32 to vector<16x1xi32>
    %870 = arith.addi %863, %869 : vector<16x1xi32>
    %c16_i32_170 = arith.constant 16 : i32
    %871 = vector.broadcast %c16_i32_170 : i32 to vector<16x1xi32>
    %872 = arith.cmpi slt, %870, %871 : vector<16x1xi32>
    %873 = arith.andi %868, %872 : vector<16x1xi1>
    %cst_171 = arith.constant 0.000000e+00 : f32
    %874 = vector.broadcast %cst_171 : f32 to vector<3x128xf32>
    %875 = vector.extract_strided_slice %860 {offsets = [0, 0], sizes = [13, 128], strides = [1, 1]} : vector<16x128xf32> to vector<13x128xf32>
    %876 = tpu.concatenate %874, %875 in 0 : vector<3x128xf32>, vector<13x128xf32> -> vector<16x128xf32>
    %cst_172 = arith.constant 0.000000e+00 : f32
    %877 = vector.shape_cast %873 : vector<16x1xi1> to vector<16x1xi1>
    %878 = vector.broadcast %877 : vector<16x1xi1> to vector<16x128xi1>
    %879 = vector.broadcast %cst_172 : f32 to vector<16x128xf32>
    %880 = arith.select %878, %876, %879 : vector<16x128xi1>, vector<16x128xf32>
    %881 = vector.extract_strided_slice %861 {offsets = [0, 0], sizes = [1, 128], strides = [1, 1]} : vector<7x128xf32> to vector<1x128xf32>
    %882 = vector.broadcast %881 : vector<1x128xf32> to vector<16x128xf32>
    %883 = arith.mulf %880, %882 : vector<16x128xf32>
    %884 = arith.addf %864, %883 : vector<16x128xf32>
    %c-2_i32 = arith.constant -2 : i32
    %885 = vector.broadcast %c-2_i32 : i32 to vector<16x1xi32>
    %886 = arith.addi %863, %885 : vector<16x1xi32>
    %c0_i32_173 = arith.constant 0 : i32
    %887 = vector.broadcast %c0_i32_173 : i32 to vector<16x1xi32>
    %888 = arith.cmpi sge, %886, %887 : vector<16x1xi32>
    %c-2_i32_174 = arith.constant -2 : i32
    %889 = vector.broadcast %c-2_i32_174 : i32 to vector<16x1xi32>
    %890 = arith.addi %863, %889 : vector<16x1xi32>
    %c16_i32_175 = arith.constant 16 : i32
    %891 = vector.broadcast %c16_i32_175 : i32 to vector<16x1xi32>
    %892 = arith.cmpi slt, %890, %891 : vector<16x1xi32>
    %893 = arith.andi %888, %892 : vector<16x1xi1>
    %cst_176 = arith.constant 0.000000e+00 : f32
    %894 = vector.broadcast %cst_176 : f32 to vector<2x128xf32>
    %895 = vector.extract_strided_slice %860 {offsets = [0, 0], sizes = [14, 128], strides = [1, 1]} : vector<16x128xf32> to vector<14x128xf32>
    %896 = tpu.concatenate %894, %895 in 0 : vector<2x128xf32>, vector<14x128xf32> -> vector<16x128xf32>
    %cst_177 = arith.constant 0.000000e+00 : f32
    %897 = vector.shape_cast %893 : vector<16x1xi1> to vector<16x1xi1>
    %898 = vector.broadcast %897 : vector<16x1xi1> to vector<16x128xi1>
    %899 = vector.broadcast %cst_177 : f32 to vector<16x128xf32>
    %900 = arith.select %898, %896, %899 : vector<16x128xi1>, vector<16x128xf32>
    %901 = vector.extract_strided_slice %861 {offsets = [1, 0], sizes = [1, 128], strides = [1, 1]} : vector<7x128xf32> to vector<1x128xf32>
    %902 = vector.broadcast %901 : vector<1x128xf32> to vector<16x128xf32>
    %903 = arith.mulf %900, %902 : vector<16x128xf32>
    %904 = arith.addf %884, %903 : vector<16x128xf32>
    %c-1_i32 = arith.constant -1 : i32
    %905 = vector.broadcast %c-1_i32 : i32 to vector<16x1xi32>
    %906 = arith.addi %863, %905 : vector<16x1xi32>
    %c0_i32_178 = arith.constant 0 : i32
    %907 = vector.broadcast %c0_i32_178 : i32 to vector<16x1xi32>
    %908 = arith.cmpi sge, %906, %907 : vector<16x1xi32>
    %c-1_i32_179 = arith.constant -1 : i32
    %909 = vector.broadcast %c-1_i32_179 : i32 to vector<16x1xi32>
    %910 = arith.addi %863, %909 : vector<16x1xi32>
    %c16_i32_180 = arith.constant 16 : i32
    %911 = vector.broadcast %c16_i32_180 : i32 to vector<16x1xi32>
    %912 = arith.cmpi slt, %910, %911 : vector<16x1xi32>
    %913 = arith.andi %908, %912 : vector<16x1xi1>
    %cst_181 = arith.constant 0.000000e+00 : f32
    %914 = vector.broadcast %cst_181 : f32 to vector<1x128xf32>
    %915 = vector.extract_strided_slice %860 {offsets = [0, 0], sizes = [15, 128], strides = [1, 1]} : vector<16x128xf32> to vector<15x128xf32>
    %916 = tpu.concatenate %914, %915 in 0 : vector<1x128xf32>, vector<15x128xf32> -> vector<16x128xf32>
    %cst_182 = arith.constant 0.000000e+00 : f32
    %917 = vector.shape_cast %913 : vector<16x1xi1> to vector<16x1xi1>
    %918 = vector.broadcast %917 : vector<16x1xi1> to vector<16x128xi1>
    %919 = vector.broadcast %cst_182 : f32 to vector<16x128xf32>
    %920 = arith.select %918, %916, %919 : vector<16x128xi1>, vector<16x128xf32>
    %921 = vector.extract_strided_slice %861 {offsets = [2, 0], sizes = [1, 128], strides = [1, 1]} : vector<7x128xf32> to vector<1x128xf32>
    %922 = vector.broadcast %921 : vector<1x128xf32> to vector<16x128xf32>
    %923 = arith.mulf %920, %922 : vector<16x128xf32>
    %924 = arith.addf %904, %923 : vector<16x128xf32>
    %c0_i32_183 = arith.constant 0 : i32
    %925 = vector.broadcast %c0_i32_183 : i32 to vector<16x1xi32>
    %926 = arith.addi %863, %925 : vector<16x1xi32>
    %c0_i32_184 = arith.constant 0 : i32
    %927 = vector.broadcast %c0_i32_184 : i32 to vector<16x1xi32>
    %928 = arith.cmpi sge, %926, %927 : vector<16x1xi32>
    %c0_i32_185 = arith.constant 0 : i32
    %929 = vector.broadcast %c0_i32_185 : i32 to vector<16x1xi32>
    %930 = arith.addi %863, %929 : vector<16x1xi32>
    %c16_i32_186 = arith.constant 16 : i32
    %931 = vector.broadcast %c16_i32_186 : i32 to vector<16x1xi32>
    %932 = arith.cmpi slt, %930, %931 : vector<16x1xi32>
    %933 = arith.andi %928, %932 : vector<16x1xi1>
    %cst_187 = arith.constant 0.000000e+00 : f32
    %934 = vector.shape_cast %933 : vector<16x1xi1> to vector<16x1xi1>
    %935 = vector.broadcast %934 : vector<16x1xi1> to vector<16x128xi1>
    %936 = vector.broadcast %cst_187 : f32 to vector<16x128xf32>
    %937 = arith.select %935, %860, %936 : vector<16x128xi1>, vector<16x128xf32>
    %938 = vector.extract_strided_slice %861 {offsets = [3, 0], sizes = [1, 128], strides = [1, 1]} : vector<7x128xf32> to vector<1x128xf32>
    %939 = vector.broadcast %938 : vector<1x128xf32> to vector<16x128xf32>
    %940 = arith.mulf %937, %939 : vector<16x128xf32>
    %941 = arith.addf %924, %940 : vector<16x128xf32>
    %c1_i32_188 = arith.constant 1 : i32
    %942 = vector.broadcast %c1_i32_188 : i32 to vector<16x1xi32>
    %943 = arith.addi %863, %942 : vector<16x1xi32>
    %c0_i32_189 = arith.constant 0 : i32
    %944 = vector.broadcast %c0_i32_189 : i32 to vector<16x1xi32>
    %945 = arith.cmpi sge, %943, %944 : vector<16x1xi32>
    %c1_i32_190 = arith.constant 1 : i32
    %946 = vector.broadcast %c1_i32_190 : i32 to vector<16x1xi32>
    %947 = arith.addi %863, %946 : vector<16x1xi32>
    %c16_i32_191 = arith.constant 16 : i32
    %948 = vector.broadcast %c16_i32_191 : i32 to vector<16x1xi32>
    %949 = arith.cmpi slt, %947, %948 : vector<16x1xi32>
    %950 = arith.andi %945, %949 : vector<16x1xi1>
    %951 = vector.extract_strided_slice %860 {offsets = [1, 0], sizes = [15, 128], strides = [1, 1]} : vector<16x128xf32> to vector<15x128xf32>
    %cst_192 = arith.constant 0.000000e+00 : f32
    %952 = vector.broadcast %cst_192 : f32 to vector<1x128xf32>
    %953 = tpu.concatenate %951, %952 in 0 : vector<15x128xf32>, vector<1x128xf32> -> vector<16x128xf32>
    %cst_193 = arith.constant 0.000000e+00 : f32
    %954 = vector.shape_cast %950 : vector<16x1xi1> to vector<16x1xi1>
    %955 = vector.broadcast %954 : vector<16x1xi1> to vector<16x128xi1>
    %956 = vector.broadcast %cst_193 : f32 to vector<16x128xf32>
    %957 = arith.select %955, %953, %956 : vector<16x128xi1>, vector<16x128xf32>
    %958 = vector.extract_strided_slice %861 {offsets = [4, 0], sizes = [1, 128], strides = [1, 1]} : vector<7x128xf32> to vector<1x128xf32>
    %959 = vector.broadcast %958 : vector<1x128xf32> to vector<16x128xf32>
    %960 = arith.mulf %957, %959 : vector<16x128xf32>
    %961 = arith.addf %941, %960 : vector<16x128xf32>
    %c2_i32_194 = arith.constant 2 : i32
    %962 = vector.broadcast %c2_i32_194 : i32 to vector<16x1xi32>
    %963 = arith.addi %863, %962 : vector<16x1xi32>
    %c0_i32_195 = arith.constant 0 : i32
    %964 = vector.broadcast %c0_i32_195 : i32 to vector<16x1xi32>
    %965 = arith.cmpi sge, %963, %964 : vector<16x1xi32>
    %c2_i32_196 = arith.constant 2 : i32
    %966 = vector.broadcast %c2_i32_196 : i32 to vector<16x1xi32>
    %967 = arith.addi %863, %966 : vector<16x1xi32>
    %c16_i32_197 = arith.constant 16 : i32
    %968 = vector.broadcast %c16_i32_197 : i32 to vector<16x1xi32>
    %969 = arith.cmpi slt, %967, %968 : vector<16x1xi32>
    %970 = arith.andi %965, %969 : vector<16x1xi1>
    %971 = vector.extract_strided_slice %860 {offsets = [2, 0], sizes = [14, 128], strides = [1, 1]} : vector<16x128xf32> to vector<14x128xf32>
    %cst_198 = arith.constant 0.000000e+00 : f32
    %972 = vector.broadcast %cst_198 : f32 to vector<2x128xf32>
    %973 = tpu.concatenate %971, %972 in 0 : vector<14x128xf32>, vector<2x128xf32> -> vector<16x128xf32>
    %cst_199 = arith.constant 0.000000e+00 : f32
    %974 = vector.shape_cast %970 : vector<16x1xi1> to vector<16x1xi1>
    %975 = vector.broadcast %974 : vector<16x1xi1> to vector<16x128xi1>
    %976 = vector.broadcast %cst_199 : f32 to vector<16x128xf32>
    %977 = arith.select %975, %973, %976 : vector<16x128xi1>, vector<16x128xf32>
    %978 = vector.extract_strided_slice %861 {offsets = [5, 0], sizes = [1, 128], strides = [1, 1]} : vector<7x128xf32> to vector<1x128xf32>
    %979 = vector.broadcast %978 : vector<1x128xf32> to vector<16x128xf32>
    %980 = arith.mulf %977, %979 : vector<16x128xf32>
    %981 = arith.addf %961, %980 : vector<16x128xf32>
    %c3_i32_200 = arith.constant 3 : i32
    %982 = vector.broadcast %c3_i32_200 : i32 to vector<16x1xi32>
    %983 = arith.addi %863, %982 : vector<16x1xi32>
    %c0_i32_201 = arith.constant 0 : i32
    %984 = vector.broadcast %c0_i32_201 : i32 to vector<16x1xi32>
    %985 = arith.cmpi sge, %983, %984 : vector<16x1xi32>
    %c3_i32_202 = arith.constant 3 : i32
    %986 = vector.broadcast %c3_i32_202 : i32 to vector<16x1xi32>
    %987 = arith.addi %863, %986 : vector<16x1xi32>
    %c16_i32_203 = arith.constant 16 : i32
    %988 = vector.broadcast %c16_i32_203 : i32 to vector<16x1xi32>
    %989 = arith.cmpi slt, %987, %988 : vector<16x1xi32>
    %990 = arith.andi %985, %989 : vector<16x1xi1>
    %991 = vector.extract_strided_slice %860 {offsets = [3, 0], sizes = [13, 128], strides = [1, 1]} : vector<16x128xf32> to vector<13x128xf32>
    %cst_204 = arith.constant 0.000000e+00 : f32
    %992 = vector.broadcast %cst_204 : f32 to vector<3x128xf32>
    %993 = tpu.concatenate %991, %992 in 0 : vector<13x128xf32>, vector<3x128xf32> -> vector<16x128xf32>
    %cst_205 = arith.constant 0.000000e+00 : f32
    %994 = vector.shape_cast %990 : vector<16x1xi1> to vector<16x1xi1>
    %995 = vector.broadcast %994 : vector<16x1xi1> to vector<16x128xi1>
    %996 = vector.broadcast %cst_205 : f32 to vector<16x128xf32>
    %997 = arith.select %995, %993, %996 : vector<16x128xi1>, vector<16x128xf32>
    %998 = vector.extract_strided_slice %861 {offsets = [6, 0], sizes = [1, 128], strides = [1, 1]} : vector<7x128xf32> to vector<1x128xf32>
    %999 = vector.broadcast %998 : vector<1x128xf32> to vector<16x128xf32>
    %1000 = arith.mulf %997, %999 : vector<16x128xf32>
    %1001 = arith.addf %981, %1000 : vector<16x128xf32>
    %c0_206 = arith.constant 0 : index
    %c0_207 = arith.constant 0 : index
    %1002 = vector.load %arg22[%c0_206, %c0_207] : memref<1x128xf32, #tpu.memory_space<vmem>>, vector<1x128xf32>
    %1003 = vector.broadcast %1002 : vector<1x128xf32> to vector<16x128xf32>
    %1004 = arith.mulf %1001, %1003 : vector<16x128xf32>
    %c0_208 = arith.constant 0 : index
    %c0_209 = arith.constant 0 : index
    %1005 = vector.load %arg23[%c0_208, %c0_209] : memref<1x128xf32, #tpu.memory_space<vmem>>, vector<1x128xf32>
    %1006 = vector.broadcast %1005 : vector<1x128xf32> to vector<16x128xf32>
    %1007 = arith.addf %1004, %1006 : vector<16x128xf32>
    %1008 = arith.negf %1007 : vector<16x128xf32>
    %1009 = math.exp %1008 : vector<16x128xf32>
    %cst_210 = arith.constant 1.000000e+00 : f32
    %1010 = vector.broadcast %cst_210 : f32 to vector<16x128xf32>
    %1011 = arith.addf %1010, %1009 : vector<16x128xf32>
    %1012 = arith.divf %1010, %1011 : vector<16x128xf32>
    %1013 = arith.mulf %1007, %1012 : vector<16x128xf32>
    %c0_211 = arith.constant 0 : index
    %c0_212 = arith.constant 0 : index
    %1014 = vector.load %arg24[%c0_211, %c0_212] : memref<128x128xbf16, #tpu.memory_space<vmem>>, vector<128x128xbf16>
    %1015 = arith.truncf %1013 : vector<16x128xf32> to vector<16x128xbf16>
    %cst_213 = arith.constant dense<0.000000e+00> : vector<16x128xf32>
    %1016 = tpu.matmul %1015, %1014, %cst_213 {dimension_numbers = #tpu.dot_dimension_numbers<[1], [0], [0], [1], [0, 0, 1, 1], [], []>} : vector<16x128xbf16>, vector<128x128xbf16>, vector<16x128xf32> -> vector<16x128xf32>
    %c0_214 = arith.constant 0 : index
    %c0_215 = arith.constant 0 : index
    %1017 = vector.load %arg25[%c0_214, %c0_215] : memref<1x128xf32, #tpu.memory_space<vmem>>, vector<1x128xf32>
    %1018 = vector.broadcast %1017 : vector<1x128xf32> to vector<16x128xf32>
    %1019 = arith.addf %1016, %1018 : vector<16x128xf32>
    %1020 = arith.addf %822, %1019 : vector<16x128xf32>
    %c0_216 = arith.constant 0 : index
    %c0_217 = arith.constant 0 : index
    %1021 = vector.load %arg26[%c0_216, %c0_217] : memref<1x128xf32, #tpu.memory_space<vmem>>, vector<1x128xf32>
    %c0_218 = arith.constant 0 : index
    %c0_219 = arith.constant 0 : index
    %1022 = vector.load %arg27[%c0_218, %c0_219] : memref<1x128xf32, #tpu.memory_space<vmem>>, vector<1x128xf32>
    %cst_220 = arith.constant dense<0.000000e+00> : vector<16xf32>
    %1023 = vector.multi_reduction <add>, %1020, %cst_220 [1] : vector<16x128xf32> to vector<16xf32>
    %1024 = vector.shape_cast %1023 : vector<16xf32> to vector<16x1xf32>
    %cst_221 = arith.constant 1.280000e+02 : f32
    %1025 = vector.broadcast %cst_221 : f32 to vector<16x1xf32>
    %1026 = arith.divf %1024, %1025 : vector<16x1xf32>
    %1027 = vector.broadcast %1026 : vector<16x1xf32> to vector<16x128xf32>
    %1028 = arith.subf %1020, %1027 : vector<16x128xf32>
    %1029 = arith.mulf %1028, %1028 : vector<16x128xf32>
    %cst_222 = arith.constant dense<0.000000e+00> : vector<16xf32>
    %1030 = vector.multi_reduction <add>, %1029, %cst_222 [1] : vector<16x128xf32> to vector<16xf32>
    %1031 = vector.shape_cast %1030 : vector<16xf32> to vector<16x1xf32>
    %cst_223 = arith.constant 1.280000e+02 : f32
    %1032 = vector.broadcast %cst_223 : f32 to vector<16x1xf32>
    %1033 = arith.divf %1031, %1032 : vector<16x1xf32>
    %1034 = vector.broadcast %1026 : vector<16x1xf32> to vector<16x128xf32>
    %1035 = arith.subf %1020, %1034 : vector<16x128xf32>
    %cst_224 = arith.constant 9.99999974E-6 : f32
    %1036 = vector.broadcast %cst_224 : f32 to vector<16x1xf32>
    %1037 = arith.addf %1033, %1036 : vector<16x1xf32>
    %1038 = math.rsqrt %1037 : vector<16x1xf32>
    %1039 = vector.broadcast %1038 : vector<16x1xf32> to vector<16x128xf32>
    %1040 = arith.mulf %1035, %1039 : vector<16x128xf32>
    %1041 = vector.broadcast %1021 : vector<1x128xf32> to vector<16x128xf32>
    %1042 = arith.mulf %1040, %1041 : vector<16x128xf32>
    %1043 = vector.broadcast %1022 : vector<1x128xf32> to vector<16x128xf32>
    %1044 = arith.addf %1042, %1043 : vector<16x128xf32>
    %c0_225 = arith.constant 0 : index
    %c0_226 = arith.constant 0 : index
    %1045 = vector.load %arg28[%c0_225, %c0_226] : memref<128x512xbf16, #tpu.memory_space<vmem>>, vector<128x512xbf16>
    %1046 = arith.truncf %1044 : vector<16x128xf32> to vector<16x128xbf16>
    %cst_227 = arith.constant dense<0.000000e+00> : vector<16x512xf32>
    %1047 = tpu.matmul %1046, %1045, %cst_227 {dimension_numbers = #tpu.dot_dimension_numbers<[1], [0], [0], [1], [0, 0, 1, 1], [], []>} : vector<16x128xbf16>, vector<128x512xbf16>, vector<16x512xf32> -> vector<16x512xf32>
    %c0_228 = arith.constant 0 : index
    %c0_229 = arith.constant 0 : index
    %1048 = vector.load %arg29[%c0_228, %c0_229] : memref<1x512xf32, #tpu.memory_space<vmem>>, vector<1x512xf32>
    %1049 = vector.broadcast %1048 : vector<1x512xf32> to vector<16x512xf32>
    %1050 = arith.addf %1047, %1049 : vector<16x512xf32>
    %1051 = arith.negf %1050 : vector<16x512xf32>
    %1052 = math.exp %1051 : vector<16x512xf32>
    %cst_230 = arith.constant 1.000000e+00 : f32
    %1053 = vector.broadcast %cst_230 : f32 to vector<16x512xf32>
    %1054 = arith.addf %1053, %1052 : vector<16x512xf32>
    %1055 = arith.divf %1053, %1054 : vector<16x512xf32>
    %1056 = arith.mulf %1050, %1055 : vector<16x512xf32>
    %c0_231 = arith.constant 0 : index
    %c0_232 = arith.constant 0 : index
    %1057 = vector.load %arg30[%c0_231, %c0_232] : memref<512x128xbf16, #tpu.memory_space<vmem>>, vector<512x128xbf16>
    %1058 = arith.truncf %1056 : vector<16x512xf32> to vector<16x512xbf16>
    %cst_233 = arith.constant dense<0.000000e+00> : vector<16x128xf32>
    %1059 = tpu.matmul %1058, %1057, %cst_233 {dimension_numbers = #tpu.dot_dimension_numbers<[1], [0], [0], [1], [0, 0, 1, 1], [], []>} : vector<16x512xbf16>, vector<512x128xbf16>, vector<16x128xf32> -> vector<16x128xf32>
    %c0_234 = arith.constant 0 : index
    %c0_235 = arith.constant 0 : index
    %1060 = vector.load %arg31[%c0_234, %c0_235] : memref<1x128xf32, #tpu.memory_space<vmem>>, vector<1x128xf32>
    %1061 = vector.broadcast %1060 : vector<1x128xf32> to vector<16x128xf32>
    %1062 = arith.addf %1059, %1061 : vector<16x128xf32>
    %cst_236 = arith.constant 5.000000e-01 : f32
    %1063 = vector.broadcast %cst_236 : f32 to vector<16x128xf32>
    %1064 = arith.mulf %1063, %1062 : vector<16x128xf32>
    %1065 = arith.addf %1020, %1064 : vector<16x128xf32>
    %c0_237 = arith.constant 0 : index
    %c0_238 = arith.constant 0 : index
    %1066 = vector.load %arg32[%c0_237, %c0_238] : memref<1x128xf32, #tpu.memory_space<vmem>>, vector<1x128xf32>
    %c0_239 = arith.constant 0 : index
    %c0_240 = arith.constant 0 : index
    %1067 = vector.load %arg33[%c0_239, %c0_240] : memref<1x128xf32, #tpu.memory_space<vmem>>, vector<1x128xf32>
    %cst_241 = arith.constant dense<0.000000e+00> : vector<16xf32>
    %1068 = vector.multi_reduction <add>, %1065, %cst_241 [1] : vector<16x128xf32> to vector<16xf32>
    %1069 = vector.shape_cast %1068 : vector<16xf32> to vector<16x1xf32>
    %cst_242 = arith.constant 1.280000e+02 : f32
    %1070 = vector.broadcast %cst_242 : f32 to vector<16x1xf32>
    %1071 = arith.divf %1069, %1070 : vector<16x1xf32>
    %1072 = vector.broadcast %1071 : vector<16x1xf32> to vector<16x128xf32>
    %1073 = arith.subf %1065, %1072 : vector<16x128xf32>
    %1074 = arith.mulf %1073, %1073 : vector<16x128xf32>
    %cst_243 = arith.constant dense<0.000000e+00> : vector<16xf32>
    %1075 = vector.multi_reduction <add>, %1074, %cst_243 [1] : vector<16x128xf32> to vector<16xf32>
    %1076 = vector.shape_cast %1075 : vector<16xf32> to vector<16x1xf32>
    %cst_244 = arith.constant 1.280000e+02 : f32
    %1077 = vector.broadcast %cst_244 : f32 to vector<16x1xf32>
    %1078 = arith.divf %1076, %1077 : vector<16x1xf32>
    %1079 = vector.broadcast %1071 : vector<16x1xf32> to vector<16x128xf32>
    %1080 = arith.subf %1065, %1079 : vector<16x128xf32>
    %cst_245 = arith.constant 9.99999974E-6 : f32
    %1081 = vector.broadcast %cst_245 : f32 to vector<16x1xf32>
    %1082 = arith.addf %1078, %1081 : vector<16x1xf32>
    %1083 = math.rsqrt %1082 : vector<16x1xf32>
    %1084 = vector.broadcast %1083 : vector<16x1xf32> to vector<16x128xf32>
    %1085 = arith.mulf %1080, %1084 : vector<16x128xf32>
    %1086 = vector.broadcast %1066 : vector<1x128xf32> to vector<16x128xf32>
    %1087 = arith.mulf %1085, %1086 : vector<16x128xf32>
    %1088 = vector.broadcast %1067 : vector<1x128xf32> to vector<16x128xf32>
    %1089 = arith.addf %1087, %1088 : vector<16x128xf32>
    %1090 = vector.shape_cast %1089 : vector<16x128xf32> to vector<1x16x128xf32>
    %c0_246 = arith.constant 0 : index
    %c0_247 = arith.constant 0 : index
    %c0_248 = arith.constant 0 : index
    %1091 = vector.load %arg34[%c0_246, %c0_247, %c0_248] : memref<1x16x128xf32, #tpu.memory_space<vmem>>, vector<1x16x128xf32>
    tpu.vector_store %arg34[%c0_246, %c0_247, %c0_248], %1090 {strides = array<i32>} : memref<1x16x128xf32, #tpu.memory_space<vmem>>, vector<1x16x128xf32>,
    return
  }
  func.func @transform_0(%arg0: i32) -> (i32, i32, i32) {
    %c0_i32 = arith.constant 0 : i32
    %c0_i32_0 = arith.constant 0 : i32
    %c0_i32_1 = arith.constant 0 : i32
    return %arg0, %c0_i32, %c0_i32_0 : i32, i32, i32
  }
  func.func @transform_1(%arg0: i32) -> (i32, i32) {
    %c0_i32 = arith.constant 0 : i32
    %c0_i32_0 = arith.constant 0 : i32
    %c0_i32_1 = arith.constant 0 : i32
    return %c0_i32, %c0_i32_0 : i32, i32
  }
  func.func @transform_2(%arg0: i32) -> (i32, i32) {
    %c0_i32 = arith.constant 0 : i32
    %c0_i32_0 = arith.constant 0 : i32
    %c0_i32_1 = arith.constant 0 : i32
    return %c0_i32, %c0_i32_0 : i32, i32
  }
  func.func @transform_3(%arg0: i32) -> (i32, i32) {
    %c0_i32 = arith.constant 0 : i32
    %c0_i32_0 = arith.constant 0 : i32
    %c0_i32_1 = arith.constant 0 : i32
    return %c0_i32, %c0_i32_0 : i32, i32
  }
  func.func @transform_4(%arg0: i32) -> (i32, i32) {
    %c0_i32 = arith.constant 0 : i32
    %c0_i32_0 = arith.constant 0 : i32
    %c0_i32_1 = arith.constant 0 : i32
    return %c0_i32, %c0_i32_0 : i32, i32
  }
  func.func @transform_5(%arg0: i32) -> (i32, i32) {
    %c0_i32 = arith.constant 0 : i32
    %c0_i32_0 = arith.constant 0 : i32
    %c0_i32_1 = arith.constant 0 : i32
    return %c0_i32, %c0_i32_0 : i32, i32
  }
  func.func @transform_6(%arg0: i32) -> (i32, i32) {
    %c0_i32 = arith.constant 0 : i32
    %c0_i32_0 = arith.constant 0 : i32
    %c0_i32_1 = arith.constant 0 : i32
    return %c0_i32, %c0_i32_0 : i32, i32
  }
  func.func @transform_7(%arg0: i32) -> (i32, i32) {
    %c0_i32 = arith.constant 0 : i32
    %c0_i32_0 = arith.constant 0 : i32
    %c0_i32_1 = arith.constant 0 : i32
    return %c0_i32, %c0_i32_0 : i32, i32
  }
  func.func @transform_8(%arg0: i32) -> (i32, i32) {
    %c0_i32 = arith.constant 0 : i32
    %c0_i32_0 = arith.constant 0 : i32
    %c0_i32_1 = arith.constant 0 : i32
    return %c0_i32, %c0_i32_0 : i32, i32
  }
  func.func @transform_9(%arg0: i32) -> (i32, i32) {
    %c0_i32 = arith.constant 0 : i32
    %c0_i32_0 = arith.constant 0 : i32
    %c0_i32_1 = arith.constant 0 : i32
    return %c0_i32, %c0_i32_0 : i32, i32
  }
  func.func @transform_10(%arg0: i32) -> (i32, i32) {
    %c0_i32 = arith.constant 0 : i32
    %c0_i32_0 = arith.constant 0 : i32
    %c0_i32_1 = arith.constant 0 : i32
    return %c0_i32, %c0_i32_0 : i32, i32
  }
  func.func @transform_11(%arg0: i32) -> (i32, i32) {
    %c0_i32 = arith.constant 0 : i32
    %c0_i32_0 = arith.constant 0 : i32
    %c0_i32_1 = arith.constant 0 : i32
    return %c0_i32, %c0_i32_0 : i32, i32
  }
  func.func @transform_12(%arg0: i32) -> (i32, i32) {
    %c0_i32 = arith.constant 0 : i32
    %c0_i32_0 = arith.constant 0 : i32
    %c0_i32_1 = arith.constant 0 : i32
    return %c0_i32, %c0_i32_0 : i32, i32
  }
  func.func @transform_13(%arg0: i32) -> (i32, i32) {
    %c0_i32 = arith.constant 0 : i32
    %c0_i32_0 = arith.constant 0 : i32
    %c0_i32_1 = arith.constant 0 : i32
    return %c0_i32, %c0_i32_0 : i32, i32
  }
  func.func @transform_14(%arg0: i32) -> (i32, i32) {
    %c0_i32 = arith.constant 0 : i32
    %c0_i32_0 = arith.constant 0 : i32
    %c0_i32_1 = arith.constant 0 : i32
    return %c0_i32, %c0_i32_0 : i32, i32
  }
  func.func @transform_15(%arg0: i32) -> (i32, i32) {
    %c0_i32 = arith.constant 0 : i32
    %c0_i32_0 = arith.constant 0 : i32
    %c0_i32_1 = arith.constant 0 : i32
    return %c0_i32, %c0_i32_0 : i32, i32
  }
  func.func @transform_16(%arg0: i32) -> (i32, i32) {
    %c0_i32 = arith.constant 0 : i32
    %c0_i32_0 = arith.constant 0 : i32
    %c0_i32_1 = arith.constant 0 : i32
    return %c0_i32, %c0_i32_0 : i32, i32
  }
  func.func @transform_17(%arg0: i32) -> (i32, i32) {
    %c0_i32 = arith.constant 0 : i32
    %c0_i32_0 = arith.constant 0 : i32
    %c0_i32_1 = arith.constant 0 : i32
    return %c0_i32, %c0_i32_0 : i32, i32
  }
  func.func @transform_18(%arg0: i32) -> (i32, i32) {
    %c0_i32 = arith.constant 0 : i32
    %c0_i32_0 = arith.constant 0 : i32
    %c0_i32_1 = arith.constant 0 : i32
    return %c0_i32, %c0_i32_0 : i32, i32
  }
  func.func @transform_19(%arg0: i32) -> (i32, i32) {
    %c0_i32 = arith.constant 0 : i32
    %c0_i32_0 = arith.constant 0 : i32
    %c0_i32_1 = arith.constant 0 : i32
    return %c0_i32, %c0_i32_0 : i32, i32
  }
  func.func @transform_20(%arg0: i32) -> (i32, i32) {
    %c0_i32 = arith.constant 0 : i32
    %c0_i32_0 = arith.constant 0 : i32
    %c0_i32_1 = arith.constant 0 : i32
    return %c0_i32, %c0_i32_0 : i32, i32
  }
  func.func @transform_21(%arg0: i32) -> (i32, i32) {
    %c0_i32 = arith.constant 0 : i32
    %c0_i32_0 = arith.constant 0 : i32
    %c0_i32_1 = arith.constant 0 : i32
    return %c0_i32, %c0_i32_0 : i32, i32
  }
  func.func @transform_22(%arg0: i32) -> (i32, i32) {
    %c0_i32 = arith.constant 0 : i32
    %c0_i32_0 = arith.constant 0 : i32
    %c0_i32_1 = arith.constant 0 : i32
    return %c0_i32, %c0_i32_0 : i32, i32
  }
  func.func @transform_23(%arg0: i32) -> (i32, i32) {
    %c0_i32 = arith.constant 0 : i32
    %c0_i32_0 = arith.constant 0 : i32
    %c0_i32_1 = arith.constant 0 : i32
    return %c0_i32, %c0_i32_0 : i32, i32
  }
  func.func @transform_24(%arg0: i32) -> (i32, i32) {
    %c0_i32 = arith.constant 0 : i32
    %c0_i32_0 = arith.constant 0 : i32
    %c0_i32_1 = arith.constant 0 : i32
    return %c0_i32, %c0_i32_0 : i32, i32
  }
  func.func @transform_25(%arg0: i32) -> (i32, i32) {
    %c0_i32 = arith.constant 0 : i32
    %c0_i32_0 = arith.constant 0 : i32
    %c0_i32_1 = arith.constant 0 : i32
    return %c0_i32, %c0_i32_0 : i32, i32
  }
  func.func @transform_26(%arg0: i32) -> (i32, i32) {
    %c0_i32 = arith.constant 0 : i32
    %c0_i32_0 = arith.constant 0 : i32
    %c0_i32_1 = arith.constant 0 : i32
    return %c0_i32, %c0_i32_0 : i32, i32
  }
  func.func @transform_27(%arg0: i32) -> (i32, i32) {
    %c0_i32 = arith.constant 0 : i32
    %c0_i32_0 = arith.constant 0 : i32
    %c0_i32_1 = arith.constant 0 : i32
    return %c0_i32, %c0_i32_0 : i32, i32
  }
  func.func @transform_28(%arg0: i32) -> (i32, i32) {
    %c0_i32 = arith.constant 0 : i32
    %c0_i32_0 = arith.constant 0 : i32
    %c0_i32_1 = arith.constant 0 : i32
    return %c0_i32, %c0_i32_0 : i32, i32
  }
  func.func @transform_29(%arg0: i32) -> (i32, i32) {
    %c0_i32 = arith.constant 0 : i32
    %c0_i32_0 = arith.constant 0 : i32
    %c0_i32_1 = arith.constant 0 : i32
    return %c0_i32, %c0_i32_0 : i32, i32
  }
  func.func @transform_30(%arg0: i32) -> (i32, i32) {
    %c0_i32 = arith.constant 0 : i32
    %c0_i32_0 = arith.constant 0 : i32
    %c0_i32_1 = arith.constant 0 : i32
    return %c0_i32, %c0_i32_0 : i32, i32
  }
  func.func @transform_31(%arg0: i32) -> (i32, i32) {
    %c0_i32 = arith.constant 0 : i32
    %c0_i32_0 = arith.constant 0 : i32
    %c0_i32_1 = arith.constant 0 : i32
    return %c0_i32, %c0_i32_0 : i32, i32
  }
  func.func @transform_32(%arg0: i32) -> (i32, i32) {
    %c0_i32 = arith.constant 0 : i32
    %c0_i32_0 = arith.constant 0 : i32
    %c0_i32_1 = arith.constant 0 : i32
    return %c0_i32, %c0_i32_0 : i32, i32
  }
  func.func @transform_33(%arg0: i32) -> (i32, i32, i32) {
    %c0_i32 = arith.constant 0 : i32
    %c0_i32_0 = arith.constant 0 : i32
    %c0_i32_1 = arith.constant 0 : i32
    return %arg0, %c0_i32, %c0_i32_0 : i32, i32, i32
  }
}

</mosaic_0001>

<bundles_post_ra>
// kernel: conformer_block.1
= control target key start
LH: loop header
LB: loop body
LE: loop exit
PB: predicated region body
PF: predicated region fallthrough
CT: control target
= control target key end

     0   :  { %s7714_s6 = smov 1   ;;  %s7715_s10 = smov 2   ;;  %s9324_s0 = inlined_call_operand.smem [shape: u32[34], index: -1, kind: input, shape index: {}] }
   0x1   :  { %s7802_s5 = sld [smem:[%s9324_s0]]   ;;  %s7716_s14 = smov 3  }
   0x2   :  { %s7807_s9 = sld [smem:[%s9324_s0 + %s7714_s6]]   ;;  %s7717_s18 = smov 4  }
   0x3   :  { %s7812_s13 = sld [smem:[%s9324_s0 + %s7715_s10]]   ;;  %s7718_s22 = smov 5  }
   0x4   :  { %s7817_s17 = sld [smem:[%s9324_s0 + %s7716_s14]]   ;;  %s7719_s26 = smov 6  }
   0x5   :  { %s7822_s21 = sld [smem:[%s9324_s0 + %s7717_s18]]   ;;  %s7720_s30 = smov 7  }
   0x6   :  { %s7827_s25 = sld [smem:[%s9324_s0 + %s7718_s22]]   ;;  %s7721_s4 = smov 8  }
   0x7   :  { %9455 = sst [smem:[#allocation36_spill]] %s7802_s5  ;;  %s7722_s10 = smov 9  }
   0x8   :  { %9456 = sst [smem:[#allocation37_spill]] %s7807_s9  ;;  %s7723_s15 = smov 10  }
   0x9   :  { %9457 = sst [smem:[#allocation38_spill]] %s7812_s13  ;;  %s7724_s20 = smov 11  }
   0xa   :  { %9458 = sst [smem:[#allocation39_spill]] %s7817_s17  ;;  %s7726_s1 = smov 13  }
   0xb   :  { %s7832_s29 = sld [smem:[%s9324_s0 + %s7719_s26]]   ;;  %s7725_s26 = smov 12  }
   0xc   :  { %9459 = sst [smem:[#allocation40_spill]] %s7827_s25  ;;  %s7727_s7 = smov 14  }
   0xd   :  { %s7837_s3 = sld [smem:[%s9324_s0 + %s7720_s30]]   ;;  %s7729_s22 = smov 16  }
   0xe   :  { %s7842_s8 = sld [smem:[%s9324_s0 + %s7721_s4]]   ;;  %s7730_s28 = smov 17  }
   0xf   :  { %s7847_s14 = sld [smem:[%s9324_s0 + %s7722_s10]]  }
  0x10   :  { %s7852_s19 = sld [smem:[%s9324_s0 + %s7723_s15]]   ;;  %s7728_s15 = smov 15  }
  0x11   :  { %s7857_s24 = sld [smem:[%s9324_s0 + %s7724_s20]]  }
  0x12   :  { %s7862_s30 = sld [smem:[%s9324_s0 + %s7725_s26]]  }
  0x13   :  { %9460 = sst [smem:[#allocation41_spill]] %s7837_s3 }
  0x14   :  { %9461 = sst [smem:[#allocation42_spill]] %s7842_s8 }
  0x15   :  { %9462 = sst [smem:[#allocation43_spill]] %s7847_s14 }
  0x16   :  { %s7867_s6 = sld [smem:[%s9324_s0 + %s7726_s1]]  }
  0x17   :  { %9463 = sst [smem:[#allocation44_spill]] %s7857_s24 }
  0x18   :  { %9464 = sst [smem:[#allocation45_spill]] %s7862_s30 }
  0x19   :  { %s7872_s12 = sld [smem:[%s9324_s0 + %s7727_s7]]   ;;  %s7731_s7 = smov 18  }
  0x1a   :  { %s7877_s20 = sld [smem:[%s9324_s0 + %s7728_s15]]   ;;  %s7732_s15 = smov 19  }
  0x1b   :  { %s7882_s27 = sld [smem:[%s9324_s0 + %s7729_s22]]   ;;  %s7733_s22 = smov 20  }
  0x1c   :  { %9465 = sst [smem:[#allocation46_spill]] %s7867_s6 }
  0x1d   :  { %s7887_s4 = sld [smem:[%s9324_s0 + %s7730_s28]]   ;;  %s7734_s28 = smov 21  }
  0x1e   :  { %s7892_s6 = sld [smem:[%s9324_s0 + %s7731_s7]]   ;;  %s7735_s7 = smov 22  }
  0x1f   :  { %9466 = sst [smem:[#allocation47_spill]] %s7872_s12 }
  0x20   :  { %9467 = sst [smem:[#allocation48_spill]] %s7877_s20 }
  0x21   :  { %s7897_s30 = sld [smem:[%s9324_s0 + %s7732_s15]]   ;;  %s7736_s15 = smov 23  }
  0x22   :  { %s7902_s12 = sld [smem:[%s9324_s0 + %s7733_s22]]   ;;  %s7737_s22 = smov 24  }
  0x23   :  { %9468 = sst [smem:[#allocation49_spill]] %s7887_s4 }
  0x24   :  { %9469 = sst [smem:[#allocation50_spill]] %s7892_s6 }
  0x25   :  { %s7907_s20 = sld [smem:[%s9324_s0 + %s7734_s28]]   ;;  %s7738_s28 = smov 25  }
  0x26   :  { %s7912_s24 = sld [smem:[%s9324_s0 + %s7735_s7]]   ;;  %s7739_s7 = smov 26  }
  0x27   :  { %s7917_s9 = sld [smem:[%s9324_s0 + %s7736_s15]]   ;;  %s7740_s15 = smov 27  }
  0x28   :  { %9470 = sst [smem:[#allocation51_spill]] %s7902_s12 }
  0x29   :  { %s7922_s12 = sld [smem:[%s9324_s0 + %s7737_s22]]   ;;  %s7741_s22 = smov 28  }
  0x2a   :  { %s7927_s14 = sld [smem:[%s9324_s0 + %s7738_s28]]   ;;  %s7742_s28 = smov 29  }
  0x2b   :  { %s7932_s8 = sld [smem:[%s9324_s0 + %s7739_s7]]   ;;  %s7743_s7 = smov 30  }
  0x2c   :  { %s7937_s25 = sld [smem:[%s9324_s0 + %s7740_s15]]   ;;  %s7744_s15 = smov 31  }
  0x2d   :  { %9471 = sst [smem:[#allocation52_spill]] %s7917_s9 }
  0x2e   :  { %s7942_s17 = sld [smem:[%s9324_s0 + %s7741_s22]]   ;;  %s7745_s22 = smov 32  }
  0x2f   :  { %9472 = sst [smem:[#allocation53_spill]] %s7922_s12 }
  0x30   :  { %9473 = sst [smem:[#allocation54_spill]] %s7927_s14 }
  0x31   :  { %9474 = sst [smem:[#allocation55_spill]] %s7932_s8 }
  0x32   :  { %s7947_s14 = sld [smem:[%s9324_s0 + %s7742_s28]]   ;;  %s7746_s28 = smov 33  }
  0x33   :  { %s7952_s8 = sld [smem:[%s9324_s0 + %s7743_s7]]  }
  0x34   :  { %9475 = sst [smem:[#allocation56_spill]] %s7942_s17 }
  0x35   :  { %s7957_s13 = sld [smem:[%s9324_s0 + %s7744_s15]]  }
  0x36   :  { %s7962_s17 = sld [smem:[%s9324_s0 + %s7745_s22]]  }
  0x37   :  { %s7967_s5 = sld [smem:[%s9324_s0 + %s7746_s28]]  }
  0x38   :  { %9476 = sst [smem:[#allocation57_spill]] %s7947_s14 }
  0x3b   :  { %9477 = sst [smem:[#allocation58_spill]] %s7957_s13 }
  0x3c   :  { %9478 = sst [smem:[#allocation59_spill]] %s7962_s17 }
  0x3d   :  { %9479 = sst [smem:[#allocation60_spill]] %s7967_s5 }
  0x3e   :  { %72 = vsyncpa [#allocation3], 0 }
  0x3f   :  { %74 = vsyncpa [#allocation3 + $0x1], 0 }
  0x40   :  { %75 = vsyncpa [#allocation6], 0 }
  0x41   :  { %76 = vsyncpa [#allocation9], 0 }
  0x42   :  { %77 = vsyncpa [#allocation12], 0 }
  0x43   :  { %78 = vsyncpa [#allocation15], 0 }
  0x44   :  { %79 = vsyncpa [#allocation18], 0 }
  0x45   :  { %80 = vsyncpa [#allocation21], 0 }
  0x46   :  { %81 = vsyncpa [#allocation24], 0 }
  0x47   :  { %82 = vsyncpa [#allocation4], 0 }
  0x48   :  { %84 = vsyncpa [#allocation4 + $0x1], 0  ;;  %s7969_s7 = smov 0   ;;  %s7971_s10 = smov 0  }
  0x49   :  { %s7973_s11 = smov 0   ;;  %s7975_s15 = smov 0  }
  0x4a LB: > { %s9480_s14 = sld [smem:[#allocation57_spill]]  ;;  %s9481_s12 = sld [smem:[#allocation53_spill]]  ;;  %s7704_s10 = sphi %s7971_s10, %s9673_s10   ;;  %s7700_s7 = sphi %s7969_s7, %s9672_s7   ;;  %s7712_s15 = sphi %s7975_s15, %s9675_s15   ;;  %s7708_s11 = sphi %s7973_s11, %s9674_s11  }
  0x4b   : > { %s9482_s4 = sld [smem:[#allocation49_spill]]  ;;  %s9483_s9 = sld [smem:[#allocation52_spill]] }
  0x4c   : > { %s9484_s6 = sld [smem:[#allocation50_spill]]  ;;  %s9485_s3 = sld [smem:[#allocation41_spill]] }
  0x4d   : > { %s7747_s0 = smov [#allocation5]   ;;  %s7990_s18 = sadd.s32 4294967295, %s7712_s15  }
  0x4e   : > { %s840_s16 = sshll.u32 %s7747_s0, 4  ;;  %p5855_p0 = scmp.ge.s32.totalorder %s7712_s15, 1  ;;  %s7995_s16 = int_to_ptr.vmem [resolvable:$true] %s840_s16 }
  0x4f   : > { %p9331_p1 = scmp.eq.s32.totalorder %s7990_s18, 0  ;;  %p819_p2 = scmp.lt.s32.totalorder %s7712_s15, 3 }
  0x50   : > { %s7748_s23 = smov [#allocation8]   ;;  %s7749_s1 = smov [#allocation11]  }
  0x51   : > { %p7997_p3 = pnand %p5855_p0, %p819_p2  ;;  %s870_s26 = sshll.u32 %s7748_s23, 4  ;;  %s8010_s26 = int_to_ptr.vmem [resolvable:$true] %s870_s26 }
  0x52   : > { %s915_s2 = sshll.u32 %s7749_s1, 4  ;;  %s7196_s0 = scalar_lea.hbm %s7822_s21, 4096  ;;  %s8012_s2 = int_to_ptr.vmem [resolvable:$true] %s915_s2 }
  0x53   : > { %s9486_s22 = scalar_select %p7997_p3, 1, 0 }
  0x54   : > { %p6514_p5 = pneg %p7997_p3  ;;  %p7197_p7 = scmp.ne.s32.totalorder %s7822_s21, %s7196_s0 }
  0x55   : > { %p7203_p11 = scmp.lt.u32.totalorder %s7196_s0, %s7822_s21 }
  0x56   : > { %p8006_p6 = pnand %p6514_p5, %p9331_p1 }
  0x58   : > { %p8018_p8 = pneg %p8006_p6 }
  0x5a   : > { %p7199_p9 = pnand %p8018_p8, %p7197_p7 }
  0x5c   : > { %p7200_p10 = pneg %p7199_p9 }
  0x5e   : > { %p7205_p12 = pnand %p7203_p11, %p7200_p10 }
  0x60   : > { %7208 = shalt.err (!%p7205_p12)
}
  0x61   : > { %s7209_s23 = scalar_lea.vmem %s7995_s16, 4096  ;;  %p7217_p5 = scmp.lt.s32.totalorder %s7995_s16, %s7995_s16 }
  0x62   : > { %p7210_p13 = scmp.ne.s32.totalorder %s7995_s16, %s7209_s23  ;;  %p7218_p4 = scmp.lt.s32.totalorder %s7209_s23, %s7209_s23 }
  0x64   : > { %p7212_p0 = pnand %p7210_p13, %p8018_p8  ;;  %p7219_p1 = por %p7218_p4, %p7217_p5 }
  0x66   : > { %p7213_p2 = pneg %p7212_p0 }
  0x68   : > { %p7220_p3 = pnand %p7219_p1, %p7213_p2 }
  0x6a   : > { %7223 = shalt.err (!%p7220_p3)
}
  0x6b   : > { %s9333_s1 = smov 256   ;;  %s9334_s0 = smov 16  }
  0x6c   : > { %6517 = dma.hbm_to_vmem [thread:$0]  (!%p8006_p6), %s7822_s21, 4096, %s7995_s16, [#allocation6], %s9333_s1, %s9333_s1, %s9334_s0  }
  0x6d   : > { %s7224_s17 = scalar_lea.hbm %s9485_s3, 16 }
  0x6e   : > { %p7225_p7 = scmp.ne.s32.totalorder %s9485_s3, %s7224_s17  ;;  %p7231_p3 = scmp.lt.u32.totalorder %s7224_s17, %s9485_s3 }
  0x70   : > { %p7227_p4 = pnand %p7225_p7, %p8018_p8 }
  0x72   : > { %p7228_p1 = pneg %p7227_p4 }
  0x74   : > { %p7233_p9 = pnand %p7231_p3, %p7228_p1 }
  0x76   : > { %7236 = shalt.err (!%p7233_p9)
}
  0x77   : > { %s7237_s23 = scalar_lea.vmem %s8010_s26, 16  ;;  %s7244_s13 = scalar_lea.vmem %s8010_s26, 32 }
  0x78   : > { %p7238_p10 = scmp.ne.s32.totalorder %s8010_s26, %s7237_s23  ;;  %p7245_p13 = scmp.lt.s32.totalorder %s8010_s26, %s8010_s26 }
  0x79   : > { %p7246_p0 = scmp.lt.s32.totalorder %s7244_s13, %s7237_s23 }
  0x7a   : > { %p7240_p11 = pnand %p7238_p10, %p8018_p8 }
  0x7b   : > { %p7247_p2 = por %p7246_p0, %p7245_p13 }
  0x7c   : > { %p7241_p12 = pneg %p7240_p11 }
  0x7e   : > { %p7248_p5 = pnand %p7247_p2, %p7241_p12 }
  0x80   : > { %7251 = shalt.err (!%p7248_p5)
}
  0x81   : > { %6523 = dma.hbm_to_vmem [thread:$0]  (!%p8006_p6), %s9485_s3, 16, %s8010_s26, [#allocation9]  }
  0x82   : > { %s7252_s17 = scalar_lea.hbm %s7882_s27, 16 }
  0x83   : > { %p7253_p7 = scmp.ne.s32.totalorder %s7882_s27, %s7252_s17  ;;  %p7259_p3 = scmp.lt.u32.totalorder %s7252_s17, %s7882_s27 }
  0x85   : > { %p7255_p4 = pnand %p7253_p7, %p8018_p8 }
  0x87   : > { %p7256_p1 = pneg %p7255_p4 }
  0x89   : > { %p7261_p9 = pnand %p7259_p3, %p7256_p1 }
  0x8b   : > { %7264 = shalt.err (!%p7261_p9)
}
  0x8c   : > { %s7265_s13 = scalar_lea.vmem %s8012_s2, 16  ;;  %s7272_s16 = scalar_lea.vmem %s8012_s2, 32 }
  0x8d   : > { %p7266_p10 = scmp.ne.s32.totalorder %s8012_s2, %s7265_s13  ;;  %p7273_p13 = scmp.lt.s32.totalorder %s8012_s2, %s8012_s2 }
  0x8e   : > { %p7274_p0 = scmp.lt.s32.totalorder %s7272_s16, %s7265_s13 }
  0x8f   : > { %p7268_p11 = pnand %p7266_p10, %p8018_p8 }
  0x90   : > { %p7275_p2 = por %p7274_p0, %p7273_p13 }
  0x91   : > { %p7269_p12 = pneg %p7268_p11 }
  0x93   : > { %p7276_p5 = pnand %p7275_p2, %p7269_p12 }
  0x95   : > { %7279 = shalt.err (!%p7276_p5)
}
  0x96   : > { %6529 = dma.hbm_to_vmem [thread:$0]  (!%p8006_p6), %s7882_s27, 16, %s8012_s2, [#allocation12]  }
  0x97   : > { %s7752_s26 = smov [#allocation14]   ;;  %s7280_s17 = scalar_lea.hbm %s9484_s6, 2048 }
  0x98   : > { %s936_s23 = sshll.u32 %s7752_s26, 4  ;;  %p7281_p7 = scmp.ne.s32.totalorder %s9484_s6, %s7280_s17  ;;  %s937_s23 = int_to_ptr.vmem [resolvable:$true] %s936_s23 }
  0x99   : > { %p7287_p3 = scmp.lt.u32.totalorder %s7280_s17, %s9484_s6 }
  0x9a   : > { %p7283_p4 = pnand %p7281_p7, %p8018_p8 }
  0x9c   : > { %p7284_p1 = pneg %p7283_p4 }
  0x9e   : > { %p7289_p9 = pnand %p7287_p3, %p7284_p1 }
  0xa0   : > { %7292 = shalt.err (!%p7289_p9)
}
  0xa1   : > { %s7293_s13 = scalar_lea.vmem %s937_s23, 2048  ;;  %p7301_p13 = scmp.lt.s32.totalorder %s937_s23, %s937_s23 }
  0xa2   : > { %p7294_p10 = scmp.ne.s32.totalorder %s937_s23, %s7293_s13  ;;  %p7302_p0 = scmp.lt.s32.totalorder %s7293_s13, %s7293_s13 }
  0xa4   : > { %p7296_p11 = pnand %p7294_p10, %p8018_p8  ;;  %p7303_p2 = por %p7302_p0, %p7301_p13 }
  0xa6   : > { %p7297_p12 = pneg %p7296_p11 }
  0xa8   : > { %p7304_p5 = pnand %p7303_p2, %p7297_p12 }
  0xaa   : > { %7307 = shalt.err (!%p7304_p5)
}
  0xab   : > { %s9335_s2 = smov 128   ;;  %s9336_s16 = smov 8  }
  0xac   : > { %6535 = dma.hbm_to_vmem [thread:$0]  (!%p8006_p6), %s9484_s6, 2048, %s937_s23, [#allocation15], %s9335_s2, %s9335_s2, %s9336_s16  }
  0xad   : > { %s7755_s26 = smov [#allocation17]   ;;  %s7308_s13 = scalar_lea.hbm %s7907_s20, 16 }
  0xae   : > { %s964_s17 = sshll.u32 %s7755_s26, 4  ;;  %p7309_p7 = scmp.ne.s32.totalorder %s7907_s20, %s7308_s13  ;;  %s965_s17 = int_to_ptr.vmem [resolvable:$true] %s964_s17 }
  0xaf   : > { %p7315_p3 = scmp.lt.u32.totalorder %s7308_s13, %s7907_s20 }
  0xb0   : > { %p7311_p4 = pnand %p7309_p7, %p8018_p8 }
  0xb2   : > { %p7312_p1 = pneg %p7311_p4 }
  0xb4   : > { %p7317_p9 = pnand %p7315_p3, %p7312_p1 }
  0xb6   : > { %7320 = shalt.err (!%p7317_p9)
}
  0xb7   : > { %s7321_s1 = scalar_lea.vmem %s965_s17, 16  ;;  %s7328_s0 = scalar_lea.vmem %s965_s17, 32 }
  0xb8   : > { %p7322_p10 = scmp.ne.s32.totalorder %s965_s17, %s7321_s1  ;;  %p7329_p13 = scmp.lt.s32.totalorder %s965_s17, %s965_s17 }
  0xb9   : > { %p7330_p0 = scmp.lt.s32.totalorder %s7328_s0, %s7321_s1 }
  0xba   : > { %p7324_p11 = pnand %p7322_p10, %p8018_p8 }
  0xbb   : > { %p7331_p2 = por %p7330_p0, %p7329_p13 }
  0xbc   : > { %p7325_p12 = pneg %p7324_p11 }
  0xbe   : > { %p7332_p5 = pnand %p7331_p2, %p7325_p12 }
  0xc0   : > { %7335 = shalt.err (!%p7332_p5)
}
  0xc1   : > { %6541 = dma.hbm_to_vmem [thread:$0]  (!%p8006_p6), %s7907_s20, 16, %s965_s17, [#allocation18]  }
  0xc2   : > { %s7756_s23 = smov [#allocation20]   ;;  %s7757_s13 = smov [#allocation23]  }
  0xc3   : > { %s985_s26 = sshll.u32 %s7756_s23, 4  ;;  %s1015_s2 = sshll.u32 %s7757_s13, 4  ;;  %s986_s26 = int_to_ptr.vmem [resolvable:$true] %s985_s26  ;;  %s1016_s2 = int_to_ptr.vmem [resolvable:$true] %s1015_s2 }
  0xc4   : > { %s7336_s16 = scalar_lea.hbm %s9483_s9, 1024 }
  0xc5   : > { %p7337_p7 = scmp.ne.s32.totalorder %s9483_s9, %s7336_s16  ;;  %p7343_p3 = scmp.lt.u32.totalorder %s7336_s16, %s9483_s9 }
  0xc7   : > { %p7339_p4 = pnand %p7337_p7, %p8018_p8 }
  0xc9   : > { %p7340_p1 = pneg %p7339_p4 }
  0xcb   : > { %p7345_p9 = pnand %p7343_p3, %p7340_p1 }
  0xcd   : > { %7348 = shalt.err (!%p7345_p9)
}
  0xce   : > { %s7349_s1 = scalar_lea.vmem %s986_s26, 1024  ;;  %p7357_p13 = scmp.lt.s32.totalorder %s986_s26, %s986_s26 }
  0xcf   : > { %p7350_p10 = scmp.ne.s32.totalorder %s986_s26, %s7349_s1  ;;  %p7358_p0 = scmp.lt.s32.totalorder %s7349_s1, %s7349_s1 }
  0xd1   : > { %p7352_p11 = pnand %p7350_p10, %p8018_p8  ;;  %p7359_p2 = por %p7358_p0, %p7357_p13 }
  0xd3   : > { %p7353_p12 = pneg %p7352_p11 }
  0xd5   : > { %p7360_p5 = pnand %p7359_p2, %p7353_p12 }
  0xd7   : > { %7363 = shalt.err (!%p7360_p5)
}
  0xd8   : > { %s9337_s0 = smov 64   ;;  %s9339_s16 = smov 4  }
  0xd9   : > { %6547 = dma.hbm_to_vmem [thread:$0]  (!%p8006_p6), %s9483_s9, 1024, %s986_s26, [#allocation21], %s9337_s0, %s9337_s0, %s9339_s16  }
  0xda   : > { %s7364_s17 = scalar_lea.hbm %s7937_s25, 4096 }
  0xdb   : > { %p7365_p7 = scmp.ne.s32.totalorder %s7937_s25, %s7364_s17  ;;  %p7371_p3 = scmp.lt.u32.totalorder %s7364_s17, %s7937_s25 }
  0xdd   : > { %p7367_p4 = pnand %p7365_p7, %p8018_p8 }
  0xdf   : > { %p7368_p1 = pneg %p7367_p4 }
  0xe1   : > { %p7373_p9 = pnand %p7371_p3, %p7368_p1 }
  0xe3   : > { %7376 = shalt.err (!%p7373_p9)
}
  0xe4   : > { %s7377_s23 = scalar_lea.vmem %s1016_s2, 4096  ;;  %p7385_p13 = scmp.lt.s32.totalorder %s1016_s2, %s1016_s2 }
  0xe5   : > { %p7378_p10 = scmp.ne.s32.totalorder %s1016_s2, %s7377_s23  ;;  %p7386_p0 = scmp.lt.s32.totalorder %s7377_s23, %s7377_s23 }
  0xe7   : > { %p7380_p11 = pnand %p7378_p10, %p8018_p8  ;;  %p7387_p2 = por %p7386_p0, %p7385_p13 }
  0xe9   : > { %p7381_p12 = pneg %p7380_p11 }
  0xeb   : > { %p7388_p5 = pnand %p7387_p2, %p7381_p12 }
  0xed   : > { %7391 = shalt.err (!%p7388_p5)
}
  0xee   : > { %s9489_s26 = smov 16   ;;  %s9490_s13 = smov 256  }
  0xef   : > { %6553 = dma.hbm_to_vmem [thread:$0]  (!%p8006_p6), %s7937_s25, 4096, %s1016_s2, [#allocation24], %s9490_s13, %s9490_s13, %s9489_s26  }
  0xf0   : > { %s7760_s1 = smov [#allocation7]   ;;  %s7761_s0 = smov [#allocation10]  }
  0xf1   : > { %s856_s17 = sshll.u32 %s7760_s1, 4  ;;  %s886_s16 = sshll.u32 %s7761_s0, 4  ;;  %s857_s17 = int_to_ptr.vmem [resolvable:$true] %s856_s17  ;;  %s887_s16 = int_to_ptr.vmem [resolvable:$true] %s886_s16 }
  0xf2   : > { %s7392_s23 = scalar_lea.hbm %s7832_s29, 4096 }
  0xf3   : > { %p7393_p7 = scmp.ne.s32.totalorder %s7832_s29, %s7392_s23  ;;  %p7399_p3 = scmp.lt.u32.totalorder %s7392_s23, %s7832_s29 }
  0xf5   : > { %p7395_p4 = pnand %p7393_p7, %p8018_p8 }
  0xf7   : > { %p7396_p1 = pneg %p7395_p4 }
  0xf9   : > { %p7401_p9 = pnand %p7399_p3, %p7396_p1 }
  0xfb   : > { %7404 = shalt.err (!%p7401_p9)
}
  0xfc   : > { %s7405_s3 = scalar_lea.vmem %s857_s17, 4096  ;;  %p7413_p13 = scmp.lt.s32.totalorder %s857_s17, %s857_s17 }
  0xfd   : > { %p7406_p10 = scmp.ne.s32.totalorder %s857_s17, %s7405_s3  ;;  %p7414_p0 = scmp.lt.s32.totalorder %s7405_s3, %s7405_s3 }
  0xff   : > { %p7408_p11 = pnand %p7406_p10, %p8018_p8  ;;  %p7415_p2 = por %p7414_p0, %p7413_p13 }
 0x101   : > { %p7409_p12 = pneg %p7408_p11 }
 0x103   : > { %p7416_p5 = pnand %p7415_p2, %p7409_p12 }
 0x105   : > { %7419 = shalt.err (!%p7416_p5)
}
 0x106   : > { %s9491_s2 = smov 4   ;;  %s9492_s0 = smov 64  }
 0x107   : > { %6520 = dma.hbm_to_vmem [thread:$0]  (!%p8006_p6), %s7832_s29, 4096, %s857_s17, [#allocation6], %s9492_s0, %s9492_s0, %s9491_s2  }
 0x108   : > { %s7420_s26 = scalar_lea.hbm %s7852_s19, 3072 }
 0x109   : > { %p7421_p7 = scmp.ne.s32.totalorder %s7852_s19, %s7420_s26  ;;  %p7427_p3 = scmp.lt.u32.totalorder %s7420_s26, %s7852_s19 }
 0x10b   : > { %p7423_p4 = pnand %p7421_p7, %p8018_p8 }
 0x10d   : > { %p7424_p1 = pneg %p7423_p4 }
 0x10f   : > { %p7429_p9 = pnand %p7427_p3, %p7424_p1 }
 0x111   : > { %7432 = shalt.err (!%p7429_p9)
}
 0x112   : > { %s7433_s3 = scalar_lea.vmem %s887_s16, 3072  ;;  %p7441_p13 = scmp.lt.s32.totalorder %s887_s16, %s887_s16 }
 0x113   : > { %p7434_p10 = scmp.ne.s32.totalorder %s887_s16, %s7433_s3  ;;  %p7442_p0 = scmp.lt.s32.totalorder %s7433_s3, %s7433_s3 }
 0x115   : > { %p7436_p11 = pnand %p7434_p10, %p8018_p8  ;;  %p7443_p2 = por %p7442_p0, %p7441_p13 }
 0x117   : > { %p7437_p12 = pneg %p7436_p11 }
 0x119   : > { %p7444_p5 = pnand %p7443_p2, %p7437_p12 }
 0x11b   : > { %7447 = shalt.err (!%p7444_p5)
}
 0x11c   : > { %s7762_s13 = smov 192   ;;  %s7763_s1 = smov 12  }
 0x11d   : > { %6526 = dma.hbm_to_vmem [thread:$0]  (!%p8006_p6), %s7852_s19, 3072, %s887_s16, [#allocation9], %s7762_s13, %s7762_s13, %s7763_s1  }
 0x11e   : > { %s7764_s17 = smov [#allocation13]   ;;  %s7765_s26 = smov [#allocation16]  }
 0x11f   : > { %s926_s23 = sshll.u32 %s7764_s17, 4  ;;  %s950_s6 = sshll.u32 %s7765_s26, 4  ;;  %s927_s23 = int_to_ptr.vmem [resolvable:$true] %s926_s23  ;;  %s951_s6 = int_to_ptr.vmem [resolvable:$true] %s950_s6 }
 0x120   : > { %s7448_s9 = scalar_lea.hbm %s9482_s4, 16 }
 0x121   : > { %p7449_p7 = scmp.ne.s32.totalorder %s9482_s4, %s7448_s9  ;;  %p7455_p3 = scmp.lt.u32.totalorder %s7448_s9, %s9482_s4 }
 0x123   : > { %p7451_p4 = pnand %p7449_p7, %p8018_p8 }
 0x125   : > { %p7452_p1 = pneg %p7451_p4 }
 0x127   : > { %p7457_p9 = pnand %p7455_p3, %p7452_p1 }
 0x129   : > { %7460 = shalt.err (!%p7457_p9)
}
 0x12a   : > { %s7461_s3 = scalar_lea.vmem %s927_s23, 16  ;;  %s7468_s16 = scalar_lea.vmem %s927_s23, 32 }
 0x12b   : > { %p7462_p10 = scmp.ne.s32.totalorder %s927_s23, %s7461_s3  ;;  %p7469_p13 = scmp.lt.s32.totalorder %s927_s23, %s927_s23 }
 0x12c   : > { %p7470_p0 = scmp.lt.s32.totalorder %s7468_s16, %s7461_s3 }
 0x12d   : > { %p7464_p11 = pnand %p7462_p10, %p8018_p8 }
 0x12e   : > { %p7471_p2 = por %p7470_p0, %p7469_p13 }
 0x12f   : > { %p7465_p12 = pneg %p7464_p11 }
 0x131   : > { %p7472_p5 = pnand %p7471_p2, %p7465_p12 }
 0x133   : > { %7475 = shalt.err (!%p7472_p5)
}
 0x134   : > { %6532 = dma.hbm_to_vmem [thread:$0]  (!%p8006_p6), %s9482_s4, 16, %s927_s23, [#allocation12]  }
 0x135   : > { %s7476_s9 = scalar_lea.hbm %s7897_s30, 32 }
 0x136   : > { %p7477_p7 = scmp.ne.s32.totalorder %s7897_s30, %s7476_s9  ;;  %p7483_p3 = scmp.lt.u32.totalorder %s7476_s9, %s7897_s30 }
 0x138   : > { %p7479_p4 = pnand %p7477_p7, %p8018_p8 }
 0x13a   : > { %p7480_p1 = pneg %p7479_p4 }
 0x13c   : > { %p7485_p9 = pnand %p7483_p3, %p7480_p1 }
 0x13e   : > { %7488 = shalt.err (!%p7485_p9)
}
 0x13f   : > { %s7489_s13 = scalar_lea.vmem %s951_s6, 32  ;;  %p7497_p13 = scmp.lt.s32.totalorder %s951_s6, %s951_s6 }
 0x140   : > { %p7490_p10 = scmp.ne.s32.totalorder %s951_s6, %s7489_s13  ;;  %p7498_p0 = scmp.lt.s32.totalorder %s7489_s13, %s7489_s13 }
 0x142   : > { %p7492_p11 = pnand %p7490_p10, %p8018_p8  ;;  %p7499_p2 = por %p7498_p0, %p7497_p13 }
 0x144   : > { %p7493_p12 = pneg %p7492_p11 }
 0x146   : > { %p7500_p5 = pnand %p7499_p2, %p7493_p12 }
 0x148   : > { %7503 = shalt.err (!%p7500_p5)
}
 0x149   : > { %6538 = dma.hbm_to_vmem [thread:$0]  (!%p8006_p6), %s7897_s30, 32, %s951_s6, [#allocation15]  }
 0x14a   : > { %s7766_s1 = smov [#allocation19]   ;;  %s7767_s23 = smov [#allocation22]  }
 0x14b   : > { %s975_s17 = sshll.u32 %s7766_s1, 4  ;;  %s999_s26 = sshll.u32 %s7767_s23, 4  ;;  %s976_s17 = int_to_ptr.vmem [resolvable:$true] %s975_s17  ;;  %s1000_s26 = int_to_ptr.vmem [resolvable:$true] %s999_s26 }
 0x14c   : > { %s7504_s3 = scalar_lea.hbm %s7912_s24, 16 }
 0x14d   : > { %p7505_p7 = scmp.ne.s32.totalorder %s7912_s24, %s7504_s3  ;;  %p7511_p3 = scmp.lt.u32.totalorder %s7504_s3, %s7912_s24 }
 0x14f   : > { %p7507_p4 = pnand %p7505_p7, %p8018_p8 }
 0x151   : > { %p7508_p1 = pneg %p7507_p4 }
 0x153   : > { %p7513_p9 = pnand %p7511_p3, %p7508_p1 }
 0x155   : > { %7516 = shalt.err (!%p7513_p9)
}
 0x156   : > { %s7517_s16 = scalar_lea.vmem %s976_s17, 16  ;;  %s7524_s6 = scalar_lea.vmem %s976_s17, 32 }
 0x157   : > { %p7518_p10 = scmp.ne.s32.totalorder %s976_s17, %s7517_s16  ;;  %p7525_p13 = scmp.lt.s32.totalorder %s976_s17, %s976_s17 }
 0x158   : > { %p7526_p0 = scmp.lt.s32.totalorder %s7524_s6, %s7517_s16 }
 0x159   : > { %p7520_p11 = pnand %p7518_p10, %p8018_p8 }
 0x15a   : > { %p7527_p2 = por %p7526_p0, %p7525_p13 }
 0x15b   : > { %p7521_p12 = pneg %p7520_p11 }
 0x15d   : > { %p7528_p5 = pnand %p7527_p2, %p7521_p12 }
 0x15f   : > { %7531 = shalt.err (!%p7528_p5)
}
 0x160   : > { %6544 = dma.hbm_to_vmem [thread:$0]  (!%p8006_p6), %s7912_s24, 16, %s976_s17, [#allocation18]  }
 0x161   : > { %s7532_s9 = scalar_lea.hbm %s9481_s12, 16 }
 0x162   : > { %p7533_p7 = scmp.ne.s32.totalorder %s9481_s12, %s7532_s9  ;;  %p7539_p3 = scmp.lt.u32.totalorder %s7532_s9, %s9481_s12 }
 0x164   : > { %p7535_p4 = pnand %p7533_p7, %p8018_p8 }
 0x166   : > { %p7536_p1 = pneg %p7535_p4 }
 0x168   : > { %p7541_p9 = pnand %p7539_p3, %p7536_p1 }
 0x16a   : > { %7544 = shalt.err (!%p7541_p9)
}
 0x16b   : > { %s7545_s13 = scalar_lea.vmem %s1000_s26, 16  ;;  %s7552_s1 = scalar_lea.vmem %s1000_s26, 32 }
 0x16c   : > { %p7546_p10 = scmp.ne.s32.totalorder %s1000_s26, %s7545_s13  ;;  %p7553_p13 = scmp.lt.s32.totalorder %s1000_s26, %s1000_s26 }
 0x16d   : > { %p7554_p0 = scmp.lt.s32.totalorder %s7552_s1, %s7545_s13 }
 0x16e   : > { %p7548_p11 = pnand %p7546_p10, %p8018_p8 }
 0x16f   : > { %p7555_p2 = por %p7554_p0, %p7553_p13 }
 0x170   : > { %p7549_p12 = pneg %p7548_p11 }
 0x172   : > { %p7556_p5 = pnand %p7555_p2, %p7549_p12 }
 0x174   : > { %7559 = shalt.err (!%p7556_p5)
}
 0x175   : > { %6550 = dma.hbm_to_vmem [thread:$0]  (!%p8006_p6), %s9481_s12, 16, %s1000_s26, [#allocation21]  }
 0x176   : > { %s7768_s17 = smov [#allocation25]   ;;  %s7560_s3 = scalar_lea.hbm %s9480_s14, 4096 }
 0x177   : > { %s1031_s23 = sshll.u32 %s7768_s17, 4  ;;  %p7561_p7 = scmp.ne.s32.totalorder %s9480_s14, %s7560_s3  ;;  %s1032_s23 = int_to_ptr.vmem [resolvable:$true] %s1031_s23 }
 0x178   : > { %p7567_p3 = scmp.lt.u32.totalorder %s7560_s3, %s9480_s14 }
 0x179   : > { %p7563_p4 = pnand %p7561_p7, %p8018_p8 }
 0x17b   : > { %p7564_p1 = pneg %p7563_p4 }
 0x17d   : > { %p7569_p9 = pnand %p7567_p3, %p7564_p1 }
 0x17f   : > { %7572 = shalt.err (!%p7569_p9)
}
 0x180   : > { %s7573_s16 = scalar_lea.vmem %s1032_s23, 4096  ;;  %p7581_p13 = scmp.lt.s32.totalorder %s1032_s23, %s1032_s23 }
 0x181   : > { %p7574_p10 = scmp.ne.s32.totalorder %s1032_s23, %s7573_s16  ;;  %p7582_p0 = scmp.lt.s32.totalorder %s7573_s16, %s7573_s16 }
 0x183   : > { %p7576_p11 = pnand %p7574_p10, %p8018_p8  ;;  %p7583_p2 = por %p7582_p0, %p7581_p13 }
 0x185   : > { %p7577_p12 = pneg %p7576_p11 }
 0x187   : > { %p7584_p5 = pnand %p7583_p2, %p7577_p12 }
 0x189   : > { %7587 = shalt.err (!%p7584_p5)
}
 0x18a   : > { %6556 = dma.hbm_to_vmem [thread:$0]  (!%p8006_p6), %s9480_s14, 4096, %s1032_s23, [#allocation24], %s9492_s0, %s9492_s0, %s9491_s2  }
 0x18b   : > { %s5854_s5 = sadd.s32 4294967294, %s7712_s15   ;;  %s8197_s28 = sadd.s32 1, %s7712_s15  }
 0x18c   : > { %s94_s26 = ssub.s32 %s7712_s15, %s8197_s28  ;;  %s97_s6 = sadd.s32 1, %s7708_s11 }
 0x18d   : > { %s9493_s9 = sld [smem:[#allocation36_spill]]  ;;  %p95_p8 = scmp.eq.s32.totalorder %s94_s26, 0 }
 0x18e   : > { %p104_p7 = scmp.ne.s32.totalorder %s7708_s11, %s7704_s10  ;;  %p105_p4 = scmp.eq.s32.totalorder %s7712_s15, 0 }
 0x18f   : > { %p110_p1 = scmp.ne.s32.totalorder %s7704_s10, %s7700_s7  ;;  %p9495_p9 = scmp.eq.s32.totalorder %s7990_s18, 0 }
 0x190   : > { %s8208_s13 = scalar_select %p95_p8, %s7708_s11, %s97_s6  }
 0x191   : > { %p8210_p3 = por %p105_p4, %p104_p7  ;;  %p8216_p6 = por %p9495_p9, %p110_p1 }
 0x192   : > { %p806_p10 = scmp.eq.s32.totalorder %s7990_s18, 1  ;;  %p812_p11 = scmp.eq.s32.totalorder %s5854_s5, 1 }
 0x193   : > { %s9496_s2 = scalar_select %p8216_p6, 1, 0 }
 0x194   : > { %p6579_p12 = scmp.lt.s32.totalorder %s7712_s15, 2  ;;  %s1054_s0 = sand.u32 1, %s7708_s11  }
 0x195   : > { %p8223_p13 = por %p806_p10, %p104_p7  ;;  %p8227_p0 = por %p812_p11, %p110_p1 }
 0x196   : > { %s5871_s3 = sshll.u32 %s1054_s0, 4  ;;  %s6166_s16 = sshll.u32 %s7712_s15, 8 }
 0x197   : > { %s9497_s17 = scalar_select %p8223_p13, 1, 0 }
 0x198   : > { %s9498_s23 = scalar_select %p8227_p0, 1, 0 }
 0x199   : > { %s8233_s26 = scalar_lea.hbm %s9493_s9, %s6166_s16  ;;  %s1058_s5 = scalar_lea.vmem [#allocation2], %s5871_s3 }
 0x19a   : > { %s1065_s6 = sshll.u32 %s1058_s5, 4  ;;  %p8239_p2 = pnand %p6579_p12, %p8210_p3  ;;  %s8235_s6 = int_to_ptr.vmem [resolvable:$true] %s1065_s6 }
 0x19b   : > { %s8243_s12 = scalar_lea.sflag [#allocation3], %s1054_s0  ;;  %s7588_s14 = scalar_lea.hbm %s8233_s26, 256 }
 0x19c   : > { %p7589_p5 = scmp.ne.s32.totalorder %s8233_s26, %s7588_s14  ;;  %p7590_p8 = pneg %p8239_p2 }
 0x19d   : > { %s7593_s3 = scalar_lea.hbm %s9493_s9, 512  ;;  %p7594_p1 = scmp.lt.u32.totalorder %s8233_s26, %s9493_s9 }
 0x19e   : > { %p7591_p7 = pnand %p7590_p8, %p7589_p5  ;;  %p7595_p9 = scmp.lt.u32.totalorder %s7593_s3, %s7588_s14 }
 0x19f   : > { %p7597_p3 = scmp.lt.u32.totalorder %s7588_s14, %s8233_s26 }
 0x1a0   : > { %p7592_p4 = pneg %p7591_p7  ;;  %p7596_p10 = por %p7595_p9, %p7594_p1 }
 0x1a2   : > { %p7598_p11 = por %p7597_p3, %p7596_p10 }
 0x1a4   : > { %p7599_p12 = pnand %p7598_p11, %p7592_p4 }
 0x1a6   : > { %7602 = shalt.err (!%p7599_p12)
}
 0x1a7   : > { %s7603_s1 = scalar_lea.vmem %s8235_s6, 256  ;;  %s7769_s0 = smov [#allocation2]  }
 0x1a8   : > { %p7604_p0 = scmp.ne.s32.totalorder %s8235_s6, %s7603_s1  ;;  %s7608_s16 = sshll.u32 %s7769_s0, 4  ;;  %s7609_s16 = int_to_ptr.vmem [resolvable:$false] %s7608_s16 }
 0x1a9   : > { %s7610_s5 = scalar_lea.vmem %s7609_s16, 512  ;;  %p7611_p5 = scmp.lt.s32.totalorder %s8235_s6, %s7609_s16 }
 0x1aa   : > { %p7606_p13 = pnand %p7604_p0, %p7590_p8  ;;  %p7612_p7 = scmp.lt.s32.totalorder %s7610_s5, %s7603_s1 }
 0x1ac   : > { %p7607_p6 = pneg %p7606_p13  ;;  %p7613_p1 = por %p7612_p7, %p7611_p5 }
 0x1ae   : > { %p7614_p9 = pnand %p7613_p1, %p7607_p6 }
 0x1b0   : > { %7617 = shalt.err (!%p7614_p9)
}
 0x1b1   : > { %s9500_s14 = smov 8   ;;  %s9501_s3 = smov 128  }
 0x1b2   : > { %6560 = dma.hbm_to_vmem [thread:$0]  (!%p8239_p2), %s8233_s26, 256, %s8235_s6, %s8243_s12, %s9501_s3, %s9501_s3, %s9500_s14  }
 0x1b3   : > { %p9502_p13 = scmp.ne.s32.totalorder %s9486_s22, 0 }
 0x1b5   : > { %1077 = sbr.rel (%p9502_p13) target bundleno = 7425 (0x1d01), region = 152 }
 0x1bc   : > { %s8273_s0 = sand.u32 1, %s7704_s10   ;;  %p9503_p6 = scmp.ne.s32.totalorder %s9496_s2, 0 }
 0x1bd   : > { %s5875_s1 = sshll.u32 %s8273_s0, 4  ;;  %s1080_s16 = scalar_lea.sflag [#allocation3], %s8273_s0 }
 0x1be   : > { %s8279_s4 = scalar_lea.vmem [#allocation2], %s5875_s1 }
 0x1bf   : > { %7663 = dma.done.wait (%p9503_p6), %s1080_s16, 256  }
 0x1c0   : > { %7665 = vsyncadd (%p9503_p6), %s1080_s16, 4294967040  ;;  %p9504_p0 = scmp.eq.s32.totalorder %s7990_s18, 0 }
 0x1c2   : > { %7667 = dma.done.wait (%p9504_p0), [#allocation6], 8192   ;;  %p9505_p2 = pmov %p9504_p0 }
 0x1c3   : > { %p9506_p8 = pmov %p9504_p0 }
 0x1c4   : > { %7669 = vsyncadd (%p9505_p2), [#allocation6], 4294959104 }
 0x1c5   : > { %7671 = dma.done.wait (%p9506_p8), [#allocation9], 3088   ;;  %p9507_p4 = pmov %p9504_p0 }
 0x1c6   : > { %p9508_p10 = pmov %p9504_p0 }
 0x1c7   : > { %7673 = vsyncadd (%p9507_p4), [#allocation9], 4294964208 }
 0x1c8   : > { %7675 = dma.done.wait (%p9508_p10), [#allocation12], 32   ;;  %p9509_p3 = pmov %p9504_p0 }
 0x1c9   : > { %p9510_p11 = pmov %p9504_p0 }
 0x1ca   : > { %7677 = vsyncadd (%p9509_p3), [#allocation12], 4294967264 }
 0x1cb   : > { %7679 = dma.done.wait (%p9510_p11), [#allocation15], 2080   ;;  %p9511_p12 = pmov %p9504_p0 }
 0x1cc   : > { %p9512_p5 = pmov %p9504_p0 }
 0x1cd   : > { %7681 = vsyncadd (%p9511_p12), [#allocation15], 4294965216 }
 0x1ce   : > { %7683 = dma.done.wait (%p9512_p5), [#allocation18], 32   ;;  %p9513_p7 = pmov %p9504_p0 }
 0x1cf   : > { %p9514_p1 = pmov %p9504_p0 }
 0x1d0   : > { %7685 = vsyncadd (%p9513_p7), [#allocation18], 4294967264 }
 0x1d1   : > { %7687 = dma.done.wait (%p9514_p1), [#allocation21], 1040   ;;  %p9515_p9 = pmov %p9504_p0 }
 0x1d2   : > { %p9516_p13 = pmov %p9504_p0 }
 0x1d3   : > { %7689 = vsyncadd (%p9515_p9), [#allocation21], 4294966256 }
 0x1d4   : > { %7691 = dma.done.wait (%p9516_p13), [#allocation24], 8192   ;;  %p9517_p6 = pmov %p9504_p0 }
 0x1d5   : > { %v1223_v0 = vld [vmem:[%s8279_s4] sm:$0xff]  ;;  %v1224_v1 = vld [vmem:[%s8279_s4 + $0x8] sm:$0xff]  ;;  %v9349_v36 = vmov 0   ;;  %s9518_s12 = sld [smem:[#allocation38_spill]]  ;;  %s9519_s22 = sld [smem:[#allocation39_spill]]  ;;  %vm7772_vm0 = vmmov 0  }
 0x1d6   : > { %7693 = vsyncadd (%p9517_p6), [#allocation24], 4294959104  ;;  %1227 = vadd.xlane.f32.xlu0 %v1223_v0  ;;  %v6828_v2 = vld [vmem:[#allocation5 + $0x4] ss:$16 sps:$4 sm:$0xff]   ;;  %v6830_v3 = vld [vmem:[#allocation5 + $0xc] ss:$16 sps:$4 sm:$0xff]   ;;  %1513 = vmatprep.mubr.bf16.mxu0 %v9349_v36 }
 0x1d7   : > { %v6832_v4 = vld [vmem:[#allocation5] ss:$16 sps:$4 sm:$0xff]   ;;  %v6833_v5 = vld [vmem:[#allocation5 + $0x8] ss:$16 sps:$4 sm:$0xff]   ;;  %v6834_v6 = vld [vmem:[#allocation5 + $0x24] ss:$16 sps:$4 sm:$0xff]   ;;  %1481 = vmatprep.subr.bf16.mxu0 %v6828_v2  ;;  %1524 = vmatprep.subr.bf16.mxu1 %v6830_v3 }
 0x1d8   : > { %v6836_v7 = vld [vmem:[#allocation5 + $0x2c] ss:$16 sps:$4 sm:$0xff]   ;;  %1482 = vmatpush1.bf16.msra.mxu0 %v6832_v4  ;;  %1525 = vmatpush1.bf16.msra.mxu1 %v6833_v5  ;;  %v6838_v16 = vld [vmem:[#allocation5 + $0x20] ss:$16 sps:$4 sm:$0xff]   ;;  %v6839_v17 = vld [vmem:[#allocation5 + $0x28] ss:$16 sps:$4 sm:$0xff]  }
 0x1d9   : > { %1483 = vmatprep.subr.bf16.mxu0 %v6834_v6  ;;  %1526 = vmatprep.subr.bf16.mxu1 %v6836_v7  ;;  %v6840_v18 = vld [vmem:[#allocation5 + $0x44] ss:$16 sps:$4 sm:$0xff]   ;;  %v6842_v19 = vld [vmem:[#allocation5 + $0x4c] ss:$16 sps:$4 sm:$0xff]   ;;  %v6844_v20 = vld [vmem:[#allocation5 + $0x40] ss:$16 sps:$4 sm:$0xff]  }
 0x1da   : > { %1229 = vadd.xlane.f32.xlu0 %v1224_v1  ;;  %v6845_v21 = vld [vmem:[#allocation5 + $0x48] ss:$16 sps:$4 sm:$0xff]   ;;  %v6846_v22 = vld [vmem:[#allocation5 + $0x64] ss:$16 sps:$4 sm:$0xff]   ;;  %v6848_v23 = vld [vmem:[#allocation5 + $0x6c] ss:$16 sps:$4 sm:$0xff]   ;;  %1556 = vmatprep.mubr.bf16.mxu1 %v9349_v36 }
 0x1db   : > { %v6850_v24 = vld [vmem:[#allocation5 + $0x60] ss:$16 sps:$4 sm:$0xff]   ;;  %v6851_v25 = vld [vmem:[#allocation5 + $0x68] ss:$16 sps:$4 sm:$0xff]   ;;  %v6852_v26 = vld [vmem:[#allocation5 + $0x84] ss:$16 sps:$4 sm:$0xff]   ;;  %6705 = vset.pattern.permute.xlu0 %v9349_v36 }
 0x1dc   : > { %1484 = vmatpush1.bf16.msra.mxu0 %v6838_v16  ;;  %1527 = vmatpush1.bf16.msra.mxu1 %v6839_v17  ;;  %v6854_v27 = vld [vmem:[#allocation5 + $0x8c] ss:$16 sps:$4 sm:$0xff]   ;;  %v6856_v28 = vld [vmem:[#allocation5 + $0x80] ss:$16 sps:$4 sm:$0xff]   ;;  %v6857_v29 = vld [vmem:[#allocation5 + $0x88] ss:$16 sps:$4 sm:$0xff]  }
 0x1dd   : > { %1485 = vmatprep.subr.bf16.mxu0 %v6840_v18  ;;  %1528 = vmatprep.subr.bf16.mxu1 %v6842_v19  ;;  %v6858_v30 = vld [vmem:[#allocation5 + $0xa4] ss:$16 sps:$4 sm:$0xff]   ;;  %v6860_v31 = vld [vmem:[#allocation5 + $0xac] ss:$16 sps:$4 sm:$0xff]   ;;  %v6862_v32 = vld [vmem:[#allocation5 + $0xa0] ss:$16 sps:$4 sm:$0xff]  }
 0x1de   : > { %v6863_v33 = vld [vmem:[#allocation5 + $0xa8] ss:$16 sps:$4 sm:$0xff]   ;;  %v6864_v34 = vld [vmem:[#allocation5 + $0xc4] ss:$16 sps:$4 sm:$0xff]   ;;  %v6866_v35 = vld [vmem:[#allocation5 + $0xcc] ss:$16 sps:$4 sm:$0xff]  }
 0x1df   : > { %v6868_v37 = vld [vmem:[#allocation5 + $0xc0] ss:$16 sps:$4 sm:$0xff]   ;;  %v6869_v38 = vld [vmem:[#allocation5 + $0xc8] ss:$16 sps:$4 sm:$0xff]   ;;  %v6870_v39 = vld [vmem:[#allocation5 + $0xe4] ss:$16 sps:$4 sm:$0xff]  }
 0x1e0   : > { %1486 = vmatpush1.bf16.msra.mxu0 %v6844_v20  ;;  %1529 = vmatpush1.bf16.msra.mxu1 %v6845_v21  ;;  %v6872_v40 = vld [vmem:[#allocation5 + $0xec] ss:$16 sps:$4 sm:$0xff]   ;;  %v6874_v41 = vld [vmem:[#allocation5 + $0xe0] ss:$16 sps:$4 sm:$0xff]   ;;  %v6875_v42 = vld [vmem:[#allocation5 + $0xe8] ss:$16 sps:$4 sm:$0xff]  }
 0x1e1   : > { %1487 = vmatprep.subr.bf16.mxu0 %v6846_v22  ;;  %1530 = vmatprep.subr.bf16.mxu1 %v6848_v23  ;;  %v5891_v51 = vld [vmem:[%s9518_s12] ss:$0 sm:$0xff]  ;;  %v6882_v2 = vld [vmem:[#allocation7 + $0x8] sm:$0xff]   ;;  %v6884_v4 = vld [vmem:[#allocation7 + $0x50] sm:$0xff]   ;;  %s9520_s2 = sld [smem:[#allocation40_spill]]  ;;  %s9528_s26 = sld [smem:[#allocation42_spill]] }
 0x1e2   : > { %v5892_v55 = vld [vmem:[%s9519_s22] ss:$0 sm:$0xff]  ;;  %v6883_v3 = vld [vmem:[#allocation7 + $0x88] sm:$0xff]   ;;  %v6885_v5 = vld [vmem:[#allocation7 + $0xd0] sm:$0xff]   ;;  %s9529_s6 = sld [smem:[#allocation43_spill]]  ;;  %s9530_s5 = sld [smem:[#allocation37_spill]] }
 0x1e3   : > { %v6876_v60 = vld [vmem:[#allocation7 + $0x40] sm:$0xff]   ;;  %v6886_v6 = vld [vmem:[#allocation7 + $0x10] sm:$0xff]   ;;  %v6896_v16 = vld [vmem:[#allocation7 + $0x68] sm:$0xff]   ;;  %s9531_s14 = sld [smem:[#allocation44_spill]]  ;;  %s9532_s3 = sld [smem:[#allocation48_spill]]  ;;  %vm2319_vm1 = vcmask 261120  }
 0x1e4   : > { %1488 = vmatpush1.bf16.msra.mxu0 %v6850_v24  ;;  %1531 = vmatpush1.bf16.msra.mxu1 %v6851_v25  ;;  %v6877_v61 = vld [vmem:[#allocation7 + $0xc0] sm:$0xff]   ;;  %v6887_v7 = vld [vmem:[#allocation7 + $0x90] sm:$0xff]   ;;  %v6897_v17 = vld [vmem:[#allocation7 + $0xe8] sm:$0xff]   ;;  %s9535_s16 = sld [smem:[#allocation47_spill]]  ;;  %s7789_s12 = smov 96  }
 0x1e5   : > { %1489 = vmatprep.subr.bf16.mxu0 %v6852_v26  ;;  %1532 = vmatprep.subr.bf16.mxu1 %v6854_v27  ;;  %v6878_v62 = vld [vmem:[#allocation7] sm:$0xff]   ;;  %v6898_v18 = vld [vmem:[#allocation7 + $0x28] sm:$0xff]   ;;  %v6900_v20 = vld [vmem:[#allocation7 + $0x70] sm:$0xff]   ;;  %s7790_s22 = smov 64   ;;  %p9669_p2 = scmp.ne.s32.totalorder %s9497_s17, 0 }
 0x1e6   : > { %v6879_v63 = vld [vmem:[#allocation7 + $0x80] sm:$0xff]   ;;  %v6899_v19 = vld [vmem:[#allocation7 + $0xa8] sm:$0xff]   ;;  %v6901_v21 = vld [vmem:[#allocation7 + $0xf0] sm:$0xff]  }
 0x1e7   : > { %v6902_v22 = vld [vmem:[#allocation7 + $0x30] sm:$0xff]   ;;  %v6904_v24 = vld [vmem:[#allocation7 + $0x78] sm:$0xff]  }
 0x1e8   : > { %1490 = vmatpush1.bf16.msra.mxu0 %v6856_v28  ;;  %1533 = vmatpush1.bf16.msra.mxu1 %v6857_v29  ;;  %v6903_v23 = vld [vmem:[#allocation7 + $0xb0] sm:$0xff]   ;;  %v6905_v25 = vld [vmem:[#allocation7 + $0xf8] sm:$0xff]   ;;  %v1301_v28 = vlaneseq }
 0x1e9   : > { %1491 = vmatprep.subr.bf16.mxu0 %v6858_v30  ;;  %1534 = vmatprep.subr.bf16.mxu1 %v6860_v31  ;;  %v6906_v26 = vld [vmem:[#allocation7 + $0x38] sm:$0xff]  }
 0x1ea   : > { %v6907_v27 = vld [vmem:[#allocation7 + $0xb8] sm:$0xff]   ;;  %v8331_v29 = vshrl.u32 %v1301_v28, 7 }
 0x1ec   : > { %1492 = vmatpush1.bf16.msra.mxu0 %v6862_v32  ;;  %1535 = vmatpush1.bf16.msra.mxu1 %v6863_v33  ;;  %9521 = vst [vmem:[#allocation61_spill] sm:$0xff] %v8331_v29  ;;  %v8334_v30 = vsub.s32 0, %v8331_v29  ;;  %v8337_v31 = vsub.s32 2, %v8331_v29  ;;  %v1299_v32 = vld [vmem:[%s9520_s2] sm:$0xf]  ;;  %v8341_v33 = vsub.s32 1, %v8331_v29 }
 0x1ed   : > { %1493 = vmatprep.subr.bf16.mxu0 %v6864_v34  ;;  %1536 = vmatprep.subr.bf16.mxu1 %v6866_v35  ;;  %v8344_v34 = vsub.s32 3, %v8331_v29  ;;  %s9574_s2 = sld [smem:[#allocation45_spill]] }
 0x1ee   : > { %9522 = vst [vmem:[#allocation62_spill] sm:$0xff] %v8334_v30  ;;  %9523 = vst [vmem:[#allocation63_spill] sm:$0xff] %v8337_v31  ;;  %v1304_v35 = vrot.slane %v1299_v32, %v8334_v30 }
 0x1ef   : > { %9524 = vst [vmem:[#allocation64_spill] sm:$0xff] %v8341_v33  ;;  %9525 = vst [vmem:[#allocation65_spill] sm:$0xff] %v8344_v34 }
 0x1f0   : > { %1494 = vmatpush1.bf16.msra.mxu0 %v6868_v37  ;;  %1537 = vmatpush1.bf16.msra.mxu1 %v6869_v38  ;;  %v1312_v37 = vrot.slane %v1299_v32, %v8337_v31  ;;  %v1308_v38 = vrot.slane %v1299_v32, %v8341_v33 }
 0x1f1   : > { %1495 = vmatprep.subr.bf16.mxu0 %v6870_v39  ;;  %1538 = vmatprep.subr.bf16.mxu1 %v6872_v40  ;;  %v1316_v39 = vrot.slane %v1299_v32, %v8344_v34 }
 0x1f4   : > { %1496 = vmatpush1.bf16.msra.mxu0 %v6874_v41  ;;  %1539 = vmatpush1.bf16.msra.mxu1 %v6875_v42 }
 0x1f5   : > { %6168 = vmatprep.subr.bf16.mxu0 %v6876_v60  ;;  %6190 = vmatprep.subr.bf16.mxu1 %v6877_v61 }
 0x263   : > { %v1228_v8 = vpop.xlane.xlu0 %1227 }
 0x264   : > { %v1232_v9 = vmul.f32 0.0078125, %v1228_v8  ;;  %v6888_v8 = vld [vmem:[#allocation7 + $0x58] sm:$0xff]  }
 0x266   : > { %v8315_v10 = vsub.f32 %v1223_v0, %v1232_v9  ;;  %v6880_v0 = vld [vmem:[#allocation7 + $0x48] sm:$0xff]   ;;  %v6889_v9 = vld [vmem:[#allocation7 + $0xd8] sm:$0xff]  }
 0x267   : > { %v1230_v11 = vpop.xlane.xlu0 %1229 }
 0x268   : > { %v1233_v12 = vmul.f32 0.0078125, %v1230_v11  ;;  %v1236_v13 = vmul.f32 %v8315_v10, %v8315_v10  ;;  %v6891_v11 = vld [vmem:[#allocation7 + $0x98] sm:$0xff]  }
 0x26a   : > { %1238 = vadd.xlane.f32.xlu1 %v1236_v13  ;;  %v8319_v14 = vsub.f32 %v1224_v1, %v1233_v12  ;;  %v6881_v1 = vld [vmem:[#allocation7 + $0xc8] sm:$0xff]   ;;  %v6892_v12 = vld [vmem:[#allocation7 + $0x60] sm:$0xff]  }
 0x26b   : > { %v6893_v13 = vld [vmem:[#allocation7 + $0xe0] sm:$0xff]  }
 0x26c   : > { %v1237_v15 = vmul.f32 %v8319_v14, %v8319_v14 }
 0x26e   : > { %1240 = vadd.xlane.f32.xlu1 %v1237_v15  ;;  %v6895_v15 = vld [vmem:[#allocation7 + $0xa0] sm:$0xff]  }
 0x2f7   : > { %v1239_v43 = vpop.xlane.xlu1 %1238 }
 0x2f8   : > { %v1242_v44 = vmul.f32 0.0078125, %v1239_v43 }
 0x2fa   : > { %v1244_v45 = vadd.f32 1e-05, %v1242_v44 }
 0x2fb   : > { %v1241_v46 = vpop.xlane.xlu1 %1240 }
 0x2fc   : > { %7060 = vrsqrt.f32 %v1244_v45  ;;  %v1243_v47 = vmul.f32 0.0078125, %v1241_v46 }
 0x2fe   : > { %v1245_v48 = vadd.f32 1e-05, %v1243_v47 }
 0x300   : > { %7062 = vrsqrt.f32 %v1245_v48 }
 0x306   : > { %v7061_v49 = vpop.eup %7060 }
 0x307   : > { %v1248_v50 = vmul.f32 %v7061_v49, %v8315_v10  ;;  %v6890_v10 = vld [vmem:[#allocation7 + $0x18] sm:$0xff]  }
 0x309   : > { %v1256_v54 = vmul.f32 %v5891_v51, %v1248_v50 }
 0x30a   : > { %v7063_v52 = vpop.eup %7062 }
 0x30b   : > { %v1249_v53 = vmul.f32 %v7063_v52, %v8319_v14  ;;  %v1264_v57 = vadd.f32 %v5892_v55, %v1256_v54  ;;  %v6894_v14 = vld [vmem:[#allocation7 + $0x20] sm:$0xff]  }
 0x30d   : > { %v1257_v56 = vmul.f32 %v5891_v51, %v1249_v53 }
 0x30f   : > { %v1265_v58 = vadd.f32 %v5892_v55, %v1257_v56 }
 0x311   : > { %v1298_v59 = vpack.c.bf16 %v1265_v58, %v1264_v57 }
 0x313   : > { %1514 = vmatmul.mubr.bf16.vlgmr.msra.gmra.mrb[0].mxu0 %v1298_v59  ;;  %1557 = vmatmul.mubr.bf16.vlgmr.msra.gmra.mrb[0].mxu1 %v1298_v59 }
 0x314   : > { %6169 = vmatpush3.bf16.msra.mxu0 %v6878_v62  ;;  %6191 = vmatpush3.bf16.msra.mxu1 %v6879_v63 }
 0x315   : > { %6170 = vmatprep.subr.bf16.mxu0 %v6880_v0  ;;  %6192 = vmatprep.subr.bf16.mxu1 %v6881_v1 }
 0x318   : > { %6171 = vmatpush3.bf16.msra.mxu0 %v6882_v2  ;;  %6193 = vmatpush3.bf16.msra.mxu1 %v6883_v3 }
 0x319   : > { %6172 = vmatprep.subr.bf16.mxu0 %v6884_v4  ;;  %6194 = vmatprep.subr.bf16.mxu1 %v6885_v5 }
 0x31c   : > { %6173 = vmatpush3.bf16.msra.mxu0 %v6886_v6  ;;  %6195 = vmatpush3.bf16.msra.mxu1 %v6887_v7 }
 0x31d   : > { %6174 = vmatprep.subr.bf16.mxu0 %v6888_v8  ;;  %6196 = vmatprep.subr.bf16.mxu1 %v6889_v9 }
 0x320   : > { %6175 = vmatpush3.bf16.msra.mxu0 %v6890_v10  ;;  %6197 = vmatpush3.bf16.msra.mxu1 %v6891_v11 }
 0x321   : > { %6176 = vmatprep.subr.bf16.mxu0 %v6892_v12  ;;  %6198 = vmatprep.subr.bf16.mxu1 %v6893_v13 }
 0x324   : > { %6177 = vmatpush3.bf16.msra.mxu0 %v6894_v14  ;;  %6199 = vmatpush3.bf16.msra.mxu1 %v6895_v15 }
 0x325   : > { %6178 = vmatprep.subr.bf16.mxu0 %v6896_v16  ;;  %6200 = vmatprep.subr.bf16.mxu1 %v6897_v17 }
 0x328   : > { %6179 = vmatpush3.bf16.msra.mxu0 %v6898_v18  ;;  %6201 = vmatpush3.bf16.msra.mxu1 %v6899_v19 }
 0x329   : > { %6180 = vmatprep.subr.bf16.mxu0 %v6900_v20  ;;  %6202 = vmatprep.subr.bf16.mxu1 %v6901_v21 }
 0x32c   : > { %6181 = vmatpush3.bf16.msra.mxu0 %v6902_v22  ;;  %6203 = vmatpush3.bf16.msra.mxu1 %v6903_v23 }
 0x32d   : > { %6182 = vmatprep.subr.bf16.mxu0 %v6904_v24  ;;  %6204 = vmatprep.subr.bf16.mxu1 %v6905_v25 }
 0x330   : > { %6183 = vmatpush3.bf16.msra.mxu0 %v6906_v26  ;;  %6205 = vmatpush3.bf16.msra.mxu1 %v6907_v27 }
 0x3e6   : > { %v1515_v40 = vpop.f32.mrb[0].mxu0  ;;  %v1558_v41 = vpop.f32.mrb[0].mxu1 }
 0x3e7   : > { %v1516_v42 = vadd.f32 %v1515_v40, %v1304_v35  ;;  %v1559_v43 = vadd.f32 %v1558_v41, %v1312_v37  ;;  %v1517_v44 = vpop.f32.mrb[1].mxu0  ;;  %v1560_v45 = vpop.f32.mrb[1].mxu1 }
 0x3e8   : > { %v1518_v46 = vadd.f32 %v1517_v44, %v1308_v38  ;;  %v8350_v47 = vadd.f32 %v1560_v45, %v1316_v39  ;;  %v1519_v48 = vpop.f32.mrb[2].mxu0  ;;  %v1562_v49 = vpop.f32.mrb[2].mxu1 }
 0x3e9   : > { %v5925_v50 = vmul.f32 -1.442695, %v1516_v42  ;;  %v5927_v51 = vmul.f32 -1.442695, %v1559_v43  ;;  %v1520_v52 = vadd.f32 %v1519_v48, %v1304_v35  ;;  %v1563_v53 = vadd.f32 %v1562_v49, %v1312_v37  ;;  %v1521_v54 = vpop.f32.mrb[3].mxu0  ;;  %v1564_v55 = vpop.f32.mrb[3].mxu1 }
 0x3ea   : > { %v5926_v56 = vmul.f32 -1.442695, %v1518_v46  ;;  %v5928_v57 = vmul.f32 -1.442695, %v8350_v47  ;;  %v1522_v58 = vadd.f32 %v1521_v54, %v1308_v38  ;;  %v1565_v59 = vadd.f32 %v1564_v55, %v1316_v39 }
 0x3eb   : > { %7064 = vpow2.f32 %v5925_v50  ;;  %v5929_v60 = vmul.f32 -1.442695, %v1520_v52  ;;  %v5931_v61 = vmul.f32 -1.442695, %v1563_v53 }
 0x3ec   : > { %7066 = vpow2.f32 %v5927_v51  ;;  %v5930_v62 = vmul.f32 -1.442695, %v1522_v58  ;;  %v5932_v63 = vmul.f32 -1.442695, %v1565_v59 }
 0x3ed   : > { %7068 = vpow2.f32 %v5926_v56 }
 0x3ee   : > { %7070 = vpow2.f32 %v5928_v57 }
 0x3ef   : > { %7072 = vpow2.f32 %v5929_v60 }
 0x3f0   : > { %7074 = vpow2.f32 %v5931_v61 }
 0x3f1   : > { %7076 = vpow2.f32 %v5930_v62  ;;  %v7192_v62 = vld [vmem:[%s8279_s4] sm:$0xff] }
 0x3f2   : > { %7078 = vpow2.f32 %v5932_v63 }
 0x3f5   : > { %v7065_v0 = vpop.eup %7064 }
 0x3f6   : > { %v7067_v1 = vpop.eup %7066  ;;  %v1591_v2 = vadd.f32 1.0, %v7065_v0  ;;  %v7193_v0 = vld [vmem:[%s8279_s4 + $0x8] sm:$0xff]  ;;  %s7788_s4 = smov 32  }
 0x3f7   : > { %v7069_v3 = vpop.eup %7068  ;;  %v1593_v4 = vadd.f32 1.0, %v7067_v1 }
 0x3f8   : > { %v7071_v5 = vpop.eup %7070  ;;  %7080 = vrcp.f32 %v1591_v2  ;;  %v1592_v6 = vadd.f32 1.0, %v7069_v3  ;;  %v6908_v2 = vld [vmem:[#allocation10] ss:$12 sps:$4 sm:$0xff]   ;;  %v6910_v3 = vld [vmem:[#allocation10 + $0x4] ss:$12 sps:$4 sm:$0xff]  }
 0x3f9   : > { %v7073_v7 = vpop.eup %7072  ;;  %7082 = vrcp.f32 %v1593_v4  ;;  %v1594_v8 = vadd.f32 1.0, %v7071_v5  ;;  %v9384_v4 = vmov 0.0   ;;  %v6911_v5 = vld [vmem:[#allocation10 + $0x8] ss:$12 sps:$4 sm:$0xff]   ;;  %2194 = vmatprep.subr.bf16.mxu0 %v6910_v3 }
 0x3fa   : > { %v7075_v9 = vpop.eup %7074  ;;  %7084 = vrcp.f32 %v1592_v6  ;;  %v1595_v10 = vadd.f32 1.0, %v7073_v7  ;;  %6310 = vmatprep.subr.bf16.mxu1 %v9384_v4  ;;  %v6914_v6 = vld [vmem:[#allocation10 + $0x1c] ss:$12 sps:$4 sm:$0xff]   ;;  %v6912_v7 = vld [vmem:[#allocation10 + $0x18] ss:$12 sps:$4 sm:$0xff]  }
 0x3fb   : > { %v7077_v11 = vpop.eup %7076  ;;  %7086 = vrcp.f32 %v1594_v8  ;;  %v1597_v12 = vadd.f32 1.0, %v7075_v9  ;;  %v6915_v8 = vld [vmem:[#allocation10 + $0x20] ss:$12 sps:$4 sm:$0xff]  }
 0x3fc   : > { %v7079_v13 = vpop.eup %7078  ;;  %7088 = vrcp.f32 %v1595_v10  ;;  %v1596_v14 = vadd.f32 1.0, %v7077_v11 }
 0x3fd   : > { %7090 = vrcp.f32 %v1597_v12  ;;  %v1598_v15 = vadd.f32 1.0, %v7079_v13 }
 0x3fe   : > { %7092 = vrcp.f32 %v1596_v14 }
 0x3ff   : > { %7094 = vrcp.f32 %v1598_v15 }
 0x402   : > { %v7081_v16 = vpop.eup %7080 }
 0x403   : > { %v7083_v17 = vpop.eup %7082  ;;  %v1615_v22 = vmul.f32 %v7081_v16, %v1516_v42 }
 0x404   : > { %v7085_v18 = vpop.eup %7084  ;;  %v1617_v25 = vmul.f32 %v7083_v17, %v1559_v43  ;;  %v5933_v43 = vld [vmem:[#allocation8] ss:$0 sm:$0xff]  ;;  %v6918_v17 = vld [vmem:[#allocation10 + $0x34] ss:$12 sps:$4 sm:$0xff]  }
 0x405   : > { %v7087_v19 = vpop.eup %7086  ;;  %v1616_v32 = vmul.f32 %v7085_v18, %v1518_v46  ;;  %v6916_v18 = vld [vmem:[#allocation10 + $0x30] ss:$12 sps:$4 sm:$0xff]  }
 0x406   : > { %v7089_v20 = vpop.eup %7088  ;;  %v1618_v38 = vmul.f32 %v7087_v19, %v8350_v47  ;;  %v6919_v19 = vld [vmem:[#allocation10 + $0x38] ss:$12 sps:$4 sm:$0xff]  }
 0x407   : > { %v7091_v21 = vpop.eup %7090  ;;  %v1619_v23 = vmul.f32 %v7089_v20, %v1520_v52  ;;  %v6922_v20 = vld [vmem:[#allocation10 + $0x4c] ss:$12 sps:$4 sm:$0xff]  }
 0x408   : > { %v7093_v24 = vpop.eup %7092  ;;  %v1621_v26 = vmul.f32 %v7091_v21, %v1563_v53  ;;  %v6920_v21 = vld [vmem:[#allocation10 + $0x48] ss:$12 sps:$4 sm:$0xff]  }
 0x409   : > { %v7095_v27 = vpop.eup %7094  ;;  %v1687_v35 = vpack.c.bf16 %v1619_v23, %v1615_v22  ;;  %v1620_v37 = vmul.f32 %v7093_v24, %v1522_v58  ;;  %v6923_v22 = vld [vmem:[#allocation10 + $0x50] ss:$12 sps:$4 sm:$0xff]   ;;  %v6924_v24 = vld [vmem:[#allocation10 + $0x60] ss:$12 sps:$4 sm:$0xff]  }
 0x40a   : > { %v1689_v39 = vpack.c.bf16 %v1621_v26, %v1617_v25  ;;  %v1622_v40 = vmul.f32 %v7095_v27, %v1565_v59  ;;  %v6926_v23 = vld [vmem:[#allocation10 + $0x64] ss:$12 sps:$4 sm:$0xff]   ;;  %v6927_v25 = vld [vmem:[#allocation10 + $0x68] ss:$12 sps:$4 sm:$0xff]  }
 0x40b   : > { %v1688_v41 = vpack.c.bf16 %v1620_v37, %v1616_v32  ;;  %v6930_v26 = vld [vmem:[#allocation10 + $0x7c] ss:$12 sps:$4 sm:$0xff]   ;;  %v6928_v27 = vld [vmem:[#allocation10 + $0x78] ss:$12 sps:$4 sm:$0xff]   ;;  %v6931_v32 = vld [vmem:[#allocation10 + $0x80] ss:$12 sps:$4 sm:$0xff]  }
 0x40c   : > { %v1690_v44 = vpack.c.bf16 %v1622_v40, %v1618_v38  ;;  %v6932_v37 = vld [vmem:[#allocation10 + $0x90] ss:$12 sps:$4 sm:$0xff]   ;;  %v6935_v38 = vld [vmem:[#allocation10 + $0x98] ss:$12 sps:$4 sm:$0xff]   ;;  %v6936_v40 = vld [vmem:[#allocation10 + $0xa8] ss:$12 sps:$4 sm:$0xff]  }
 0x40d   : > { %1922 = vmatprep.mubr.bf16.mxu0 %v1688_v41  ;;  %v6939_v41 = vld [vmem:[#allocation10 + $0xb0] ss:$12 sps:$4 sm:$0xff]  }
 0x40e   : > { %1963 = vmatprep.mubr.bf16.mxu1 %v1690_v44  ;;  %1923 = vmatmul.mubr.bf16.vlgmr.msra.gmra.mrb[4].mxu0 %v1687_v35  ;;  %v6934_v35 = vld [vmem:[#allocation10 + $0x94] ss:$12 sps:$4 sm:$0xff]  }
 0x40f   : > { %1964 = vmatmul.mubr.bf16.vlgmr.msra.gmra.mrb[4].mxu1 %v1689_v39  ;;  %2226 = vmatprep.mubr.bf16.mxu0 %v9349_v36  ;;  %v6938_v39 = vld [vmem:[#allocation10 + $0xac] ss:$12 sps:$4 sm:$0xff]  }
 0x410   : > { %2195 = vmatpush1.bf16.msra.mxu0 %v6908_v2  ;;  %6311 = vmatpush3.bf16.msra.mxu1 %v6911_v5  ;;  %v2049_v2 = vld [vmem:[%s9531_s14] sm:$0x7]  ;;  %s9663_s14 = sld [smem:[#allocation54_spill]] }
 0x411   : > { %2196 = vmatprep.subr.bf16.mxu0 %v6914_v6  ;;  %6312 = vmatprep.subr.bf16.mxu1 %v9384_v4  ;;  %v2054_v3 = vrot.slane %v2049_v2, %v8334_v30  ;;  %v8394_v5 = vld [vmem:[%s9532_s3] sm:$0xf]  ;;  %v2062_v6 = vrot.slane %v2049_v2, %v8337_v31 }
 0x412   : > { %6326 = vmatprep.mubr.msk.bf16.mxu1 %vm7772_vm0, %v9384_v4 }
 0x414   : > { %2197 = vmatpush1.bf16.msra.mxu0 %v6912_v7  ;;  %6313 = vmatpush3.bf16.msra.mxu1 %v6915_v8 }
 0x415   : > { %6314 = vmatprep.subr.bf16.mxu1 %v9384_v4  ;;  %2198 = vmatprep.subr.bf16.mxu0 %v6918_v17 }
 0x418   : > { %2199 = vmatpush1.bf16.msra.mxu0 %v6916_v18  ;;  %6315 = vmatpush3.bf16.msra.mxu1 %v6919_v19 }
 0x419   : > { %6316 = vmatprep.subr.bf16.mxu1 %v9384_v4  ;;  %2200 = vmatprep.subr.bf16.mxu0 %v6922_v20 }
 0x41c   : > { %2201 = vmatpush1.bf16.msra.mxu0 %v6920_v21  ;;  %6317 = vmatpush3.bf16.msra.mxu1 %v6923_v22 }
 0x41d   : > { %2202 = vmatprep.subr.bf16.mxu0 %v6926_v23  ;;  %6318 = vmatprep.subr.bf16.mxu1 %v9384_v4 }
 0x420   : > { %2203 = vmatpush1.bf16.msra.mxu0 %v6924_v24  ;;  %6319 = vmatpush3.bf16.msra.mxu1 %v6927_v25 }
 0x421   : > { %2204 = vmatprep.subr.bf16.mxu0 %v6930_v26  ;;  %6320 = vmatprep.subr.bf16.mxu1 %v9384_v4  ;;  %v8409_v26 = vld [vmem:[%s9535_s16] sm:$0xf] }
 0x424   : > { %2205 = vmatpush1.bf16.msra.mxu0 %v6928_v27  ;;  %6321 = vmatpush3.bf16.msra.mxu1 %v6931_v32 }
 0x425   : > { %2206 = vmatprep.subr.bf16.mxu0 %v6934_v35  ;;  %6322 = vmatprep.subr.bf16.mxu1 %v9384_v4 }
 0x428   : > { %2207 = vmatpush1.bf16.msra.mxu0 %v6932_v37  ;;  %6323 = vmatpush3.bf16.msra.mxu1 %v6935_v38  ;;  %v2306_v37 = vrot.slane %v8409_v26, %v8334_v30 }
 0x429   : > { %2208 = vmatprep.subr.bf16.mxu0 %v6938_v39  ;;  %6324 = vmatprep.subr.bf16.mxu1 %v9384_v4 }
 0x42c   : > { %2209 = vmatpush1.bf16.msra.mxu0 %v6936_v40  ;;  %6325 = vmatpush3.bf16.msra.mxu1 %v6939_v41 }
 0x42d   : > { %6330 = vmatprep.subr.bf16.mxu0 %v9384_v4  ;;  %6336 = vmatprep.subr.bf16.mxu1 %v9384_v4 }
 0x4e1   : > { %v6184_v42 = vpop.f32.mrb[4].mxu0 }
 0x4e2   : > { %v6206_v45 = vpop.f32.mrb[4].mxu1  ;;  %v6185_v48 = vpop.f32.mrb[5].mxu0 }
 0x4e3   : > { %v6186_v46 = vadd.f32 %v6185_v48, %v6184_v42  ;;  %v6207_v49 = vpop.f32.mrb[5].mxu1  ;;  %v6187_v50 = vpop.f32.mrb[6].mxu0 }
 0x4e4   : > { %v6208_v47 = vadd.f32 %v6207_v49, %v6206_v45  ;;  %v6209_v51 = vpop.f32.mrb[6].mxu1  ;;  %v6188_v52 = vpop.f32.mrb[7].mxu0 }
 0x4e5   : > { %v1925_v53 = vadd.f32 %v6186_v46, %v5933_v43  ;;  %v6189_v54 = vadd.f32 %v6188_v52, %v6187_v50  ;;  %v6210_v55 = vpop.f32.mrb[7].mxu1  ;;  %v5966_v50 = vld [vmem:[%s9528_s26] ss:$0 sm:$0xff]  ;;  %s9653_s26 = sld [smem:[#allocation46_spill]] }
 0x4e6   : > { %v6211_v56 = vadd.f32 %v6210_v55, %v6209_v51 }
 0x4e7   : > { %v1966_v57 = vadd.f32 %v6208_v47, %v1925_v53  ;;  %v1928_v58 = vadd.f32 %v6189_v54, %v5933_v43  ;;  %v5967_v54 = vld [vmem:[%s9529_s6] ss:$0 sm:$0xff]  ;;  %s9659_s6 = sld [smem:[#allocation51_spill]] }
 0x4e9   : > { %v1972_v59 = vmul.f32 0.5, %v1966_v57  ;;  %v1969_v60 = vadd.f32 %v6211_v56, %v1928_v58 }
 0x4eb   : > { %v1973_v61 = vmul.f32 0.5, %v1969_v60  ;;  %v8356_v63 = vadd.f32 %v7192_v62, %v1972_v59  ;;  %v2278_v59 = vld [vmem:[%s9530_s5] sm:$0xff]  ;;  %v2279_v60 = vld [vmem:[%s9530_s5 + $0x8] sm:$0xff] }
 0x4ed   : > { %9526 = vst [vmem:[#allocation66_spill] sm:$0xff] %v8356_v63  ;;  %1978 = vadd.xlane.f32.xlu0 %v8356_v63  ;;  %v8360_v1 = vadd.f32 %v7193_v0, %v1973_v61  ;;  %v8385_v61 = vpack.c.bf16 %v2279_v60, %v2278_v59  ;;  %v9379_v0 = vmov 1   ;;  %v9351_v59 = vmov 13  }
 0x4ee   : > { %6706 = vset.pattern.permute.xlu1 %v9379_v0  ;;  %v9363_v60 = vmov 11  }
 0x4ef   : > { %9527 = vst [vmem:[#allocation67_spill] sm:$0xff] %v8360_v1  ;;  %1980 = vadd.xlane.f32.xlu1 %v8360_v1  ;;  %9533 = vst [vmem:[#allocation68_spill] sm:$0xff] %v8385_v61  ;;  %v2324_v62 = vsel %vm2319_vm1, %v8385_v61, 0 }
 0x57a   : > { %v1979_v9 = vpop.xlane.xlu0 %1978 }
 0x57b   : > { %v1982_v10 = vmul.f32 0.0078125, %v1979_v9  ;;  %v2058_v9 = vrot.slane %v2049_v2, %v8341_v33  ;;  %v9357_v2 = vmov 14  }
 0x57c   : > { %v1981_v11 = vpop.xlane.xlu1 %1980 }
 0x57d   : > { %v1983_v12 = vmul.f32 0.0078125, %v1981_v11  ;;  %v1984_v13 = vsub.f32 %v8356_v63, %v1982_v10 }
 0x57f   : > { %v1986_v14 = vmul.f32 %v1984_v13, %v1984_v13  ;;  %v1985_v15 = vsub.f32 %v8360_v1, %v1983_v12 }
 0x581   : > { %1988 = vadd.xlane.f32.xlu0 %v1986_v14  ;;  %v1987_v16 = vmul.f32 %v1985_v15, %v1985_v15 }
 0x583   : > { %1990 = vadd.xlane.f32.xlu1 %v1987_v16 }
 0x60e   : > { %v1989_v44 = vpop.xlane.xlu0 %1988 }
 0x60f   : > { %v1992_v42 = vmul.f32 0.0078125, %v1989_v44 }
 0x610   : > { %v1991_v45 = vpop.xlane.xlu1 %1990 }
 0x611   : > { %v1994_v43 = vadd.f32 1e-05, %v1992_v42  ;;  %v1993_v48 = vmul.f32 0.0078125, %v1991_v45 }
 0x613   : > { %7096 = vrsqrt.f32 %v1994_v43  ;;  %v1995_v46 = vadd.f32 1e-05, %v1993_v48  ;;  %v9377_v43 = vmov 2   ;;  %v9371_v48 = vmov 6  }
 0x615   : > { %7098 = vrsqrt.f32 %v1995_v46 }
 0x61d   : > { %v7097_v49 = vpop.eup %7096 }
 0x61e   : > { %v1998_v47 = vmul.f32 %v7097_v49, %v1984_v13  ;;  %v2314_v13 = vrot.slane %v8394_v5, %v8334_v30 }
 0x61f   : > { %v7099_v51 = vpop.eup %7098 }
 0x620   : > { %v1999_v52 = vmul.f32 %v7099_v51, %v1985_v15  ;;  %v2006_v53 = vmul.f32 %v5966_v50, %v1998_v47  ;;  %v9375_v47 = vmov 3   ;;  %v9365_v51 = vmov 9  }
 0x622   : > { %v2007_v55 = vmul.f32 %v5966_v50, %v1999_v52  ;;  %v2014_v56 = vadd.f32 %v5967_v54, %v2006_v53  ;;  %v9369_v53 = vmov 4  }
 0x624   : > { %v2015_v57 = vadd.f32 %v5967_v54, %v2007_v55  ;;  %v9361_v54 = vmov 12   ;;  %v9373_v55 = vmov 5  }
 0x626   : > { %v2048_v58 = vpack.c.bf16 %v2015_v57, %v2014_v56  ;;  %v9359_v56 = vmov 7   ;;  %v9367_v57 = vmov 8  }
 0x628   : > { %2227 = vmatmul.mubr.bf16.vlgmr.msra.gmra.mrb[8].mxu0 %v2048_v58  ;;  %6327 = vmatmul.mubr.bf16.vlgmr.msra.gmra.mrb[8].mxu1 %v2048_v58  ;;  %v9353_v58 = vmov 10  }
 0x629   : > { %6332 = vmatprep.mubr.msk.bf16.mxu0 %vm7772_vm0, %v9384_v4  ;;  %6338 = vmatprep.mubr.msk.bf16.mxu1 %vm7772_vm0, %v9384_v4 }
 0x62a   : > { %6331 = vmatpush3.bf16.xpose.msra.mxu0 %v2324_v62  ;;  %v9355_v62 = vmov 15  }
 0x62b   : > { %6342 = vmatprep.subr.bf16.mxu0 %v9384_v4 }
 0x6fb   : > { %v2228_v7 = vpop.f32.mrb[8].mxu0  ;;  %v2271_v8 = vpop.f32.mrb[8].mxu1 }
 0x6fc   : > { %v8398_v10 = vadd.f32 %v2228_v7, %v2054_v3  ;;  %v2230_v11 = vpop.f32.mrb[9].mxu0  ;;  %v6328_v12 = vpop.f32.mrb[9].mxu1  ;;  %v2272_v16 = vadd.f32 %v2271_v8, %v2062_v6 }
 0x6fd   : > { %v2232_v14 = vpop.f32.mrb[10].mxu0  ;;  %v2274_v15 = vpop.f32.mrb[10].mxu1  ;;  %v2231_v21 = vadd.f32 %v2230_v11, %v2058_v9 }
 0x6fe   : > { %9534 = vst [vmem:[#allocation69_spill] sm:$0xff] %v8398_v10  ;;  %v8402_v17 = vadd.f32 %v2232_v14, %v2054_v3  ;;  %v2275_v18 = vadd.f32 %v2274_v15, %v2062_v6  ;;  %v2234_v19 = vpop.f32.mrb[11].mxu0  ;;  %v6329_v20 = vpop.f32.mrb[11].mxu1  ;;  %v2315_v24 = vadd.f32 %v2314_v13, %v8398_v10  ;;  %v2307_v39 = vadd.f32 %v2306_v37, %v8398_v10 }
 0x6ff   : > { %v2235_v22 = vadd.f32 %v2234_v19, %v2058_v9  ;;  %v2819_v3 = vrot.slane %v8394_v5, %v8341_v33  ;;  %v8494_v15 = vand.u32 127, %v1301_v28 }
 0x700   : > { %9536 = vst [vmem:[#allocation70_spill] sm:$0xff] %v8402_v17  ;;  %v8404_v23 = vpack.c.bf16 %v2275_v18, %v2272_v16  ;;  %v2316_v25 = vadd.f32 %v2314_v13, %v8402_v17  ;;  %v2308_v38 = vadd.f32 %v2306_v37, %v8402_v17  ;;  %v8499_v16 = vadd.s32 8, %v8331_v29 }
 0x701   : > { %v8411_v27 = vpack.c.bf16 %v2235_v22, %v2231_v21  ;;  %v2367_v18 = vsub.s32 %v8494_v15, %v8331_v29 }
 0x702   : > { %9537 = vst [vmem:[#allocation71_spill] sm:$0xff] %v8404_v23  ;;  %v2317_v32 = vpack.c.bf16 %v2316_v25, %v2315_v24  ;;  %v2309_v40 = vpack.c.bf16 %v2308_v38, %v2307_v39  ;;  %9539 = vst [vmem:[#allocation73_spill] sm:$0xff] %v8499_v16  ;;  %v2368_v20 = vsub.s32 %v8494_v15, %v8499_v16  ;;  %v8693_v1 = vadd.s32 2, %v8499_v16 }
 0x703   : > { %9538 = vst [vmem:[#allocation72_spill] sm:$0xff] %v8411_v27  ;;  %v2692_v35 = vsel %vm2319_vm1, %v8411_v27, 0  ;;  %v5993_v21 = vadd.s32 4294967295, %v2367_v18 }
 0x704   : > { %6333 = vmatmul.mubr.msk.bf16.vlgmr.msra.gmra.mrb[12].mxu0 %vm2319_vm1, %v2317_v32  ;;  %6337 = vmatpush3.bf16.xpose.msra.mxu1 %v2692_v35  ;;  %v5994_v24 = vadd.s32 4294967295, %v2368_v20  ;;  %9544 = vst [vmem:[#allocation78_spill] sm:$0xff] %v8693_v1 }
 0x705   : > { %6343 = vmatpush3.bf16.msra.mxu0 %v8404_v23  ;;  %6348 = vmatprep.subr.bf16.mxu1 %v9384_v4  ;;  %v2373_v28 = vadd.s32 16, %v5993_v21  ;;  %vm2371_vm2 = vcmp.lt.s32.totalorder %v5993_v21, 0 }
 0x706   : > { %6344 = vmatprep.mubr.msk.bf16.mxu0 %vm7772_vm0, %v9384_v4  ;;  %6354 = vmatprep.subr.bf16.mxu0 %v9384_v4  ;;  %v2374_v35 = vadd.s32 16, %v5994_v24  ;;  %vm2372_vm3 = vcmp.lt.s32.totalorder %v5994_v24, 0 }
 0x707   : > { %v8511_v38 = vsel %vm2371_vm2, %v2373_v28, %v5993_v21 }
 0x708   : > { %v8513_v39 = vsel %vm2372_vm3, %v2374_v35, %v5994_v24  ;;  %vm2397_vm4 = vcmp.eq.s32.totalorder %v8511_v38, 1  ;;  %vm2377_vm5 = vcmp.eq.s32.totalorder %v8511_v38, 0  ;;  %vm2415_vm7 = vcmp.eq.s32.totalorder %v8511_v38, 2 }
 0x709   : > { %vm2398_vm6 = vcmp.eq.s32.totalorder %v8513_v39, 1  ;;  %vm2378_vm8 = vcmp.eq.s32.totalorder %v8513_v39, 0  ;;  %vm2416_vm9 = vcmp.eq.s32.totalorder %v8513_v39, 2  ;;  %vm2433_vm10 = vcmp.eq.s32.totalorder %v8511_v38, 3 }
 0x70a   : > { %vm2451_vm11 = vcmp.eq.s32.totalorder %v8511_v38, 4  ;;  %vm2434_vm12 = vcmp.eq.s32.totalorder %v8513_v39, 3  ;;  %v8548_v28 = vsel %vm2433_vm10, 1.0, %v9384_v4  ;;  %vm2469_vm13 = vcmp.eq.s32.totalorder %v8511_v38, 5 }
 0x70b   : > { %6339 = vmatmul.mubr.msk.bf16.vlgmr.msra.gmra.mrb[12].mxu1 %vm2319_vm1, %v2309_v40  ;;  %vm2452_vm14 = vcmp.eq.s32.totalorder %v8513_v39, 4  ;;  %vm2470_vm15 = vcmp.eq.s32.totalorder %v8513_v39, 5  ;;  %vm2487_vm2 = vcmp.eq.s32.totalorder %v8511_v38, 6  ;;  %vm2505_vm3 = vcmp.eq.s32.totalorder %v8511_v38, 7 }
 0x70c   : > { %6350 = vmatprep.mubr.msk.bf16.mxu1 %vm7772_vm0, %v9384_v4  ;;  %vm2542_vm10 = vcmp.eq.s32.totalorder %v8513_v39, 9 }
 0x7d7   : > { %v2360_v41 = vpop.f32.mrb[12].mxu0 }
 0x7d8   : > { %2404 = vperm.xlu1 %6706, %v2360_v41   ;;  %2385 = vperm.xlu0 %6705, %v2360_v41   ;;  %v6334_v44 = vpop.f32.mrb[13].mxu0 }
 0x7d9   : > { %v8428_v42 = vpop.f32.mrb[14].mxu0  ;;  %v8524_v44 = vsel %vm2397_vm4, 1.0, %v9384_v4  ;;  %vm2488_vm4 = vcmp.eq.s32.totalorder %v8513_v39, 6 }
 0x7da   : > { %v6335_v45 = vpop.f32.mrb[15].mxu0  ;;  %9540 = vst [vmem:[#allocation74_spill] sm:$0xff] %v8524_v44 }
 0x7db   : > { %v8530_v45 = vsel %vm2398_vm6, 1.0, %v9384_v4  ;;  %vm2506_vm6 = vcmp.eq.s32.totalorder %v8513_v39, 7 }
 0x7dc   : > { %6707 = vset.pattern.permute.xlu1 %v9377_v43  ;;  %6711 = vset.pattern.permute.xlu0 %v9371_v48 }
 0x7dd   : > { %2422 = vperm.xlu1 %6707, %v2360_v41   ;;  %2494 = vperm.xlu0 %6711, %v2360_v41  }
 0x7de   : > { %v8432_v46 = vpop.f32.mrb[12].mxu1 }
 0x7df   : > { %v6340_v49 = vpop.f32.mrb[13].mxu1 }
 0x7e0   : > { %v8434_v50 = vpop.f32.mrb[14].mxu1  ;;  %v8534_v49 = vsel %vm2415_vm7, 1.0, %v9384_v4  ;;  %vm2524_vm7 = vcmp.eq.s32.totalorder %v8513_v39, 8 }
 0x7e1   : > { %6708 = vset.pattern.permute.xlu1 %v9375_v47  ;;  %6714 = vset.pattern.permute.xlu0 %v9365_v51  ;;  %v6341_v52 = vpop.f32.mrb[15].mxu1 }
 0x7e2   : > { %2440 = vperm.xlu1 %6708, %v2360_v41   ;;  %2548 = vperm.xlu0 %6714, %v2360_v41   ;;  %v8538_v52 = vsel %vm2378_vm8, 1.0, %v9384_v4  ;;  %vm2541_vm8 = vcmp.eq.s32.totalorder %v8511_v38, 9 }
 0x7e6   : > { %6709 = vset.pattern.permute.xlu1 %v9369_v53  ;;  %6717 = vset.pattern.permute.xlu0 %v9361_v54 }
 0x7e7   : > { %2458 = vperm.xlu1 %6709, %v2360_v41   ;;  %2602 = vperm.xlu0 %6717, %v2360_v41  }
 0x7eb   : > { %6710 = vset.pattern.permute.xlu1 %v9373_v55  ;;  %6724 = vset.pattern.permute.xlu0 %v9369_v53 }
 0x7ec   : > { %2476 = vperm.xlu1 %6710, %v2360_v41   ;;  %2462 = vperm.xlu0 %6724, %v8428_v42  }
 0x7f0   : > { %6712 = vset.pattern.permute.xlu1 %v9359_v56  ;;  %6727 = vset.pattern.permute.xlu0 %v9359_v56 }
 0x7f1   : > { %2512 = vperm.xlu1 %6712, %v2360_v41   ;;  %2516 = vperm.xlu0 %6727, %v8428_v42  }
 0x7f5   : > { %6713 = vset.pattern.permute.xlu1 %v9367_v57  ;;  %6730 = vset.pattern.permute.xlu0 %v9353_v58 }
 0x7f6   : > { %2530 = vperm.xlu1 %6713, %v2360_v41   ;;  %2570 = vperm.xlu0 %6730, %v8428_v42  }
 0x7fa   : > { %6715 = vset.pattern.permute.xlu1 %v9353_v58  ;;  %6733 = vset.pattern.permute.xlu0 %v9351_v59 }
 0x7fb   : > { %2566 = vperm.xlu1 %6715, %v2360_v41   ;;  %2624 = vperm.xlu0 %6733, %v8428_v42  }
 0x7ff   : > { %6716 = vset.pattern.permute.xlu1 %v9363_v60  ;;  %6734 = vset.pattern.permute.xlu0 %v9355_v62 }
 0x800   : > { %2584 = vperm.xlu1 %6716, %v2360_v41   ;;  %2656 = vperm.xlu0 %6734, %v2360_v41  }
 0x804   : > { %6718 = vset.pattern.permute.xlu1 %v9351_v59  ;;  %6738 = vset.pattern.permute.xlu0 %v9349_v36 }
 0x805   : > { %2620 = vperm.xlu1 %6718, %v2360_v41  }
 0x809   : > { %6719 = vset.pattern.permute.xlu1 %v9357_v2 }
 0x80a   : > { %2638 = vperm.xlu1 %6719, %v2360_v41  }
 0x80e   : > { %6720 = vset.pattern.permute.xlu1 %v9349_v36 }
 0x80f   : > { %2390 = vperm.xlu1 %6720, %v8428_v42  }
 0x813   : > { %6721 = vset.pattern.permute.xlu1 %v9379_v0 }
 0x814   : > { %2408 = vperm.xlu1 %6721, %v8428_v42  }
 0x818   : > { %6722 = vset.pattern.permute.xlu1 %v9377_v43 }
 0x819   : > { %2426 = vperm.xlu1 %6722, %v8428_v42  }
 0x81d   : > { %6723 = vset.pattern.permute.xlu1 %v9375_v47 }
 0x81e   : > { %2444 = vperm.xlu1 %6723, %v8428_v42  }
 0x822   : > { %6725 = vset.pattern.permute.xlu1 %v9373_v55 }
 0x823   : > { %2480 = vperm.xlu1 %6725, %v8428_v42  }
 0x827   : > { %6726 = vset.pattern.permute.xlu1 %v9371_v48 }
 0x828   : > { %2498 = vperm.xlu1 %6726, %v8428_v42  }
 0x82c   : > { %6728 = vset.pattern.permute.xlu1 %v9367_v57  ;;  %v8610_v57 = vsel %vm2524_vm7, 1.0, %v9384_v4  ;;  %vm2650_vm7 = vcmp.eq.s32.totalorder %v8513_v39, 15 }
 0x82d   : > { %2534 = vperm.xlu1 %6728, %v8428_v42  }
 0x831   : > { %6729 = vset.pattern.permute.xlu1 %v9365_v51  ;;  %v8571_v51 = vsel %vm2452_vm14, 1.0, %v9384_v4  ;;  %vm2595_vm14 = vcmp.eq.s32.totalorder %v8511_v38, 12 }
 0x832   : > { %2552 = vperm.xlu1 %6729, %v8428_v42  }
 0x836   : > { %6731 = vset.pattern.permute.xlu1 %v9363_v60 }
 0x837   : > { %2588 = vperm.xlu1 %6731, %v8428_v42  }
 0x83b   : > { %6732 = vset.pattern.permute.xlu1 %v9361_v54 }
 0x83c   : > { %2606 = vperm.xlu1 %6732, %v8428_v42  }
 0x840   : > { %6735 = vset.pattern.permute.xlu1 %v9357_v2 }
 0x841   : > { %2642 = vperm.xlu1 %6735, %v8428_v42  }
 0x845   : > { %6736 = vset.pattern.permute.xlu1 %v9355_v62 }
 0x846   : > { %2660 = vperm.xlu1 %6736, %v8428_v42   ;;  %v8527_v42 = vsel %vm2377_vm5, 1.0, %v9384_v4  ;;  %vm2523_vm5 = vcmp.eq.s32.totalorder %v8511_v38, 8 }
 0x847   : > { %9541 = vst [vmem:[#allocation75_spill] sm:$0xff] %v8527_v42 }
 0x84a   : > { %2821 = vrot.lane.b32.xlu1 %v2819_v3, %s7788_s4  ;;  %v8541_v3 = vsel %vm2416_vm9, 1.0, %v9384_v4  ;;  %vm2559_vm9 = vcmp.eq.s32.totalorder %v8511_v38, 10 }
 0x84b   : > { %6737 = vset.pattern.permute.xlu1 %v9349_v36  ;;  %9542 = vst [vmem:[#allocation76_spill] sm:$0xff] %v8541_v3 }
 0x857   : > { %v2405_v6 = vpop.permute.xlu1 %2404  ;;  %v2386_v22 = vpop.permute.xlu0 %2385 }
 0x858   : > { %v2411_v18 = vmul.f32 %v8524_v44, %v2405_v6  ;;  %v2393_v20 = vmul.f32 %v8527_v42, %v2386_v22  ;;  %v8557_v22 = vsel %vm2451_vm11, 1.0, %v9384_v4  ;;  %vm2577_vm11 = vcmp.eq.s32.totalorder %v8511_v38, 11 }
 0x85a   : > { %v2413_v58 = vadd.f32 %v2411_v18, %v2393_v20 }
 0x85c   : > { %v2423_v7 = vpop.permute.xlu1 %2422  ;;  %v8509_v32 = vpop.permute.xlu0 %2494 }
 0x85d   : > { %v2429_v36 = vmul.f32 %v8534_v49, %v2423_v7  ;;  %v8565_v7 = vsel %vm2469_vm13, 1.0, %v9384_v4  ;;  %vm2578_vm13 = vcmp.eq.s32.totalorder %v8513_v39, 11 }
 0x85e   : > { %v8643_v55 = vsel %vm2578_vm13, 1.0, %v9384_v4  ;;  %vm2735_vm13 = vcmask 130048  }
 0x861   : > { %v2441_v8 = vpop.permute.xlu1 %2440  ;;  %v8518_v40 = vpop.permute.xlu0 %2548 }
 0x862   : > { %v2447_v62 = vmul.f32 %v8548_v28, %v2441_v8 }
 0x866   : > { %v2459_v9 = vpop.permute.xlu1 %2458  ;;  %v8550_v35 = vpop.permute.xlu0 %2602 }
 0x86b   : > { %v8485_v11 = vpop.permute.xlu1 %2476  ;;  %v2463_v18 = vpop.permute.xlu0 %2462 }
 0x870   : > { %v8487_v12 = vpop.permute.xlu1 %2512 }
 0x875   : > { %v8489_v13 = vpop.permute.xlu1 %2530 }
 0x87a   : > { %v8491_v14 = vpop.permute.xlu1 %2566 }
 0x87f   : > { %v8496_v5 = vpop.permute.xlu1 %2584 }
 0x884   : > { %v8503_v19 = vpop.permute.xlu1 %2620 }
 0x889   : > { %v8507_v25 = vpop.permute.xlu1 %2638 }
 0x88e   : > { %v2391_v37 = vpop.permute.xlu1 %2390 }
 0x88f   : > { %v2394_v59 = vmul.f32 %v8538_v52, %v2391_v37  ;;  %v2431_v37 = vadd.f32 %v2429_v36, %v2413_v58  ;;  %v2466_v58 = vmul.f32 %v8571_v51, %v2463_v18 }
 0x891   : > { %v2449_v8 = vadd.f32 %v2447_v62, %v2431_v37  ;;  %v8597_v37 = vsel %vm2523_vm5, 1.0, %v9384_v4  ;;  %vm2632_vm5 = vcmp.eq.s32.totalorder %v8513_v39, 14 }
 0x892   : > { %v8676_v0 = vsel %vm2632_vm5, 1.0, %v9384_v4  ;;  %vm4612_vm5 = vcmask 1045504  }
 0x893   : > { %v2409_v41 = vpop.permute.xlu1 %2408 }
 0x894   : > { %v2412_v21 = vmul.f32 %v8530_v45, %v2409_v41  ;;  %v8560_v41 = vsel %vm2434_vm12, 1.0, %v9384_v4  ;;  %vm2560_vm12 = vcmp.eq.s32.totalorder %v8513_v39, 10 }
 0x896   : > { %v2414_v2 = vadd.f32 %v2412_v21, %v2394_v59  ;;  %v2483_v59 = vmul.f32 %v8565_v7, %v8485_v11  ;;  %v8577_v21 = vsel %vm2470_vm15, 1.0, %v9384_v4  ;;  %v8591_v11 = vsel %vm2488_vm4, 1.0, %v9384_v4 }
 0x897   : > { %vm2613_vm15 = vcmp.eq.s32.totalorder %v8511_v38, 13  ;;  %vm2614_vm4 = vcmp.eq.s32.totalorder %v8513_v39, 13 }
 0x898   : > { %v2427_v24 = vpop.permute.xlu1 %2426  ;;  %v8670_v47 = vsel %vm2614_vm4, 1.0, %v9384_v4 }
 0x899   : > { %v2430_v6 = vmul.f32 %v8541_v3, %v2427_v24  ;;  %v2465_v24 = vmul.f32 %v8557_v22, %v2459_v9 }
 0x89b   : > { %v2432_v54 = vadd.f32 %v2430_v6, %v2414_v2  ;;  %v2467_v36 = vadd.f32 %v2465_v24, %v2449_v8  ;;  %v8583_v2 = vsel %vm2487_vm2, 1.0, %v9384_v4  ;;  %vm2596_vm2 = vcmp.eq.s32.totalorder %v8513_v39, 12 }
 0x89c   : > { %v2501_v6 = vmul.f32 %v8583_v2, %v8509_v32  ;;  %v2537_v32 = vmul.f32 %v8597_v37, %v8489_v13 }
 0x89d   : > { %v2445_v56 = vpop.permute.xlu1 %2444  ;;  %v2485_v9 = vadd.f32 %v2483_v59, %v2467_v36  ;;  %v8604_v36 = vsel %vm2506_vm6, 1.0, %v9384_v4  ;;  %vm2649_vm6 = vcmp.eq.s32.totalorder %v8511_v38, 15 }
 0x89e   : > { %v2448_v60 = vmul.f32 %v8560_v41, %v2445_v56 }
 0x89f   : > { %v2503_v18 = vadd.f32 %v2501_v6, %v2485_v9 }
 0x8a0   : > { %v2450_v20 = vadd.f32 %v2448_v60, %v2432_v54  ;;  %v8588_v60 = vsel %vm2505_vm3, 1.0, %v9384_v4  ;;  %vm2631_vm3 = vcmp.eq.s32.totalorder %v8511_v38, 14 }
 0x8a1   : > { %v2519_v8 = vmul.f32 %v8588_v60, %v8487_v12 }
 0x8a2   : > { %v2481_v56 = vpop.permute.xlu1 %2480  ;;  %v2468_v62 = vadd.f32 %v2466_v58, %v2450_v20  ;;  %v2517_v58 = vpop.permute.xlu0 %2516 }
 0x8a3   : > { %v2484_v54 = vmul.f32 %v8577_v21, %v2481_v56  ;;  %v2521_v9 = vadd.f32 %v2519_v8, %v2503_v18  ;;  %v2520_v6 = vmul.f32 %v8604_v36, %v2517_v58  ;;  %v8624_v18 = vsel %vm2542_vm10, 1.0, %v9384_v4 }
 0x8a4   : > { %vm2677_vm10 = vcmp.le.s32.totalorder %v8494_v15, %v8499_v16 }
 0x8a5   : > { %v2486_v59 = vadd.f32 %v2484_v54, %v2468_v62  ;;  %v8616_v62 = vsel %vm2541_vm8, 1.0, %v9384_v4  ;;  %v2539_v54 = vadd.f32 %v2537_v32, %v2521_v9  ;;  %vm2669_vm8 = vcmask 1046528  }
 0x8a6   : > { %v2555_v8 = vmul.f32 %v8616_v62, %v8518_v40  ;;  %v2571_v53 = vpop.permute.xlu0 %2570 }
 0x8a7   : > { %v2499_v24 = vpop.permute.xlu1 %2498 }
 0x8a8   : > { %v2502_v20 = vmul.f32 %v8591_v11, %v2499_v24  ;;  %v2557_v32 = vadd.f32 %v2555_v8, %v2539_v54 }
 0x8aa   : > { %v2504_v56 = vadd.f32 %v2502_v20, %v2486_v59  ;;  %v8621_v59 = vsel %vm2559_vm9, 1.0, %v9384_v4  ;;  %v8630_v20 = vsel %vm2577_vm11, 1.0, %v9384_v4  ;;  %vm2676_vm9 = vcmp.le.s32.totalorder %v8494_v15, %v8331_v29 }
 0x8ab   : > { %v2591_v40 = vmul.f32 %v8630_v20, %v8496_v5 }
 0x8ac   : > { %v2535_v12 = vpop.permute.xlu1 %2534  ;;  %v2522_v24 = vadd.f32 %v2520_v6, %v2504_v56  ;;  %v2573_v56 = vmul.f32 %v8621_v59, %v8491_v14 }
 0x8ad   : > { %v2538_v13 = vmul.f32 %v8610_v57, %v2535_v12  ;;  %v8637_v12 = vsel %vm2560_vm12, 1.0, %v9384_v4  ;;  %vm2683_vm12 = vcmp.ge.s32.totalorder %v8494_v15, %v8693_v1 }
 0x8ae   : > { %v2574_v54 = vmul.f32 %v8637_v12, %v2571_v53  ;;  %v2575_v8 = vadd.f32 %v2573_v56, %v2557_v32  ;;  %v8657_v53 = vsel %vm2596_vm2, 1.0, %v9384_v4  ;;  %v2625_v56 = vpop.permute.xlu0 %2624 }
 0x8af   : > { %v2540_v9 = vadd.f32 %v2538_v13, %v2522_v24  ;;  %v8649_v24 = vsel %vm2595_vm14, 1.0, %v9384_v4  ;;  %vm4508_vm14 = vcmask 1041408  }
 0x8b0   : > { %v2593_v13 = vadd.f32 %v2591_v40, %v2575_v8  ;;  %v2609_v32 = vmul.f32 %v8649_v24, %v8550_v35 }
 0x8b1   : > { %v2553_v58 = vpop.permute.xlu1 %2552 }
 0x8b2   : > { %v2556_v6 = vmul.f32 %v8624_v18, %v2553_v58 }
 0x8b4   : > { %v2558_v48 = vadd.f32 %v2556_v6, %v2540_v9  ;;  %v8654_v9 = vsel %vm2613_vm15, 1.0, %v9384_v4  ;;  %v8663_v6 = vsel %vm2631_vm3, 1.0, %v9384_v4  ;;  %vm4537_vm15 = vcmask 1040384  }
 0x8b5   : > { %v2645_v35 = vmul.f32 %v8663_v6, %v8507_v25  ;;  %v8685_v25 = vsel %vm2650_vm7, 1.0, %v9384_v4  ;;  %vm4641_vm7 = vcmask 1044480  }
 0x8b6   : > { %v2589_v14 = vpop.permute.xlu1 %2588  ;;  %v2576_v58 = vadd.f32 %v2574_v54, %v2558_v48  ;;  %v2611_v48 = vadd.f32 %v2609_v32, %v2593_v13  ;;  %v2627_v54 = vmul.f32 %v8654_v9, %v8503_v19  ;;  %v2628_v13 = vmul.f32 %v8670_v47, %v2625_v56 }
 0x8b7   : > { %v2592_v5 = vmul.f32 %v8643_v55, %v2589_v14  ;;  %v8681_v19 = vsel %vm2649_vm6, 1.0, %v9384_v4  ;;  %v8689_v56 = vadd.s32 2, %v8331_v29 }
 0x8b8   : > { %v2629_v32 = vadd.f32 %v2627_v54, %v2611_v48 }
 0x8b9   : > { %v2594_v8 = vadd.f32 %v2592_v5, %v2576_v58  ;;  %v2657_v58 = vpop.permute.xlu0 %2656  ;;  %9543 = vst [vmem:[#allocation77_spill] sm:$0xff] %v8689_v56  ;;  %vm2682_vm11 = vcmp.ge.s32.totalorder %v8494_v15, %v8689_v56 }
 0x8ba   : > { %v2647_v5 = vadd.f32 %v2645_v35, %v2629_v32 }
 0x8bb   : > { %v2607_v40 = vpop.permute.xlu1 %2606 }
 0x8bc   : > { %v2610_v14 = vmul.f32 %v8657_v53, %v2607_v40 }
 0x8be   : > { %v2612_v43 = vadd.f32 %v2610_v14, %v2594_v8  ;;  %v2663_v8 = vmul.f32 %v8681_v19, %v2657_v58 }
 0x8c0   : > { %v2643_v30 = vpop.permute.xlu1 %2642  ;;  %v2630_v40 = vadd.f32 %v2628_v13, %v2612_v43  ;;  %v2665_v48 = vadd.f32 %v2663_v8, %v2647_v5 }
 0x8c1   : > { %v2646_v38 = vmul.f32 %v8676_v0, %v2643_v30 }
 0x8c2   : > { %v2670_v30 = vrot.slane %v2665_v48, 1  ;;  %v2678_v58 = vsel %vm2676_vm9, %v2665_v48, 0.0 }
 0x8c3   : > { %v2648_v54 = vadd.f32 %v2646_v38, %v2630_v40 }
 0x8c5   : > { %v2661_v14 = vpop.permute.xlu1 %2660 }
 0x8c6   : > { %v2664_v39 = vmul.f32 %v8685_v25, %v2661_v14 }
 0x8c8   : > { %v2666_v35 = vadd.f32 %v2664_v39, %v2648_v54 }
 0x8ca   : > { %v2671_v43 = vrot.slane %v2666_v35, 1  ;;  %v2679_v40 = vsel %vm2677_vm10, %v2666_v35, 0.0 }
 0x8cc   : > { %v2672_v13 = vsel %vm2669_vm8, %v2670_v30, %v2671_v43  ;;  %v2675_v32 = vsel %vm2669_vm8, %v2671_v43, 0.0  ;;  %v2822_v43 = vpop.permute.xlu1 %2821 }
 0x8cd   : > { %v2684_v5 = vsel %vm2682_vm11, %v2672_v13, 0.0  ;;  %v2685_v38 = vsel %vm2683_vm12, %v2675_v32, 0.0  ;;  %v2824_v35 = vadd.f32 %v2822_v43, %v8398_v10  ;;  %v2825_v13 = vadd.f32 %v2822_v43, %v8402_v17 }
 0x8ce   : > { %v2686_v8 = vadd.f32 %v2684_v5, %v2678_v58  ;;  %v2687_v14 = vadd.f32 %v2685_v38, %v2679_v40 }
 0x8cf   : > { %v2826_v4 = vpack.c.bf16 %v2825_v13, %v2824_v35 }
 0x8d0   : > { %v2729_v54 = vadd.f32 %v8432_v46, %v2686_v8  ;;  %v2732_v39 = vadd.f32 %v8434_v50, %v2687_v14  ;;  %v2808_v46 = vrot.slane %v8409_v26, %v8341_v33  ;;  %v9561_v33 = vmov 0  }
 0x8d2   : > { %v2736_v48 = vsel %vm2735_vm13, %v2729_v54, -inf  ;;  %v2739_v30 = vsel %vm2735_vm13, %v2732_v39, -inf }
 0x8d3   : > { %2737 = vmax.xlane.f32.xlu0 %v2736_v48  ;;  %2740 = vmax.xlane.f32.xlu1 %v2739_v30 }
 0x8e4   : > { %2828 = vrot.lane.b32.xlu1 %v2826_v4, %s7789_s12  ;;  %v9545_v4 = vmov 0.0  }
 0x8e9   : > { %2831 = vrot.lane.b32.xlu0 %v8385_v61, %s7789_s12 }
 0x8ed   : > { %2810 = vrot.lane.b32.xlu0 %v2808_v46, %s7788_s4 }
 0x960   : > { %v2738_v50 = vpop.xlane.xlu0 %2737  ;;  %v2741_v32 = vpop.xlane.xlu1 %2740 }
 0x961   : > { %v2742_v58 = vsub.f32 %v2729_v54, %v2738_v50  ;;  %v2743_v5 = vsub.f32 %v2732_v39, %v2741_v32 }
 0x963   : > { %v2744_v40 = vmul.f32 1.442695, %v2742_v58  ;;  %v2746_v38 = vmul.f32 1.442695, %v2743_v5 }
 0x964   : > { %v2832_v8 = vpop.permute.xlu0 %2831  ;;  %v2829_v48 = vpop.permute.xlu1 %2828 }
 0x965   : > { %7100 = vpow2.f32 %v2744_v40  ;;  %v2837_v14 = vsel %vm2319_vm1, %v2832_v8, 0 }
 0x966   : > { %7102 = vpow2.f32 %v2746_v38  ;;  %6349 = vmatpush3.bf16.xpose.msra.mxu1 %v2837_v14 }
 0x967   : > { %6360 = vmatprep.subr.bf16.mxu1 %v9545_v4 }
 0x968   : > { %v2811_v43 = vpop.permute.xlu0 %2810 }
 0x969   : > { %v2813_v35 = vadd.f32 %v2811_v43, %v8398_v10  ;;  %v2814_v13 = vadd.f32 %v2811_v43, %v8402_v17 }
 0x96b   : > { %v2815_v46 = vpack.c.bf16 %v2814_v13, %v2813_v35  ;;  %v9546_v35 = vmov 1   ;;  %v9547_v13 = vmov 2  }
 0x96d   : > { %6351 = vmatmul.mubr.msk.bf16.vlgmr.msra.gmra.mrb[16].mxu1 %vm2319_vm1, %v2829_v48 }
 0x96e   : > { %6362 = vmatprep.mubr.msk.bf16.mxu1 %vm7772_vm0, %v9545_v4 }
 0x96f   : > { %v7101_v26 = vpop.eup %7100 }
 0x970   : > { %v7103_v30 = vpop.eup %7102  ;;  %v2748_v54 = vsel %vm2735_vm13, %v7101_v26, 0.0 }
 0x971   : > { %2749 = vadd.xlane.f32.xlu1 %v2748_v54  ;;  %v2751_v39 = vsel %vm2735_vm13, %v7103_v30, 0.0 }
 0x972   : > { %2752 = vadd.xlane.f32.xlu0 %v2751_v39 }
 0x982   : > { %3089 = vrot.lane.b32.xlu1 %v2815_v46, %s7789_s12  ;;  %v9548_v46 = vmov 3  }
 0x988   : > { %3092 = vrot.lane.b32.xlu0 %v8411_v27, %s7789_s12 }
 0x9fe   : > { %v2750_v50 = vpop.xlane.xlu1 %2749 }
 0x9ff   : > { %v2753_v32 = vpop.xlane.xlu0 %2752  ;;  %7104 = vrcp.f32 %v2750_v50  ;;  %v9549_v50 = vmov 5  }
 0xa00   : > { %7106 = vrcp.f32 %v2753_v32  ;;  %v9550_v32 = vmov 6  }
 0xa02   : > { %v3090_v54 = vpop.permute.xlu1 %3089 }
 0xa03   : > { %v3093_v8 = vpop.permute.xlu0 %3092 }
 0xa04   : > { %v3098_v48 = vsel %vm2319_vm1, %v3093_v8, 0  ;;  %v9555_v8 = vmov 12  }
 0xa09   : > { %v7105_v58 = vpop.eup %7104 }
 0xa0a   : > { %v7107_v5 = vpop.eup %7106  ;;  %v2756_v40 = vmul.f32 %v7105_v58, %v7101_v26  ;;  %v9551_v58 = vmov 4  }
 0xa0b   : > { %v2757_v38 = vmul.f32 %v7107_v5, %v7103_v30  ;;  %v9552_v5 = vmov 8  }
 0xa0d   : > { %v2758_v14 = vpack.c.bf16 %v2757_v38, %v2756_v40  ;;  %v9553_v40 = vmov 9   ;;  %v9554_v38 = vmov 11  }
 0xa0f   : > { %6345 = vmatmul.mubr.msk.bf16.vlgmr.msra.gmra.mrb[16].mxu0 %vm2735_vm13, %v2758_v14  ;;  %v9556_v14 = vmov 7  }
 0xa10   : > { %6355 = vmatpush3.bf16.xpose.msra.mxu0 %v3098_v48  ;;  %6356 = vmatprep.mubr.msk.bf16.mxu0 %vm7772_vm0, %v9545_v4  ;;  %v9557_v48 = vmov 14  }
 0xa11   : > { %6366 = vmatprep.subr.bf16.mxu0 %v9545_v4 }
 0xa17   : > { %6357 = vmatmul.mubr.msk.bf16.vlgmr.msra.gmra.mrb[20].mxu0 %vm2319_vm1, %v3090_v54  ;;  %v9558_v54 = vmov 15  }
 0xa18   : > { %6370 = vmatprep.mubr.msk.bf16.mxu0 %vm7772_vm0, %v9545_v4 }
 0xa40   : > { %v2873_v26 = vpop.f32.mrb[16].mxu1 }
 0xa41   : > { %2882 = vperm.xlu1 %6737, %v2873_v26   ;;  %v6352_v30 = vpop.f32.mrb[17].mxu1 }
 0xa42   : > { %v2876_v39 = vpop.f32.mrb[18].mxu1  ;;  %v9559_v30 = vmov 10  }
 0xa43   : > { %2887 = vperm.xlu0 %6738, %v2876_v39   ;;  %v6353_v43 = vpop.f32.mrb[19].mxu1 }
 0xa44   : > { %v9560_v43 = vmov 13  }
 0xa45   : > { %6739 = vset.pattern.permute.xlu1 %v9546_v35 }
 0xa46   : > { %2895 = vperm.xlu1 %6739, %v2873_v26  }
 0xa47   : > { %6740 = vset.pattern.permute.xlu0 %v9547_v13 }
 0xa48   : > { %2907 = vperm.xlu0 %6740, %v2873_v26  }
 0xa4a   : > { %2899 = vperm.xlu1 %6739, %v2876_v39  }
 0xa4c   : > { %6743 = vset.pattern.permute.xlu0 %v9548_v46 }
 0xa4d   : > { %2923 = vperm.xlu0 %6743, %v2876_v39  }
 0xa4e   : > { %6741 = vset.pattern.permute.xlu1 %v9547_v13 }
 0xa4f   : > { %2911 = vperm.xlu1 %6741, %v2876_v39  }
 0xa51   : > { %6745 = vset.pattern.permute.xlu0 %v9549_v50 }
 0xa52   : > { %2943 = vperm.xlu0 %6745, %v2873_v26  }
 0xa53   : > { %6742 = vset.pattern.permute.xlu1 %v9548_v46 }
 0xa54   : > { %2919 = vperm.xlu1 %6742, %v2873_v26  }
 0xa56   : > { %6748 = vset.pattern.permute.xlu0 %v9550_v32 }
 0xa57   : > { %2959 = vperm.xlu0 %6748, %v2876_v39  }
 0xa58   : > { %6744 = vset.pattern.permute.xlu1 %v9551_v58 }
 0xa59   : > { %2931 = vperm.xlu1 %6744, %v2873_v26  }
 0xa5b   : > { %6750 = vset.pattern.permute.xlu0 %v9552_v5 }
 0xa5c   : > { %2979 = vperm.xlu0 %6750, %v2873_v26  }
 0xa5d   : > { %2935 = vperm.xlu1 %6744, %v2876_v39  }
 0xa60   : > { %6753 = vset.pattern.permute.xlu0 %v9553_v40 }
 0xa61   : > { %6746 = vset.pattern.permute.xlu1 %v9549_v50  ;;  %2995 = vperm.xlu0 %6753, %v2876_v39  }
 0xa62   : > { %2947 = vperm.xlu1 %6746, %v2876_v39  }
 0xa65   : > { %6755 = vset.pattern.permute.xlu0 %v9554_v38 }
 0xa66   : > { %6747 = vset.pattern.permute.xlu1 %v9550_v32  ;;  %3015 = vperm.xlu0 %6755, %v2873_v26  }
 0xa67   : > { %2955 = vperm.xlu1 %6747, %v2873_v26  }
 0xa6a   : > { %6758 = vset.pattern.permute.xlu0 %v9555_v8 }
 0xa6b   : > { %6749 = vset.pattern.permute.xlu1 %v9556_v14  ;;  %3031 = vperm.xlu0 %6758, %v2876_v39  }
 0xa6c   : > { %2967 = vperm.xlu1 %6749, %v2873_v26  }
 0xa6f   : > { %6760 = vset.pattern.permute.xlu0 %v9557_v48 }
 0xa70   : > { %2971 = vperm.xlu1 %6749, %v2876_v39   ;;  %3051 = vperm.xlu0 %6760, %v2873_v26  }
 0xa74   : > { %6751 = vset.pattern.permute.xlu1 %v9552_v5  ;;  %6763 = vset.pattern.permute.xlu0 %v9558_v54 }
 0xa75   : > { %2983 = vperm.xlu1 %6751, %v2876_v39   ;;  %3067 = vperm.xlu0 %6763, %v2876_v39  }
 0xa79   : > { %6752 = vset.pattern.permute.xlu1 %v9553_v40  ;;  %6766 = vset.pattern.permute.xlu0 %v9547_v13 }
 0xa7a   : > { %2991 = vperm.xlu1 %6752, %v2873_v26  }
 0xa7e   : > { %6754 = vset.pattern.permute.xlu1 %v9559_v30 }
 0xa7f   : > { %3003 = vperm.xlu1 %6754, %v2873_v26  }
 0xa83   : > { %3007 = vperm.xlu1 %6754, %v2876_v39  }
 0xa87   : > { %6756 = vset.pattern.permute.xlu1 %v9554_v38 }
 0xa88   : > { %3019 = vperm.xlu1 %6756, %v2876_v39  }
 0xa8c   : > { %6757 = vset.pattern.permute.xlu1 %v9555_v8 }
 0xa8d   : > { %3027 = vperm.xlu1 %6757, %v2873_v26  }
 0xa91   : > { %6759 = vset.pattern.permute.xlu1 %v9560_v43 }
 0xa92   : > { %3039 = vperm.xlu1 %6759, %v2873_v26  }
 0xa96   : > { %3043 = vperm.xlu1 %6759, %v2876_v39  }
 0xa9a   : > { %6761 = vset.pattern.permute.xlu1 %v9557_v48 }
 0xa9b   : > { %3055 = vperm.xlu1 %6761, %v2876_v39  }
 0xa9f   : > { %6762 = vset.pattern.permute.xlu1 %v9558_v54 }
 0xaa0   : > { %3063 = vperm.xlu1 %6762, %v2873_v26  }
 0xaa4   : > { %6764 = vset.pattern.permute.xlu1 %v9561_v33 }
 0xac0   : > { %v2883_v63 = vpop.permute.xlu1 %2882 }
 0xac2   : > { %v2888_v32 = vpop.permute.xlu0 %2887 }
 0xac3   : > { %v2891_v26 = vmul.f32 %v8538_v52, %v2888_v32 }
 0xac5   : > { %v2896_v34 = vpop.permute.xlu1 %2895 }
 0xac6   : > { %v2902_v31 = vmul.f32 %v8524_v44, %v2896_v34 }
 0xac7   : > { %v2908_v46 = vpop.permute.xlu0 %2907 }
 0xac8   : > { %v2914_v56 = vmul.f32 %v8534_v49, %v2908_v46 }
 0xac9   : > { %v2900_v13 = vpop.permute.xlu1 %2899 }
 0xaca   : > { %v2903_v23 = vmul.f32 %v8530_v45, %v2900_v13 }
 0xacc   : > { %v2924_v33 = vpop.permute.xlu0 %2923 }
 0xacd   : > { %v2927_v13 = vmul.f32 %v8560_v41, %v2924_v33 }
 0xace   : > { %v2912_v30 = vpop.permute.xlu1 %2911 }
 0xad1   : > { %v2944_v10 = vpop.permute.xlu0 %2943 }
 0xad3   : > { %v2920_v40 = vpop.permute.xlu1 %2919 }
 0xad4   : > { %v2926_v29 = vmul.f32 %v8548_v28, %v2920_v40 }
 0xad8   : > { %v2932_v14 = vpop.permute.xlu1 %2931 }
 0xad9   : > { %v2938_v32 = vmul.f32 %v8557_v22, %v2932_v14 }
 0xadc   : > { %v2936_v8 = vpop.permute.xlu1 %2935 }
 0xadd   : > { %v2939_v34 = vmul.f32 %v8571_v51, %v2936_v8 }
 0xae1   : > { %v2948_v58 = vpop.permute.xlu1 %2947 }
 0xae2   : > { %v8776_v43 = vpop.f32.mrb[16].mxu0 }
 0xae3   : > { %9562 = vst [vmem:[#allocation79_spill] sm:$0xff] %v8776_v43  ;;  %v6346_v38 = vpop.f32.mrb[17].mxu0 }
 0xae4   : > { %v8778_v48 = vpop.f32.mrb[18].mxu0  ;;  %v2960_v38 = vpop.permute.xlu0 %2959 }
 0xae5   : > { %9563 = vst [vmem:[#allocation80_spill] sm:$0xff] %v8778_v48  ;;  %v6347_v39 = vpop.f32.mrb[19].mxu0  ;;  %v2890_v48 = vmul.f32 %v8527_v42, %v2883_v63  ;;  %v2963_v33 = vmul.f32 %v8591_v11, %v2960_v38 }
 0xae6   : > { %v2956_v54 = vpop.permute.xlu1 %2955  ;;  %v2915_v39 = vmul.f32 %v8541_v3, %v2912_v30  ;;  %v2951_v3 = vmul.f32 %v8577_v21, %v2948_v58 }
 0xae7   : > { %v2962_v40 = vmul.f32 %v8583_v2, %v2956_v54 }
 0xaea   : > { %v8782_v5 = vpop.f32.mrb[20].mxu0 }
 0xaeb   : > { %9564 = vst [vmem:[#allocation81_spill] sm:$0xff] %v8782_v5  ;;  %v6358_v35 = vpop.f32.mrb[21].mxu0  ;;  %v2968_v50 = vpop.permute.xlu1 %2967  ;;  %v2904_v5 = vadd.f32 %v2902_v31, %v2890_v48 }
 0xaec   : > { %v8784_v27 = vpop.f32.mrb[22].mxu0  ;;  %v2905_v35 = vadd.f32 %v2903_v23, %v2891_v26 }
 0xaed   : > { %9565 = vst [vmem:[#allocation82_spill] sm:$0xff] %v8784_v27  ;;  %v6359_v4 = vpop.f32.mrb[23].mxu0  ;;  %v2916_v44 = vadd.f32 %v2914_v56, %v2904_v5 }
 0xaee   : > { %v2980_v4 = vpop.permute.xlu0 %2979  ;;  %v2917_v27 = vadd.f32 %v2915_v39, %v2905_v35  ;;  %v2950_v39 = vmul.f32 %v8565_v7, %v2944_v10 }
 0xaef   : > { %v2972_v17 = vpop.permute.xlu1 %2971  ;;  %v2928_v63 = vadd.f32 %v2926_v29, %v2916_v44  ;;  %v2986_v10 = vmul.f32 %v8597_v37, %v2980_v4 }
 0xaf0   : > { %v2929_v30 = vadd.f32 %v2927_v13, %v2917_v27  ;;  %v2975_v8 = vmul.f32 %v8604_v36, %v2972_v17  ;;  %v2974_v27 = vmul.f32 %v8588_v60, %v2968_v50 }
 0xaf1   : > { %v2940_v46 = vadd.f32 %v2938_v32, %v2928_v63 }
 0xaf2   : > { %v2996_v23 = vpop.permute.xlu0 %2995  ;;  %v2941_v48 = vadd.f32 %v2939_v34, %v2929_v30 }
 0xaf3   : > { %v2952_v14 = vadd.f32 %v2950_v39, %v2940_v46  ;;  %v2999_v17 = vmul.f32 %v8624_v18, %v2996_v23 }
 0xaf4   : > { %v2984_v61 = vpop.permute.xlu1 %2983  ;;  %v2953_v26 = vadd.f32 %v2951_v3, %v2941_v48 }
 0xaf5   : > { %v2987_v29 = vmul.f32 %v8610_v57, %v2984_v61  ;;  %v2964_v44 = vadd.f32 %v2962_v40, %v2952_v14 }
 0xaf6   : > { %v3016_v5 = vpop.permute.xlu0 %3015  ;;  %v2965_v58 = vadd.f32 %v2963_v33, %v2953_v26 }
 0xaf7   : > { %v2976_v13 = vadd.f32 %v2974_v27, %v2964_v44 }
 0xaf8   : > { %v2977_v35 = vadd.f32 %v2975_v8, %v2965_v58  ;;  %v3022_v8 = vmul.f32 %v8630_v20, %v3016_v5 }
 0xaf9   : > { %v2992_v43 = vpop.permute.xlu1 %2991  ;;  %v2988_v30 = vadd.f32 %v2986_v10, %v2976_v13 }
 0xafa   : > { %v2989_v34 = vadd.f32 %v2987_v29, %v2977_v35  ;;  %v3032_v54 = vpop.permute.xlu0 %3031  ;;  %v2998_v38 = vmul.f32 %v8616_v62, %v2992_v43 }
 0xafb   : > { %v3035_v23 = vmul.f32 %v8657_v53, %v3032_v54 }
 0xafc   : > { %v3001_v63 = vadd.f32 %v2999_v17, %v2989_v34  ;;  %v3000_v46 = vadd.f32 %v2998_v38, %v2988_v30 }
 0xafe   : > { %v3004_v1 = vpop.permute.xlu1 %3003  ;;  %v3052_v39 = vpop.permute.xlu0 %3051 }
 0xaff   : > { %v3010_v50 = vmul.f32 %v8621_v59, %v3004_v1 }
 0xb01   : > { %v3012_v40 = vadd.f32 %v3010_v50, %v3000_v46 }
 0xb02   : > { %v3008_v31 = vpop.permute.xlu1 %3007 }
 0xb03   : > { %v3011_v32 = vmul.f32 %v8637_v12, %v3008_v31  ;;  %v3024_v14 = vadd.f32 %v3022_v8, %v3012_v40 }
 0xb05   : > { %v3013_v26 = vadd.f32 %v3011_v32, %v3001_v63 }
 0xb07   : > { %v3020_v56 = vpop.permute.xlu1 %3019 }
 0xb08   : > { %v3023_v61 = vmul.f32 %v8643_v55, %v3020_v56  ;;  %v3068_v56 = vpop.permute.xlu0 %3067 }
 0xb09   : > { %v3071_v34 = vmul.f32 %v8685_v25, %v3068_v56 }
 0xb0a   : > { %v3025_v33 = vadd.f32 %v3023_v61, %v3013_v26 }
 0xb0c   : > { %v3028_v3 = vpop.permute.xlu1 %3027  ;;  %v3037_v27 = vadd.f32 %v3035_v23, %v3025_v33 }
 0xb0d   : > { %v3034_v43 = vmul.f32 %v8649_v24, %v3028_v3  ;;  %v3058_v3 = vmul.f32 %v8663_v6, %v3052_v39 }
 0xb0f   : > { %v3036_v58 = vadd.f32 %v3034_v43, %v3024_v14 }
 0xb11   : > { %v3040_v48 = vpop.permute.xlu1 %3039 }
 0xb12   : > { %v3046_v1 = vmul.f32 %v8654_v9, %v3040_v48 }
 0xb14   : > { %v3048_v13 = vadd.f32 %v3046_v1, %v3036_v58  ;;  %v9570_v1 = vld [vmem:[#allocation81_spill] sm:$0xff] }
 0xb15   : > { %v3044_v4 = vpop.permute.xlu1 %3043 }
 0xb16   : > { %v3047_v31 = vmul.f32 %v8670_v47, %v3044_v4  ;;  %v3060_v38 = vadd.f32 %v3058_v3, %v3048_v13  ;;  %v9568_v4 = vld [vmem:[#allocation82_spill] sm:$0xff] }
 0xb18   : > { %v3049_v44 = vadd.f32 %v3047_v31, %v3037_v27 }
 0xb1a   : > { %v3056_v29 = vpop.permute.xlu1 %3055 }
 0xb1b   : > { %v3059_v35 = vmul.f32 %v8676_v0, %v3056_v29 }
 0xb1d   : > { %v3061_v5 = vadd.f32 %v3059_v35, %v3049_v44 }
 0xb1f   : > { %v3073_v10 = vadd.f32 %v3071_v34, %v3061_v5  ;;  %v3064_v54 = vpop.permute.xlu1 %3063 }
 0xb20   : > { %v3070_v17 = vmul.f32 %v8681_v19, %v3064_v54 }
 0xb21   : > { %v3077_v32 = vrot.slane %v3073_v10, 1  ;;  %v3083_v61 = vsel %vm2677_vm10, %v3073_v10, 0.0 }
 0xb22   : > { %v3072_v30 = vadd.f32 %v3070_v17, %v3060_v38  ;;  %v8839_v38 = vld [vmem:[%s9532_s3] sm:$0xf] }
 0xb23   : > { %v3081_v50 = vsel %vm2669_vm8, %v3077_v32, 0.0  ;;  %9571 = vst [vmem:[#allocation82_spill] sm:$0xff] %v8839_v38  ;;  %v9572_v17 = vld [vmem:[#allocation63_spill] sm:$0xff] }
 0xb24   : > { %v3076_v63 = vrot.slane %v3072_v30, 1  ;;  %v3085_v46 = vsel %vm2683_vm12, %v3081_v50, 0.0  ;;  %v3082_v33 = vsel %vm2676_vm9, %v3072_v30, 0.0  ;;  %v9573_v30 = vld [vmem:[#allocation71_spill] sm:$0xff] }
 0xb25   : > { %v3087_v26 = vadd.f32 %v3085_v46, %v3083_v61  ;;  %v8847_v50 = vld [vmem:[%s9535_s16] sm:$0xf]  ;;  %v9576_v61 = vld [vmem:[#allocation68_spill] sm:$0xff] }
 0xb26   : > { %v3078_v39 = vsel %vm2669_vm8, %v3076_v63, %v3077_v32  ;;  %v3339_v32 = vrot.slane %v8839_v38, %v9572_v17  ;;  %9575 = vst [vmem:[#allocation81_spill] sm:$0xff] %v8847_v50  ;;  %v3328_v63 = vrot.slane %v8847_v50, %v9572_v17  ;;  %v9602_v17 = vmov 15   ;;  %v9605_v50 = vld [vmem:[#allocation76_spill] sm:$0xff] }
 0xb27   : > { %v3138_v8 = vadd.f32 %v9568_v4, %v3087_v26  ;;  %v3084_v23 = vsel %vm2682_vm11, %v3078_v39, 0.0 }
 0xb28   : > { %v3086_v31 = vadd.f32 %v3084_v23, %v3082_v33  ;;  %v9577_v33 = vld [vmem:[#allocation69_spill] sm:$0xff] }
 0xb29   : > { %v3144_v14 = vsel %vm2735_vm13, %v3138_v8, -inf }
 0xb2a   : > { %3145 = vmax.xlane.f32.xlu0 %v3144_v14  ;;  %v3135_v27 = vadd.f32 %v9570_v1, %v3086_v31 }
 0xb2c   : > { %v3141_v56 = vsel %vm2735_vm13, %v3135_v27, -inf }
 0xb2d   : > { %3142 = vmax.xlane.f32.xlu1 %v3141_v56 }
 0xbb7   : > { %v3146_v58 = vpop.xlane.xlu0 %3145 }
 0xbb8   : > { %v3148_v29 = vsub.f32 %v3138_v8, %v3146_v58  ;;  %v9578_v8 = vld [vmem:[#allocation70_spill] sm:$0xff] }
 0xbba   : > { %v3151_v44 = vmul.f32 1.442695, %v3148_v29  ;;  %v3143_v35 = vpop.xlane.xlu1 %3142  ;;  %v9579_v29 = vmov 0.0  }
 0xbbb   : > { %v3147_v13 = vsub.f32 %v3135_v27, %v3143_v35  ;;  %v6942_v27 = vld [vmem:[%s9574_s2 + $0x10] sm:$0xff]  }
 0xbbc   : > { %7108 = vpow2.f32 %v3151_v44  ;;  %6367 = vmatpush3.bf16.msra.mxu0 %v6942_v27  ;;  %v6943_v44 = vld [vmem:[%s9574_s2 + $0x18] sm:$0xff]  }
 0xbbd   : > { %v3149_v34 = vmul.f32 1.442695, %v3147_v13  ;;  %6368 = vmatprep.subr.bf16.mxu0 %v9579_v29 }
 0xbbf   : > { %7110 = vpow2.f32 %v3149_v34  ;;  %v9580_v34 = vld [vmem:[#allocation72_spill] sm:$0xff] }
 0xbc0   : > { %6369 = vmatpush3.bf16.msra.mxu0 %v6943_v44 }
 0xbc1   : > { %6382 = vmatprep.subr.bf16.mxu0 %v9579_v29 }
 0xbc6   : > { %v7109_v5 = vpop.eup %7108 }
 0xbc7   : > { %v3156_v3 = vsel %vm2735_vm13, %v7109_v5, 0.0 }
 0xbc8   : > { %3157 = vadd.xlane.f32.xlu0 %v3156_v3 }
 0xbc9   : > { %v7111_v10 = vpop.eup %7110 }
 0xbca   : > { %v3153_v54 = vsel %vm2735_vm13, %v7111_v10, 0.0 }
 0xbcb   : > { %3154 = vadd.xlane.f32.xlu1 %v3153_v54 }
 0xbdc   : > { %3165 = vrot.lane.b32.xlu1 %v9573_v30, %s7789_s12 }
 0xbde   : > { %3341 = vrot.lane.b32.xlu0 %v3339_v32, %s7790_s22 }
 0xbe0   : > { %3350 = vrot.lane.b32.xlu1 %v9576_v61, %s7790_s22 }
 0xbe2   : > { %3330 = vrot.lane.b32.xlu0 %v3328_v63, %s7790_s22  ;;  %v6940_v63 = vld [vmem:[%s9574_s2] sm:$0xff]  }
 0xc55   : > { %v3158_v46 = vpop.xlane.xlu0 %3157 }
 0xc56   : > { %7112 = vrcp.f32 %v3158_v46 }
 0xc58   : > { %v3155_v26 = vpop.xlane.xlu1 %3154 }
 0xc59   : > { %7114 = vrcp.f32 %v3155_v26  ;;  %v3342_v39 = vpop.permute.xlu0 %3341  ;;  %v6941_v26 = vld [vmem:[%s9574_s2 + $0x8] sm:$0xff]  }
 0xc5a   : > { %v3344_v4 = vadd.f32 %v3342_v39, %v9577_v33  ;;  %v3345_v23 = vadd.f32 %v3342_v39, %v9578_v8  ;;  %v9581_v39 = vld [vmem:[#allocation80_spill] sm:$0xff] }
 0xc5c   : > { %v3346_v31 = vpack.c.bf16 %v3345_v23, %v3344_v4  ;;  %v3166_v14 = vpop.permute.xlu1 %3165  ;;  %v9582_v4 = vld [vmem:[#allocation79_spill] sm:$0xff] }
 0xc5d   : > { %v3331_v1 = vpop.permute.xlu0 %3330  ;;  %6361 = vmatpush3.bf16.msra.mxu1 %v3166_v14 }
 0xc5e   : > { %v3333_v56 = vadd.f32 %v3331_v1, %v9577_v33  ;;  %v3334_v58 = vadd.f32 %v3331_v1, %v9578_v8  ;;  %3348 = vrot.lane.b32.xlu1 %v3346_v31, %s7790_s22  ;;  %6374 = vmatprep.subr.bf16.mxu1 %v9579_v29 }
 0xc60   : > { %v3335_v35 = vpack.c.bf16 %v3334_v58, %v3333_v56  ;;  %v7113_v13 = vpop.eup %7112 }
 0xc61   : > { %v3162_v54 = vmul.f32 %v7113_v13, %v7109_v5  ;;  %v9583_v5 = vpack.c.bf16 %v9581_v39, %v9582_v4 }
 0xc62   : > { %3608 = vrot.lane.b32.xlu0 %v3335_v35, %s7790_s22  ;;  %3610 = vrot.lane.b32.xlu1 %v9580_v34, %s7790_s22 }
 0xc63   : > { %v7115_v3 = vpop.eup %7114 }
 0xc64   : > { %v3161_v32 = vmul.f32 %v7115_v3, %v7111_v10  ;;  %v3351_v10 = vpop.permute.xlu1 %3350 }
 0xc65   : > { %v3356_v44 = vsel %vm2319_vm1, %v3351_v10, 0 }
 0xc66   : > { %v3163_v46 = vpack.c.bf16 %v3162_v54, %v3161_v32 }
 0xc68   : > { %6363 = vmatmul.mubr.msk.bf16.vlgmr.msra.gmra.mrb[20].mxu1 %vm2735_vm13, %v3163_v46 }
 0xc69   : > { %6375 = vmatpush3.bf16.msra.mxu1 %v6940_v63  ;;  %6378 = vmatprep.mubr.msk.bf16.mxu1 %vm7772_vm0, %v9579_v29 }
 0xc6a   : > { %6376 = vmatprep.subr.bf16.mxu1 %v9579_v29 }
 0xc6d   : > { %6377 = vmatpush3.bf16.msra.mxu1 %v6941_v26 }
 0xc6e   : > { %6388 = vmatprep.subr.bf16.mxu1 %v9579_v29 }
 0xc70   : > { %6379 = vmatmul.mubr.msk.bf16.vlgmr.msra.gmra.mrb[24].mxu1 %vm2319_vm1, %v9583_v5 }
 0xc71   : > { %6390 = vmatprep.mubr.msk.bf16.mxu1 %vm7772_vm0, %v9579_v29 }
 0xcd0   : > { %v3349_v23 = vpop.permute.xlu1 %3348 }
 0xcd4   : > { %v3611_v31 = vpop.permute.xlu1 %3610  ;;  %v3609_v1 = vpop.permute.xlu0 %3608 }
 0xcd5   : > { %v3616_v14 = vsel %vm2319_vm1, %v3611_v31, 0 }
 0xcd6   : > { %6389 = vmatpush3.bf16.xpose.msra.mxu1 %v3616_v14 }
 0xcd7   : > { %6400 = vmatprep.subr.bf16.mxu1 %v9579_v29 }
 0xcdd   : > { %6391 = vmatmul.mubr.msk.bf16.vlgmr.msra.gmra.mrb[28].mxu1 %vm2319_vm1, %v3609_v1 }
 0xcde   : > { %6404 = vmatprep.mubr.msk.bf16.mxu1 %vm7772_vm0, %v9579_v29 }
 0xd3b   : > { %v3205_v27 = vpop.f32.mrb[20].mxu1 }
 0xd3c   : > { %v6364_v56 = vpop.f32.mrb[21].mxu1 }
 0xd3d   : > { %v3208_v58 = vpop.f32.mrb[22].mxu1 }
 0xd3e   : > { %v3212_v35 = vpack.c.bf16 %v3208_v58, %v3205_v27  ;;  %v6365_v13 = vpop.f32.mrb[23].mxu1 }
 0xd3f   : > { %v9589_v13 = vmov 1  }
 0xd40   : > { %6371 = vmatmul.mubr.msk.bf16.vlgmr.msra.gmra.mrb[24].mxu0 %vm2319_vm1, %v3212_v35  ;;  %v9588_v35 = vmov 5  }
 0xd41   : > { %6383 = vmatpush3.bf16.xpose.msra.mxu0 %v3356_v44  ;;  %6384 = vmatprep.mubr.msk.bf16.mxu0 %vm7772_vm0, %v9579_v29 }
 0xd42   : > { %6394 = vmatprep.subr.bf16.mxu0 %v9579_v29 }
 0xd43   : > { %v3318_v3 = vpop.f32.mrb[24].mxu1 }
 0xd44   : > { %v6380_v54 = vpop.f32.mrb[25].mxu1 }
 0xd45   : > { %v3321_v32 = vpop.f32.mrb[26].mxu1  ;;  %v9591_v54 = vmov 3  }
 0xd46   : > { %v6381_v63 = vpop.f32.mrb[27].mxu1 }
 0xd47   : > { %v9593_v63 = vmov 4  }
 0xd48   : > { %6385 = vmatmul.mubr.msk.bf16.vlgmr.msra.gmra.mrb[28].mxu0 %vm2319_vm1, %v3349_v23 }
 0xd49   : > { %6396 = vmatprep.mubr.msk.bf16.mxu0 %vm7772_vm0, %v9579_v29 }
 0xdb0   : > { %v8893_v46 = vpop.f32.mrb[28].mxu1 }
 0xdb1   : > { %9584 = vst [vmem:[#allocation80_spill] sm:$0xff] %v8893_v46  ;;  %v6392_v26 = vpop.f32.mrb[29].mxu1 }
 0xdb2   : > { %v8895_v39 = vpop.f32.mrb[30].mxu1  ;;  %v9594_v26 = vmov 14  }
 0xdb3   : > { %9585 = vst [vmem:[#allocation79_spill] sm:$0xff] %v8895_v39  ;;  %v6393_v4 = vpop.f32.mrb[31].mxu1 }
 0xdb4   : > { %v9595_v4 = vmov 6  }
 0xe13   : > { %v3262_v5 = vpop.f32.mrb[24].mxu0 }
 0xe14   : > { %v8897_v10 = vadd.f32 %v3318_v3, %v3262_v5  ;;  %v6372_v31 = vpop.f32.mrb[25].mxu0  ;;  %v9590_v3 = vmov 8   ;;  %v9596_v5 = vmov 0  }
 0xe15   : > { %v3265_v14 = vpop.f32.mrb[26].mxu0  ;;  %v9597_v31 = vmov 7  }
 0xe16   : > { %9586 = vst [vmem:[#allocation83_spill] sm:$0xff] %v8897_v10  ;;  %v8899_v1 = vadd.f32 %v3321_v32, %v3265_v14  ;;  %v6373_v27 = vpop.f32.mrb[27].mxu0  ;;  %v9592_v32 = vmov 11   ;;  %v9598_v14 = vmov 9  }
 0xe17   : > { %v9599_v27 = vmov 10  }
 0xe18   : > { %9587 = vst [vmem:[#allocation84_spill] sm:$0xff] %v8899_v1  ;;  %v9603_v1 = vmov 2  }
 0xe1b   : > { %v8901_v56 = vpop.f32.mrb[28].mxu0 }
 0xe1c   : > { %3426 = vperm.xlu0 %6766, %v8901_v56   ;;  %3401 = vperm.xlu1 %6764, %v8901_v56   ;;  %v6386_v23 = vpop.f32.mrb[29].mxu0 }
 0xe1d   : > { %v3395_v58 = vpop.f32.mrb[30].mxu0  ;;  %v9600_v23 = vmov 12  }
 0xe1e   : > { %v6387_v44 = vpop.f32.mrb[31].mxu0 }
 0xe1f   : > { %v9601_v44 = vmov 13  }
 0xe20   : > { %6769 = vset.pattern.permute.xlu0 %v9588_v35  ;;  %6765 = vset.pattern.permute.xlu1 %v9589_v13 }
 0xe21   : > { %3462 = vperm.xlu0 %6769, %v8901_v56   ;;  %3414 = vperm.xlu1 %6765, %v8901_v56  }
 0xe25   : > { %6772 = vset.pattern.permute.xlu0 %v9590_v3  ;;  %6767 = vset.pattern.permute.xlu1 %v9591_v54 }
 0xe26   : > { %3498 = vperm.xlu0 %6772, %v8901_v56   ;;  %3438 = vperm.xlu1 %6767, %v8901_v56  }
 0xe2a   : > { %6775 = vset.pattern.permute.xlu0 %v9592_v32  ;;  %6768 = vset.pattern.permute.xlu1 %v9593_v63 }
 0xe2b   : > { %3534 = vperm.xlu0 %6775, %v8901_v56   ;;  %3450 = vperm.xlu1 %6768, %v8901_v56  }
 0xe2f   : > { %6778 = vset.pattern.permute.xlu0 %v9594_v26  ;;  %6770 = vset.pattern.permute.xlu1 %v9595_v4 }
 0xe30   : > { %3570 = vperm.xlu0 %6778, %v8901_v56   ;;  %3474 = vperm.xlu1 %6770, %v8901_v56  }
 0xe34   : > { %6779 = vset.pattern.permute.xlu0 %v9596_v5  ;;  %6771 = vset.pattern.permute.xlu1 %v9597_v31 }
 0xe35   : > { %3486 = vperm.xlu1 %6771, %v8901_v56   ;;  %3406 = vperm.xlu0 %6779, %v3395_v58  }
 0xe39   : > { %6773 = vset.pattern.permute.xlu1 %v9598_v14  ;;  %6782 = vset.pattern.permute.xlu0 %v9591_v54 }
 0xe3a   : > { %3510 = vperm.xlu1 %6773, %v8901_v56   ;;  %3442 = vperm.xlu0 %6782, %v3395_v58  }
 0xe3e   : > { %6774 = vset.pattern.permute.xlu1 %v9599_v27  ;;  %6785 = vset.pattern.permute.xlu0 %v9595_v4 }
 0xe3f   : > { %3522 = vperm.xlu1 %6774, %v8901_v56   ;;  %3478 = vperm.xlu0 %6785, %v3395_v58  }
 0xe43   : > { %6776 = vset.pattern.permute.xlu1 %v9600_v23  ;;  %6788 = vset.pattern.permute.xlu0 %v9598_v14 }
 0xe44   : > { %3546 = vperm.xlu1 %6776, %v8901_v56   ;;  %3514 = vperm.xlu0 %6788, %v3395_v58  }
 0xe48   : > { %6777 = vset.pattern.permute.xlu1 %v9601_v44  ;;  %6791 = vset.pattern.permute.xlu0 %v9600_v23 }
 0xe49   : > { %3558 = vperm.xlu1 %6777, %v8901_v56   ;;  %3550 = vperm.xlu0 %6791, %v3395_v58  }
 0xe4d   : > { %6780 = vset.pattern.permute.xlu1 %v9589_v13  ;;  %6795 = vset.pattern.permute.xlu0 %v9602_v17  ;;  %v9604_v13 = vld [vmem:[#allocation74_spill] sm:$0xff] }
 0xe4e   : > { %3418 = vperm.xlu1 %6780, %v3395_v58   ;;  %3586 = vperm.xlu0 %6795, %v3395_v58  }
 0xe52   : > { %6781 = vset.pattern.permute.xlu1 %v9603_v1  ;;  %6798 = vset.pattern.permute.xlu0 %v9603_v1 }
 0xe53   : > { %3430 = vperm.xlu1 %6781, %v3395_v58  }
 0xe57   : > { %6783 = vset.pattern.permute.xlu1 %v9593_v63 }
 0xe58   : > { %3454 = vperm.xlu1 %6783, %v3395_v58  }
 0xe5c   : > { %6784 = vset.pattern.permute.xlu1 %v9588_v35 }
 0xe5d   : > { %3466 = vperm.xlu1 %6784, %v3395_v58  }
 0xe61   : > { %6786 = vset.pattern.permute.xlu1 %v9597_v31 }
 0xe62   : > { %3490 = vperm.xlu1 %6786, %v3395_v58  }
 0xe66   : > { %6787 = vset.pattern.permute.xlu1 %v9590_v3 }
 0xe67   : > { %3502 = vperm.xlu1 %6787, %v3395_v58  }
 0xe6b   : > { %6789 = vset.pattern.permute.xlu1 %v9599_v27 }
 0xe6c   : > { %3526 = vperm.xlu1 %6789, %v3395_v58  }
 0xe70   : > { %6790 = vset.pattern.permute.xlu1 %v9592_v32 }
 0xe71   : > { %3538 = vperm.xlu1 %6790, %v3395_v58  }
 0xe75   : > { %6792 = vset.pattern.permute.xlu1 %v9601_v44 }
 0xe76   : > { %3562 = vperm.xlu1 %6792, %v3395_v58  }
 0xe7a   : > { %6793 = vset.pattern.permute.xlu1 %v9594_v26 }
 0xe7b   : > { %3574 = vperm.xlu1 %6793, %v3395_v58  }
 0xe7f   : > { %6794 = vset.pattern.permute.xlu1 %v9602_v17 }
 0xe80   : > { %3582 = vperm.xlu1 %6794, %v8901_v56  }
 0xe84   : > { %6796 = vset.pattern.permute.xlu1 %v9596_v5 }
 0xe9b   : > { %v3402_v10 = vpop.permute.xlu1 %3401  ;;  %v3427_v31 = vpop.permute.xlu0 %3426 }
 0xe9c   : > { %v3409_v33 = vmul.f32 %v8527_v42, %v3402_v10  ;;  %v3433_v43 = vmul.f32 %v8534_v49, %v3427_v31 }
 0xea0   : > { %v3415_v1 = vpop.permute.xlu1 %3414  ;;  %v3463_v32 = vpop.permute.xlu0 %3462 }
 0xea1   : > { %v3421_v34 = vmul.f32 %v9604_v13, %v3415_v1 }
 0xea3   : > { %v3423_v38 = vadd.f32 %v3421_v34, %v3409_v33  ;;  %v3469_v34 = vmul.f32 %v8565_v7, %v3463_v32 }
 0xea5   : > { %v3439_v23 = vpop.permute.xlu1 %3438  ;;  %v3499_v44 = vpop.permute.xlu0 %3498  ;;  %v3435_v16 = vadd.f32 %v3433_v43, %v3423_v38 }
 0xea6   : > { %v3505_v32 = vmul.f32 %v8597_v37, %v3499_v44 }
 0xeaa   : > { %v3451_v27 = vpop.permute.xlu1 %3450  ;;  %v3535_v54 = vpop.permute.xlu0 %3534 }
 0xeab   : > { %v3457_v10 = vmul.f32 %v8557_v22, %v3451_v27  ;;  %v3541_v44 = vmul.f32 %v8630_v20, %v3535_v54 }
 0xeaf   : > { %v3475_v14 = vpop.permute.xlu1 %3474  ;;  %v8953_v58 = vpop.permute.xlu0 %3570 }
 0xeb4   : > { %v3487_v4 = vpop.permute.xlu1 %3486  ;;  %v3407_v5 = vpop.permute.xlu0 %3406 }
 0xeb5   : > { %v3410_v8 = vmul.f32 %v8538_v52, %v3407_v5 }
 0xeb9   : > { %v3511_v63 = vpop.permute.xlu1 %3510  ;;  %v3443_v46 = vpop.permute.xlu0 %3442 }
 0xeba   : > { %v3446_v40 = vmul.f32 %v8560_v41, %v3443_v46 }
 0xebe   : > { %v3523_v3 = vpop.permute.xlu1 %3522 }
 0xec3   : > { %v8951_v26 = vpop.permute.xlu1 %3546 }
 0xec8   : > { %v8955_v17 = vpop.permute.xlu1 %3558 }
 0xecd   : > { %v3419_v56 = vpop.permute.xlu1 %3418 }
 0xece   : > { %v3422_v35 = vmul.f32 %v8530_v45, %v3419_v56  ;;  %v3445_v56 = vmul.f32 %v8548_v28, %v3439_v23 }
 0xed0   : > { %v3424_v61 = vadd.f32 %v3422_v35, %v3410_v8  ;;  %v3447_v42 = vadd.f32 %v3445_v56, %v3435_v16  ;;  %v3493_v16 = vmul.f32 %v8588_v60, %v3487_v4  ;;  %v3529_v4 = vmul.f32 %v8621_v59, %v3523_v3 }
 0xed2   : > { %v3431_v29 = vpop.permute.xlu1 %3430 }
 0xed3   : > { %v3434_v30 = vmul.f32 %v9605_v50, %v3431_v29  ;;  %v3459_v29 = vadd.f32 %v3457_v10, %v3447_v42 }
 0xed5   : > { %v3436_v39 = vadd.f32 %v3434_v30, %v3424_v61  ;;  %v3479_v30 = vpop.permute.xlu0 %3478  ;;  %v3471_v38 = vadd.f32 %v3469_v34, %v3459_v29 }
 0xed6   : > { %v3482_v46 = vmul.f32 %v8591_v11, %v3479_v30 }
 0xed7   : > { %v3455_v48 = vpop.permute.xlu1 %3454  ;;  %v3448_v1 = vadd.f32 %v3446_v40, %v3436_v39  ;;  %v3481_v40 = vmul.f32 %v8583_v2, %v3475_v14  ;;  %v3517_v14 = vmul.f32 %v8616_v62, %v3511_v63  ;;  %v3553_v63 = vmul.f32 %v8649_v24, %v8951_v26 }
 0xed8   : > { %v3458_v5 = vmul.f32 %v8571_v51, %v3455_v48 }
 0xed9   : > { %v3483_v31 = vadd.f32 %v3481_v40, %v3471_v38 }
 0xeda   : > { %v3460_v35 = vadd.f32 %v3458_v5, %v3448_v1  ;;  %v3515_v1 = vpop.permute.xlu0 %3514 }
 0xedb   : > { %v3495_v56 = vadd.f32 %v3493_v16, %v3483_v31  ;;  %v3518_v10 = vmul.f32 %v8624_v18, %v3515_v1 }
 0xedc   : > { %v3467_v8 = vpop.permute.xlu1 %3466 }
 0xedd   : > { %v3470_v33 = vmul.f32 %v8577_v21, %v3467_v8 }
 0xede   : > { %v3551_v38 = vpop.permute.xlu0 %3550 }
 0xedf   : > { %v3472_v61 = vadd.f32 %v3470_v33, %v3460_v35  ;;  %v3507_v35 = vadd.f32 %v3505_v32, %v3495_v56 }
 0xee1   : > { %v3491_v43 = vpop.permute.xlu1 %3490  ;;  %v3484_v39 = vadd.f32 %v3482_v46, %v3472_v61  ;;  %v3519_v30 = vadd.f32 %v3517_v14, %v3507_v35 }
 0xee2   : > { %v3494_v48 = vmul.f32 %v8604_v36, %v3491_v43 }
 0xee3   : > { %v3531_v43 = vadd.f32 %v3529_v4, %v3519_v30 }
 0xee4   : > { %v3496_v23 = vadd.f32 %v3494_v48, %v3484_v39  ;;  %v3554_v39 = vmul.f32 %v8657_v53, %v3551_v38 }
 0xee5   : > { %v3543_v16 = vadd.f32 %v3541_v44, %v3531_v43 }
 0xee6   : > { %v3503_v27 = vpop.permute.xlu1 %3502 }
 0xee7   : > { %v3506_v42 = vmul.f32 %v8610_v57, %v3503_v27  ;;  %v3565_v27 = vmul.f32 %v8654_v9, %v8955_v17 }
 0xee9   : > { %v3508_v5 = vadd.f32 %v3506_v42, %v3496_v23  ;;  %v3555_v23 = vadd.f32 %v3553_v63, %v3543_v16  ;;  %v3587_v42 = vpop.permute.xlu0 %3586  ;;  %v9610_v16 = vld [vmem:[#allocation79_spill] sm:$0xff] }
 0xeea   : > { %v3590_v32 = vmul.f32 %v8685_v25, %v3587_v42 }
 0xeeb   : > { %v3527_v8 = vpop.permute.xlu1 %3526  ;;  %v3520_v33 = vadd.f32 %v3518_v10, %v3508_v5  ;;  %v3567_v54 = vadd.f32 %v3565_v27, %v3555_v23  ;;  %v9611_v27 = vld [vmem:[#allocation80_spill] sm:$0xff] }
 0xeec   : > { %v3530_v29 = vmul.f32 %v8637_v12, %v3527_v8  ;;  %v3577_v8 = vmul.f32 %v8663_v6, %v8953_v58 }
 0xeee   : > { %v3532_v34 = vadd.f32 %v3530_v29, %v3520_v33  ;;  %v3579_v14 = vadd.f32 %v3577_v8, %v3567_v54 }
 0xef0   : > { %v3539_v61 = vpop.permute.xlu1 %3538 }
 0xef1   : > { %v3542_v46 = vmul.f32 %v8643_v55, %v3539_v61 }
 0xef3   : > { %v3544_v40 = vadd.f32 %v3542_v46, %v3532_v34 }
 0xef5   : > { %v3563_v48 = vpop.permute.xlu1 %3562  ;;  %v3556_v31 = vadd.f32 %v3554_v39, %v3544_v40 }
 0xef6   : > { %v3566_v3 = vmul.f32 %v8670_v47, %v3563_v48 }
 0xef8   : > { %v3568_v1 = vadd.f32 %v3566_v3, %v3556_v31 }
 0xefa   : > { %v3575_v56 = vpop.permute.xlu1 %3574 }
 0xefb   : > { %v3578_v5 = vmul.f32 %v8676_v0, %v3575_v56 }
 0xefd   : > { %v3580_v10 = vadd.f32 %v3578_v5, %v3568_v1 }
 0xeff   : > { %v3592_v26 = vadd.f32 %v3590_v32, %v3580_v10  ;;  %v3583_v35 = vpop.permute.xlu1 %3582 }
 0xf00   : > { %v3589_v33 = vmul.f32 %v8681_v19, %v3583_v35 }
 0xf01   : > { %v3596_v29 = vrot.slane %v3592_v26, 1  ;;  %v3602_v34 = vsel %vm2677_vm10, %v3592_v26, 0.0 }
 0xf02   : > { %v3591_v17 = vadd.f32 %v3589_v33, %v3579_v14  ;;  %v9612_v33 = vld [vmem:[#allocation65_spill] sm:$0xff] }
 0xf03   : > { %v3600_v4 = vsel %vm2669_vm8, %v3596_v29, 0.0 }
 0xf04   : > { %v3595_v30 = vrot.slane %v3591_v17, 1  ;;  %v3604_v43 = vsel %vm2683_vm12, %v3600_v4, 0.0  ;;  %v3601_v44 = vsel %vm2676_vm9, %v3591_v17, 0.0  ;;  %v9614_v4 = vld [vmem:[#allocation71_spill] sm:$0xff] }
 0xf05   : > { %v3606_v38 = vadd.f32 %v3604_v43, %v3602_v34  ;;  %v9616_v43 = vld [vmem:[#allocation68_spill] sm:$0xff] }
 0xf06   : > { %v3597_v58 = vsel %vm2669_vm8, %v3595_v30, %v3596_v29  ;;  %v9613_v29 = vld [vmem:[#allocation82_spill] sm:$0xff]  ;;  %v9615_v30 = vld [vmem:[#allocation81_spill] sm:$0xff] }
 0xf07   : > { %v3603_v48 = vsel %vm2682_vm11, %v3597_v58, 0.0  ;;  %v3656_v63 = vadd.f32 %v9610_v16, %v3606_v38  ;;  %v3802_v17 = vrot.slane %v9613_v29, %v9612_v33  ;;  %v3791_v34 = vrot.slane %v9615_v30, %v9612_v33  ;;  %v6944_v58 = vld [vmem:[%s9574_s2 + $0x20] sm:$0xff]  }
 0xf08   : > { %v3605_v31 = vadd.f32 %v3603_v48, %v3601_v44  ;;  %6401 = vmatpush3.bf16.msra.mxu1 %v6944_v58  ;;  %v6945_v44 = vld [vmem:[%s9574_s2 + $0x28] sm:$0xff]   ;;  %v9617_v16 = vmov 0.0   ;;  %v9643_v33 = vld [vmem:[#allocation75_spill] sm:$0xff] }
 0xf09   : > { %v3662_v3 = vsel %vm2735_vm13, %v3656_v63, -inf  ;;  %6402 = vmatprep.subr.bf16.mxu1 %v9617_v16 }
 0xf0a   : > { %3663 = vmax.xlane.f32.xlu0 %v3662_v3  ;;  %v3653_v23 = vadd.f32 %v9611_v27, %v3605_v31  ;;  %v9618_v31 = vld [vmem:[#allocation69_spill] sm:$0xff]  ;;  %v9619_v27 = vld [vmem:[#allocation70_spill] sm:$0xff] }
 0xf0c   : > { %v3659_v42 = vsel %vm2735_vm13, %v3653_v23, -inf  ;;  %6403 = vmatpush3.bf16.msra.mxu1 %v6945_v44 }
 0xf0d   : > { %3660 = vmax.xlane.f32.xlu1 %v3659_v42  ;;  %6414 = vmatprep.subr.bf16.mxu1 %v9617_v16 }
 0xf97   : > { %v3664_v56 = vpop.xlane.xlu0 %3663 }
 0xf98   : > { %v3666_v1 = vsub.f32 %v3656_v63, %v3664_v56 }
 0xf9a   : > { %v3669_v5 = vmul.f32 1.442695, %v3666_v1  ;;  %v3661_v54 = vpop.xlane.xlu1 %3660 }
 0xf9b   : > { %v3665_v32 = vsub.f32 %v3653_v23, %v3661_v54 }
 0xf9c   : > { %7116 = vpow2.f32 %v3669_v5 }
 0xf9d   : > { %v3667_v10 = vmul.f32 1.442695, %v3665_v32 }
 0xf9f   : > { %7118 = vpow2.f32 %v3667_v10 }
 0xfa6   : > { %v7117_v8 = vpop.eup %7116 }
 0xfa7   : > { %v3674_v26 = vsel %vm2735_vm13, %v7117_v8, 0.0 }
 0xfa8   : > { %3675 = vadd.xlane.f32.xlu0 %v3674_v26  ;;  %v9620_v26 = vld [vmem:[#allocation72_spill] sm:$0xff] }
 0xfa9   : > { %v7119_v35 = vpop.eup %7118 }
 0xfaa   : > { %v3671_v14 = vsel %vm2735_vm13, %v7119_v35, 0.0 }
 0xfab   : > { %3672 = vadd.xlane.f32.xlu1 %v3671_v14 }
 0xfbc   : > { %3682 = vrot.lane.b32.xlu1 %v9614_v4, %s7790_s22  ;;  %s9666_s22 = sld [smem:[#allocation58_spill]] }
 0xfbe   : > { %3804 = vrot.lane.b32.xlu0 %v3802_v17, %s7789_s12 }
 0xfc0   : > { %3813 = vrot.lane.b32.xlu1 %v9616_v43, %s7788_s4 }
 0xfc2   : > { %3793 = vrot.lane.b32.xlu0 %v3791_v34, %s7789_s12  ;;  %s9665_s12 = sld [smem:[#allocation56_spill]] }
0x1035   : > { %v3676_v38 = vpop.xlane.xlu0 %3675 }
0x1036   : > { %7120 = vrcp.f32 %v3676_v38 }
0x1038   : > { %v3673_v48 = vpop.xlane.xlu1 %3672 }
0x1039   : > { %7122 = vrcp.f32 %v3673_v48  ;;  %v3805_v63 = vpop.permute.xlu0 %3804 }
0x103a   : > { %v3807_v3 = vadd.f32 %v3805_v63, %v9618_v31  ;;  %v3808_v23 = vadd.f32 %v3805_v63, %v9619_v27 }
0x103c   : > { %v3809_v42 = vpack.c.bf16 %v3808_v23, %v3807_v3  ;;  %v3683_v56 = vpop.permute.xlu1 %3682 }
0x103d   : > { %6395 = vmatpush3.bf16.msra.mxu0 %v3683_v56  ;;  %v3794_v1 = vpop.permute.xlu0 %3793 }
0x103e   : > { %v3796_v5 = vadd.f32 %v3794_v1, %v9618_v31  ;;  %v3797_v54 = vadd.f32 %v3794_v1, %v9619_v27  ;;  %3811 = vrot.lane.b32.xlu1 %v3809_v42, %s7788_s4  ;;  %6408 = vmatprep.subr.bf16.mxu0 %v9617_v16  ;;  %v9621_v1 = vmov 1  }
0x1040   : > { %v3798_v32 = vpack.c.bf16 %v3797_v54, %v3796_v5  ;;  %v7121_v10 = vpop.eup %7120  ;;  %v3814_v29 = vpop.permute.xlu1 %3813  ;;  %v9622_v5 = vmov 5   ;;  %v9623_v54 = vmov 3  }
0x1041   : > { %v3680_v17 = vmul.f32 %v7121_v10, %v7117_v8  ;;  %v3819_v43 = vsel %vm2319_vm1, %v3814_v29, 0  ;;  %v9625_v10 = vmov 4   ;;  %v9628_v29 = vmov 14  }
0x1042   : > { %4073 = vrot.lane.b32.xlu1 %v9620_v26, %s7788_s4  ;;  %4071 = vrot.lane.b32.xlu0 %v3798_v32, %s7788_s4  ;;  %v9624_v32 = vmov 8   ;;  %v9626_v26 = vmov 11  }
0x1043   : > { %v7123_v14 = vpop.eup %7122 }
0x1044   : > { %v3679_v30 = vmul.f32 %v7123_v14, %v7119_v35  ;;  %v9627_v14 = vmov 6  }
0x1046   : > { %v3681_v34 = vpack.c.bf16 %v3680_v17, %v3679_v30  ;;  %v9629_v17 = vmov 7   ;;  %v9630_v30 = vmov 0  }
0x1048   : > { %6397 = vmatmul.mubr.msk.bf16.vlgmr.msra.gmra.mrb[32].mxu0 %vm2735_vm13, %v3681_v34  ;;  %v9631_v34 = vmov 9  }
0x1049   : > { %6409 = vmatpush3.bf16.xpose.msra.mxu0 %v3819_v43  ;;  %6410 = vmatprep.mubr.msk.bf16.mxu0 %vm7772_vm0, %v9617_v16  ;;  %v9632_v43 = vmov 10  }
0x104a   : > { %6420 = vmatprep.subr.bf16.mxu0 %v9617_v16 }
0x10b0   : > { %v3812_v38 = vpop.permute.xlu1 %3811 }
0x10b1   : > { %6411 = vmatmul.mubr.msk.bf16.vlgmr.msra.gmra.mrb[36].mxu0 %vm2319_vm1, %v3812_v38  ;;  %v9633_v38 = vmov 12  }
0x10b2   : > { %6422 = vmatprep.mubr.msk.bf16.mxu0 %vm7772_vm0, %v9617_v16 }
0x10b4   : > { %v4074_v35 = vpop.permute.xlu1 %4073  ;;  %v4072_v3 = vpop.permute.xlu0 %4071 }
0x10b5   : > { %v4079_v31 = vsel %vm2319_vm1, %v4074_v35, 0  ;;  %v9636_v35 = vmov 2  }
0x111b   : > { %v3722_v58 = vpop.f32.mrb[32].mxu0 }
0x111c   : > { %v6398_v8 = vpop.f32.mrb[33].mxu0 }
0x111d   : > { %v3725_v44 = vpop.f32.mrb[34].mxu0  ;;  %v9635_v8 = vmov 15  }
0x111e   : > { %v3729_v48 = vpack.c.bf16 %v3725_v44, %v3722_v58  ;;  %v6399_v63 = vpop.f32.mrb[35].mxu0  ;;  %v9634_v58 = vmov 13  }
0x1120   : > { %6405 = vmatmul.mubr.msk.bf16.vlgmr.msra.gmra.mrb[32].mxu1 %vm2319_vm1, %v3729_v48  ;;  %v9637_v48 = vld [vmem:[#allocation83_spill] sm:$0xff] }
0x1121   : > { %6415 = vmatpush3.bf16.xpose.msra.mxu1 %v4079_v31  ;;  %6416 = vmatprep.mubr.msk.bf16.mxu1 %vm7772_vm0, %v9617_v16 }
0x1122   : > { %6426 = vmatprep.subr.bf16.mxu1 %v9617_v16 }
0x1128   : > { %6417 = vmatmul.mubr.msk.bf16.vlgmr.msra.gmra.mrb[36].mxu1 %vm2319_vm1, %v4072_v3 }
0x1129   : > { %6430 = vmatprep.mubr.msk.bf16.mxu1 %vm7772_vm0, %v9617_v16 }
0x1184   : > { %v9051_v27 = vpop.f32.mrb[36].mxu0 }
0x1185   : > { %3864 = vperm.xlu1 %6796, %v9051_v27   ;;  %v6412_v23 = vpop.f32.mrb[37].mxu0  ;;  %3889 = vperm.xlu0 %6798, %v9051_v27  }
0x1186   : > { %v3858_v42 = vpop.f32.mrb[38].mxu0  ;;  %v9639_v23 = vld [vmem:[#allocation84_spill] sm:$0xff] }
0x1187   : > { %v6413_v56 = vpop.f32.mrb[39].mxu0 }
0x1189   : > { %6797 = vset.pattern.permute.xlu1 %v9621_v1  ;;  %6801 = vset.pattern.permute.xlu0 %v9622_v5 }
0x118a   : > { %3877 = vperm.xlu1 %6797, %v9051_v27   ;;  %3925 = vperm.xlu0 %6801, %v9051_v27  }
0x118e   : > { %6799 = vset.pattern.permute.xlu1 %v9623_v54  ;;  %6804 = vset.pattern.permute.xlu0 %v9624_v32 }
0x118f   : > { %3901 = vperm.xlu1 %6799, %v9051_v27   ;;  %3961 = vperm.xlu0 %6804, %v9051_v27  }
0x1193   : > { %6800 = vset.pattern.permute.xlu1 %v9625_v10  ;;  %6807 = vset.pattern.permute.xlu0 %v9626_v26 }
0x1194   : > { %3913 = vperm.xlu1 %6800, %v9051_v27   ;;  %3997 = vperm.xlu0 %6807, %v9051_v27  }
0x1198   : > { %6802 = vset.pattern.permute.xlu1 %v9627_v14  ;;  %6810 = vset.pattern.permute.xlu0 %v9628_v29 }
0x1199   : > { %3937 = vperm.xlu1 %6802, %v9051_v27   ;;  %4033 = vperm.xlu0 %6810, %v9051_v27  }
0x119d   : > { %6803 = vset.pattern.permute.xlu1 %v9629_v17  ;;  %6811 = vset.pattern.permute.xlu0 %v9630_v30 }
0x119e   : > { %3949 = vperm.xlu1 %6803, %v9051_v27   ;;  %3869 = vperm.xlu0 %6811, %v3858_v42  }
0x11a2   : > { %6805 = vset.pattern.permute.xlu1 %v9631_v34  ;;  %6814 = vset.pattern.permute.xlu0 %v9623_v54 }
0x11a3   : > { %3973 = vperm.xlu1 %6805, %v9051_v27   ;;  %3905 = vperm.xlu0 %6814, %v3858_v42  }
0x11a7   : > { %6806 = vset.pattern.permute.xlu1 %v9632_v43  ;;  %6817 = vset.pattern.permute.xlu0 %v9627_v14 }
0x11a8   : > { %3985 = vperm.xlu1 %6806, %v9051_v27   ;;  %3941 = vperm.xlu0 %6817, %v3858_v42  }
0x11ac   : > { %6808 = vset.pattern.permute.xlu1 %v9633_v38  ;;  %6820 = vset.pattern.permute.xlu0 %v9631_v34 }
0x11ad   : > { %4009 = vperm.xlu1 %6808, %v9051_v27   ;;  %3977 = vperm.xlu0 %6820, %v3858_v42  }
0x11b1   : > { %6809 = vset.pattern.permute.xlu1 %v9634_v58  ;;  %6823 = vset.pattern.permute.xlu0 %v9633_v38 }
0x11b2   : > { %4021 = vperm.xlu1 %6809, %v9051_v27   ;;  %4013 = vperm.xlu0 %6823, %v3858_v42  }
0x11b6   : > { %6812 = vset.pattern.permute.xlu1 %v9621_v1  ;;  %6827 = vset.pattern.permute.xlu0 %v9635_v8 }
0x11b7   : > { %3881 = vperm.xlu1 %6812, %v3858_v42   ;;  %4049 = vperm.xlu0 %6827, %v3858_v42  }
0x11bb   : > { %6813 = vset.pattern.permute.xlu1 %v9636_v35 }
0x11bc   : > { %3893 = vperm.xlu1 %6813, %v3858_v42  }
0x11c0   : > { %6815 = vset.pattern.permute.xlu1 %v9625_v10 }
0x11c1   : > { %3917 = vperm.xlu1 %6815, %v3858_v42  }
0x11c5   : > { %6816 = vset.pattern.permute.xlu1 %v9622_v5 }
0x11c6   : > { %3929 = vperm.xlu1 %6816, %v3858_v42  }
0x11ca   : > { %6818 = vset.pattern.permute.xlu1 %v9629_v17 }
0x11cb   : > { %3953 = vperm.xlu1 %6818, %v3858_v42  }
0x11cf   : > { %6819 = vset.pattern.permute.xlu1 %v9624_v32 }
0x11d0   : > { %3965 = vperm.xlu1 %6819, %v3858_v42  }
0x11d4   : > { %6821 = vset.pattern.permute.xlu1 %v9632_v43 }
0x11d5   : > { %3989 = vperm.xlu1 %6821, %v3858_v42  }
0x11d9   : > { %6822 = vset.pattern.permute.xlu1 %v9626_v26 }
0x11da   : > { %4001 = vperm.xlu1 %6822, %v3858_v42  }
0x11de   : > { %6824 = vset.pattern.permute.xlu1 %v9634_v58 }
0x11df   : > { %4025 = vperm.xlu1 %6824, %v3858_v42  }
0x11e3   : > { %6825 = vset.pattern.permute.xlu1 %v9628_v29 }
0x11e4   : > { %4037 = vperm.xlu1 %6825, %v3858_v42  }
0x11e8   : > { %6826 = vset.pattern.permute.xlu1 %v9635_v8 }
0x11e9   : > { %4045 = vperm.xlu1 %6826, %v9051_v27  }
0x11f3   : > { %v3779_v44 = vpop.f32.mrb[32].mxu1 }
0x11f4   : > { %v9100_v63 = vadd.f32 %v3779_v44, %v9637_v48  ;;  %v6406_v31 = vpop.f32.mrb[33].mxu1 }
0x11f5   : > { %v3782_v3 = vpop.f32.mrb[34].mxu1 }
0x11f6   : > { %9638 = vst [vmem:[#allocation74_spill] sm:$0xff] %v9100_v63  ;;  %v9103_v56 = vadd.f32 %v3782_v3, %v9639_v23  ;;  %v6407_v1 = vpop.f32.mrb[35].mxu1 }
0x11f8   : > { %9640 = vst [vmem:[#allocation76_spill] sm:$0xff] %v9103_v56 }
0x11fb   : > { %v9105_v5 = vpop.f32.mrb[36].mxu1 }
0x11fc   : > { %9641 = vst [vmem:[#allocation79_spill] sm:$0xff] %v9105_v5  ;;  %v6418_v54 = vpop.f32.mrb[37].mxu1 }
0x11fd   : > { %v9107_v32 = vpop.f32.mrb[38].mxu1 }
0x11fe   : > { %9642 = vst [vmem:[#allocation80_spill] sm:$0xff] %v9107_v32  ;;  %v6419_v42 = vpop.f32.mrb[39].mxu1 }
0x1204   : > { %v3865_v10 = vpop.permute.xlu1 %3864  ;;  %v3890_v17 = vpop.permute.xlu0 %3889 }
0x1205   : > { %v3872_v56 = vmul.f32 %v9643_v33, %v3865_v10  ;;  %v3896_v39 = vmul.f32 %v8534_v49, %v3890_v17 }
0x1209   : > { %v3878_v26 = vpop.permute.xlu1 %3877  ;;  %v3926_v43 = vpop.permute.xlu0 %3925 }
0x120a   : > { %v3884_v54 = vmul.f32 %v9604_v13, %v3878_v26  ;;  %v3932_v49 = vmul.f32 %v8565_v7, %v3926_v43 }
0x120c   : > { %v3886_v4 = vadd.f32 %v3884_v54, %v3872_v56 }
0x120e   : > { %v3902_v14 = vpop.permute.xlu1 %3901  ;;  %v3962_v58 = vpop.permute.xlu0 %3961  ;;  %v3898_v61 = vadd.f32 %v3896_v39, %v3886_v4 }
0x120f   : > { %v3968_v7 = vmul.f32 %v8597_v37, %v3962_v58 }
0x1213   : > { %v3914_v27 = vpop.permute.xlu1 %3913  ;;  %v3998_v35 = vpop.permute.xlu0 %3997 }
0x1214   : > { %v3920_v33 = vmul.f32 %v8557_v22, %v3914_v27  ;;  %v4004_v37 = vmul.f32 %v8630_v20, %v3998_v35 }
0x1218   : > { %v3938_v29 = vpop.permute.xlu1 %3937  ;;  %v9111_v48 = vpop.permute.xlu0 %4033 }
0x121d   : > { %v3950_v34 = vpop.permute.xlu1 %3949  ;;  %v3870_v23 = vpop.permute.xlu0 %3869 }
0x121e   : > { %v3873_v42 = vmul.f32 %v8538_v52, %v3870_v23  ;;  %v3956_v22 = vmul.f32 %v8588_v60, %v3950_v34 }
0x1222   : > { %v3974_v38 = vpop.permute.xlu1 %3973  ;;  %v3906_v5 = vpop.permute.xlu0 %3905 }
0x1223   : > { %v3909_v40 = vmul.f32 %v8560_v41, %v3906_v5 }
0x1227   : > { %v3986_v8 = vpop.permute.xlu1 %3985 }
0x1228   : > { %v3992_v60 = vmul.f32 %v8621_v59, %v3986_v8 }
0x122c   : > { %v9109_v44 = vpop.permute.xlu1 %4009 }
0x1231   : > { %v9113_v31 = vpop.permute.xlu1 %4021 }
0x1236   : > { %v3882_v3 = vpop.permute.xlu1 %3881 }
0x1237   : > { %v3885_v1 = vmul.f32 %v8530_v45, %v3882_v3  ;;  %v3908_v45 = vmul.f32 %v8548_v28, %v3902_v14  ;;  %v3944_v28 = vmul.f32 %v8583_v2, %v3938_v29  ;;  %v3980_v2 = vmul.f32 %v8616_v62, %v3974_v38 }
0x1238   : > { %v4016_v62 = vmul.f32 %v8649_v24, %v9109_v44  ;;  %v4028_v38 = vmul.f32 %v8654_v9, %v9113_v31 }
0x1239   : > { %v3887_v30 = vadd.f32 %v3885_v1, %v3873_v42  ;;  %v3910_v10 = vadd.f32 %v3908_v45, %v3898_v61 }
0x123b   : > { %v3894_v63 = vpop.permute.xlu1 %3893 }
0x123c   : > { %v3897_v16 = vmul.f32 %v9605_v50, %v3894_v63  ;;  %v3922_v63 = vadd.f32 %v3920_v33, %v3910_v10  ;;  %v4040_v10 = vmul.f32 %v8663_v6, %v9111_v48  ;;  %v9646_v48 = vld [vmem:[#allocation61_spill] sm:$0xff] }
0x123e   : > { %v3899_v32 = vadd.f32 %v3897_v16, %v3887_v30  ;;  %v3942_v16 = vpop.permute.xlu0 %3941  ;;  %v3934_v4 = vadd.f32 %v3932_v49, %v3922_v63 }
0x123f   : > { %v3945_v41 = vmul.f32 %v8591_v11, %v3942_v16 }
0x1240   : > { %v3918_v46 = vpop.permute.xlu1 %3917  ;;  %v3911_v13 = vadd.f32 %v3909_v40, %v3899_v32  ;;  %v3946_v61 = vadd.f32 %v3944_v28, %v3934_v4 }
0x1241   : > { %v3921_v52 = vmul.f32 %v8571_v51, %v3918_v46 }
0x1242   : > { %v3958_v5 = vadd.f32 %v3956_v22, %v3946_v61  ;;  %v3978_v32 = vpop.permute.xlu0 %3977 }
0x1243   : > { %v3923_v3 = vadd.f32 %v3921_v52, %v3911_v13  ;;  %v3981_v11 = vmul.f32 %v8624_v18, %v3978_v32 }
0x1244   : > { %v3970_v17 = vadd.f32 %v3968_v7, %v3958_v5 }
0x1245   : > { %v3930_v26 = vpop.permute.xlu1 %3929 }
0x1246   : > { %v3933_v50 = vmul.f32 %v8577_v21, %v3930_v26  ;;  %v3982_v34 = vadd.f32 %v3980_v2, %v3970_v17  ;;  %v4014_v54 = vpop.permute.xlu0 %4013  ;;  %v9650_v17 = vld [vmem:[#allocation71_spill] sm:$0xff]  ;;  %v6946_v2 = vld [vmem:[%s9574_s2 + $0x30] sm:$0xff]  }
0x1247   : > { %v4017_v18 = vmul.f32 %v8657_v53, %v4014_v54  ;;  %6427 = vmatpush3.bf16.msra.mxu1 %v6946_v2 }
0x1248   : > { %v3935_v30 = vadd.f32 %v3933_v50, %v3923_v3  ;;  %v3994_v1 = vadd.f32 %v3992_v60, %v3982_v34  ;;  %v9644_v50 = vld [vmem:[#allocation73_spill] sm:$0xff] }
0x124a   : > { %v3954_v39 = vpop.permute.xlu1 %3953  ;;  %v3947_v40 = vadd.f32 %v3945_v41, %v3935_v30  ;;  %v4006_v45 = vadd.f32 %v4004_v37, %v3994_v1  ;;  %v6947_v37 = vld [vmem:[%s9574_s2 + $0x38] sm:$0xff]  }
0x124b   : > { %v3957_v51 = vmul.f32 %v8604_v36, %v3954_v39  ;;  %v9648_v39 = vld [vmem:[#allocation80_spill] sm:$0xff] }
0x124c   : > { %v4018_v8 = vadd.f32 %v4016_v62, %v4006_v45 }
0x124d   : > { %v3959_v56 = vadd.f32 %v3957_v51, %v3947_v40  ;;  %v9649_v51 = vld [vmem:[#allocation79_spill] sm:$0xff] }
0x124e   : > { %v4030_v20 = vadd.f32 %v4028_v38, %v4018_v8  ;;  %v9654_v38 = vld [vmem:[#allocation74_spill] sm:$0xff] }
0x124f   : > { %v3966_v46 = vpop.permute.xlu1 %3965 }
0x1250   : > { %v3969_v21 = vmul.f32 %v8610_v57, %v3966_v46  ;;  %v4042_v26 = vadd.f32 %v4040_v10, %v4030_v20 }
0x1252   : > { %v3971_v14 = vadd.f32 %v3969_v21, %v3959_v56 }
0x1254   : > { %v3990_v27 = vpop.permute.xlu1 %3989  ;;  %v3983_v29 = vadd.f32 %v3981_v11, %v3971_v14 }
0x1255   : > { %v3993_v36 = vmul.f32 %v8637_v12, %v3990_v27 }
0x1257   : > { %v3995_v23 = vadd.f32 %v3993_v36, %v3983_v29  ;;  %v9651_v29 = vmov 0.0  }
0x1258   : > { %6428 = vmatprep.subr.bf16.mxu1 %v9651_v29 }
0x1259   : > { %v4002_v43 = vpop.permute.xlu1 %4001  ;;  %6429 = vmatpush3.bf16.msra.mxu1 %v6947_v37 }
0x125a   : > { %v4005_v57 = vmul.f32 %v8643_v55, %v4002_v43  ;;  %v4050_v55 = vpop.permute.xlu0 %4049  ;;  %6434 = vmatprep.subr.bf16.mxu1 %v9651_v29 }
0x125b   : > { %v4053_v53 = vmul.f32 %v8685_v25, %v4050_v55  ;;  %v9645_v25 = vld [vmem:[#allocation78_spill] sm:$0xff] }
0x125c   : > { %v4007_v42 = vadd.f32 %v4005_v57, %v3995_v23  ;;  %vm4609_vm6 = vcmp.lt.s32.totalorder %v9645_v25, 16 }
0x125e   : > { %v4026_v58 = vpop.permute.xlu1 %4025  ;;  %v4019_v12 = vadd.f32 %v4017_v18, %v4007_v42  ;;  %v9652_v42 = vmov 0  }
0x125f   : > { %v4029_v59 = vmul.f32 %v8670_v47, %v4026_v58 }
0x1261   : > { %v4031_v52 = vadd.f32 %v4029_v59, %v4019_v12 }
0x1263   : > { %v4038_v13 = vpop.permute.xlu1 %4037 }
0x1264   : > { %v4041_v33 = vmul.f32 %v8676_v0, %v4038_v13 }
0x1266   : > { %v4043_v35 = vadd.f32 %v4041_v33, %v4031_v52  ;;  %v6050_v52 = vld [vmem:[%s9653_s26] ss:$0 sm:$0xff]  ;;  %v9655_v33 = vld [vmem:[#allocation66_spill] sm:$0xff]  ;;  %s9667_s26 = sld [smem:[#allocation59_spill]] }
0x1268   : > { %v4055_v24 = vadd.f32 %v4053_v53, %v4043_v35  ;;  %v4046_v44 = vpop.permute.xlu1 %4045  ;;  %v9656_v53 = vld [vmem:[#allocation76_spill] sm:$0xff] }
0x1269   : > { %v4052_v47 = vmul.f32 %v8681_v19, %v4046_v44 }
0x126a   : > { %v4059_v3 = vrot.slane %v4055_v24, 1  ;;  %v4065_v0 = vsel %vm2677_vm10, %v4055_v24, 0.0  ;;  %v9657_v24 = vld [vmem:[#allocation67_spill] sm:$0xff] }
0x126b   : > { %v4054_v9 = vadd.f32 %v4052_v47, %v4042_v26 }
0x126c   : > { %v4063_v31 = vsel %vm2669_vm8, %v4059_v3, 0.0 }
0x126d   : > { %v4058_v63 = vrot.slane %v4054_v9, 1  ;;  %v4067_v16 = vsel %vm2683_vm12, %v4063_v31, 0.0  ;;  %v4064_v19 = vsel %vm2676_vm9, %v4054_v9, 0.0  ;;  %v6950_v9 = vld [vmem:[#allocation14 + $0x4] ss:$8 sps:$4 sm:$0xff]  }
0x126e   : > { %v4069_v30 = vadd.f32 %v4067_v16, %v4065_v0  ;;  %v6953_v31 = vld [vmem:[#allocation14 + $0x14] ss:$8 sps:$4 sm:$0xff]   ;;  %v6951_v0 = vld [vmem:[#allocation14 + $0x10] ss:$8 sps:$4 sm:$0xff]  }
0x126f   : > { %v4060_v6 = vsel %vm2669_vm8, %v4058_v63, %v4059_v3  ;;  %v6948_v3 = vld [vmem:[#allocation14] ss:$8 sps:$4 sm:$0xff]  }
0x1270   : > { %v4066_v41 = vsel %vm2682_vm11, %v4060_v6, 0.0  ;;  %v4119_v4 = vadd.f32 %v9648_v39, %v4069_v30 }
0x1271   : > { %v4068_v28 = vadd.f32 %v4066_v41, %v4064_v19 }
0x1272   : > { %v4125_v40 = vsel %vm2735_vm13, %v4119_v4, -inf }
0x1273   : > { %4126 = vmax.xlane.f32.xlu0 %v4125_v40  ;;  %v4116_v22 = vadd.f32 %v9649_v51, %v4068_v28  ;;  %v6954_v28 = vld [vmem:[#allocation14 + $0x20] ss:$8 sps:$4 sm:$0xff]   ;;  %v6959_v40 = vld [vmem:[#allocation14 + $0x34] ss:$8 sps:$4 sm:$0xff]   ;;  %v6957_v51 = vld [vmem:[#allocation14 + $0x30] ss:$8 sps:$4 sm:$0xff]  }
0x1275   : > { %v4122_v61 = vsel %vm2735_vm13, %v4116_v22, -inf }
0x1276   : > { %4123 = vmax.xlane.f32.xlu1 %v4122_v61  ;;  %v6960_v61 = vld [vmem:[#allocation14 + $0x40] ss:$8 sps:$4 sm:$0xff]  }
0x1300   : > { %v4127_v46 = vpop.xlane.xlu0 %4126 }
0x1301   : > { %v4129_v56 = vsub.f32 %v4119_v4, %v4127_v46  ;;  %v6956_v4 = vld [vmem:[#allocation14 + $0x24] ss:$8 sps:$4 sm:$0xff]   ;;  %v6965_v46 = vld [vmem:[#allocation14 + $0x54] ss:$8 sps:$4 sm:$0xff]  }
0x1303   : > { %v4132_v21 = vmul.f32 1.442695, %v4129_v56  ;;  %v4124_v5 = vpop.xlane.xlu1 %4123  ;;  %v6963_v56 = vld [vmem:[#allocation14 + $0x50] ss:$8 sps:$4 sm:$0xff]  }
0x1304   : > { %v4128_v32 = vsub.f32 %v4116_v22, %v4124_v5  ;;  %v6962_v22 = vld [vmem:[#allocation14 + $0x44] ss:$8 sps:$4 sm:$0xff]  }
0x1305   : > { %7124 = vpow2.f32 %v4132_v21  ;;  %v6966_v21 = vld [vmem:[#allocation14 + $0x60] ss:$8 sps:$4 sm:$0xff]   ;;  %v6968_v5 = vld [vmem:[#allocation14 + $0x64] ss:$8 sps:$4 sm:$0xff]  }
0x1306   : > { %v4130_v15 = vmul.f32 1.442695, %v4128_v32  ;;  %v6971_v32 = vld [vmem:[#allocation14 + $0x74] ss:$8 sps:$4 sm:$0xff]  }
0x1308   : > { %7126 = vpow2.f32 %v4130_v15  ;;  %v6969_v15 = vld [vmem:[#allocation14 + $0x70] ss:$8 sps:$4 sm:$0xff]  }
0x130f   : > { %v7125_v14 = vpop.eup %7124 }
0x1310   : > { %v4137_v7 = vsel %vm2735_vm13, %v7125_v14, 0.0 }
0x1311   : > { %4138 = vadd.xlane.f32.xlu0 %v4137_v7 }
0x1312   : > { %v7127_v11 = vpop.eup %7126 }
0x1313   : > { %v4134_v27 = vsel %vm2735_vm13, %v7127_v11, 0.0 }
0x1314   : > { %4135 = vadd.xlane.f32.xlu1 %v4134_v27 }
0x1325   : > { %4145 = vrot.lane.b32.xlu1 %v9650_v17, %s7788_s4  ;;  %s9664_s4 = sld [smem:[#allocation55_spill]] }
0x139e   : > { %v4139_v36 = vpop.xlane.xlu0 %4138 }
0x139f   : > { %7128 = vrcp.f32 %v4139_v36 }
0x13a1   : > { %v4136_v60 = vpop.xlane.xlu1 %4135 }
0x13a2   : > { %7130 = vrcp.f32 %v4136_v60 }
0x13a5   : > { %v4146_v34 = vpop.permute.xlu1 %4145 }
0x13a6   : > { %6421 = vmatpush3.bf16.msra.mxu0 %v4146_v34  ;;  %v6051_v34 = vld [vmem:[#allocation11] ss:$0 sm:$0xff] }
0x13a7   : > { %4411 = vmatprep.subr.bf16.mxu0 %v6950_v9 }
0x13a9   : > { %v7129_v43 = vpop.eup %7128 }
0x13aa   : > { %v4143_v57 = vmul.f32 %v7129_v43, %v7125_v14 }
0x13ac   : > { %v7131_v23 = vpop.eup %7130 }
0x13ad   : > { %v4142_v1 = vmul.f32 %v7131_v23, %v7127_v11 }
0x13af   : > { %v4144_v54 = vpack.c.bf16 %v4143_v57, %v4142_v1  ;;  %v6052_v1 = vld [vmem:[#allocation13] ss:$0 sm:$0xff] }
0x13b1   : > { %6423 = vmatmul.mubr.msk.bf16.vlgmr.msra.gmra.mrb[40].mxu0 %vm2735_vm13, %v4144_v54 }
0x13b2   : > { %4443 = vmatprep.mubr.bf16.mxu0 %v9652_v42  ;;  %4412 = vmatpush1.bf16.msra.mxu0 %v6948_v3 }
0x13b3   : > { %4413 = vmatprep.subr.bf16.mxu0 %v6953_v31 }
0x13b6   : > { %4414 = vmatpush1.bf16.msra.mxu0 %v6951_v0 }
0x13b7   : > { %4415 = vmatprep.subr.bf16.mxu0 %v6956_v4  ;;  %v9661_v4 = vld [vmem:[#allocation65_spill] sm:$0xff] }
0x13ba   : > { %4416 = vmatpush1.bf16.msra.mxu0 %v6954_v28 }
0x13bb   : > { %4417 = vmatprep.subr.bf16.mxu0 %v6959_v40  ;;  %v9210_v40 = vadd.s32 1, %v9644_v50 }
0x13bd   : > { %vm4583_vm4 = vcmp.lt.s32.totalorder %v9210_v40, 16 }
0x13be   : > { %4418 = vmatpush1.bf16.msra.mxu0 %v6957_v51  ;;  %v4600_v51 = vsub.s32 4, %v9646_v48 }
0x13bf   : > { %4419 = vmatprep.subr.bf16.mxu0 %v6962_v22 }
0x13c2   : > { %4420 = vmatpush1.bf16.msra.mxu0 %v6960_v61 }
0x13c3   : > { %4421 = vmatprep.subr.bf16.mxu0 %v6965_v46 }
0x13c6   : > { %4422 = vmatpush1.bf16.msra.mxu0 %v6963_v56 }
0x13c7   : > { %4423 = vmatprep.subr.bf16.mxu0 %v6968_v5  ;;  %v4656_v5 = vsub.s32 6, %v9646_v48 }
0x13ca   : > { %4424 = vmatpush1.bf16.msra.mxu0 %v6966_v21  ;;  %v4627_v21 = vsub.s32 5, %v9646_v48 }
0x13cb   : > { %4425 = vmatprep.subr.bf16.mxu0 %v6971_v32 }
0x13ce   : > { %4426 = vmatpush1.bf16.msra.mxu0 %v6969_v15 }
0x1484   : > { %v4185_v18 = vpop.f32.mrb[40].mxu0 }
0x1485   : > { %v6424_v58 = vpop.f32.mrb[41].mxu0 }
0x1486   : > { %v4188_v45 = vpop.f32.mrb[42].mxu0 }
0x1487   : > { %v4192_v62 = vpack.c.bf16 %v4188_v45, %v4185_v18  ;;  %v6425_v12 = vpop.f32.mrb[43].mxu0  ;;  %v6972_v45 = vld [vmem:[#allocation20] sm:$0xff]  }
0x1488   : > { %v6974_v12 = vld [vmem:[#allocation20 + $0x10] sm:$0xff]  }
0x1489   : > { %6431 = vmatmul.mubr.msk.bf16.vlgmr.msra.gmra.mrb[40].mxu1 %vm2319_vm1, %v4192_v62  ;;  %v6973_v62 = vld [vmem:[#allocation20 + $0x8] sm:$0xff]  }
0x148a   : > { %6450 = vmatprep.mubr.msk.bf16.mxu1 %vm7772_vm0, %v9651_v29  ;;  %6435 = vmatpush3.bf16.msra.mxu1 %v6972_v45  ;;  %vm4479_vm0 = vcmask 1042432  }
0x148b   : > { %6436 = vmatprep.subr.bf16.mxu1 %v9651_v29 }
0x148e   : > { %6437 = vmatpush3.bf16.msra.mxu1 %v6973_v62 }
0x148f   : > { %6438 = vmatprep.subr.bf16.mxu1 %v9651_v29 }
0x1492   : > { %6439 = vmatpush3.bf16.msra.mxu1 %v6974_v12 }
0x1493   : > { %6440 = vmatprep.subr.bf16.mxu1 %v9651_v29 }
0x155c   : > { %v4242_v59 = vpop.f32.mrb[40].mxu1 }
0x155d   : > { %v4249_v8 = vadd.f32 %v4242_v59, %v9654_v38  ;;  %v6432_v55 = vpop.f32.mrb[41].mxu1  ;;  %v6975_v59 = vld [vmem:[#allocation20 + $0x18] sm:$0xff]   ;;  %v6976_v38 = vld [vmem:[#allocation20 + $0x20] sm:$0xff]  }
0x155e   : > { %v4245_v13 = vpop.f32.mrb[42].mxu1  ;;  %6441 = vmatpush3.bf16.msra.mxu1 %v6975_v59  ;;  %v6978_v55 = vld [vmem:[#allocation20 + $0x30] sm:$0xff]  }
0x155f   : > { %v4251_v20 = vadd.f32 %v4249_v8, %v9655_v33  ;;  %v4250_v35 = vadd.f32 %v4245_v13, %v9656_v53  ;;  %v6433_v10 = vpop.f32.mrb[43].mxu1  ;;  %6442 = vmatprep.subr.bf16.mxu1 %v9651_v29  ;;  %v6977_v8 = vld [vmem:[#allocation20 + $0x28] sm:$0xff]   ;;  %v6979_v13 = vld [vmem:[#allocation20 + $0x38] sm:$0xff]  }
0x1560   : > { %v9658_v33 = vld [vmem:[#allocation64_spill] sm:$0xff] }
0x1561   : > { %v4252_v44 = vadd.f32 %v4250_v35, %v9657_v24  ;;  %v9186_v26 = vadd.f32 %v6050_v52, %v4251_v20 }
0x1562   : > { %6443 = vmatpush3.bf16.msra.mxu1 %v6976_v38 }
0x1563   : > { %4264 = vadd.xlane.f32.xlu0 %v9186_v26  ;;  %v9189_v47 = vadd.f32 %v6050_v52, %v4252_v44  ;;  %6444 = vmatprep.subr.bf16.mxu1 %v9651_v29  ;;  %v4319_v52 = vld [vmem:[#allocation16] sm:$0x3] }
0x1564   : > { %v4328_v20 = vrot.slane %v4319_v52, %v9658_v33 }
0x1566   : > { %6445 = vmatpush3.bf16.msra.mxu1 %v6977_v8 }
0x1567   : > { %4266 = vadd.xlane.f32.xlu0 %v9189_v47  ;;  %6446 = vmatprep.subr.bf16.mxu1 %v9651_v29 }
0x156a   : > { %6447 = vmatpush3.bf16.msra.mxu1 %v6978_v55 }
0x156b   : > { %6448 = vmatprep.subr.bf16.mxu1 %v9651_v29 }
0x156e   : > { %6449 = vmatpush3.bf16.msra.mxu1 %v6979_v13 }
0x15f0   : > { %v4265_v63 = vpop.xlane.xlu0 %4264 }
0x15f1   : > { %v4268_v16 = vmul.f32 0.0078125, %v4265_v63 }
0x15f3   : > { %v4270_v30 = vsub.f32 %v9186_v26, %v4268_v16 }
0x15f4   : > { %v4267_v6 = vpop.xlane.xlu0 %4266 }
0x15f5   : > { %v4269_v19 = vmul.f32 0.0078125, %v4267_v6  ;;  %v4272_v49 = vmul.f32 %v4270_v30, %v4270_v30  ;;  %v9660_v6 = vld [vmem:[#allocation62_spill] sm:$0xff] }
0x15f7   : > { %v4271_v41 = vsub.f32 %v9189_v47, %v4269_v19  ;;  %4274 = vadd.xlane.f32.xlu0 %v4272_v49  ;;  %v4324_v19 = vrot.slane %v4319_v52, %v9660_v6  ;;  %v4468_v49 = vld [vmem:[%s9659_s6] sm:$0x7f]  ;;  %s9668_s6 = sld [smem:[#allocation60_spill]] }
0x15f8   : > { %v4573_v28 = vrot.slane %v4468_v49, %v9661_v4  ;;  %v4495_v61 = vrot.slane %v4468_v49, %v9660_v6  ;;  %v4524_v56 = vrot.slane %v4468_v49, %v9658_v33 }
0x15f9   : > { %v4273_v39 = vmul.f32 %v4271_v41, %v4271_v41 }
0x15fb   : > { %4276 = vadd.xlane.f32.xlu0 %v4273_v39  ;;  %v4529_v39 = vadd.s32 4294967295, %v9646_v48 }
0x15fd   : > { %vm4531_vm3 = vcmp.ge.s32.totalorder %v4529_v39, 0 }
0x1684   : > { %v4275_v14 = vpop.xlane.xlu0 %4274 }
0x1685   : > { %v4278_v7 = vmul.f32 0.0078125, %v4275_v14  ;;  %v4634_v14 = vadd.s32 3, %v9644_v50 }
0x1687   : > { %v4280_v11 = vadd.f32 1e-05, %v4278_v7  ;;  %vm4638_vm9 = vcmp.lt.s32.totalorder %v4634_v14, 16 }
0x1688   : > { %v4277_v27 = vpop.xlane.xlu0 %4276 }
0x1689   : > { %7132 = vrsqrt.f32 %v4280_v11  ;;  %v4279_v17 = vmul.f32 0.0078125, %v4277_v27  ;;  %v9662_v11 = vld [vmem:[#allocation63_spill] sm:$0xff] }
0x168a   : > { %v4553_v27 = vrot.slane %v4468_v49, %v9662_v11 }
0x168b   : > { %v4281_v2 = vadd.f32 1e-05, %v4279_v17  ;;  %v4601_v17 = vrot.slane %v4468_v49, %v4600_v51 }
0x168d   : > { %7134 = vrsqrt.f32 %v4281_v2 }
0x1693   : > { %v7133_v36 = vpop.eup %7132 }
0x1694   : > { %v4284_v60 = vmul.f32 %v7133_v36, %v4270_v30  ;;  %v4469_v30 = vadd.s32 4294967293, %v9646_v48 }
0x1696   : > { %v4292_v57 = vmul.f32 %v6051_v34, %v4284_v60  ;;  %vm4471_vm1 = vcmp.ge.s32.totalorder %v4469_v30, 0 }
0x1697   : > { %v7135_v43 = vpop.eup %7134 }
0x1698   : > { %v4285_v23 = vmul.f32 %v7135_v43, %v4271_v41  ;;  %v4300_v37 = vadd.f32 %v6052_v1, %v4292_v57  ;;  %v4500_v41 = vadd.s32 4294967294, %v9646_v48  ;;  %v4628_v48 = vrot.slane %v4468_v49, %v4627_v21 }
0x169a   : > { %v4293_v54 = vmul.f32 %v6051_v34, %v4285_v23  ;;  %vm4502_vm2 = vcmp.ge.s32.totalorder %v4500_v41, 0  ;;  %v4657_v23 = vrot.slane %v4468_v49, %v4656_v5 }
0x169c   : > { %v4301_v18 = vadd.f32 %v6052_v1, %v4293_v54 }
0x169e   : > { %v4318_v58 = vpack.c.bf16 %v4301_v18, %v4300_v37 }
0x16a0   : > { %4444 = vmatmul.mubr.bf16.vlgmr.msra.gmra.mrb[44].mxu0 %v4318_v58 }
0x16a1   : > { %5096 = vmatprep.mubr.bf16.mxu0 %v9652_v42 }
0x1773   : > { %v4445_v53 = vpop.f32.mrb[44].mxu0 }
0x1774   : > { %v4447_v35 = vpop.f32.mrb[45].mxu0  ;;  %v4446_v22 = vadd.f32 %v4445_v53, %v4324_v19 }
0x1775   : > { %v4448_v10 = vadd.f32 %v4447_v35, %v4328_v20  ;;  %v4449_v24 = vpop.f32.mrb[46].mxu0 }
0x1776   : > { %v4451_v44 = vpop.f32.mrb[47].mxu0  ;;  %v4450_v15 = vadd.f32 %v4449_v24, %v4324_v19 }
0x1777   : > { %v6069_v3 = vmul.f32 -1.442695, %v4448_v10  ;;  %v4452_v9 = vadd.f32 %v4451_v44, %v4328_v20 }
0x1779   : > { %7136 = vpow2.f32 %v6069_v3  ;;  %v6070_v31 = vmul.f32 -1.442695, %v4452_v9 }
0x177b   : > { %7138 = vpow2.f32 %v6070_v31 }
0x1783   : > { %v7137_v0 = vpop.eup %7136 }
0x1784   : > { %v4460_v63 = vadd.f32 1.0, %v7137_v0 }
0x1785   : > { %v7139_v16 = vpop.eup %7138 }
0x1786   : > { %7140 = vrcp.f32 %v4460_v63  ;;  %v4461_v29 = vadd.f32 1.0, %v7139_v16 }
0x1788   : > { %7142 = vrcp.f32 %v4461_v29 }
0x1790   : > { %v7141_v46 = vpop.eup %7140 }
0x1791   : > { %v4466_v32 = vmul.f32 %v7141_v46, %v4446_v22 }
0x1792   : > { %v7143_v7 = vpop.eup %7142 }
0x1793   : > { %v4467_v2 = vmul.f32 %v7143_v7, %v4450_v15  ;;  %v4480_v36 = vrot.slane %v4466_v32, 5  ;;  %v4509_v60 = vrot.slane %v4466_v32, 6  ;;  %v4538_v34 = vrot.slane %v4466_v32, 7 }
0x1794   : > { %v4574_v43 = vmul.f32 %v4573_v28, %v4466_v32  ;;  %v4586_v35 = vrot.slane %v4466_v32, 1  ;;  %v4613_v10 = vrot.slane %v4466_v32, 2  ;;  %v4642_v63 = vrot.slane %v4466_v32, 3 }
0x1795   : > { %v4481_v57 = vrot.slane %v4467_v2, 5  ;;  %v4485_v50 = vsel %vm4479_vm0, 0.0, %v4480_v36  ;;  %v4510_v1 = vrot.slane %v4467_v2, 6  ;;  %v4514_v54 = vsel %vm4508_vm14, 0.0, %v4509_v60 }
0x1796   : > { %v4490_v37 = vsel %vm4471_vm1, %v4485_v50, 0.0  ;;  %v4519_v18 = vsel %vm4502_vm2, %v4514_v54, 0.0  ;;  %v4539_v58 = vrot.slane %v4467_v2, 7  ;;  %v4543_v45 = vsel %vm4537_vm15, 0.0, %v4538_v34 }
0x1797   : > { %v4482_v62 = vsel %vm4479_vm0, %v4480_v36, %v4481_v57  ;;  %v4496_v12 = vmul.f32 %v4495_v61, %v4490_v37  ;;  %v4511_v59 = vsel %vm4508_vm14, %v4509_v60, %v4510_v1  ;;  %v4525_v38 = vmul.f32 %v4524_v56, %v4519_v18  ;;  %v6072_v57 = vld [vmem:[#allocation19] ss:$0 sm:$0xff] }
0x1798   : > { %v4497_v8 = vmul.f32 %v4495_v61, %v4482_v62  ;;  %v4526_v55 = vmul.f32 %v4524_v56, %v4511_v59  ;;  %v4540_v13 = vsel %vm4537_vm15, %v4538_v34, %v4539_v58  ;;  %v4548_v52 = vsel %vm4531_vm3, %v4543_v45, 0.0  ;;  %v6071_v34 = vld [vmem:[#allocation17] ss:$0 sm:$0xff] }
0x1799   : > { %v4527_v20 = vadd.f32 %v4525_v38, %v4496_v12  ;;  %v4554_v53 = vmul.f32 %v4553_v27, %v4548_v52  ;;  %v4555_v44 = vmul.f32 %v4553_v27, %v4540_v13  ;;  %v4587_v3 = vrot.slane %v4467_v2, 1 }
0x179a   : > { %v4528_v24 = vadd.f32 %v4526_v55, %v4497_v8  ;;  %v4614_v9 = vrot.slane %v4467_v2, 2  ;;  %v4575_v0 = vmul.f32 %v4573_v28, %v4467_v2  ;;  %v4643_v16 = vrot.slane %v4467_v2, 3  ;;  %v6075_v8 = vld [vmem:[#allocation22] ss:$0 sm:$0xff] }
0x179b   : > { %v4556_v31 = vadd.f32 %v4554_v53, %v4527_v20  ;;  %v4588_v30 = vsel %vm2669_vm8, %v4586_v35, %v4587_v3  ;;  %v4591_v19 = vsel %vm2669_vm8, %v4587_v3, 0.0  ;;  %v6982_v3 = vld [vmem:[#allocation23 + $0x4] ss:$16 sps:$4 sm:$0xff]  }
0x179c   : > { %v4557_v29 = vadd.f32 %v4555_v44, %v4528_v24  ;;  %v4615_v49 = vsel %vm4612_vm5, %v4613_v10, %v4614_v9  ;;  %v4597_v39 = vsel %vm4583_vm4, %v4591_v19, 0.0  ;;  %v4602_v51 = vmul.f32 %v4601_v17, %v4588_v30  ;;  %v6980_v44 = vld [vmem:[#allocation23] ss:$16 sps:$4 sm:$0xff]   ;;  %5064 = vmatprep.subr.bf16.mxu0 %v6982_v3 }
0x179d   : > { %v4576_v41 = vadd.f32 %v4574_v43, %v4556_v31  ;;  %v4618_v22 = vsel %vm4612_vm5, %v4614_v9, 0.0  ;;  %v4603_v46 = vmul.f32 %v4601_v17, %v4597_v39  ;;  %v4629_v21 = vmul.f32 %v4628_v48, %v4615_v49  ;;  %v6985_v9 = vld [vmem:[#allocation23 + $0xc] ss:$16 sps:$4 sm:$0xff]   ;;  %v6988_v31 = vld [vmem:[#allocation23 + $0x24] ss:$16 sps:$4 sm:$0xff]   ;;  %5065 = vmatpush1.bf16.msra.mxu0 %v6980_v44 }
0x179e   : > { %v4577_v61 = vadd.f32 %v4575_v0, %v4557_v29  ;;  %v4624_v28 = vsel %vm4609_vm6, %v4618_v22, 0.0  ;;  %v4644_v5 = vsel %vm4641_vm7, %v4642_v63, %v4643_v16  ;;  %v4647_v32 = vsel %vm4641_vm7, %v4643_v16, 0.0  ;;  %v6991_v0 = vld [vmem:[#allocation23 + $0x2c] ss:$16 sps:$4 sm:$0xff]   ;;  %5107 = vmatprep.subr.bf16.mxu1 %v6985_v9  ;;  %5066 = vmatprep.subr.bf16.mxu0 %v6988_v31  ;;  %v6989_v63 = vld [vmem:[#allocation23 + $0x28] ss:$16 sps:$4 sm:$0xff]  }
0x179f   : > { %v4604_v56 = vadd.f32 %v4602_v51, %v4576_v41  ;;  %v4630_v7 = vmul.f32 %v4628_v48, %v4624_v28  ;;  %v4653_v27 = vsel %vm4638_vm9, %v4647_v32, 0.0  ;;  %v4658_v2 = vmul.f32 %v4657_v23, %v4644_v5  ;;  %v6994_v51 = vld [vmem:[#allocation23 + $0x44] ss:$16 sps:$4 sm:$0xff]   ;;  %v6997_v22 = vld [vmem:[#allocation23 + $0x4c] ss:$16 sps:$4 sm:$0xff]  }
0x17a0   : > { %v4605_v15 = vadd.f32 %v4603_v46, %v4577_v61  ;;  %v4659_v60 = vmul.f32 %v4657_v23, %v4653_v27  ;;  %v6992_v61 = vld [vmem:[#allocation23 + $0x40] ss:$16 sps:$4 sm:$0xff]   ;;  %v6995_v46 = vld [vmem:[#allocation23 + $0x48] ss:$16 sps:$4 sm:$0xff]   ;;  %v7000_v28 = vld [vmem:[#allocation23 + $0x64] ss:$16 sps:$4 sm:$0xff]  }
0x17a1   : > { %v4631_v40 = vadd.f32 %v4629_v21, %v4604_v56  ;;  %v7003_v56 = vld [vmem:[#allocation23 + $0x6c] ss:$16 sps:$4 sm:$0xff]   ;;  %v6998_v21 = vld [vmem:[#allocation23 + $0x60] ss:$16 sps:$4 sm:$0xff]   ;;  %v7001_v5 = vld [vmem:[#allocation23 + $0x68] ss:$16 sps:$4 sm:$0xff]  }
0x17a2   : > { %v4632_v36 = vadd.f32 %v4630_v7, %v4605_v15  ;;  %v7006_v32 = vld [vmem:[#allocation23 + $0x84] ss:$16 sps:$4 sm:$0xff]   ;;  %v7009_v15 = vld [vmem:[#allocation23 + $0x8c] ss:$16 sps:$4 sm:$0xff]   ;;  %v7004_v7 = vld [vmem:[#allocation23 + $0x80] ss:$16 sps:$4 sm:$0xff]  }
0x17a3   : > { %v4660_v43 = vadd.f32 %v4658_v2, %v4631_v40  ;;  %v7007_v27 = vld [vmem:[#allocation23 + $0x88] ss:$16 sps:$4 sm:$0xff]   ;;  %v7012_v40 = vld [vmem:[#allocation23 + $0xa4] ss:$16 sps:$4 sm:$0xff]   ;;  %v7010_v2 = vld [vmem:[#allocation23 + $0xa0] ss:$16 sps:$4 sm:$0xff]  }
0x17a4   : > { %v4661_v17 = vadd.f32 %v4659_v60, %v4632_v36  ;;  %v7013_v36 = vld [vmem:[#allocation23 + $0xa8] ss:$16 sps:$4 sm:$0xff]   ;;  %v7015_v60 = vld [vmem:[#allocation23 + $0xac] ss:$16 sps:$4 sm:$0xff]   ;;  %v7029_v44 = vld [vmem:[#allocation25 + $0xc0] sm:$0xff]  }
0x17a5   : > { %v4669_v25 = vmul.f32 %v6071_v34, %v4660_v43  ;;  %v7021_v43 = vld [vmem:[#allocation23 + $0xcc] ss:$16 sps:$4 sm:$0xff]   ;;  %v7030_v3 = vld [vmem:[#allocation25] sm:$0xff]  }
0x17a6   : > { %v4670_v50 = vmul.f32 %v6071_v34, %v4661_v17  ;;  %v7018_v34 = vld [vmem:[#allocation23 + $0xc4] ss:$16 sps:$4 sm:$0xff]   ;;  %v7016_v17 = vld [vmem:[#allocation23 + $0xc0] ss:$16 sps:$4 sm:$0xff]   ;;  %v7032_v9 = vld [vmem:[#allocation25 + $0x48] sm:$0xff]  }
0x17a7   : > { %v4678_v1 = vadd.f32 %v6072_v57, %v4669_v25  ;;  %v7024_v25 = vld [vmem:[#allocation23 + $0xe4] ss:$16 sps:$4 sm:$0xff]   ;;  %v7033_v31 = vld [vmem:[#allocation25 + $0xc8] sm:$0xff]  }
0x17a8   : > { %v4679_v54 = vadd.f32 %v6072_v57, %v4670_v50  ;;  %v7019_v57 = vld [vmem:[#allocation23 + $0xc8] ss:$16 sps:$4 sm:$0xff]   ;;  %v7027_v50 = vld [vmem:[#allocation23 + $0xec] ss:$16 sps:$4 sm:$0xff]  }
0x17a9   : > { %v6073_v37 = vmul.f32 -1.442695, %v4678_v1 }
0x17aa   : > { %v6074_v18 = vmul.f32 -1.442695, %v4679_v54 }
0x17ab   : > { %7144 = vpow2.f32 %v6073_v37 }
0x17ac   : > { %7146 = vpow2.f32 %v6074_v18 }
0x17b5   : > { %v7145_v58 = vpop.eup %7144 }
0x17b6   : > { %v7147_v48 = vpop.eup %7146  ;;  %v4686_v14 = vadd.f32 1.0, %v7145_v58 }
0x17b7   : > { %v4687_v45 = vadd.f32 1.0, %v7147_v48 }
0x17b8   : > { %7148 = vrcp.f32 %v4686_v14 }
0x17b9   : > { %7150 = vrcp.f32 %v4687_v45 }
0x17c2   : > { %v7149_v62 = vpop.eup %7148 }
0x17c3   : > { %v7151_v23 = vpop.eup %7150  ;;  %v4692_v12 = vmul.f32 %v7149_v62, %v4678_v1  ;;  %v7022_v1 = vld [vmem:[#allocation23 + $0xe0] ss:$16 sps:$4 sm:$0xff]  }
0x17c4   : > { %v4693_v59 = vmul.f32 %v7151_v23, %v4679_v54  ;;  %v7025_v54 = vld [vmem:[#allocation23 + $0xe8] ss:$16 sps:$4 sm:$0xff]  }
0x17c6   : > { %v4710_v38 = vpack.c.bf16 %v4693_v59, %v4692_v12  ;;  %v6084_v12 = vld [vmem:[%s9663_s14] ss:$0 sm:$0xff]  ;;  %s6167_s14 = sshll.u32 %s7990_s18, 8  ;;  %s7791_s18 = smov [#allocation26]  }
0x17c7   : > { %s9282_s2 = scalar_lea.hbm %s9668_s6, %s6167_s14 }
0x17c8   : > { %6451 = vmatmul.mubr.bf16.vlgmr.msra.gmra.mrb[44].mxu1 %v4710_v38 }
0x17c9   : > { %5139 = vmatprep.mubr.bf16.mxu1 %v9652_v42  ;;  %v6983_v42 = vld [vmem:[#allocation23 + $0x8] ss:$16 sps:$4 sm:$0xff]  }
0x17ca   : > { %5108 = vmatpush1.bf16.msra.mxu1 %v6983_v42  ;;  %v7031_v42 = vld [vmem:[#allocation25 + $0x80] sm:$0xff]  }
0x17cb   : > { %5109 = vmatprep.subr.bf16.mxu1 %v6991_v0  ;;  %v7034_v0 = vld [vmem:[#allocation25 + $0x8] sm:$0xff]  }
0x17ce   : > { %5110 = vmatpush1.bf16.msra.mxu1 %v6989_v63  ;;  %v7036_v63 = vld [vmem:[#allocation25 + $0x50] sm:$0xff]  }
0x17cf   : > { %5111 = vmatprep.subr.bf16.mxu1 %v6997_v22  ;;  %v7046_v22 = vld [vmem:[#allocation25 + $0x20] sm:$0xff]  }
0x17d2   : > { %5112 = vmatpush1.bf16.msra.mxu1 %v6995_v46  ;;  %v7048_v46 = vld [vmem:[#allocation25 + $0x68] sm:$0xff]  }
0x17d3   : > { %5113 = vmatprep.subr.bf16.mxu1 %v7003_v56  ;;  %v7050_v56 = vld [vmem:[#allocation25 + $0x28] sm:$0xff]  }
0x17d6   : > { %5114 = vmatpush1.bf16.msra.mxu1 %v7001_v5  ;;  %v7052_v5 = vld [vmem:[#allocation25 + $0x70] sm:$0xff]  }
0x17d7   : > { %5115 = vmatprep.subr.bf16.mxu1 %v7009_v15  ;;  %v7054_v15 = vld [vmem:[#allocation25 + $0x30] sm:$0xff]  }
0x17da   : > { %5116 = vmatpush1.bf16.msra.mxu1 %v7007_v27  ;;  %v7056_v27 = vld [vmem:[#allocation25 + $0x78] sm:$0xff]  }
0x17db   : > { %5117 = vmatprep.subr.bf16.mxu1 %v7015_v60  ;;  %v4882_v60 = vld [vmem:[%s9665_s12] sm:$0xf] }
0x17de   : > { %5118 = vmatpush1.bf16.msra.mxu1 %v7013_v36  ;;  %v7059_v36 = vld [vmem:[#allocation25 + $0xb8] sm:$0xff]  }
0x17df   : > { %5119 = vmatprep.subr.bf16.mxu1 %v7021_v43  ;;  %v4895_v43 = vrot.slane %v4882_v60, %v9662_v11 }
0x17e2   : > { %5120 = vmatpush1.bf16.msra.mxu1 %v7019_v57  ;;  %v4899_v57 = vrot.slane %v4882_v60, %v9661_v4 }
0x17e3   : > { %5121 = vmatprep.subr.bf16.mxu1 %v7027_v50 }
0x17e6   : > { %5122 = vmatpush1.bf16.msra.mxu1 %v7025_v54 }
0x17e7   : > { %6288 = vmatprep.subr.bf16.mxu1 %v7029_v44 }
0x189b   : > { %v4800_v55 = vpop.f32.mrb[44].mxu1 }
0x189c   : > { %v4801_v13 = vadd.f32 %v6075_v8, %v4800_v55  ;;  %v6452_v52 = vpop.f32.mrb[45].mxu1  ;;  %v6085_v55 = vld [vmem:[%s9664_s4] ss:$0 sm:$0xff]  ;;  %s1221_s4 = scalar_lea.vmem [#allocation26], %s5875_s1  ;;  %s7622_s1 = sshll.u32 %s7791_s18, 4  ;;  %s7623_s1 = int_to_ptr.vmem [resolvable:$false] %s7622_s1 }
0x189d   : > { %v4803_v20 = vpop.f32.mrb[46].mxu1  ;;  %s5615_s12 = sshll.u32 %s1221_s4, 4  ;;  %s7624_s3 = scalar_lea.vmem %s7623_s1, 512  ;;  %s9284_s12 = int_to_ptr.vmem [resolvable:$true] %s5615_s12 }
0x189e   : > { %v9243_v53 = vadd.f32 %v4801_v13, %v9186_v26  ;;  %v4804_v35 = vadd.f32 %v6075_v8, %v4803_v20  ;;  %v6453_v10 = vpop.f32.mrb[47].mxu1  ;;  %v6986_v26 = vld [vmem:[#allocation23 + $0x20] ss:$16 sps:$4 sm:$0xff]   ;;  %p7625_p10 = scmp.lt.s32.totalorder %s9284_s12, %s7623_s1 }
0x189f   : > { %5067 = vmatpush1.bf16.msra.mxu0 %v6986_v26  ;;  %v7028_v10 = vld [vmem:[#allocation25 + $0x40] sm:$0xff]   ;;  %v7035_v26 = vld [vmem:[#allocation25 + $0x88] sm:$0xff]  }
0x18a0   : > { %v9246_v24 = vadd.f32 %v4804_v35, %v9189_v47  ;;  %4811 = vadd.xlane.f32.xlu1 %v9243_v53  ;;  %5068 = vmatprep.subr.bf16.mxu0 %v6994_v51  ;;  %v7045_v51 = vld [vmem:[#allocation25 + $0xe0] sm:$0xff]  }
0x18a2   : > { %4813 = vadd.xlane.f32.xlu0 %v9246_v24 }
0x18a3   : > { %5069 = vmatpush1.bf16.msra.mxu0 %v6992_v61  ;;  %v7047_v61 = vld [vmem:[#allocation25 + $0xa0] sm:$0xff]  }
0x18a4   : > { %5070 = vmatprep.subr.bf16.mxu0 %v7000_v28  ;;  %v7049_v28 = vld [vmem:[#allocation25 + $0xe8] sm:$0xff]  }
0x18a7   : > { %5071 = vmatpush1.bf16.msra.mxu0 %v6998_v21  ;;  %v7051_v21 = vld [vmem:[#allocation25 + $0xa8] sm:$0xff]  }
0x18a8   : > { %5072 = vmatprep.subr.bf16.mxu0 %v7006_v32  ;;  %v7053_v32 = vld [vmem:[#allocation25 + $0xf0] sm:$0xff]  }
0x18ab   : > { %5073 = vmatpush1.bf16.msra.mxu0 %v7004_v7  ;;  %v7055_v7 = vld [vmem:[#allocation25 + $0xb0] sm:$0xff]  }
0x18ac   : > { %5074 = vmatprep.subr.bf16.mxu0 %v7012_v40  ;;  %v7057_v40 = vld [vmem:[#allocation25 + $0xf8] sm:$0xff]  }
0x18af   : > { %5075 = vmatpush1.bf16.msra.mxu0 %v7010_v2  ;;  %v7058_v2 = vld [vmem:[#allocation25 + $0x38] sm:$0xff]  }
0x18b0   : > { %5076 = vmatprep.subr.bf16.mxu0 %v7018_v34  ;;  %v4887_v34 = vrot.slane %v4882_v60, %v9660_v6 }
0x18b3   : > { %5077 = vmatpush1.bf16.msra.mxu0 %v7016_v17  ;;  %v4891_v17 = vrot.slane %v4882_v60, %v9658_v33 }
0x18b4   : > { %5078 = vmatprep.subr.bf16.mxu0 %v7024_v25 }
0x18b7   : > { %5079 = vmatpush1.bf16.msra.mxu0 %v7022_v1 }
0x18b8   : > { %6266 = vmatprep.subr.bf16.mxu0 %v7028_v10 }
0x192d   : > { %v4812_v47 = vpop.xlane.xlu1 %4811 }
0x192e   : > { %v4815_v16 = vmul.f32 0.0078125, %v4812_v47  ;;  %v7037_v47 = vld [vmem:[#allocation25 + $0xd0] sm:$0xff]  }
0x192f   : > { %v4814_v29 = vpop.xlane.xlu0 %4813 }
0x1930   : > { %v9251_v30 = vsub.f32 %v9243_v53, %v4815_v16  ;;  %v4816_v19 = vmul.f32 0.0078125, %v4814_v29  ;;  %v7038_v16 = vld [vmem:[#allocation25 + $0x10] sm:$0xff]  }
0x1931   : > { %v7039_v29 = vld [vmem:[#allocation25 + $0x90] sm:$0xff]  }
0x1932   : > { %v4819_v49 = vmul.f32 %v9251_v30, %v9251_v30  ;;  %v9256_v41 = vsub.f32 %v9246_v24, %v4816_v19  ;;  %v7041_v19 = vld [vmem:[#allocation25 + $0xd8] sm:$0xff]  }
0x1934   : > { %4821 = vadd.xlane.f32.xlu0 %v4819_v49  ;;  %v4820_v39 = vmul.f32 %v9256_v41, %v9256_v41  ;;  %v7042_v49 = vld [vmem:[#allocation25 + $0x18] sm:$0xff]  }
0x1938   : > { %4823 = vadd.xlane.f32.xlu0 %v4820_v39  ;;  %v7044_v39 = vld [vmem:[#allocation25 + $0x60] sm:$0xff]  }
0x19c1   : > { %v4822_v37 = vpop.xlane.xlu0 %4821 }
0x19c2   : > { %v4825_v18 = vmul.f32 0.0078125, %v4822_v37 }
0x19c4   : > { %v4827_v58 = vadd.f32 1e-05, %v4825_v18 }
0x19c5   : > { %v4824_v48 = vpop.xlane.xlu0 %4823 }
0x19c6   : > { %7152 = vrsqrt.f32 %v4827_v58  ;;  %v4826_v14 = vmul.f32 0.0078125, %v4824_v48 }
0x19c8   : > { %v4828_v45 = vadd.f32 1e-05, %v4826_v14 }
0x19ca   : > { %7154 = vrsqrt.f32 %v4828_v45 }
0x19d0   : > { %v7153_v62 = vpop.eup %7152 }
0x19d1   : > { %v4831_v23 = vmul.f32 %v7153_v62, %v9251_v30  ;;  %v7040_v30 = vld [vmem:[#allocation25 + $0x58] sm:$0xff]  }
0x19d3   : > { %v4839_v8 = vmul.f32 %v6084_v12, %v4831_v23 }
0x19d4   : > { %v7155_v59 = vpop.eup %7154 }
0x19d5   : > { %v4832_v38 = vmul.f32 %v7155_v59, %v9256_v41  ;;  %v4847_v52 = vadd.f32 %v6085_v55, %v4839_v8  ;;  %v7043_v41 = vld [vmem:[#allocation25 + $0x98] sm:$0xff]  }
0x19d7   : > { %v4840_v13 = vmul.f32 %v6084_v12, %v4832_v38 }
0x19d9   : > { %v4848_v20 = vadd.f32 %v6085_v55, %v4840_v13 }
0x19db   : > { %v4881_v35 = vpack.c.bf16 %v4848_v20, %v4847_v52 }
0x19dd   : > { %5097 = vmatmul.mubr.bf16.vlgmr.msra.gmra.mrb[48].mxu0 %v4881_v35  ;;  %5140 = vmatmul.mubr.bf16.vlgmr.msra.gmra.mrb[48].mxu1 %v4881_v35 }
0x19de   : > { %6267 = vmatpush3.bf16.msra.mxu0 %v7030_v3  ;;  %6289 = vmatpush3.bf16.msra.mxu1 %v7031_v42 }
0x19df   : > { %6268 = vmatprep.subr.bf16.mxu0 %v7032_v9  ;;  %6290 = vmatprep.subr.bf16.mxu1 %v7033_v31 }
0x19e2   : > { %6269 = vmatpush3.bf16.msra.mxu0 %v7034_v0  ;;  %6291 = vmatpush3.bf16.msra.mxu1 %v7035_v26 }
0x19e3   : > { %6270 = vmatprep.subr.bf16.mxu0 %v7036_v63  ;;  %6292 = vmatprep.subr.bf16.mxu1 %v7037_v47 }
0x19e6   : > { %6271 = vmatpush3.bf16.msra.mxu0 %v7038_v16  ;;  %6293 = vmatpush3.bf16.msra.mxu1 %v7039_v29 }
0x19e7   : > { %6272 = vmatprep.subr.bf16.mxu0 %v7040_v30  ;;  %6294 = vmatprep.subr.bf16.mxu1 %v7041_v19 }
0x19ea   : > { %6273 = vmatpush3.bf16.msra.mxu0 %v7042_v49  ;;  %6295 = vmatpush3.bf16.msra.mxu1 %v7043_v41 }
0x19eb   : > { %6274 = vmatprep.subr.bf16.mxu0 %v7044_v39  ;;  %6296 = vmatprep.subr.bf16.mxu1 %v7045_v51 }
0x19ee   : > { %6275 = vmatpush3.bf16.msra.mxu0 %v7046_v22  ;;  %6297 = vmatpush3.bf16.msra.mxu1 %v7047_v61 }
0x19ef   : > { %6276 = vmatprep.subr.bf16.mxu0 %v7048_v46  ;;  %6298 = vmatprep.subr.bf16.mxu1 %v7049_v28 }
0x19f2   : > { %6277 = vmatpush3.bf16.msra.mxu0 %v7050_v56  ;;  %6299 = vmatpush3.bf16.msra.mxu1 %v7051_v21 }
0x19f3   : > { %6278 = vmatprep.subr.bf16.mxu0 %v7052_v5  ;;  %6300 = vmatprep.subr.bf16.mxu1 %v7053_v32 }
0x19f6   : > { %6279 = vmatpush3.bf16.msra.mxu0 %v7054_v15  ;;  %6301 = vmatpush3.bf16.msra.mxu1 %v7055_v7 }
0x19f7   : > { %6280 = vmatprep.subr.bf16.mxu0 %v7056_v27  ;;  %6302 = vmatprep.subr.bf16.mxu1 %v7057_v40 }
0x19fa   : > { %6281 = vmatpush3.bf16.msra.mxu0 %v7058_v2  ;;  %6303 = vmatpush3.bf16.msra.mxu1 %v7059_v36 }
0x1ab0   : > { %v5098_v25 = vpop.f32.mrb[48].mxu0  ;;  %v5141_v50 = vpop.f32.mrb[48].mxu1 }
0x1ab1   : > { %v5099_v1 = vadd.f32 %v5098_v25, %v4887_v34  ;;  %v5142_v54 = vadd.f32 %v5141_v50, %v4895_v43  ;;  %v5100_v37 = vpop.f32.mrb[49].mxu0  ;;  %v5143_v18 = vpop.f32.mrb[49].mxu1  ;;  %v6126_v25 = vld [vmem:[%s7952_s8] ss:$0 sm:$0xff] }
0x1ab2   : > { %v5101_v58 = vadd.f32 %v5100_v37, %v4891_v17  ;;  %v9269_v48 = vadd.f32 %v5143_v18, %v4899_v57  ;;  %v5102_v14 = vpop.f32.mrb[50].mxu0  ;;  %v5145_v45 = vpop.f32.mrb[50].mxu1 }
0x1ab3   : > { %v6118_v62 = vmul.f32 -1.442695, %v5099_v1  ;;  %v6120_v23 = vmul.f32 -1.442695, %v5142_v54  ;;  %v5103_v6 = vadd.f32 %v5102_v14, %v4887_v34  ;;  %v5146_v12 = vadd.f32 %v5145_v45, %v4895_v43  ;;  %v5104_v11 = vpop.f32.mrb[51].mxu0  ;;  %v5147_v59 = vpop.f32.mrb[51].mxu1 }
0x1ab4   : > { %v6119_v33 = vmul.f32 -1.442695, %v5101_v58  ;;  %v6121_v4 = vmul.f32 -1.442695, %v9269_v48  ;;  %v5105_v38 = vadd.f32 %v5104_v11, %v4891_v17  ;;  %v5148_v8 = vadd.f32 %v5147_v59, %v4899_v57 }
0x1ab5   : > { %7156 = vpow2.f32 %v6118_v62  ;;  %v6122_v55 = vmul.f32 -1.442695, %v5103_v6  ;;  %v6124_v13 = vmul.f32 -1.442695, %v5146_v12 }
0x1ab6   : > { %7158 = vpow2.f32 %v6120_v23  ;;  %v6123_v52 = vmul.f32 -1.442695, %v5105_v38  ;;  %v6125_v20 = vmul.f32 -1.442695, %v5148_v8 }
0x1ab7   : > { %7160 = vpow2.f32 %v6119_v33 }
0x1ab8   : > { %7162 = vpow2.f32 %v6121_v4 }
0x1ab9   : > { %7164 = vpow2.f32 %v6122_v55 }
0x1aba   : > { %7166 = vpow2.f32 %v6124_v13 }
0x1abb   : > { %7168 = vpow2.f32 %v6123_v52 }
0x1abc   : > { %7170 = vpow2.f32 %v6125_v20 }
0x1abf   : > { %v7157_v35 = vpop.eup %7156 }
0x1ac0   : > { %v7159_v10 = vpop.eup %7158  ;;  %v5174_v44 = vadd.f32 1.0, %v7157_v35 }
0x1ac1   : > { %v7161_v3 = vpop.eup %7160  ;;  %v5176_v42 = vadd.f32 1.0, %v7159_v10 }
0x1ac2   : > { %v7163_v9 = vpop.eup %7162  ;;  %7172 = vrcp.f32 %v5174_v44  ;;  %v5175_v31 = vadd.f32 1.0, %v7161_v3 }
0x1ac3   : > { %v7165_v0 = vpop.eup %7164  ;;  %7174 = vrcp.f32 %v5176_v42  ;;  %v5177_v26 = vadd.f32 1.0, %v7163_v9 }
0x1ac4   : > { %v7167_v63 = vpop.eup %7166  ;;  %7176 = vrcp.f32 %v5175_v31  ;;  %v5178_v47 = vadd.f32 1.0, %v7165_v0 }
0x1ac5   : > { %v7169_v16 = vpop.eup %7168  ;;  %7178 = vrcp.f32 %v5177_v26  ;;  %v5180_v29 = vadd.f32 1.0, %v7167_v63  ;;  %v6159_v26 = vld [vmem:[%s9666_s22] ss:$0 sm:$0xff]  ;;  %s5602_s22 = scalar_lea.sflag [#allocation4], %s8273_s0 }
0x1ac6   : > { %v7171_v30 = vpop.eup %7170  ;;  %7180 = vrcp.f32 %v5178_v47  ;;  %v5179_v19 = vadd.f32 1.0, %v7169_v16  ;;  %v6160_v47 = vld [vmem:[%s9667_s26] ss:$0 sm:$0xff]  ;;  %s7618_s26 = scalar_lea.vmem %s9284_s12, 256 }
0x1ac7   : > { %7182 = vrcp.f32 %v5180_v29  ;;  %v5181_v49 = vadd.f32 1.0, %v7171_v30  ;;  %p7619_p0 = scmp.ne.s32.totalorder %s9284_s12, %s7618_s26  ;;  %p7626_p3 = scmp.lt.s32.totalorder %s7624_s3, %s7618_s26 }
0x1ac8   : > { %7184 = vrcp.f32 %v5179_v19 }
0x1ac9   : > { %7186 = vrcp.f32 %v5181_v49  ;;  %p7620_p8 = pnand %p7619_p0, %p9669_p2  ;;  %p7627_p11 = por %p7626_p3, %p7625_p10 }
0x1acb   : > { %p7621_p4 = pneg %p7620_p8 }
0x1acc   : > { %v7173_v41 = vpop.eup %7172 }
0x1acd   : > { %v7175_v39 = vpop.eup %7174  ;;  %v5198_v28 = vmul.f32 %v7173_v41, %v5099_v1  ;;  %p7628_p12 = pnand %p7627_p11, %p7621_p4 }
0x1ace   : > { %v7177_v51 = vpop.eup %7176  ;;  %v5200_v5 = vmul.f32 %v7175_v39, %v5142_v54 }
0x1acf   : > { %v7179_v22 = vpop.eup %7178  ;;  %v5199_v7 = vmul.f32 %v7177_v51, %v5101_v58 }
0x1ad0   : > { %v7181_v61 = vpop.eup %7180  ;;  %v5201_v2 = vmul.f32 %v7179_v22, %v9269_v48 }
0x1ad1   : > { %v7183_v46 = vpop.eup %7182  ;;  %v5202_v56 = vmul.f32 %v7181_v61, %v5103_v6 }
0x1ad2   : > { %v7185_v21 = vpop.eup %7184  ;;  %v5204_v32 = vmul.f32 %v7183_v46, %v5146_v12 }
0x1ad3   : > { %v7187_v15 = vpop.eup %7186  ;;  %v5270_v27 = vpack.c.bf16 %v5202_v56, %v5198_v28  ;;  %v5203_v40 = vmul.f32 %v7185_v21, %v5105_v38 }
0x1ad4   : > { %v5272_v36 = vpack.c.bf16 %v5204_v32, %v5200_v5  ;;  %v5205_v60 = vmul.f32 %v7187_v15, %v5148_v8 }
0x1ad5   : > { %v5271_v34 = vpack.c.bf16 %v5203_v40, %v5199_v7 }
0x1ad6   : > { %v5273_v43 = vpack.c.bf16 %v5205_v60, %v5201_v2 }
0x1ad7   : > { %5505 = vmatprep.mubr.bf16.mxu0 %v5271_v34 }
0x1ad8   : > { %5546 = vmatprep.mubr.bf16.mxu1 %v5273_v43  ;;  %5506 = vmatmul.mubr.bf16.vlgmr.msra.gmra.mrb[52].mxu0 %v5270_v27 }
0x1ad9   : > { %5547 = vmatmul.mubr.bf16.vlgmr.msra.gmra.mrb[52].mxu1 %v5272_v36 }
0x1bab   : > { %v6282_v17 = vpop.f32.mrb[52].mxu0 }
0x1bac   : > { %v6304_v57 = vpop.f32.mrb[52].mxu1  ;;  %v6283_v50 = vpop.f32.mrb[53].mxu0 }
0x1bad   : > { %v6284_v1 = vadd.f32 %v6283_v50, %v6282_v17  ;;  %v6305_v54 = vpop.f32.mrb[53].mxu1  ;;  %v6285_v37 = vpop.f32.mrb[54].mxu0 }
0x1bae   : > { %v6306_v18 = vadd.f32 %v6305_v54, %v6304_v57  ;;  %v6307_v58 = vpop.f32.mrb[54].mxu1  ;;  %v6286_v14 = vpop.f32.mrb[55].mxu0 }
0x1baf   : > { %v5508_v45 = vadd.f32 %v6284_v1, %v6126_v25  ;;  %v6287_v48 = vadd.f32 %v6286_v14, %v6285_v37  ;;  %v6308_v62 = vpop.f32.mrb[55].mxu1 }
0x1bb0   : > { %v6309_v23 = vadd.f32 %v6308_v62, %v6307_v58 }
0x1bb1   : > { %v5549_v6 = vadd.f32 %v6306_v18, %v5508_v45  ;;  %v5511_v12 = vadd.f32 %v6287_v48, %v6126_v25 }
0x1bb3   : > { %v5555_v11 = vmul.f32 0.5, %v5549_v6  ;;  %v5552_v59 = vadd.f32 %v6309_v23, %v5511_v12 }
0x1bb5   : > { %v5556_v33 = vmul.f32 0.5, %v5552_v59  ;;  %v5557_v4 = vadd.f32 %v5555_v11, %v9243_v53 }
0x1bb7   : > { %5561 = vadd.xlane.f32.xlu0 %v5557_v4  ;;  %v5558_v38 = vadd.f32 %v5556_v33, %v9246_v24 }
0x1bbb   : > { %5563 = vadd.xlane.f32.xlu0 %v5558_v38 }
0x1c44   : > { %v5562_v8 = vpop.xlane.xlu0 %5561 }
0x1c45   : > { %v5565_v55 = vmul.f32 0.0078125, %v5562_v8 }
0x1c47   : > { %v5567_v13 = vsub.f32 %v5557_v4, %v5565_v55 }
0x1c48   : > { %v5564_v52 = vpop.xlane.xlu0 %5563 }
0x1c49   : > { %v5566_v20 = vmul.f32 0.0078125, %v5564_v52  ;;  %v5569_v35 = vmul.f32 %v5567_v13, %v5567_v13 }
0x1c4b   : > { %v5568_v10 = vsub.f32 %v5558_v38, %v5566_v20  ;;  %5571 = vadd.xlane.f32.xlu0 %v5569_v35 }
0x1c4d   : > { %v5570_v44 = vmul.f32 %v5568_v10, %v5568_v10 }
0x1c4f   : > { %5573 = vadd.xlane.f32.xlu0 %v5570_v44 }
0x1cd8   : > { %v5572_v3 = vpop.xlane.xlu0 %5571 }
0x1cd9   : > { %v5575_v42 = vmul.f32 0.0078125, %v5572_v3 }
0x1cdb   : > { %v5577_v53 = vadd.f32 1e-05, %v5575_v42 }
0x1cdc   : > { %v5574_v9 = vpop.xlane.xlu0 %5573 }
0x1cdd   : > { %7188 = vrsqrt.f32 %v5577_v53  ;;  %v5576_v24 = vmul.f32 0.0078125, %v5574_v9 }
0x1cdf   : > { %v5578_v31 = vadd.f32 1e-05, %v5576_v24 }
0x1ce1   : > { %7190 = vrsqrt.f32 %v5578_v31 }
0x1ce7   : > { %v7189_v0 = vpop.eup %7188 }
0x1ce8   : > { %v5581_v63 = vmul.f32 %v7189_v0, %v5567_v13 }
0x1cea   : > { %v5589_v16 = vmul.f32 %v6159_v26, %v5581_v63 }
0x1ceb   : > { %v7191_v29 = vpop.eup %7190 }
0x1cec   : > { %v5597_v30 = vadd.f32 %v6160_v47, %v5589_v16  ;;  %v5582_v19 = vmul.f32 %v7191_v29, %v5568_v10 }
0x1cee   : > { %v5590_v49 = vmul.f32 %v6159_v26, %v5582_v19  ;;  %5599 = vst [vmem:[%s1221_s4] sm:$0xff] %v5597_v30 }
0x1cf0   : > { %v5598_v41 = vadd.f32 %v6160_v47, %v5590_v49 }
0x1cf2   : > { %5600 = vst [vmem:[%s1221_s4 + $0x8] sm:$0xff] %v5598_v41 }
0x1cf3   : > { %7631 = shalt.err (!%p7628_p12)
}
0x1cf4   : > { %s7632_s14 = scalar_lea.hbm %s9282_s2, 256  ;;  %s7636_s4 = scalar_lea.hbm %s9668_s6, 512 }
0x1cf5   : > { %p7633_p5 = scmp.ne.s32.totalorder %s9282_s2, %s7632_s14  ;;  %p7637_p9 = scmp.lt.u32.totalorder %s9282_s2, %s9668_s6 }
0x1cf6   : > { %p7638_p13 = scmp.lt.u32.totalorder %s7636_s4, %s7632_s14  ;;  %p7640_p0 = scmp.lt.u32.totalorder %s7632_s14, %s9282_s2 }
0x1cf7   : > { %p7634_p7 = pnand %p7633_p5, %p9669_p2 }
0x1cf8   : > { %p7639_p6 = por %p7638_p13, %p7637_p9 }
0x1cf9   : > { %p7635_p1 = pneg %p7634_p7 }
0x1cfa   : > { %p7641_p8 = por %p7640_p0, %p7639_p6 }
0x1cfc   : > { %p7642_p4 = pnand %p7641_p8, %p7635_p1 }
0x1cfe   : > { %7645 = shalt.err (!%p7642_p4)
}
0x1cff   : > { %s7792_s3 = smov 128   ;;  %s7793_s26 = smov 8  }
0x1d00   : > { %6512 = dma.vmem_to_hbm [thread:$0]  (%p9669_p2), %s9284_s12, 256, %s9282_s2, %s5602_s22, %s7792_s3, %s7792_s3, %s7793_s26  }
0x1d01 PF: > { %s5630_s18 = sand.u32 1, %s7700_s7   ;;  %p9670_p10 = scmp.ne.s32.totalorder %s9498_s23, 0 }
0x1d02   : > { %p9671_p3 = scmp.ge.s32.totalorder %s7712_s15, 2  ;;  %s5631_s1 = scalar_lea.sflag [#allocation4], %s5630_s18 }
0x1d04   : > { %p6562_p11 = pnand %p9671_p3, %p9670_p10 }
0x1d06   : > { %7695 = dma.done.wait (!%p6562_p11), %s5631_s1, 256  }
0x1d07   : > { %7697 = vsyncadd (!%p6562_p11), %s5631_s1, 4294967040  ;;  %p87_p12 = scmp.ge.s32.totalorder %s8197_s28, 4   ;;  %s9672_s7 = smov %s7704_s10 }
0x1d08   : > { %s9673_s10 = smov %s7708_s11  ;;  %s9674_s11 = smov %s8208_s13 }
0x1d09   : > { %s9675_s15 = smov %s8197_s28  ;;  %89 = sbr.rel (!%p87_p12) target bundleno = 74 (0x4a), region = 286 }
0x1d10   :  { %5636 = vsyncpa [#allocation3], 1 }
0x1d11   :  { %5638 = vsyncpa [#allocation3 + $0x1], 1 }
0x1d12   :  { %5639 = vsyncpa [#allocation6], 1 }
0x1d13   :  { %5640 = vsyncpa [#allocation9], 1 }
0x1d14   :  { %5641 = vsyncpa [#allocation12], 1 }
0x1d15   :  { %5642 = vsyncpa [#allocation15], 1 }
0x1d16   :  { %5643 = vsyncpa [#allocation18], 1 }
0x1d17   :  { %5644 = vsyncpa [#allocation21], 1 }
0x1d18   :  { %5645 = vsyncpa [#allocation24], 1 }
0x1d19   :  { %5646 = vsyncpa [#allocation4], 1 }
0x1d1a   :  { %5648 = vsyncpa [#allocation4 + $0x1], 1 }

</bundles_post_ra>
